<compile_context>
chip_gen: v5e
topology: v5e:2x2
jax: 0.10.0
libtpu: 0.0.40
codegen_flags: <defaults>
</compile_context>

<pallas_src>
import math

import jax
import jax.numpy as jnp
import numpy as np
from jax.experimental import pallas as pl
from jax.experimental.pallas import tpu as pltpu

# ---------------- config consistent with MacGNN.__init__ ----------------
EMBED_DIM = 16                   # embed_dim
HIDDEN_DIM = 2 * EMBED_DIM       # NeighborAggregation hidden_dim = 2*embed_dim
U_GROUP = 6                      # u_group_num (module uses +1 internally)
I_GROUP = 10                     # i_group_num
GU = U_GROUP + 1                 # self.u_group_num = 7
GI = I_GROUP + 1                 # self.i_group_num = 11
RECENT = 8                       # recent_len
TAU = 0.8
BATCH = 256                      # multiple of 8; fills sublanes / MXU rows
FIELD_DIMS = (50, 60, 20)        # (#users, #items, #cates)
MLP_H1, MLP_H2 = 200, 80

# column offsets inside the packed id/count matrix x (B, 54)
U1_LO = 1
U1_HI = U1_LO + GI               # 12
U2_HI = U1_HI + GU               # 19
UR_HI = U2_HI + RECENT           # 27  (item_id lives at column UR_HI)
I1_LO = UR_HI + 1                # 28
I1_HI = I1_LO + GU               # 35
I2_HI = I1_HI + GI               # 46
IR_HI = I2_HI + RECENT           # 54
X_COLS = IR_HI

FEAT_DIM = GI + GU + GU + GI + 4 * EMBED_DIM     # 100 real feature columns
FEAT_PAD = 128                                   # lane-dense, MXU-K aligned


# ------------------------------- Pallas kernel -------------------------------
def _dice(x, alpha):
    # torch: avg = x.mean(0); std = x.std(0) (unbiased); eps inside the sigmoid.
    # rsqrt -> EUP slot; x*(alpha + (1-alpha)*p) is the exact factoring of
    # x*p + alpha*x*(1-p) and saves one full-size VPU multiply.
    n = x.shape[0]
    avg = jnp.mean(x, axis=0, keepdims=True)
    var = jnp.sum((x - avg) ** 2, axis=0, keepdims=True) / (n - 1)
    p = jax.nn.sigmoid((x - avg) * jax.lax.rsqrt(var) + 1e-8)
    return x * (alpha + (1.0 - alpha) * p)


def macgnn_mlp_kernel(feat_ref, w1_ref, b1_ref, w2_ref, b2_ref, w3t_ref,
                      scal_ref, out_ref):
    """Fused MLP: (B,128)@(128,200) -> Dice -> @(200,80) -> Dice -> w3 -> sigmoid."""
    f32 = jnp.float32
    b3 = scal_ref[0]
    a1 = scal_ref[1]
    a2 = scal_ref[2]

    # MLP layer 1: one MXU matmul against the pre-folded, K-padded weights.
    h1 = jnp.dot(feat_ref[...], w1_ref[...], preferred_element_type=f32) + b1_ref[...]
    h1 = _dice(h1, a1)

    h2 = jnp.dot(h1, w2_ref[...], preferred_element_type=f32) + b2_ref[...]
    h2 = _dice(h2, a2)

    # N=1 output projection on the VPU/XLU instead of a 1-column MXU matmul.
    logit = jnp.sum(h2 * w3t_ref[...], axis=1, keepdims=True) + b3    # (B, 1)
    out_ref[...] = jax.nn.sigmoid(logit)


# ------------------------- param folding (offline prep) -----------------------
def fold_params(params):
    """Fold all batch-independent weight products; exact by associativity."""
    D = EMBED_DIM
    W1 = params['W1']                                          # (14D, 200)
    vi = params['i_macro_tbl'] @ params['Vw_i']                # (GI, H)
    vu = params['u_macro_tbl'] @ params['Vw_u']                # (GU, H)
    w_fold = jnp.concatenate([
        vi @ W1[1 * D:3 * D],                 # u1_w       (GI, 200)
        vu @ W1[3 * D:5 * D],                 # u2_w       (GU, 200)
        vu @ W1[8 * D:10 * D],                # i1_w       (GU, 200)
        vi @ W1[10 * D:12 * D],               # i2_w       (GI, 200)
        W1[0:1 * D],                          # user_emb   (D, 200)
        W1[7 * D:8 * D],                      # item_emb   (D, 200)
        params['Vw_i'] @ W1[5 * D:7 * D],     # ur_sum     (D, 200)
        params['Vw_u'] @ W1[12 * D:14 * D],   # ir_sum     (D, 200)
    ], axis=0).astype(jnp.float32)                              # (100, 200)
    # K-pad 100 -> 128 with zero rows: exact, gives (8,128)-aligned MXU operand.
    w_fold = jnp.concatenate(
        [w_fold, jnp.zeros((FEAT_PAD - FEAT_DIM, MLP_H1), jnp.float32)], axis=0)

    scalars = jnp.stack([
        params['b3'].reshape(()),
        params['alpha1'].reshape(()),
        params['alpha2'].reshape(()),
    ]).astype(jnp.float32)                                      # (3,) -> SMEM

    return {
        'user_tbl': params['user_tbl'],
        'item_tbl': params['item_tbl'],
        'w_fold': w_fold,                                       # (128, 200)
        'b1': params['b1'].reshape(1, MLP_H1).astype(jnp.float32),
        'W2': params['W2'].astype(jnp.float32),                 # (200, 80)
        'b2': params['b2'].reshape(1, MLP_H2).astype(jnp.float32),
        'w3t': params['W3'].reshape(1, MLP_H2).astype(jnp.float32),   # W3^T
        'scalars': scalars,
    }


# ------------------------------ wrapper (glue) --------------------------------
def _build_feat(x, folded):
    """All lane-unaligned integer preprocessing; XLA fuses it with the gathers."""
    f32 = jnp.float32
    user_id = x[:, 0]
    user_1ord = x[:, U1_LO:U1_HI]
    user_2ord = x[:, U1_HI:U2_HI]
    user_recent = x[:, U2_HI:UR_HI]
    item_id = x[:, UR_HI]
    item_1ord = x[:, I1_LO:I1_HI]
    item_2ord = x[:, I1_HI:I2_HI]
    item_recent = x[:, I2_HI:IR_HI]

    # embedding gathers stay in plain JAX (data-dependent gather; not worth a
    # manual-DMA Pallas path at these sizes)
    user_emb = folded['user_tbl'][user_id]                      # (B, D)
    item_emb = folded['item_tbl'][item_id]                      # (B, D)
    # recent histories pre-reduced to (B, D): mask-sum commutes with the
    # folded V_w @ W1 product, so this is exact.
    ur_sum = jnp.sum(folded['item_tbl'][user_recent]
                     * (user_recent > 0).astype(f32)[..., None], axis=1)
    ir_sum = jnp.sum(folded['user_tbl'][item_recent]
                     * (item_recent > 0).astype(f32)[..., None], axis=1)

    def wfun(c):
        return jax.nn.softmax(jnp.log(c.astype(f32) + 1.0) / TAU, axis=1)

    B = x.shape[0]
    feat = jnp.concatenate([
        wfun(user_1ord), wfun(user_2ord), wfun(item_1ord), wfun(item_2ord),
        user_emb, item_emb, ur_sum, ir_sum,
        jnp.zeros((B, FEAT_PAD - FEAT_DIM), f32),               # lane pad -> 128
    ], axis=1)
    return feat                                                  # (B, 128)


def macgnn_forward(x, folded):
    """x: int32 (B, 54) id/count matrix (MacGNN layout); folded: fold_params()."""
    feat = _build_feat(x, folded)
    B = x.shape[0]
    out = pl.pallas_call(
        macgnn_mlp_kernel,
        out_shape=jax.ShapeDtypeStruct((B, 1), jnp.float32),
        in_specs=[pl.BlockSpec(memory_space=pltpu.MemorySpace.VMEM)] * 6
                 + [pl.BlockSpec(memory_space=pltpu.MemorySpace.SMEM)],
        out_specs=pl.BlockSpec(memory_space=pltpu.MemorySpace.VMEM),
    )(feat, folded['w_fold'], folded['b1'], folded['W2'],
      folded['b2'], folded['w3t'], folded['scalars'])
    return out


# --------------------------- pure-JAX reference -------------------------------
def _neighbor_agg_ref(query, key, Qw, Kw, Vw):
    tq = query @ Qw                                   # (B, N, H)
    tk = key @ Kw                                     # (B, 1, H)
    tv = query @ Vw                                   # (B, N, H)
    score = jax.nn.softmax(
        jnp.einsum('bnh,bmh->bnm', tq, tk) / math.sqrt(Vw.shape[1]), axis=-1)
    return tv * score                                 # (B, N, H) * (B, N, 1)


def macgnn_reference(x, params):
    i, u, r = GI, GU, RECENT
    B = x.shape[0]
    user_id = x[:, 0]
    user_1ord = x[:, 1:i + 1]
    user_2ord = x[:, i + 1:i + u + 1]
    user_recent = x[:, i + u + 1:i + u + r + 1]
    item_id = x[:, i + u + r + 1]
    item_1ord = x[:, i + u + r + 2:i + 2 * u + r + 2]
    item_2ord = x[:, i + 2 * u + r + 2:2 * i + 2 * u + r + 2]
    item_recent = x[:, 2 * i + 2 * u + r + 2:]

    user_emb = params['user_tbl'][user_id]
    item_emb = params['item_tbl'][item_id]
    u_macro = jnp.broadcast_to(params['u_macro_tbl'], (B, GU, EMBED_DIM))
    i_macro = jnp.broadcast_to(params['i_macro_tbl'], (B, GI, EMBED_DIM))
    ur_emb = params['item_tbl'][user_recent]
    ir_emb = params['user_tbl'][item_recent]

    def wfun(c):
        return jax.nn.softmax(jnp.log(c.astype(jnp.float32) + 1.0) / TAU, axis=1)[..., None]

    u1_w, u2_w = wfun(user_1ord), wfun(user_2ord)
    i1_w, i2_w = wfun(item_1ord), wfun(item_2ord)
    ur_mask = (user_recent > 0).astype(jnp.float32)[..., None]
    ir_mask = (item_recent > 0).astype(jnp.float32)[..., None]

    agg_u = lambda q, k: _neighbor_agg_ref(q, k, params['Qw_u'], params['Kw_u'], params['Vw_u'])
    agg_i = lambda q, k: _neighbor_agg_ref(q, k, params['Qw_i'], params['Kw_i'], params['Vw_i'])

    u1 = (agg_i(i_macro, item_emb[:, None]) * u1_w).sum(1)
    u2 = (agg_u(u_macro, user_emb[:, None]) * u2_w).sum(1)
    i1 = (agg_u(u_macro, user_emb[:, None]) * i1_w).sum(1)
    i2 = (agg_i(i_macro, item_emb[:, None]) * i2_w).sum(1)
    ur = (agg_i(ur_emb, item_emb[:, None]) * ur_mask).sum(1)
    ir = (agg_u(ir_emb, user_emb[:, None]) * ir_mask).sum(1)

    concat = jnp.concatenate([user_emb, u1, u2, ur, item_emb, i1, i2, ir], axis=1)

    def dice(v, alpha):
        avg = v.mean(0, keepdims=True)
        std = jnp.sqrt(jnp.sum((v - avg) ** 2, axis=0, keepdims=True) / (v.shape[0] - 1))
        p = jax.nn.sigmoid((v - avg) / std + 1e-8)
        return v * p + alpha * v * (1.0 - p)

    h1 = dice(concat @ params['W1'] + params['b1'], params['alpha1'])
    h2 = dice(h1 @ params['W2'] + params['b2'], params['alpha2'])
    return jax.nn.sigmoid(h2 @ params['W3'] + params['b3'])


# --------------------------------- setup --------------------------------------
def make_params(key):
    def xavier(k, shape):
        a = math.sqrt(6.0 / (shape[0] + shape[1]))
        return jax.random.uniform(k, shape, jnp.float32, -a, a)

    ks = jax.random.split(key, 16)
    D, H = EMBED_DIM, HIDDEN_DIM
    return {
        'user_tbl': xavier(ks[0], (FIELD_DIMS[0], D)),
        'item_tbl': xavier(ks[1], (FIELD_DIMS[1], D)),
        'u_macro_tbl': xavier(ks[2], (GU, D)),
        'i_macro_tbl': xavier(ks[3], (GI, D)),
        # NeighborAggregation weights, stored (in, out) so y = x @ W
        'Qw_u': xavier(ks[4], (D, H)), 'Kw_u': xavier(ks[5], (D, H)), 'Vw_u': xavier(ks[6], (D, H)),
        'Qw_i': xavier(ks[7], (D, H)), 'Kw_i': xavier(ks[8], (D, H)), 'Vw_i': xavier(ks[9], (D, H)),
        # MLP
        'W1': xavier(ks[10], (14 * D, MLP_H1)),
        'b1': 0.01 * jax.random.normal(ks[11], (1, MLP_H1), jnp.float32),
        'alpha1': jnp.zeros((1, 1), jnp.float32),        # Dice alpha init = 0 (as in torch)
        'W2': xavier(ks[12], (MLP_H1, MLP_H2)),
        'b2': 0.01 * jax.random.normal(ks[13], (1, MLP_H2), jnp.float32),
        'alpha2': jnp.zeros((1, 1), jnp.float32),
        'W3': xavier(ks[14], (MLP_H2, 1)),
        'b3': 0.01 * jax.random.normal(ks[15], (1, 1), jnp.float32),
    }


def make_input(key):
    ks = jax.random.split(key, 8)
    user_id = jax.random.randint(ks[0], (BATCH, 1), 0, FIELD_DIMS[0])
    u1 = jax.random.randint(ks[1], (BATCH, GI), 0, 50)
    u2 = jax.random.randint(ks[2], (BATCH, GU), 0, 50)
    ur = jax.random.randint(ks[3], (BATCH, RECENT), 0, FIELD_DIMS[1])
    ur = ur.at[:, -2:].set(0)                      # exercise the recent>0 mask
    item_id = jax.random.randint(ks[4], (BATCH, 1), 0, FIELD_DIMS[1])
    i1 = jax.random.randint(ks[5], (BATCH, GU), 0, 50)
    i2 = jax.random.randint(ks[6], (BATCH, GI), 0, 50)
    ir = jax.random.randint(ks[7], (BATCH, RECENT), 0, FIELD_DIMS[0])
    ir = ir.at[:, -1:].set(0)
    x = jnp.concatenate([user_id, u1, u2, ur, item_id, i1, i2, ir], axis=1)
    return x.astype(jnp.int32)


if __name__ == "__main__":
    root = jax.random.PRNGKey(0)
    k_params, k_data = jax.random.split(root)
    params = make_params(k_params)
    folded = fold_params(params)                    # one-time offline weight folding
    x = make_input(k_data)                          # (BATCH, 54)
    assert x.shape == (BATCH, X_COLS)

    out = jax.jit(macgnn_forward)(x, folded)
    out = jax.block_until_ready(out)

    ref = macgnn_reference(x, params)
    np.testing.assert_allclose(np.asarray(out), np.asarray(ref), rtol=2e-3, atol=1e-3)

    print("KERNEL_OK")
</pallas_src>

<mosaic_0001>
module attributes {stable_mosaic.version = 11 : i64} {
  func.func @macgnn_mlp_kernel(%arg0: memref<256x128xf32, #tpu.memory_space<vmem>>, %arg1: memref<128x200xf32, #tpu.memory_space<vmem>>, %arg2: memref<1x200xf32, #tpu.memory_space<vmem>>, %arg3: memref<200x80xf32, #tpu.memory_space<vmem>>, %arg4: memref<1x80xf32, #tpu.memory_space<vmem>>, %arg5: memref<1x80xf32, #tpu.memory_space<vmem>>, %arg6: memref<3xf32, #tpu.memory_space<smem>>, %arg7: memref<256x1xf32, #tpu.memory_space<vmem>>) attributes {dimension_semantics = [], scalar_prefetch = 0 : i64, scratch_operands = 0 : i64, tpu.core_type = #tpu.core_type<tc>} {
    %c0 = arith.constant 0 : index
    %0 = memref.load %arg6[%c0] : memref<3xf32, #tpu.memory_space<smem>>
    %c1 = arith.constant 1 : index
    %1 = memref.load %arg6[%c1] : memref<3xf32, #tpu.memory_space<smem>>
    %c2 = arith.constant 2 : index
    %2 = memref.load %arg6[%c2] : memref<3xf32, #tpu.memory_space<smem>>
    %c0_0 = arith.constant 0 : index
    %c0_1 = arith.constant 0 : index
    %3 = vector.load %arg0[%c0_0, %c0_1] : memref<256x128xf32, #tpu.memory_space<vmem>>, vector<256x128xf32>
    %c0_2 = arith.constant 0 : index
    %c0_3 = arith.constant 0 : index
    %4 = vector.load %arg1[%c0_2, %c0_3] : memref<128x200xf32, #tpu.memory_space<vmem>>, vector<128x200xf32>
    %cst = arith.constant dense<0.000000e+00> : vector<256x200xf32>
    %5 = tpu.matmul %3, %4, %cst {dimension_numbers = #tpu.dot_dimension_numbers<[1], [0], [0], [1], [0, 0, 1, 1], [], []>} : vector<256x128xf32>, vector<128x200xf32>, vector<256x200xf32> -> vector<256x200xf32>
    %c0_4 = arith.constant 0 : index
    %c0_5 = arith.constant 0 : index
    %6 = vector.load %arg2[%c0_4, %c0_5] : memref<1x200xf32, #tpu.memory_space<vmem>>, vector<1x200xf32>
    %7 = vector.broadcast %6 : vector<1x200xf32> to vector<256x200xf32>
    %8 = arith.addf %5, %7 : vector<256x200xf32>
    %cst_6 = arith.constant dense<0.000000e+00> : vector<200xf32>
    %9 = vector.multi_reduction <add>, %8, %cst_6 [0] : vector<256x200xf32> to vector<200xf32>
    %10 = vector.shape_cast %9 : vector<200xf32> to vector<1x200xf32>
    %cst_7 = arith.constant 2.560000e+02 : f32
    %11 = vector.broadcast %cst_7 : f32 to vector<1x200xf32>
    %12 = arith.divf %10, %11 : vector<1x200xf32>
    %13 = vector.broadcast %12 : vector<1x200xf32> to vector<256x200xf32>
    %14 = arith.subf %8, %13 : vector<256x200xf32>
    %15 = arith.mulf %14, %14 : vector<256x200xf32>
    %cst_8 = arith.constant dense<0.000000e+00> : vector<200xf32>
    %16 = vector.multi_reduction <add>, %15, %cst_8 [0] : vector<256x200xf32> to vector<200xf32>
    %17 = vector.shape_cast %16 : vector<200xf32> to vector<1x200xf32>
    %cst_9 = arith.constant 2.550000e+02 : f32
    %18 = vector.broadcast %cst_9 : f32 to vector<1x200xf32>
    %19 = arith.divf %17, %18 : vector<1x200xf32>
    %20 = vector.broadcast %12 : vector<1x200xf32> to vector<256x200xf32>
    %21 = arith.subf %8, %20 : vector<256x200xf32>
    %22 = math.rsqrt %19 : vector<1x200xf32>
    %23 = vector.broadcast %22 : vector<1x200xf32> to vector<256x200xf32>
    %24 = arith.mulf %21, %23 : vector<256x200xf32>
    %cst_10 = arith.constant 9.99999993E-9 : f32
    %25 = vector.broadcast %cst_10 : f32 to vector<256x200xf32>
    %26 = arith.addf %24, %25 : vector<256x200xf32>
    %27 = arith.negf %26 : vector<256x200xf32>
    %28 = math.exp %27 : vector<256x200xf32>
    %cst_11 = arith.constant 1.000000e+00 : f32
    %29 = vector.broadcast %cst_11 : f32 to vector<256x200xf32>
    %30 = arith.addf %29, %28 : vector<256x200xf32>
    %31 = arith.divf %29, %30 : vector<256x200xf32>
    %cst_12 = arith.constant 1.000000e+00 : f32
    %32 = arith.subf %cst_12, %1 : f32
    %33 = vector.broadcast %32 : f32 to vector<256x200xf32>
    %34 = arith.mulf %33, %31 : vector<256x200xf32>
    %35 = vector.broadcast %1 : f32 to vector<256x200xf32>
    %36 = arith.addf %35, %34 : vector<256x200xf32>
    %37 = arith.mulf %8, %36 : vector<256x200xf32>
    %c0_13 = arith.constant 0 : index
    %c0_14 = arith.constant 0 : index
    %38 = vector.load %arg3[%c0_13, %c0_14] : memref<200x80xf32, #tpu.memory_space<vmem>>, vector<200x80xf32>
    %cst_15 = arith.constant dense<0.000000e+00> : vector<256x80xf32>
    %39 = tpu.matmul %37, %38, %cst_15 {dimension_numbers = #tpu.dot_dimension_numbers<[1], [0], [0], [1], [0, 0, 1, 1], [], []>} : vector<256x200xf32>, vector<200x80xf32>, vector<256x80xf32> -> vector<256x80xf32>
    %c0_16 = arith.constant 0 : index
    %c0_17 = arith.constant 0 : index
    %40 = vector.load %arg4[%c0_16, %c0_17] : memref<1x80xf32, #tpu.memory_space<vmem>>, vector<1x80xf32>
    %41 = vector.broadcast %40 : vector<1x80xf32> to vector<256x80xf32>
    %42 = arith.addf %39, %41 : vector<256x80xf32>
    %cst_18 = arith.constant dense<0.000000e+00> : vector<80xf32>
    %43 = vector.multi_reduction <add>, %42, %cst_18 [0] : vector<256x80xf32> to vector<80xf32>
    %44 = vector.shape_cast %43 : vector<80xf32> to vector<1x80xf32>
    %cst_19 = arith.constant 2.560000e+02 : f32
    %45 = vector.broadcast %cst_19 : f32 to vector<1x80xf32>
    %46 = arith.divf %44, %45 : vector<1x80xf32>
    %47 = vector.broadcast %46 : vector<1x80xf32> to vector<256x80xf32>
    %48 = arith.subf %42, %47 : vector<256x80xf32>
    %49 = arith.mulf %48, %48 : vector<256x80xf32>
    %cst_20 = arith.constant dense<0.000000e+00> : vector<80xf32>
    %50 = vector.multi_reduction <add>, %49, %cst_20 [0] : vector<256x80xf32> to vector<80xf32>
    %51 = vector.shape_cast %50 : vector<80xf32> to vector<1x80xf32>
    %cst_21 = arith.constant 2.550000e+02 : f32
    %52 = vector.broadcast %cst_21 : f32 to vector<1x80xf32>
    %53 = arith.divf %51, %52 : vector<1x80xf32>
    %54 = vector.broadcast %46 : vector<1x80xf32> to vector<256x80xf32>
    %55 = arith.subf %42, %54 : vector<256x80xf32>
    %56 = math.rsqrt %53 : vector<1x80xf32>
    %57 = vector.broadcast %56 : vector<1x80xf32> to vector<256x80xf32>
    %58 = arith.mulf %55, %57 : vector<256x80xf32>
    %cst_22 = arith.constant 9.99999993E-9 : f32
    %59 = vector.broadcast %cst_22 : f32 to vector<256x80xf32>
    %60 = arith.addf %58, %59 : vector<256x80xf32>
    %61 = arith.negf %60 : vector<256x80xf32>
    %62 = math.exp %61 : vector<256x80xf32>
    %cst_23 = arith.constant 1.000000e+00 : f32
    %63 = vector.broadcast %cst_23 : f32 to vector<256x80xf32>
    %64 = arith.addf %63, %62 : vector<256x80xf32>
    %65 = arith.divf %63, %64 : vector<256x80xf32>
    %cst_24 = arith.constant 1.000000e+00 : f32
    %66 = arith.subf %cst_24, %2 : f32
    %67 = vector.broadcast %66 : f32 to vector<256x80xf32>
    %68 = arith.mulf %67, %65 : vector<256x80xf32>
    %69 = vector.broadcast %2 : f32 to vector<256x80xf32>
    %70 = arith.addf %69, %68 : vector<256x80xf32>
    %71 = arith.mulf %42, %70 : vector<256x80xf32>
    %c0_25 = arith.constant 0 : index
    %c0_26 = arith.constant 0 : index
    %72 = vector.load %arg5[%c0_25, %c0_26] : memref<1x80xf32, #tpu.memory_space<vmem>>, vector<1x80xf32>
    %73 = vector.broadcast %72 : vector<1x80xf32> to vector<256x80xf32>
    %74 = arith.mulf %71, %73 : vector<256x80xf32>
    %cst_27 = arith.constant dense<0.000000e+00> : vector<256xf32>
    %75 = vector.multi_reduction <add>, %74, %cst_27 [1] : vector<256x80xf32> to vector<256xf32>
    %76 = vector.shape_cast %75 : vector<256xf32> to vector<256x1xf32>
    %77 = vector.broadcast %0 : f32 to vector<256x1xf32>
    %78 = arith.addf %76, %77 : vector<256x1xf32>
    %79 = arith.negf %78 : vector<256x1xf32>
    %80 = math.exp %79 : vector<256x1xf32>
    %cst_28 = arith.constant 1.000000e+00 : f32
    %81 = vector.broadcast %cst_28 : f32 to vector<256x1xf32>
    %82 = arith.addf %81, %80 : vector<256x1xf32>
    %83 = arith.divf %81, %82 : vector<256x1xf32>
    %c0_29 = arith.constant 0 : index
    %c0_30 = arith.constant 0 : index
    %84 = vector.load %arg7[%c0_29, %c0_30] : memref<256x1xf32, #tpu.memory_space<vmem>>, vector<256x1xf32>
    tpu.vector_store %arg7[%c0_29, %c0_30], %83 {strides = array<i32>} : memref<256x1xf32, #tpu.memory_space<vmem>>, vector<256x1xf32>,
    return
  }
}

</mosaic_0001>

<bundles_post_ra>
// kernel: macgnn_forward.1
= control target key start
LH: loop header
LB: loop body
LE: loop exit
PB: predicated region body
PF: predicated region fallthrough
CT: control target
= control target key end

     0   :  { %12 = vsyncpa [#allocation3], 0  ;;  %s5109_s27 = smov [#allocation2]   ;;  %s9885_s0 = inlined_call_operand.vmem [shape: f32[256,128], index: 0, kind: input, shape index: {}]   ;;  %s9886_s1 = inlined_call_operand.vmem [shape: f32[128,200], index: 1, kind: input, shape index: {}]   ;;  %s9887_s2 = inlined_call_operand.vmem [shape: f32[1,200], index: 2, kind: input, shape index: {}]   ;;  %s9888_s3 = inlined_call_operand.vmem [shape: f32[200,80], index: 3, kind: input, shape index: {}]   ;;  %s9889_s4 = inlined_call_operand.vmem [shape: f32[1,80], index: 4, kind: input, shape index: {}]   ;;  %s9890_s5 = inlined_call_operand.vmem [shape: f32[1,80], index: 5, kind: input, shape index: {}]   ;;  %s9891_s6 = inlined_call_operand.vmem [shape: f32[3], index: 6, kind: input, shape index: {}]   ;;  %s9892_s7 = inlined_call_operand.vmem [shape: f32[256,1], index: 7, kind: output, shape index: {}]  }
   0x1   :  { %s30_s26 = sshll.u32 %s9891_s6, 4  ;;  %s31_s26 = int_to_ptr.vmem [resolvable:$true] %s30_s26 }
   0x2   :  { %33 = dma.vmem_to_smem %s31_s26, 16, %s5109_s27, [#allocation3]  }
   0x3   :  { %5107 = dma.done.wait [#allocation3], 16  }
   0x4   :  { %5108 = vsyncadd [#allocation3], 4294967280 }
   0x5   :  { %38 = sfence }
   0x6   :  { %v104_v0 = vld [vmem:[%s9886_s1 + $0xf0] sm:$0xff]  ;;  %v105_v1 = vld [vmem:[%s9886_s1 + $0xf8] sm:$0xff]  ;;  %v102_v2 = vld [vmem:[%s9886_s1 + $0xe0] sm:$0xff]  ;;  %vm375_vm0 = vcmask 588800   ;;  %s6481_s11 = sld [smem:[#allocation2 + $0x1]] }
   0x7   :  { %112 = vmatpush.msra.mxu0 %v104_v0  ;;  %225 = vmatpush.msra.mxu1 %v105_v1  ;;  %v103_v3 = vld [vmem:[%s9886_s1 + $0xe8] sm:$0xff]  ;;  %v100_v4 = vld [vmem:[%s9886_s1 + $0xd0] sm:$0xff]  ;;  %v101_v5 = vld [vmem:[%s9886_s1 + $0xd8] sm:$0xff] }
   0x8   :  { %v98_v6 = vld [vmem:[%s9886_s1 + $0xc0] sm:$0xff]  ;;  %v99_v7 = vld [vmem:[%s9886_s1 + $0xc8] sm:$0xff]  ;;  %v96_v8 = vld [vmem:[%s9886_s1 + $0xb0] sm:$0xff] }
   0x9   :  { %113 = vmatpush.msra.mxu0 %v102_v2  ;;  %226 = vmatpush.msra.mxu1 %v103_v3  ;;  %v97_v9 = vld [vmem:[%s9886_s1 + $0xb8] sm:$0xff]  ;;  %v94_v10 = vld [vmem:[%s9886_s1 + $0xa0] sm:$0xff]  ;;  %v95_v11 = vld [vmem:[%s9886_s1 + $0xa8] sm:$0xff] }
   0xa   :  { %v92_v12 = vld [vmem:[%s9886_s1 + $0x90] sm:$0xff]  ;;  %v93_v13 = vld [vmem:[%s9886_s1 + $0x98] sm:$0xff]  ;;  %v90_v14 = vld [vmem:[%s9886_s1 + $0x80] sm:$0xff] }
   0xb   :  { %114 = vmatpush.msra.mxu0 %v100_v4  ;;  %227 = vmatpush.msra.mxu1 %v101_v5  ;;  %v91_v15 = vld [vmem:[%s9886_s1 + $0x88] sm:$0xff]  ;;  %v88_v16 = vld [vmem:[%s9886_s1 + $0x70] sm:$0xff]  ;;  %v89_v17 = vld [vmem:[%s9886_s1 + $0x78] sm:$0xff] }
   0xc   :  { %v86_v18 = vld [vmem:[%s9886_s1 + $0x60] sm:$0xff]  ;;  %v87_v19 = vld [vmem:[%s9886_s1 + $0x68] sm:$0xff]  ;;  %v84_v20 = vld [vmem:[%s9886_s1 + $0x50] sm:$0xff]  ;;  %s2061_s20 = ssub.f32 1.0, %s6481_s11 }
   0xd   :  { %115 = vmatpush.msra.mxu0 %v98_v6  ;;  %228 = vmatpush.msra.mxu1 %v99_v7  ;;  %v85_v21 = vld [vmem:[%s9886_s1 + $0x58] sm:$0xff]  ;;  %v82_v22 = vld [vmem:[%s9886_s1 + $0x40] sm:$0xff]  ;;  %v83_v23 = vld [vmem:[%s9886_s1 + $0x48] sm:$0xff] }
   0xe   :  { %v80_v24 = vld [vmem:[%s9886_s1 + $0x30] sm:$0xff]  ;;  %v81_v25 = vld [vmem:[%s9886_s1 + $0x38] sm:$0xff]  ;;  %v78_v26 = vld [vmem:[%s9886_s1 + $0x20] sm:$0xff] }
   0xf   :  { %116 = vmatpush.msra.mxu0 %v96_v8  ;;  %229 = vmatpush.msra.mxu1 %v97_v9  ;;  %v79_v27 = vld [vmem:[%s9886_s1 + $0x28] sm:$0xff]  ;;  %v76_v28 = vld [vmem:[%s9886_s1 + $0x10] sm:$0xff]  ;;  %v77_v29 = vld [vmem:[%s9886_s1 + $0x18] sm:$0xff] }
  0x10   :  { %v74_v30 = vld [vmem:[%s9886_s1] sm:$0xff]  ;;  %v75_v31 = vld [vmem:[%s9886_s1 + $0x8] sm:$0xff]  ;;  %v44_v34 = vld [vmem:[%s9885_s0 + $0x10] sm:$0xff] }
  0x11   :  { %117 = vmatpush.msra.mxu0 %v94_v10  ;;  %230 = vmatpush.msra.mxu1 %v95_v11  ;;  %v42_v32 = vld [vmem:[%s9885_s0] sm:$0xff]  ;;  %v43_v33 = vld [vmem:[%s9885_s0 + $0x8] sm:$0xff]  ;;  %v45_v35 = vld [vmem:[%s9885_s0 + $0x18] sm:$0xff] }
  0x12   :  { %v46_v36 = vld [vmem:[%s9885_s0 + $0x20] sm:$0xff]  ;;  %v47_v37 = vld [vmem:[%s9885_s0 + $0x28] sm:$0xff]  ;;  %v48_v38 = vld [vmem:[%s9885_s0 + $0x30] sm:$0xff] }
  0x13   :  { %118 = vmatpush.msra.mxu0 %v92_v12  ;;  %231 = vmatpush.msra.mxu1 %v93_v13  ;;  %v49_v39 = vld [vmem:[%s9885_s0 + $0x38] sm:$0xff]  ;;  %v50_v40 = vld [vmem:[%s9885_s0 + $0x40] sm:$0xff]  ;;  %v51_v41 = vld [vmem:[%s9885_s0 + $0x48] sm:$0xff] }
  0x14   :  { %v52_v42 = vld [vmem:[%s9885_s0 + $0x50] sm:$0xff]  ;;  %v53_v43 = vld [vmem:[%s9885_s0 + $0x58] sm:$0xff]  ;;  %v54_v44 = vld [vmem:[%s9885_s0 + $0x60] sm:$0xff] }
  0x15   :  { %119 = vmatpush.msra.mxu0 %v90_v14  ;;  %232 = vmatpush.msra.mxu1 %v91_v15  ;;  %v55_v45 = vld [vmem:[%s9885_s0 + $0x68] sm:$0xff]  ;;  %v56_v46 = vld [vmem:[%s9885_s0 + $0x70] sm:$0xff]  ;;  %v57_v47 = vld [vmem:[%s9885_s0 + $0x78] sm:$0xff] }
  0x16   :  { %v58_v50 = vld [vmem:[%s9885_s0 + $0x80] sm:$0xff]  ;;  %v59_v53 = vld [vmem:[%s9885_s0 + $0x88] sm:$0xff]  ;;  %v60_v56 = vld [vmem:[%s9885_s0 + $0x90] sm:$0xff] }
  0x17   :  { %120 = vmatpush.msra.mxu0 %v88_v16  ;;  %233 = vmatpush.msra.mxu1 %v89_v17  ;;  %v61_v59 = vld [vmem:[%s9885_s0 + $0x98] sm:$0xff]  ;;  %v62_v62 = vld [vmem:[%s9885_s0 + $0xa0] sm:$0xff]  ;;  %v63_v1 = vld [vmem:[%s9885_s0 + $0xa8] sm:$0xff] }
  0x18   :  { %v64_v4 = vld [vmem:[%s9885_s0 + $0xb0] sm:$0xff]  ;;  %v65_v7 = vld [vmem:[%s9885_s0 + $0xb8] sm:$0xff]  ;;  %v66_v10 = vld [vmem:[%s9885_s0 + $0xc0] sm:$0xff] }
  0x19   :  { %121 = vmatpush.msra.mxu0 %v86_v18  ;;  %234 = vmatpush.msra.mxu1 %v87_v19  ;;  %v67_v13 = vld [vmem:[%s9885_s0 + $0xc8] sm:$0xff]  ;;  %v68_v16 = vld [vmem:[%s9885_s0 + $0xd0] sm:$0xff]  ;;  %v69_v19 = vld [vmem:[%s9885_s0 + $0xd8] sm:$0xff] }
  0x1b   :  { %122 = vmatpush.msra.mxu0 %v84_v20  ;;  %235 = vmatpush.msra.mxu1 %v85_v21 }
  0x1d   :  { %123 = vmatpush.msra.mxu0 %v82_v22  ;;  %236 = vmatpush.msra.mxu1 %v83_v23  ;;  %v70_v22 = vld [vmem:[%s9885_s0 + $0xe0] sm:$0xff] }
  0x1f   :  { %124 = vmatpush.msra.mxu0 %v80_v24  ;;  %237 = vmatpush.msra.mxu1 %v81_v25  ;;  %v71_v25 = vld [vmem:[%s9885_s0 + $0xe8] sm:$0xff] }
  0x21   :  { %125 = vmatpush.msra.mxu0 %v78_v26  ;;  %238 = vmatpush.msra.mxu1 %v79_v27 }
  0x23   :  { %126 = vmatpush.msra.mxu0 %v76_v28  ;;  %239 = vmatpush.msra.mxu1 %v77_v29  ;;  %v72_v28 = vld [vmem:[%s9885_s0 + $0xf0] sm:$0xff] }
  0x25   :  { %127 = vmatpush.msra.mxu0 %v74_v30  ;;  %240 = vmatpush.msra.mxu1 %v75_v31  ;;  %v73_v31 = vld [vmem:[%s9885_s0 + $0xf8] sm:$0xff] }
  0x26   :  { %128 = vmatmul.f32.vlgmr.msra.gmra.mxu0 %v42_v32  ;;  %241 = vmatmul.f32.vlgmr.msra.gmra.mxu1 %v42_v32 }
  0x2e   :  { %131 = vmatmul.f32.gmra.mxu0 %v43_v33  ;;  %244 = vmatmul.f32.gmra.mxu1 %v43_v33 }
  0x36   :  { %134 = vmatmul.f32.gmra.mxu0 %v44_v34  ;;  %247 = vmatmul.f32.gmra.mxu1 %v44_v34 }
  0x3e   :  { %137 = vmatmul.f32.gmra.mxu0 %v45_v35  ;;  %250 = vmatmul.f32.gmra.mxu1 %v45_v35 }
  0x46   :  { %140 = vmatmul.f32.gmra.mxu0 %v46_v36  ;;  %253 = vmatmul.f32.gmra.mxu1 %v46_v36 }
  0x4e   :  { %143 = vmatmul.f32.gmra.mxu0 %v47_v37  ;;  %256 = vmatmul.f32.gmra.mxu1 %v47_v37 }
  0x56   :  { %146 = vmatmul.f32.gmra.mxu0 %v48_v38  ;;  %259 = vmatmul.f32.gmra.mxu1 %v48_v38 }
  0x5e   :  { %149 = vmatmul.f32.gmra.mxu0 %v49_v39  ;;  %262 = vmatmul.f32.gmra.mxu1 %v49_v39 }
  0x66   :  { %152 = vmatmul.f32.gmra.mxu0 %v50_v40  ;;  %265 = vmatmul.f32.gmra.mxu1 %v50_v40 }
  0x6e   :  { %155 = vmatmul.f32.gmra.mxu0 %v51_v41  ;;  %268 = vmatmul.f32.gmra.mxu1 %v51_v41 }
  0x76   :  { %158 = vmatmul.f32.gmra.mxu0 %v52_v42  ;;  %271 = vmatmul.f32.gmra.mxu1 %v52_v42 }
  0x7e   :  { %161 = vmatmul.f32.gmra.mxu0 %v53_v43  ;;  %274 = vmatmul.f32.gmra.mxu1 %v53_v43 }
  0x86   :  { %164 = vmatmul.f32.gmra.mxu0 %v54_v44  ;;  %277 = vmatmul.f32.gmra.mxu1 %v54_v44 }
  0x8e   :  { %167 = vmatmul.f32.gmra.mxu0 %v55_v45  ;;  %280 = vmatmul.f32.gmra.mxu1 %v55_v45 }
  0x96   :  { %170 = vmatmul.f32.gmra.mxu0 %v56_v46  ;;  %283 = vmatmul.f32.gmra.mxu1 %v56_v46  ;;  %v106_v46 = vld [vmem:[%s9887_s2] sm:$0x3] }
  0x9e   :  { %173 = vmatmul.f32.gmra.mxu0 %v57_v47  ;;  %286 = vmatmul.f32.gmra.mxu1 %v57_v47 }
  0xa3   :  { %v5299_v48 = vpop.f32.mrf.mxu0  ;;  %v5301_v49 = vpop.f32.mrf.mxu1 }
  0xa6   :  { %176 = vmatmul.f32.gmra.mxu0 %v58_v50  ;;  %289 = vmatmul.f32.gmra.mxu1 %v58_v50 }
  0xab   :  { %v5306_v51 = vpop.f32.mrf.mxu0  ;;  %v5308_v52 = vpop.f32.mrf.mxu1 }
  0xae   :  { %179 = vmatmul.f32.gmra.mxu0 %v59_v53  ;;  %292 = vmatmul.f32.gmra.mxu1 %v59_v53  ;;  %v5446_v53 = vperm.slane %v106_v46, 0 }
  0xb3   :  { %v5313_v54 = vpop.f32.mrf.mxu0  ;;  %v5315_v55 = vpop.f32.mrf.mxu1 }
  0xb6   :  { %182 = vmatmul.f32.gmra.mxu0 %v60_v56  ;;  %295 = vmatmul.f32.gmra.mxu1 %v60_v56  ;;  %v5450_v56 = vadd.f32 %v5306_v51, %v5446_v53 }
  0xb8   :  { %10113 = vst [vmem:[#allocation5_spill] sm:$0xff] %v5450_v56 }
  0xbb   :  { %v5320_v57 = vpop.f32.mrf.mxu0  ;;  %v5322_v58 = vpop.f32.mrf.mxu1 }
  0xbe   :  { %185 = vmatmul.f32.gmra.mxu0 %v61_v59  ;;  %298 = vmatmul.f32.gmra.mxu1 %v61_v59  ;;  %v5454_v59 = vadd.f32 %v5299_v48, %v5446_v53 }
  0xc0   :  { %10114 = vst [vmem:[#allocation6_spill] sm:$0xff] %v5454_v59 }
  0xc3   :  { %v5327_v60 = vpop.f32.mrf.mxu0  ;;  %v5329_v61 = vpop.f32.mrf.mxu1 }
  0xc6   :  { %188 = vmatmul.f32.gmra.mxu0 %v62_v62  ;;  %301 = vmatmul.f32.gmra.mxu1 %v62_v62  ;;  %v5458_v62 = vadd.f32 %v5313_v54, %v5446_v53 }
  0xc8   :  { %10115 = vst [vmem:[#allocation7_spill] sm:$0xff] %v5458_v62 }
  0xcb   :  { %v5334_v63 = vpop.f32.mrf.mxu0  ;;  %v5336_v0 = vpop.f32.mrf.mxu1 }
  0xce   :  { %191 = vmatmul.f32.gmra.mxu0 %v63_v1  ;;  %304 = vmatmul.f32.gmra.mxu1 %v63_v1  ;;  %v338_v1 = vadd.f32 %v5450_v56, %v5454_v59 }
  0xd0   :  { %v339_v48 = vadd.f32 %v338_v1, %v5458_v62 }
  0xd3   :  { %v5341_v2 = vpop.f32.mrf.mxu0  ;;  %v5343_v3 = vpop.f32.mrf.mxu1 }
  0xd6   :  { %194 = vmatmul.f32.gmra.mxu0 %v64_v4  ;;  %307 = vmatmul.f32.gmra.mxu1 %v64_v4  ;;  %v5464_v4 = vadd.f32 %v5320_v57, %v5446_v53  ;;  %v5484_v57 = vadd.f32 %v5334_v63, %v5446_v53 }
  0xd8   :  { %10116 = vst [vmem:[#allocation8_spill] sm:$0xff] %v5464_v4 }
  0xd9   :  { %10119 = vst [vmem:[#allocation11_spill] sm:$0xff] %v5484_v57 }
  0xdb   :  { %v5348_v5 = vpop.f32.mrf.mxu0  ;;  %v5350_v6 = vpop.f32.mrf.mxu1 }
  0xde   :  { %197 = vmatmul.f32.gmra.mxu0 %v65_v7  ;;  %310 = vmatmul.f32.gmra.mxu1 %v65_v7  ;;  %v5466_v7 = vperm.slane %v106_v46, 1 }
  0xe0   :  { %v5479_v54 = vadd.f32 %v5308_v52, %v5466_v7  ;;  %v5497_v52 = vadd.f32 %v5341_v2, %v5446_v53  ;;  %v5503_v63 = vadd.f32 %v5322_v58, %v5466_v7 }
  0xe2   :  { %10118 = vst [vmem:[#allocation10_spill] sm:$0xff] %v5479_v54 }
  0xe3   :  { %v5355_v8 = vpop.f32.mrf.mxu0  ;;  %v5357_v9 = vpop.f32.mrf.mxu1  ;;  %10122 = vst [vmem:[#allocation14_spill] sm:$0xff] %v5497_v52 }
  0xe4   :  { %10123 = vst [vmem:[#allocation15_spill] sm:$0xff] %v5503_v63 }
  0xe6   :  { %200 = vmatmul.f32.gmra.mxu0 %v66_v10  ;;  %313 = vmatmul.f32.gmra.mxu1 %v66_v10 }
  0xeb   :  { %v5362_v11 = vpop.f32.mrf.mxu0  ;;  %v5364_v12 = vpop.f32.mrf.mxu1 }
  0xee   :  { %203 = vmatmul.f32.gmra.mxu0 %v67_v13  ;;  %316 = vmatmul.f32.gmra.mxu1 %v67_v13  ;;  %v5475_v13 = vadd.f32 %v5327_v60, %v5446_v53 }
  0xf0   :  { %10117 = vst [vmem:[#allocation9_spill] sm:$0xff] %v5475_v13 }
  0xf3   :  { %v5369_v14 = vpop.f32.mrf.mxu0  ;;  %v5371_v15 = vpop.f32.mrf.mxu1 }
  0xf6   :  { %206 = vmatmul.f32.gmra.mxu0 %v68_v16  ;;  %319 = vmatmul.f32.gmra.mxu1 %v68_v16  ;;  %v340_v16 = vadd.f32 %v339_v48, %v5464_v4 }
  0xf8   :  { %v341_v60 = vadd.f32 %v340_v16, %v5475_v13  ;;  %v381_v16 = vsel %vm375_vm0, %v5503_v63, 0.0 }
  0xfb   :  { %v5376_v17 = vpop.f32.mrf.mxu0  ;;  %v5378_v18 = vpop.f32.mrf.mxu1 }
  0xfe   :  { %209 = vmatmul.f32.gmra.mxu0 %v69_v19  ;;  %322 = vmatmul.f32.gmra.mxu1 %v69_v19  ;;  %v5488_v19 = vadd.f32 %v5301_v49, %v5466_v7  ;;  %v342_v49 = vadd.f32 %v341_v60, %v5484_v57  ;;  %v5531_v60 = vadd.f32 %v5336_v0, %v5466_v7 }
  0xff   :  { %v5547_v0 = vadd.f32 %v5369_v14, %v5446_v53  ;;  %v5564_v14 = vadd.f32 %v5357_v9, %v5466_v7 }
 0x100   :  { %10120 = vst [vmem:[#allocation12_spill] sm:$0xff] %v5488_v19  ;;  %v343_v48 = vadd.f32 %v342_v49, %v5497_v52 }
 0x101   :  { %10127 = vst [vmem:[#allocation19_spill] sm:$0xff] %v5531_v60 }
 0x102   :  { %10130 = vst [vmem:[#allocation22_spill] sm:$0xff] %v5547_v0 }
 0x103   :  { %v5383_v20 = vpop.f32.mrf.mxu0  ;;  %v5385_v21 = vpop.f32.mrf.mxu1  ;;  %10133 = vst [vmem:[#allocation25_spill] sm:$0xff] %v5564_v14 }
 0x106   :  { %212 = vmatmul.f32.gmra.mxu0 %v70_v22  ;;  %325 = vmatmul.f32.gmra.mxu1 %v70_v22  ;;  %v5492_v22 = vadd.f32 %v5315_v55, %v5466_v7  ;;  %v5508_v55 = vadd.f32 %v5348_v5, %v5446_v53  ;;  %v5525_v5 = vadd.f32 %v5355_v8, %v5446_v53 }
 0x107   :  { %v5542_v8 = vadd.f32 %v5343_v3, %v5466_v7  ;;  %v5558_v3 = vadd.f32 %v5376_v17, %v5446_v53 }
 0x108   :  { %10121 = vst [vmem:[#allocation13_spill] sm:$0xff] %v5492_v22  ;;  %v379_v2 = vsel %vm375_vm0, %v5492_v22, 0.0  ;;  %v344_v22 = vadd.f32 %v343_v48, %v5508_v55 }
 0x109   :  { %10124 = vst [vmem:[#allocation16_spill] sm:$0xff] %v5508_v55 }
 0x10a   :  { %10126 = vst [vmem:[#allocation18_spill] sm:$0xff] %v5525_v5 }
 0x10b   :  { %v5390_v23 = vpop.f32.mrf.mxu0  ;;  %v5392_v24 = vpop.f32.mrf.mxu1  ;;  %10129 = vst [vmem:[#allocation21_spill] sm:$0xff] %v5542_v8 }
 0x10c   :  { %10132 = vst [vmem:[#allocation24_spill] sm:$0xff] %v5558_v3 }
 0x10e   :  { %215 = vmatmul.f32.gmra.mxu0 %v71_v25  ;;  %328 = vmatmul.f32.gmra.mxu1 %v71_v25  ;;  %v377_v25 = vsel %vm375_vm0, %v5479_v54, 0.0  ;;  %v5536_v54 = vadd.f32 %v5362_v11, %v5446_v53  ;;  %v5553_v11 = vadd.f32 %v5350_v6, %v5466_v7 }
 0x110   :  { %10128 = vst [vmem:[#allocation20_spill] sm:$0xff] %v5536_v54  ;;  %v389_v17 = vsel %vm375_vm0, %v5553_v11, 0.0 }
 0x111   :  { %10131 = vst [vmem:[#allocation23_spill] sm:$0xff] %v5553_v11 }
 0x113   :  { %v5397_v26 = vpop.f32.mrf.mxu0  ;;  %v5399_v27 = vpop.f32.mrf.mxu1 }
 0x116   :  { %218 = vmatmul.f32.gmra.mxu0 %v72_v28  ;;  %331 = vmatmul.f32.gmra.mxu1 %v72_v28  ;;  %v376_v28 = vsel %vm375_vm0, %v5488_v19, 0.0 }
 0x117   :  { %v378_v1 = vadd.f32 %v377_v25, %v376_v28  ;;  %v345_v28 = vadd.f32 %v344_v22, %v5525_v5  ;;  %v387_v22 = vsel %vm375_vm0, %v5542_v8, 0.0 }
 0x119   :  { %v346_v48 = vadd.f32 %v345_v28, %v5536_v54  ;;  %v5579_v28 = vadd.f32 %v5364_v12, %v5466_v7  ;;  %v5595_v12 = vadd.f32 %v5397_v26, %v5446_v53  ;;  %v5612_v26 = vadd.f32 %v5385_v21, %v5466_v7 }
 0x11b   :  { %v5404_v29 = vpop.f32.mrf.mxu0  ;;  %v5406_v30 = vpop.f32.mrf.mxu1  ;;  %10135 = vst [vmem:[#allocation27_spill] sm:$0xff] %v5579_v28 }
 0x11c   :  { %10138 = vst [vmem:[#allocation30_spill] sm:$0xff] %v5595_v12 }
 0x11d   :  { %10141 = vst [vmem:[#allocation33_spill] sm:$0xff] %v5612_v26 }
 0x11e   :  { %221 = vmatmul.f32.gmra.mxu0 %v73_v31  ;;  %334 = vmatmul.f32.gmra.mxu1 %v73_v31  ;;  %v5516_v31 = vadd.f32 %v5329_v61, %v5466_v7  ;;  %v380_v61 = vadd.f32 %v379_v2, %v378_v1  ;;  %v385_v2 = vsel %vm375_vm0, %v5531_v60, 0.0  ;;  %v5584_v60 = vadd.f32 %v5390_v23, %v5446_v53 }
 0x11f   :  { %v5601_v23 = vadd.f32 %v5378_v18, %v5466_v7 }
 0x120   :  { %10125 = vst [vmem:[#allocation17_spill] sm:$0xff] %v5516_v31  ;;  %v383_v25 = vsel %vm375_vm0, %v5516_v31, 0.0  ;;  %v382_v49 = vadd.f32 %v381_v16, %v380_v61 }
 0x121   :  { %10136 = vst [vmem:[#allocation28_spill] sm:$0xff] %v5584_v60 }
 0x122   :  { %v384_v1 = vadd.f32 %v383_v25, %v382_v49  ;;  %v347_v25 = vadd.f32 %v346_v48, %v5547_v0  ;;  %v5573_v49 = vadd.f32 %v5383_v20, %v5446_v53  ;;  %v5590_v20 = vadd.f32 %v5371_v15, %v5466_v7  ;;  %10139 = vst [vmem:[#allocation31_spill] sm:$0xff] %v5601_v23 }
 0x123   :  { %v5411_v32 = vpop.f32.mrf.mxu0  ;;  %v5413_v33 = vpop.f32.mrf.mxu1  ;;  %v5606_v15 = vadd.f32 %v5404_v29, %v5446_v53  ;;  %v397_v29 = vsel %vm375_vm0, %v5601_v23, 0.0 }
 0x124   :  { %v386_v6 = vadd.f32 %v385_v2, %v384_v1  ;;  %10134 = vst [vmem:[#allocation26_spill] sm:$0xff] %v5573_v49  ;;  %v348_v8 = vadd.f32 %v347_v25, %v5558_v3  ;;  %v391_v2 = vsel %vm375_vm0, %v5564_v14, 0.0 }
 0x125   :  { %10137 = vst [vmem:[#allocation29_spill] sm:$0xff] %v5590_v20 }
 0x126   :  { %v388_v9 = vadd.f32 %v387_v22, %v386_v6  ;;  %v349_v48 = vadd.f32 %v348_v8, %v5573_v49  ;;  %v393_v22 = vsel %vm375_vm0, %v5579_v28, 0.0  ;;  %10140 = vst [vmem:[#allocation32_spill] sm:$0xff] %v5606_v15  ;;  %v395_v8 = vsel %vm375_vm0, %v5590_v20, 0.0 }
 0x128   :  { %v390_v1 = vadd.f32 %v389_v17, %v388_v9  ;;  %v350_v25 = vadd.f32 %v349_v48, %v5584_v60  ;;  %v5627_v48 = vadd.f32 %v5392_v24, %v5466_v7 }
 0x12a   :  { %v392_v6 = vadd.f32 %v391_v2, %v390_v1  ;;  %v351_v2 = vadd.f32 %v350_v25, %v5595_v12  ;;  %v5621_v1 = vadd.f32 %v5411_v32, %v5446_v53  ;;  %10143 = vst [vmem:[#allocation35_spill] sm:$0xff] %v5627_v48  ;;  %v5638_v32 = vadd.f32 %v5399_v27, %v5466_v7 }
 0x12b   :  { %v5415_v34 = vpop.f32.mrf.mxu0  ;;  %v5417_v35 = vpop.f32.mrf.mxu1 }
 0x12c   :  { %v394_v18 = vadd.f32 %v393_v22, %v392_v6  ;;  %10142 = vst [vmem:[#allocation34_spill] sm:$0xff] %v5621_v1  ;;  %v352_v20 = vadd.f32 %v351_v2, %v5606_v15  ;;  %v5632_v28 = vadd.f32 %v5415_v34, %v5446_v53  ;;  %v399_v22 = vsel %vm375_vm0, %v5612_v26, 0.0 }
 0x12d   :  { %10145 = vst [vmem:[#allocation37_spill] sm:$0xff] %v5638_v32  ;;  %v5649_v34 = vadd.f32 %v5406_v30, %v5466_v7 }
 0x12e   :  { %v396_v21 = vadd.f32 %v395_v8, %v394_v18  ;;  %10144 = vst [vmem:[#allocation36_spill] sm:$0xff] %v5632_v28  ;;  %v353_v25 = vadd.f32 %v352_v20, %v5621_v1  ;;  %v401_v8 = vsel %vm375_vm0, %v5627_v48, 0.0  ;;  %v403_v20 = vsel %vm375_vm0, %v5638_v32, 0.0 }
 0x12f   :  { %10147 = vst [vmem:[#allocation39_spill] sm:$0xff] %v5649_v34 }
 0x130   :  { %v398_v6 = vadd.f32 %v397_v29, %v396_v21  ;;  %v354_v2 = vadd.f32 %v353_v25, %v5632_v28 }
 0x132   :  { %v400_v18 = vadd.f32 %v399_v22, %v398_v6  ;;  %v5673_v6 = vadd.f32 %v5417_v35, %v5466_v7 }
 0x133   :  { %v5419_v36 = vpop.f32.mrf.mxu0  ;;  %v5421_v37 = vpop.f32.mrf.mxu1 }
 0x134   :  { %v5643_v24 = vadd.f32 %v5419_v36, %v5446_v53  ;;  %v5660_v36 = vadd.f32 %v5413_v33, %v5466_v7  ;;  %v402_v48 = vadd.f32 %v401_v8, %v400_v18  ;;  %10151 = vst [vmem:[#allocation43_spill] sm:$0xff] %v5673_v6 }
 0x136   :  { %10146 = vst [vmem:[#allocation38_spill] sm:$0xff] %v5643_v24  ;;  %v355_v30 = vadd.f32 %v354_v2, %v5643_v24  ;;  %v404_v25 = vadd.f32 %v403_v20, %v402_v48  ;;  %v407_v8 = vsel %vm375_vm0, %v5660_v36, 0.0  ;;  %v409_v48 = vsel %vm375_vm0, %v5673_v6, 0.0 }
 0x137   :  { %10149 = vst [vmem:[#allocation41_spill] sm:$0xff] %v5660_v36 }
 0x13b   :  { %v5423_v38 = vpop.f32.mrf.mxu0  ;;  %v5425_v39 = vpop.f32.mrf.mxu1 }
 0x13c   :  { %v5654_v27 = vadd.f32 %v5423_v38, %v5446_v53  ;;  %v405_v38 = vsel %vm375_vm0, %v5649_v34, 0.0 }
 0x13d   :  { %v406_v18 = vadd.f32 %v405_v38, %v404_v25 }
 0x13e   :  { %10148 = vst [vmem:[#allocation40_spill] sm:$0xff] %v5654_v27  ;;  %v356_v33 = vadd.f32 %v355_v30, %v5654_v27 }
 0x13f   :  { %v408_v20 = vadd.f32 %v407_v8, %v406_v18 }
 0x141   :  { %v410_v6 = vadd.f32 %v409_v48, %v408_v20 }
 0x143   :  { %v5427_v40 = vpop.f32.mrf.mxu0  ;;  %v5429_v41 = vpop.f32.mrf.mxu1 }
 0x144   :  { %v5667_v22 = vadd.f32 %v5427_v40, %v5446_v53  ;;  %v5684_v40 = vadd.f32 %v5421_v37, %v5466_v7 }
 0x146   :  { %10150 = vst [vmem:[#allocation42_spill] sm:$0xff] %v5667_v22  ;;  %v357_v2 = vadd.f32 %v356_v33, %v5667_v22  ;;  %v411_v38 = vsel %vm375_vm0, %v5684_v40, 0.0 }
 0x147   :  { %10153 = vst [vmem:[#allocation45_spill] sm:$0xff] %v5684_v40 }
 0x14b   :  { %v5431_v42 = vpop.f32.mrf.mxu0  ;;  %v5433_v43 = vpop.f32.mrf.mxu1 }
 0x14c   :  { %v5678_v32 = vadd.f32 %v5431_v42, %v5446_v53  ;;  %v5695_v42 = vadd.f32 %v5425_v39, %v5466_v7  ;;  %v5717_v18 = vadd.f32 %v5433_v43, %v5466_v7 }
 0x14e   :  { %10152 = vst [vmem:[#allocation44_spill] sm:$0xff] %v5678_v32  ;;  %v358_v30 = vadd.f32 %v357_v2, %v5678_v32  ;;  %v412_v2 = vadd.f32 %v411_v38, %v410_v6  ;;  %v417_v6 = vsel %vm375_vm0, %v5717_v18, 0.0 }
 0x14f   :  { %10155 = vst [vmem:[#allocation47_spill] sm:$0xff] %v5695_v42 }
 0x150   :  { %10159 = vst [vmem:[#allocation51_spill] sm:$0xff] %v5717_v18 }
 0x153   :  { %v5435_v44 = vpop.f32.mrf.mxu0  ;;  %v5437_v45 = vpop.f32.mrf.mxu1 }
 0x154   :  { %v5689_v35 = vadd.f32 %v5435_v44, %v5446_v53  ;;  %v5706_v44 = vadd.f32 %v5429_v41, %v5466_v7 }
 0x156   :  { %10154 = vst [vmem:[#allocation46_spill] sm:$0xff] %v5689_v35  ;;  %v359_v39 = vadd.f32 %v358_v30, %v5689_v35  ;;  %v415_v48 = vsel %vm375_vm0, %v5706_v44, 0.0 }
 0x157   :  { %10157 = vst [vmem:[#allocation49_spill] sm:$0xff] %v5706_v44 }
 0x15b   :  { %v5442_v47 = vpop.f32.mrf.mxu0  ;;  %v5444_v50 = vpop.f32.mrf.mxu1 }
 0x15c   :  { %v5700_v37 = vadd.f32 %v5442_v47, %v5446_v53  ;;  %v413_v47 = vsel %vm375_vm0, %v5695_v42, 0.0 }
 0x15d   :  { %v414_v20 = vadd.f32 %v413_v47, %v412_v2 }
 0x15e   :  { %10156 = vst [vmem:[#allocation48_spill] sm:$0xff] %v5700_v37  ;;  %v360_v41 = vadd.f32 %v359_v39, %v5700_v37 }
 0x15f   :  { %v416_v38 = vadd.f32 %v415_v48, %v414_v20 }
 0x163   :  { %v5468_v10 = vpop.f32.mrf.mxu0  ;;  %v5470_v51 = vpop.f32.mrf.mxu1 }
 0x164   :  { %v5711_v8 = vadd.f32 %v5468_v10, %v5446_v53  ;;  %v5728_v10 = vadd.f32 %v5437_v45, %v5466_v7 }
 0x166   :  { %10158 = vst [vmem:[#allocation50_spill] sm:$0xff] %v5711_v8  ;;  %v361_v30 = vadd.f32 %v360_v41, %v5711_v8  ;;  %v419_v47 = vsel %vm375_vm0, %v5728_v10, 0.0  ;;  %v418_v41 = vadd.f32 %v417_v6, %v416_v38  ;;  %v5110_v6 = vmov 256.0  }
 0x167   :  { %10161 = vst [vmem:[#allocation53_spill] sm:$0xff] %v5728_v10  ;;  %4571 = vrcp.f32 %v5110_v6 }
 0x16b   :  { %v5518_v46 = vpop.f32.mrf.mxu0  ;;  %v5520_v58 = vpop.f32.mrf.mxu1 }
 0x16c   :  { %v5722_v40 = vadd.f32 %v5518_v46, %v5446_v53  ;;  %v5739_v46 = vadd.f32 %v5444_v50, %v5466_v7 }
 0x16e   :  { %10160 = vst [vmem:[#allocation52_spill] sm:$0xff] %v5722_v40  ;;  %v362_v39 = vadd.f32 %v361_v30, %v5722_v40  ;;  %v421_v20 = vsel %vm375_vm0, %v5739_v46, 0.0  ;;  %v420_v30 = vadd.f32 %v419_v47, %v418_v41 }
 0x16f   :  { %10163 = vst [vmem:[#allocation55_spill] sm:$0xff] %v5739_v46 }
 0x173   :  { %v5566_v16 = vpop.f32.mrf.mxu0  ;;  %v5568_v61 = vpop.f32.mrf.mxu1 }
 0x174   :  { %v5733_v43 = vadd.f32 %v5566_v16, %v5446_v53  ;;  %v5750_v16 = vadd.f32 %v5470_v51, %v5466_v7  ;;  %v5770_v38 = vadd.f32 %v5568_v61, %v5466_v7 }
 0x176   :  { %10162 = vst [vmem:[#allocation54_spill] sm:$0xff] %v5733_v43  ;;  %v363_v18 = vadd.f32 %v362_v39, %v5733_v43  ;;  %v422_v39 = vadd.f32 %v421_v20, %v420_v30  ;;  %v427_v61 = vsel %vm375_vm0, %v5770_v38, 0.0 }
 0x177   :  { %10165 = vst [vmem:[#allocation57_spill] sm:$0xff] %v5750_v16 }
 0x178   :  { %10169 = vst [vmem:[#allocation61_spill] sm:$0xff] %v5770_v38 }
 0x17b   :  { %v5614_v17 = vpop.f32.mrf.mxu0  ;;  %v5616_v9 = vpop.f32.mrf.mxu1 }
 0x17c   :  { %v5744_v45 = vadd.f32 %v5614_v17, %v5446_v53  ;;  %v5760_v17 = vadd.f32 %v5520_v58, %v5466_v7 }
 0x17e   :  { %10164 = vst [vmem:[#allocation56_spill] sm:$0xff] %v5744_v45  ;;  %v364_v10 = vadd.f32 %v363_v18, %v5744_v45  ;;  %v425_v18 = vsel %vm375_vm0, %v5760_v17, 0.0 }
 0x17f   :  { %10167 = vst [vmem:[#allocation59_spill] sm:$0xff] %v5760_v17 }
 0x183   :  { %v213_v29 = vpop.f32.mrf.mxu0  ;;  %v5662_v21 = vpop.f32.mrf.mxu1 }
 0x184   :  { %v5754_v50 = vadd.f32 %v213_v29, %v5446_v53  ;;  %v423_v29 = vsel %vm375_vm0, %v5750_v16, 0.0  ;;  %v5787_v20 = vadd.f32 %v5662_v21, %v5466_v7 }
 0x185   :  { %v424_v47 = vadd.f32 %v423_v29, %v422_v39 }
 0x186   :  { %10166 = vst [vmem:[#allocation58_spill] sm:$0xff] %v5754_v50  ;;  %v365_v46 = vadd.f32 %v364_v10, %v5754_v50  ;;  %v431_v21 = vsel %vm375_vm0, %v5787_v20, 0.0 }
 0x187   :  { %10172 = vst [vmem:[#allocation64_spill] sm:$0xff] %v5787_v20  ;;  %v426_v30 = vadd.f32 %v425_v18, %v424_v47 }
 0x189   :  { %v428_v29 = vadd.f32 %v427_v61, %v426_v30 }
 0x18b   :  { %v216_v25 = vpop.f32.mrf.mxu0  ;;  %v329_v33 = vpop.f32.mrf.mxu1 }
 0x18c   :  { %v5764_v51 = vadd.f32 %v216_v25, %v5446_v53  ;;  %v5780_v25 = vadd.f32 %v5616_v9, %v5466_v7 }
 0x18e   :  { %10168 = vst [vmem:[#allocation60_spill] sm:$0xff] %v5764_v51  ;;  %v366_v41 = vadd.f32 %v365_v46, %v5764_v51  ;;  %v429_v9 = vsel %vm375_vm0, %v5780_v25, 0.0  ;;  %v5796_v46 = vadd.f32 %v329_v33, %v5466_v7 }
 0x18f   :  { %10171 = vst [vmem:[#allocation63_spill] sm:$0xff] %v5780_v25 }
 0x190   :  { %10174 = vst [vmem:[#allocation66_spill] sm:$0xff] %v5796_v46 }
 0x193   :  { %v219_v2 = vpop.f32.mrf.mxu0  ;;  %v332_v48 = vpop.f32.mrf.mxu1 }
 0x194   :  { %v5774_v58 = vadd.f32 %v219_v2, %v5446_v53  ;;  %v4572_v2 = vpop.eup %4571  ;;  %v5802_v18 = vadd.f32 %v332_v48, %v5466_v7 }
 0x195   :  { %v446_v47 = vmul.f32 256.0, %v4572_v2  ;;  %vm450_vm1 = vweird.f32 %v4572_v2 }
 0x196   :  { %10170 = vst [vmem:[#allocation62_spill] sm:$0xff] %v5774_v58  ;;  %v367_v6 = vadd.f32 %v366_v41, %v5774_v58  ;;  %v430_v41 = vadd.f32 %v429_v9, %v428_v29  ;;  %v435_v30 = vsel %vm375_vm0, %v5802_v18, 0.0 }
 0x197   :  { %10175 = vst [vmem:[#allocation67_spill] sm:$0xff] %v5802_v18 }
 0x198   :  { %v432_v33 = vadd.f32 %v431_v21, %v430_v41 }
 0x19b   :  { %v222_v10 = vpop.f32.mrf.mxu0  ;;  %v335_v38 = vpop.f32.mrf.mxu1 }
 0x19c   :  { %v5791_v17 = vadd.f32 %v222_v10, %v5446_v53  ;;  %v433_v10 = vsel %vm375_vm0, %v5796_v46, 0.0  ;;  %v5807_v25 = vadd.f32 %v335_v38, %v5466_v7 }
 0x19e   :  { %10173 = vst [vmem:[#allocation65_spill] sm:$0xff] %v5791_v17  ;;  %v368_v39 = vadd.f32 %v367_v6, %v5791_v17  ;;  %v447_v6 = vsub.f32 1.0, %v446_v47  ;;  %v434_v17 = vadd.f32 %v433_v10, %v432_v33  ;;  %v437_v48 = vsel %vm375_vm0, %v5807_v25, 0.0 }
 0x19f   :  { %10176 = vst [vmem:[#allocation68_spill] sm:$0xff] %v5807_v25 }
 0x1a0   :  { %v369_v53 = vrot.slane %v368_v39, 4  ;;  %v436_v16 = vadd.f32 %v435_v30, %v434_v17  ;;  %v448_v29 = vmul.f32 %v4572_v2, %v447_v6 }
 0x1a2   :  { %v370_v61 = vadd.f32 %v369_v53, %v368_v39  ;;  %v438_v58 = vadd.f32 %v437_v48, %v436_v16  ;;  %v449_v46 = vadd.f32 %v4572_v2, %v448_v29 }
 0x1a4   :  { %v371_v20 = vrot.slane %v370_v61, 2  ;;  %v439_v7 = vrot.slane %v438_v58, 4  ;;  %v5813_v21 = vsel %vm450_vm1, %v4572_v2, %v449_v46 }
 0x1a5   :  { %10177 = vst [vmem:[#allocation69_spill] sm:$0xff] %v5813_v21 }
 0x1a6   :  { %v372_v9 = vadd.f32 %v371_v20, %v370_v61  ;;  %v440_v39 = vadd.f32 %v439_v7, %v438_v58 }
 0x1a8   :  { %v373_v51 = vrot.slane %v372_v9, 1  ;;  %v441_v47 = vrot.slane %v440_v39, 2 }
 0x1aa   :  { %v374_v38 = vadd.f32 %v373_v51, %v372_v9  ;;  %v442_v16 = vadd.f32 %v441_v47, %v440_v39 }
 0x1ac   :  { %v5816_v41 = vmul.f32 %v5813_v21, %v374_v38  ;;  %v443_v46 = vrot.slane %v442_v16, 1 }
 0x1ae   :  { %v5820_v53 = vsub.f32 %v5454_v59, %v5816_v41  ;;  %v5824_v17 = vsub.f32 %v5450_v56, %v5816_v41  ;;  %v5828_v20 = vsub.f32 %v5458_v62, %v5816_v41  ;;  %v5836_v2 = vsub.f32 %v5464_v4, %v5816_v41 }
 0x1af   :  { %v5840_v10 = vsub.f32 %v5475_v13, %v5816_v41  ;;  %v5846_v30 = vsub.f32 %v5484_v57, %v5816_v41  ;;  %v444_v9 = vadd.f32 %v443_v46, %v442_v16  ;;  %v5852_v29 = vsub.f32 %v5497_v52, %v5816_v41 }
 0x1b0   :  { %v518_v51 = vmul.f32 %v5820_v53, %v5820_v53  ;;  %v520_v58 = vmul.f32 %v5824_v17, %v5824_v17  ;;  %v522_v33 = vmul.f32 %v5828_v20, %v5828_v20  ;;  %v524_v6 = vmul.f32 %v5836_v2, %v5836_v2 }
 0x1b1   :  { %v526_v7 = vmul.f32 %v5840_v10, %v5840_v10  ;;  %v5858_v39 = vsub.f32 %v5508_v55, %v5816_v41  ;;  %v528_v47 = vmul.f32 %v5846_v30, %v5846_v30  ;;  %v5867_v16 = vsub.f32 %v5525_v5, %v5816_v41 }
 0x1b2   :  { %v582_v61 = vadd.f32 %v520_v58, %v518_v51  ;;  %v5863_v58 = vmul.f32 %v5813_v21, %v444_v9  ;;  %v530_v46 = vmul.f32 %v5852_v29, %v5852_v29  ;;  %v5887_v21 = vsub.f32 %v5547_v0, %v5816_v41 }
 0x1b3   :  { %v5923_v13 = vsub.f32 %v5584_v60, %v5816_v41  ;;  %v5937_v62 = vsub.f32 %v5595_v12, %v5816_v41 }
 0x1b4   :  { %v583_v48 = vadd.f32 %v582_v61, %v522_v33  ;;  %v5873_v61 = vsub.f32 %v5536_v54, %v5816_v41  ;;  %v5879_v9 = vsub.f32 %v5488_v19, %v5863_v58  ;;  %v10179_v54 = vld [vmem:[#allocation13_spill] sm:$0xff]  ;;  %v5903_v0 = vsub.f32 %v5503_v63, %v5863_v58 }
 0x1b5   :  { %v5893_v5 = vsub.f32 %v10179_v54, %v5863_v58 }
 0x1b6   :  { %v584_v38 = vadd.f32 %v583_v48, %v524_v6  ;;  %v532_v6 = vmul.f32 %v5858_v39, %v5858_v39  ;;  %v519_v52 = vmul.f32 %v5879_v9, %v5879_v9 }
 0x1b8   :  { %v585_v51 = vadd.f32 %v584_v38, %v526_v7  ;;  %v10178_v7 = vld [vmem:[#allocation10_spill] sm:$0xff] }
 0x1b9   :  { %v5883_v38 = vsub.f32 %v10178_v7, %v5863_v58 }
 0x1ba   :  { %v586_v33 = vadd.f32 %v585_v51, %v528_v47  ;;  %v534_v47 = vmul.f32 %v5867_v16, %v5867_v16 }
 0x1bc   :  { %v587_v48 = vadd.f32 %v586_v33, %v530_v46  ;;  %v5897_v46 = vsub.f32 %v5558_v3, %v5816_v41  ;;  %v536_v33 = vmul.f32 %v5873_v61, %v5873_v61  ;;  %v538_v3 = vmul.f32 %v5887_v21, %v5887_v21 }
 0x1be   :  { %v588_v51 = vadd.f32 %v587_v48, %v532_v6  ;;  %v521_v6 = vmul.f32 %v5883_v38, %v5883_v38  ;;  %v5911_v48 = vsub.f32 %v5573_v49, %v5816_v41  ;;  %v540_v63 = vmul.f32 %v5897_v46, %v5897_v46  ;;  %v10180_v49 = vld [vmem:[#allocation19_spill] sm:$0xff] }
 0x1bf   :  { %v5929_v4 = vsub.f32 %v10180_v49, %v5863_v58  ;;  %v10181_v49 = vld [vmem:[#allocation21_spill] sm:$0xff] }
 0x1c0   :  { %v589_v55 = vadd.f32 %v588_v51, %v534_v47  ;;  %v5917_v47 = vsub.f32 %v5516_v31, %v5863_v58  ;;  %v523_v51 = vmul.f32 %v5893_v5, %v5893_v5  ;;  %v620_v31 = vsel %vm375_vm0, %v521_v6, 0.0 }
 0x1c1   :  { %v542_v60 = vmul.f32 %v5911_v48, %v5911_v48  ;;  %v5943_v19 = vsub.f32 %v10181_v49, %v5863_v58  ;;  %v544_v6 = vmul.f32 %v5923_v13, %v5923_v13 }
 0x1c2   :  { %v590_v57 = vadd.f32 %v589_v55, %v536_v33  ;;  %v525_v55 = vmul.f32 %v5903_v0, %v5903_v0  ;;  %v619_v33 = vsel %vm375_vm0, %v519_v52, 0.0  ;;  %v622_v52 = vsel %vm375_vm0, %v523_v51, 0.0 }
 0x1c3   :  { %v621_v7 = vadd.f32 %v620_v31, %v619_v33  ;;  %v5963_v51 = vsub.f32 %v5621_v1, %v5816_v41  ;;  %v546_v33 = vmul.f32 %v5937_v62, %v5937_v62 }
 0x1c4   :  { %v591_v54 = vadd.f32 %v590_v57, %v538_v3  ;;  %v527_v57 = vmul.f32 %v5917_v47, %v5917_v47  ;;  %v5950_v3 = vsub.f32 %v5606_v15, %v5816_v41  ;;  %v624_v31 = vsel %vm375_vm0, %v525_v55, 0.0 }
 0x1c5   :  { %v623_v12 = vadd.f32 %v622_v52, %v621_v7  ;;  %10183 = vst [vmem:[#allocation71_spill] sm:$0xff] %v5963_v51  ;;  %v5976_v55 = vsub.f32 %v5632_v28, %v5816_v41  ;;  %v550_v28 = vmul.f32 %v5963_v51, %v5963_v51 }
 0x1c6   :  { %v592_v56 = vadd.f32 %v591_v54, %v540_v63  ;;  %10182 = vst [vmem:[#allocation70_spill] sm:$0xff] %v5950_v3  ;;  %v5956_v54 = vsub.f32 %v5553_v11, %v5863_v58  ;;  %v529_v63 = vmul.f32 %v5929_v4, %v5929_v4  ;;  %v626_v7 = vsel %vm375_vm0, %v527_v57, 0.0 }
 0x1c7   :  { %v625_v15 = vadd.f32 %v624_v31, %v623_v12  ;;  %v548_v52 = vmul.f32 %v5950_v3, %v5950_v3  ;;  %v5989_v57 = vsub.f32 %v5643_v24, %v5816_v41  ;;  %v552_v24 = vmul.f32 %v5976_v55, %v5976_v55 }
 0x1c8   :  { %v593_v59 = vadd.f32 %v592_v56, %v542_v60  ;;  %v5969_v56 = vsub.f32 %v5564_v14, %v5863_v58  ;;  %v531_v60 = vmul.f32 %v5943_v19, %v5943_v19  ;;  %v628_v31 = vsel %vm375_vm0, %v529_v63, 0.0 }
 0x1c9   :  { %v627_v1 = vadd.f32 %v626_v7, %v625_v15  ;;  %v6002_v63 = vsub.f32 %v5654_v27, %v5816_v41 }
 0x1ca   :  { %v594_v49 = vadd.f32 %v593_v59, %v544_v6  ;;  %v10184_v59 = vld [vmem:[#allocation27_spill] sm:$0xff]  ;;  %v533_v6 = vmul.f32 %v5956_v54, %v5956_v54  ;;  %v630_v7 = vsel %vm375_vm0, %v531_v60, 0.0  ;;  %v6015_v60 = vsub.f32 %v5667_v22, %v5816_v41 }
 0x1cb   :  { %v5982_v12 = vsub.f32 %v10184_v59, %v5863_v58  ;;  %v629_v14 = vadd.f32 %v628_v31, %v627_v1  ;;  %10186 = vst [vmem:[#allocation72_spill] sm:$0xff] %v6002_v63  ;;  %v554_v31 = vmul.f32 %v5989_v57, %v5989_v57 }
 0x1cc   :  { %v595_v11 = vadd.f32 %v594_v49, %v546_v33  ;;  %v10185_v49 = vld [vmem:[#allocation29_spill] sm:$0xff]  ;;  %v535_v33 = vmul.f32 %v5969_v56, %v5969_v56  ;;  %10187 = vst [vmem:[#allocation73_spill] sm:$0xff] %v6015_v60 }
 0x1cd   :  { %v5995_v15 = vsub.f32 %v10185_v49, %v5863_v58  ;;  %v631_v59 = vadd.f32 %v630_v7, %v629_v14  ;;  %v537_v1 = vmul.f32 %v5982_v12, %v5982_v12  ;;  %v6021_v14 = vsub.f32 %v5612_v26, %v5863_v58 }
 0x1ce   :  { %v596_v3 = vadd.f32 %v595_v11, %v548_v52  ;;  %v6008_v11 = vsub.f32 %v5601_v23, %v5863_v58  ;;  %v632_v52 = vsel %vm375_vm0, %v533_v6, 0.0  ;;  %v6028_v6 = vsub.f32 %v5678_v32, %v5816_v41 }
 0x1cf   :  { %v633_v27 = vadd.f32 %v632_v52, %v631_v59  ;;  %v556_v7 = vmul.f32 %v6002_v63, %v6002_v63  ;;  %v636_v52 = vsel %vm375_vm0, %v537_v1, 0.0  ;;  %v558_v32 = vmul.f32 %v6015_v60, %v6015_v60 }
 0x1d0   :  { %v597_v51 = vadd.f32 %v596_v3, %v550_v28  ;;  %v539_v28 = vmul.f32 %v5995_v15, %v5995_v15  ;;  %v634_v3 = vsel %vm375_vm0, %v535_v33, 0.0  ;;  %10188 = vst [vmem:[#allocation74_spill] sm:$0xff] %v6028_v6  ;;  %v541_v59 = vmul.f32 %v6008_v11, %v6008_v11 }
 0x1d1   :  { %v635_v22 = vadd.f32 %v634_v3, %v633_v27  ;;  %v6041_v33 = vsub.f32 %v5689_v35, %v5816_v41  ;;  %v10191_v27 = vld [vmem:[#allocation37_spill] sm:$0xff]  ;;  %v6054_v1 = vsub.f32 %v5700_v37, %v5816_v41  ;;  %v560_v35 = vmul.f32 %v6028_v6, %v6028_v6 }
 0x1d2   :  { %v598_v49 = vadd.f32 %v597_v51, %v552_v24  ;;  %v10189_v24 = vld [vmem:[#allocation35_spill] sm:$0xff]  ;;  %v638_v3 = vsel %vm375_vm0, %v539_v28, 0.0  ;;  %v6067_v28 = vsub.f32 %v5711_v8, %v5816_v41 }
 0x1d3   :  { %v6034_v51 = vsub.f32 %v10189_v24, %v5863_v58  ;;  %10190 = vst [vmem:[#allocation75_spill] sm:$0xff] %v6041_v33  ;;  %v637_v26 = vadd.f32 %v636_v52, %v635_v22  ;;  %v562_v52 = vmul.f32 %v6041_v33, %v6041_v33 }
 0x1d4   :  { %v599_v23 = vadd.f32 %v598_v49, %v554_v31  ;;  %v6047_v49 = vsub.f32 %v10191_v27, %v5863_v58  ;;  %v543_v31 = vmul.f32 %v6021_v14, %v6021_v14  ;;  %10192 = vst [vmem:[#allocation76_spill] sm:$0xff] %v6054_v1 }
 0x1d5   :  { %v639_v24 = vadd.f32 %v638_v3, %v637_v26  ;;  %v545_v22 = vmul.f32 %v6034_v51, %v6034_v51  ;;  %10193 = vst [vmem:[#allocation77_spill] sm:$0xff] %v6067_v28  ;;  %v6073_v26 = vsub.f32 %v5660_v36, %v5863_v58  ;;  %v564_v3 = vmul.f32 %v6054_v1, %v6054_v1 }
 0x1d6   :  { %v600_v63 = vadd.f32 %v599_v23, %v556_v7  ;;  %v6060_v23 = vsub.f32 %v5649_v34, %v5863_v58  ;;  %v640_v7 = vsel %vm375_vm0, %v541_v59, 0.0  ;;  %v6080_v59 = vsub.f32 %v5722_v40, %v5816_v41 }
 0x1d7   :  { %v641_v37 = vadd.f32 %v640_v7, %v639_v24  ;;  %v644_v7 = vsel %vm375_vm0, %v545_v22, 0.0  ;;  %v566_v40 = vmul.f32 %v6067_v28, %v6067_v28  ;;  %v6106_v22 = vsub.f32 %v5744_v45, %v5816_v41 }
 0x1d8   :  { %v601_v60 = vadd.f32 %v600_v63, %v558_v32  ;;  %v547_v32 = vmul.f32 %v6047_v49, %v6047_v49  ;;  %v642_v63 = vsel %vm375_vm0, %v543_v31, 0.0  ;;  %10194 = vst [vmem:[#allocation78_spill] sm:$0xff] %v6080_v59  ;;  %v549_v24 = vmul.f32 %v6060_v23, %v6060_v23 }
 0x1d9   :  { %v643_v8 = vadd.f32 %v642_v63, %v641_v37  ;;  %v6093_v31 = vsub.f32 %v5733_v43, %v5816_v41  ;;  %v10197_v37 = vld [vmem:[#allocation45_spill] sm:$0xff]  ;;  %10198 = vst [vmem:[#allocation80_spill] sm:$0xff] %v6106_v22  ;;  %v568_v43 = vmul.f32 %v6080_v59, %v6080_v59 }
 0x1da   :  { %v602_v27 = vadd.f32 %v601_v60, %v560_v35  ;;  %v10195_v35 = vld [vmem:[#allocation43_spill] sm:$0xff]  ;;  %v646_v63 = vsel %vm375_vm0, %v547_v32, 0.0  ;;  %v6119_v32 = vsub.f32 %v5754_v50, %v5816_v41 }
 0x1db   :  { %v6086_v60 = vsub.f32 %v10195_v35, %v5863_v58  ;;  %10196 = vst [vmem:[#allocation79_spill] sm:$0xff] %v6093_v31  ;;  %v645_v36 = vadd.f32 %v644_v7, %v643_v8  ;;  %v570_v7 = vmul.f32 %v6093_v31, %v6093_v31  ;;  %v10206_v31 = vld [vmem:[#allocation55_spill] sm:$0xff] }
 0x1dc   :  { %v603_v34 = vadd.f32 %v602_v27, %v562_v52  ;;  %v6099_v27 = vsub.f32 %v10197_v37, %v5863_v58  ;;  %v551_v52 = vmul.f32 %v6073_v26, %v6073_v26  ;;  %10199 = vst [vmem:[#allocation81_spill] sm:$0xff] %v6119_v32 }
 0x1dd   :  { %v647_v35 = vadd.f32 %v646_v63, %v645_v36  ;;  %v553_v8 = vmul.f32 %v6086_v60, %v6086_v60  ;;  %v6125_v36 = vsub.f32 %v5706_v44, %v5863_v58 }
 0x1de   :  { %v604_v1 = vadd.f32 %v603_v34, %v564_v3  ;;  %v6112_v34 = vsub.f32 %v5695_v42, %v5863_v58  ;;  %v648_v3 = vsel %vm375_vm0, %v549_v24, 0.0  ;;  %v572_v24 = vmul.f32 %v6106_v22, %v6106_v22  ;;  %v10200_v42 = vld [vmem:[#allocation51_spill] sm:$0xff] }
 0x1df   :  { %v649_v45 = vadd.f32 %v648_v3, %v647_v35  ;;  %v6134_v59 = vsub.f32 %v10200_v42, %v5863_v58  ;;  %v10202_v35 = vld [vmem:[#allocation60_spill] sm:$0xff] }
 0x1e0   :  { %v605_v28 = vadd.f32 %v604_v1, %v566_v40  ;;  %v555_v40 = vmul.f32 %v6099_v27, %v6099_v27  ;;  %v650_v1 = vsel %vm375_vm0, %v551_v52, 0.0  ;;  %v6141_v3 = vsub.f32 %v10202_v35, %v5816_v41 }
 0x1e1   :  { %v651_v63 = vadd.f32 %v650_v1, %v649_v45  ;;  %10201 = vst [vmem:[#allocation82_spill] sm:$0xff] %v6134_v59  ;;  %v574_v52 = vmul.f32 %v6119_v32, %v6119_v32  ;;  %v10204_v45 = vld [vmem:[#allocation53_spill] sm:$0xff]  ;;  %v6154_v35 = vsub.f32 %v10206_v31, %v5863_v58  ;;  %v561_v32 = vmul.f32 %v6134_v59, %v6134_v59 }
 0x1e2   :  { %v606_v37 = vadd.f32 %v605_v28, %v568_v43  ;;  %v557_v43 = vmul.f32 %v6112_v34, %v6112_v34  ;;  %v652_v28 = vsel %vm375_vm0, %v553_v8, 0.0  ;;  %10203 = vst [vmem:[#allocation83_spill] sm:$0xff] %v6141_v3  ;;  %v654_v1 = vsel %vm375_vm0, %v555_v40, 0.0 }
 0x1e3   :  { %v653_v44 = vadd.f32 %v652_v28, %v651_v63  ;;  %10207 = vst [vmem:[#allocation85_spill] sm:$0xff] %v6154_v35 }
 0x1e4   :  { %v607_v50 = vadd.f32 %v606_v37, %v570_v7  ;;  %v6147_v37 = vsub.f32 %v10204_v45, %v5863_v58  ;;  %v559_v7 = vmul.f32 %v6125_v36, %v6125_v36  ;;  %v576_v45 = vmul.f32 %v6141_v3, %v6141_v3 }
 0x1e5   :  { %v655_v42 = vadd.f32 %v654_v1, %v653_v44  ;;  %v10210_v44 = vld [vmem:[#allocation57_spill] sm:$0xff] }
 0x1e6   :  { %v608_v22 = vadd.f32 %v607_v50, %v572_v24  ;;  %10205 = vst [vmem:[#allocation84_spill] sm:$0xff] %v6147_v37  ;;  %v656_v50 = vsel %vm375_vm0, %v557_v43, 0.0  ;;  %v10208_v24 = vld [vmem:[#allocation62_spill] sm:$0xff]  ;;  %v563_v40 = vmul.f32 %v6147_v37, %v6147_v37  ;;  %v10212_v43 = vld [vmem:[#allocation59_spill] sm:$0xff] }
 0x1e7   :  { %v6161_v63 = vsub.f32 %v10208_v24, %v5816_v41  ;;  %v657_v28 = vadd.f32 %v656_v50, %v655_v42  ;;  %v6174_v33 = vsub.f32 %v10212_v43, %v5863_v58  ;;  %v565_v42 = vmul.f32 %v6154_v35, %v6154_v35  ;;  %v10214_v24 = vld [vmem:[#allocation65_spill] sm:$0xff] }
 0x1e8   :  { %v609_v8 = vadd.f32 %v608_v22, %v574_v52  ;;  %v6167_v22 = vsub.f32 %v10210_v44, %v5863_v58  ;;  %v658_v52 = vsel %vm375_vm0, %v559_v7, 0.0  ;;  %v660_v50 = vsel %vm375_vm0, %v561_v32, 0.0  ;;  %v10215_v7 = vld [vmem:[#allocation61_spill] sm:$0xff]  ;;  %v10217_v32 = vld [vmem:[#allocation63_spill] sm:$0xff] }
 0x1e9   :  { %10209 = vst [vmem:[#allocation86_spill] sm:$0xff] %v6161_v63  ;;  %v659_v1 = vadd.f32 %v658_v52, %v657_v28  ;;  %v6181_v44 = vsub.f32 %v10214_v24, %v5816_v41  ;;  %v578_v37 = vmul.f32 %v6161_v63, %v6161_v63  ;;  %v662_v28 = vsel %vm375_vm0, %v563_v40, 0.0 }
 0x1ea   :  { %10211 = vst [vmem:[#allocation87_spill] sm:$0xff] %v6167_v22  ;;  %v610_v31 = vadd.f32 %v609_v8, %v576_v45  ;;  %v6187_v45 = vsub.f32 %v10215_v7, %v5863_v58  ;;  %v567_v8 = vmul.f32 %v6167_v22, %v6167_v22  ;;  %v6194_v35 = vsub.f32 %v10217_v32, %v5863_v58  ;;  %v10219_v7 = vld [vmem:[#allocation64_spill] sm:$0xff] }
 0x1eb   :  { %10213 = vst [vmem:[#allocation88_spill] sm:$0xff] %v6174_v33  ;;  %v661_v3 = vadd.f32 %v660_v50, %v659_v1  ;;  %v569_v41 = vmul.f32 %v6174_v33, %v6174_v33  ;;  %v664_v1 = vsel %vm375_vm0, %v565_v42, 0.0  ;;  %v580_v24 = vmul.f32 %v6181_v44, %v6181_v44 }
 0x1ec   :  { %10216 = vst [vmem:[#allocation89_spill] sm:$0xff] %v6187_v45  ;;  %v611_v43 = vadd.f32 %v610_v31, %v578_v37  ;;  %v6203_v63 = vsub.f32 %v10219_v7, %v5863_v58  ;;  %v571_v31 = vmul.f32 %v6187_v45, %v6187_v45  ;;  %v10221_v37 = vld [vmem:[#allocation66_spill] sm:$0xff]  ;;  %v5111_v42 = vmov 255.0  }
 0x1ed   :  { %v663_v52 = vadd.f32 %v662_v28, %v661_v3  ;;  %10218 = vst [vmem:[#allocation90_spill] sm:$0xff] %v6194_v35  ;;  %v666_v3 = vsel %vm375_vm0, %v567_v8, 0.0  ;;  %v6210_v40 = vsub.f32 %v10221_v37, %v5863_v58  ;;  %4573 = vrcp.f32 %v5111_v42 }
 0x1ee   :  { %10220 = vst [vmem:[#allocation91_spill] sm:$0xff] %v6203_v63  ;;  %v612_v32 = vadd.f32 %v611_v43, %v580_v24  ;;  %v6217_v33 = vsub.f32 %v5802_v18, %v5863_v58  ;;  %v575_v8 = vmul.f32 %v6203_v63, %v6203_v63  ;;  %v670_v37 = vsel %vm375_vm0, %v571_v31, 0.0 }
 0x1ef   :  { %v665_v50 = vadd.f32 %v664_v1, %v663_v52  ;;  %10222 = vst [vmem:[#allocation92_spill] sm:$0xff] %v6210_v40  ;;  %v573_v52 = vmul.f32 %v6194_v35, %v6194_v35  ;;  %v668_v1 = vsel %vm375_vm0, %v569_v41, 0.0  ;;  %v517_v24 = vsub.f32 %v5807_v25, %v5863_v58 }
 0x1f0   :  { %10223 = vst [vmem:[#allocation93_spill] sm:$0xff] %v6217_v33  ;;  %v577_v43 = vmul.f32 %v6210_v40, %v6210_v40  ;;  %v579_v42 = vmul.f32 %v6217_v33, %v6217_v33 }
 0x1f1   :  { %v667_v28 = vadd.f32 %v666_v3, %v665_v50  ;;  %v613_v50 = vrot.slane %v612_v32, 4  ;;  %v672_v41 = vsel %vm375_vm0, %v573_v52, 0.0  ;;  %v581_v31 = vmul.f32 %v517_v24, %v517_v24 }
 0x1f2   :  { %v678_v58 = vsel %vm375_vm0, %v579_v42, 0.0 }
 0x1f3   :  { %v669_v7 = vadd.f32 %v668_v1, %v667_v28  ;;  %v4574_v28 = vpop.eup %4573  ;;  %v674_v1 = vsel %vm375_vm0, %v575_v8, 0.0  ;;  %v614_v63 = vadd.f32 %v613_v50, %v612_v32  ;;  %v680_v52 = vsel %vm375_vm0, %v581_v31, 0.0 }
 0x1f4   :  { %vm693_vm2 = vweird.f32 %v4574_v28 }
 0x1f5   :  { %v671_v45 = vadd.f32 %v670_v37, %v669_v7  ;;  %v676_v7 = vsel %vm375_vm0, %v577_v43, 0.0  ;;  %v689_v37 = vmul.f32 255.0, %v4574_v28  ;;  %v615_v40 = vrot.slane %v614_v63, 2 }
 0x1f7   :  { %v673_v3 = vadd.f32 %v672_v41, %v671_v45  ;;  %v690_v45 = vsub.f32 1.0, %v689_v37  ;;  %v616_v59 = vadd.f32 %v615_v40, %v614_v63 }
 0x1f9   :  { %v675_v18 = vadd.f32 %v674_v1, %v673_v3  ;;  %v691_v33 = vmul.f32 %v4574_v28, %v690_v45  ;;  %v617_v8 = vrot.slane %v616_v59, 1 }
 0x1fb   :  { %v677_v35 = vadd.f32 %v676_v7, %v675_v18  ;;  %v692_v3 = vadd.f32 %v4574_v28, %v691_v33  ;;  %v618_v50 = vadd.f32 %v617_v8, %v616_v59 }
 0x1fd   :  { %v679_v25 = vadd.f32 %v678_v58, %v677_v35  ;;  %v6233_v43 = vsel %vm693_vm2, %v4574_v28, %v692_v3 }
 0x1fe   :  { %10224 = vst [vmem:[#allocation94_spill] sm:$0xff] %v6233_v43  ;;  %v695_v42 = vmul.f32 %v6233_v43, %v618_v50 }
 0x1ff   :  { %v681_v41 = vadd.f32 %v680_v52, %v679_v25 }
 0x200   :  { %4575 = vrsqrt.f32 %v695_v42  ;;  %vm703_vm4 = vweird.f32 %v695_v42 }
 0x201   :  { %v682_v22 = vrot.slane %v681_v41, 4 }
 0x203   :  { %v683_v6 = vadd.f32 %v682_v22, %v681_v41 }
 0x205   :  { %v684_v32 = vrot.slane %v683_v6, 2 }
 0x206   :  { %v4576_v31 = vpop.eup %4575 }
 0x207   :  { %v685_v18 = vadd.f32 %v684_v32, %v683_v6  ;;  %v698_v7 = vmul.f32 %v4576_v31, %v695_v42  ;;  %vm704_vm3 = vweird.f32 %v4576_v31 }
 0x208   :  { %vm705_vm5 = vmor %vm703_vm4, %vm704_vm3 }
 0x209   :  { %v686_v35 = vrot.slane %v685_v18, 1  ;;  %v699_v63 = vmul.f32 %v4576_v31, %v698_v7 }
 0x20b   :  { %v687_v1 = vadd.f32 %v686_v35, %v685_v18  ;;  %v700_v40 = vmul.f32 0.5, %v699_v63 }
 0x20d   :  { %v696_v25 = vmul.f32 %v6233_v43, %v687_v1  ;;  %v701_v37 = vsub.f32 1.5, %v700_v40 }
 0x20f   :  { %4577 = vrsqrt.f32 %v696_v25  ;;  %v702_v59 = vmul.f32 %v4576_v31, %v701_v37  ;;  %vm713_vm7 = vweird.f32 %v696_v25 }
 0x211   :  { %v6237_v28 = vsel %vm705_vm5, %v4576_v31, %v702_v59 }
 0x212   :  { %v779_v52 = vmul.f32 %v6237_v28, %v6181_v44  ;;  %v717_v18 = vmul.f32 %v6237_v28, %v5820_v53  ;;  %v719_v42 = vmul.f32 %v6237_v28, %v5824_v17  ;;  %v721_v44 = vmul.f32 %v6237_v28, %v5828_v20 }
 0x213   :  { %v723_v1 = vmul.f32 %v6237_v28, %v5836_v2  ;;  %v729_v17 = vmul.f32 %v6237_v28, %v5852_v29  ;;  %v731_v20 = vmul.f32 %v6237_v28, %v5858_v39 }
 0x214   :  { %v843_v41 = vadd.f32 1e-08, %v779_v52  ;;  %v781_v7 = vadd.f32 1e-08, %v717_v18  ;;  %v783_v53 = vadd.f32 1e-08, %v719_v42  ;;  %v737_v52 = vmul.f32 %v6237_v28, %v5887_v21 }
 0x215   :  { %v4578_v22 = vpop.eup %4577  ;;  %v787_v2 = vadd.f32 1e-08, %v723_v1  ;;  %v795_v39 = vadd.f32 1e-08, %v731_v20 }
 0x216   :  { %v708_v33 = vmul.f32 %v4578_v22, %v696_v25  ;;  %vm714_vm6 = vweird.f32 %v4578_v22  ;;  %v4468_v3 = vmul.f32 -1.442695, %v843_v41  ;;  %v725_v25 = vmul.f32 %v6237_v28, %v5840_v10 }
 0x217   :  { %vm715_vm8 = vmor %vm713_vm7, %vm714_vm6  ;;  %v4406_v37 = vmul.f32 -1.442695, %v781_v7  ;;  %v4408_v59 = vmul.f32 -1.442695, %v783_v53 }
 0x218   :  { %v709_v58 = vmul.f32 %v4578_v22, %v708_v33  ;;  %4579 = vpow2.f32 %v4468_v3  ;;  %v733_v33 = vmul.f32 %v6237_v28, %v5867_v16  ;;  %v789_v10 = vadd.f32 1e-08, %v725_v25 }
 0x219   :  { %v739_v16 = vmul.f32 %v6237_v28, %v5897_v46  ;;  %v4420_v46 = vmul.f32 -1.442695, %v795_v39 }
 0x21a   :  { %v710_v6 = vmul.f32 0.5, %v709_v58  ;;  %v797_v41 = vadd.f32 1e-08, %v733_v33 }
 0x21c   :  { %v711_v45 = vsub.f32 1.5, %v710_v6  ;;  %v793_v6 = vadd.f32 1e-08, %v729_v17 }
 0x21e   :  { %v712_v8 = vmul.f32 %v4578_v22, %v711_v45  ;;  %v4580_v31 = vpop.eup %4579  ;;  %v4412_v45 = vmul.f32 -1.442695, %v787_v2  ;;  %v4418_v42 = vmul.f32 -1.442695, %v793_v6 }
 0x21f   :  { %v6258_v40 = vadd.f32 1.0, %v4580_v31  ;;  %v803_v31 = vadd.f32 1e-08, %v739_v16 }
 0x220   :  { %v6241_v32 = vsel %vm715_vm8, %v4578_v22, %v712_v8  ;;  %v785_v22 = vadd.f32 1e-08, %v721_v44  ;;  %v4414_v8 = vmul.f32 -1.442695, %v789_v10  ;;  %v801_v44 = vadd.f32 1e-08, %v737_v52 }
 0x221   :  { %v780_v50 = vmul.f32 %v6241_v32, %v517_v24  ;;  %v727_v24 = vmul.f32 %v6237_v28, %v5846_v30  ;;  %10225 = vst [vmem:[#allocation95_spill] sm:$0xff] %v6258_v40  ;;  %v735_v30 = vmul.f32 %v6237_v28, %v5873_v61  ;;  %v741_v61 = vmul.f32 %v6237_v28, %v5911_v48 }
 0x222   :  { %v4410_v29 = vmul.f32 -1.442695, %v785_v22  ;;  %v718_v18 = vmul.f32 %v6241_v32, %v5879_v9  ;;  %v722_v1 = vmul.f32 %v6241_v32, %v5893_v5  ;;  %v4422_v48 = vmul.f32 -1.442695, %v797_v41 }
 0x223   :  { %v844_v35 = vadd.f32 1e-08, %v780_v50  ;;  %v791_v58 = vadd.f32 1e-08, %v727_v24  ;;  %v799_v3 = vadd.f32 1e-08, %v735_v30  ;;  %v724_v9 = vmul.f32 %v6241_v32, %v5903_v0 }
 0x224   :  { %v805_v7 = vadd.f32 1e-08, %v741_v61  ;;  %v726_v53 = vmul.f32 %v6241_v32, %v5917_v47  ;;  %v782_v17 = vadd.f32 1e-08, %v718_v18  ;;  %v728_v22 = vmul.f32 %v6241_v32, %v5929_v4 }
 0x225   :  { %v4469_v63 = vmul.f32 -1.442695, %v844_v35  ;;  %v4416_v50 = vmul.f32 -1.442695, %v791_v58  ;;  %v720_v35 = vmul.f32 %v6241_v32, %v5883_v38  ;;  %v4424_v24 = vmul.f32 -1.442695, %v799_v3 }
 0x226   :  { %v4426_v0 = vmul.f32 -1.442695, %v801_v44  ;;  %v730_v33 = vmul.f32 %v6241_v32, %v5943_v19  ;;  %v786_v10 = vadd.f32 1e-08, %v722_v1  ;;  %v732_v47 = vmul.f32 %v6241_v32, %v5956_v54 }
 0x227   :  { %4581 = vpow2.f32 %v4469_v63  ;;  %v784_v20 = vadd.f32 1e-08, %v720_v35  ;;  %v788_v58 = vadd.f32 1e-08, %v724_v9  ;;  %v734_v6 = vmul.f32 %v6241_v32, %v5969_v56 }
 0x228   :  { %4583 = vrcp.f32 %v6258_v40  ;;  %v4407_v19 = vmul.f32 -1.442695, %v782_v17  ;;  %v736_v39 = vmul.f32 %v6241_v32, %v5982_v12  ;;  %v738_v41 = vmul.f32 %v6241_v32, %v5995_v15 }
 0x229   :  { %4585 = vpow2.f32 %v4406_v37  ;;  %v4428_v37 = vmul.f32 -1.442695, %v803_v31  ;;  %v4409_v16 = vmul.f32 -1.442695, %v784_v20  ;;  %v4411_v61 = vmul.f32 -1.442695, %v786_v10 }
 0x22a   :  { %4587 = vpow2.f32 %v4408_v59  ;;  %v4430_v59 = vmul.f32 -1.442695, %v805_v7  ;;  %v740_v56 = vmul.f32 %v6241_v32, %v6008_v11  ;;  %v4413_v18 = vmul.f32 -1.442695, %v788_v58 }
 0x22b   :  { %4589 = vpow2.f32 %v4410_v29  ;;  %v790_v29 = vadd.f32 1e-08, %v726_v53  ;;  %v743_v44 = vmul.f32 %v6237_v28, %v5923_v13  ;;  %v744_v31 = vmul.f32 %v6241_v32, %v6034_v51 }
 0x22c   :  { %4591 = vpow2.f32 %v4412_v45  ;;  %v792_v45 = vadd.f32 1e-08, %v728_v22  ;;  %v745_v7 = vmul.f32 %v6237_v28, %v5937_v62  ;;  %v746_v17 = vmul.f32 %v6241_v32, %v6047_v49 }
 0x22d   :  { %v4582_v21 = vpop.eup %4581  ;;  %4593 = vpow2.f32 %v4414_v8  ;;  %v794_v8 = vadd.f32 1e-08, %v730_v33  ;;  %v4415_v35 = vmul.f32 -1.442695, %v790_v29  ;;  %v807_v10 = vadd.f32 1e-08, %v743_v44 }
 0x22e   :  { %v6279_v25 = vpop.eup %4583  ;;  %4595 = vpow2.f32 %v4416_v50  ;;  %v6285_v38 = vadd.f32 1.0, %v4582_v21  ;;  %v796_v50 = vadd.f32 1e-08, %v732_v47  ;;  %v798_v21 = vadd.f32 1e-08, %v734_v6  ;;  %v10230_v6 = vld [vmem:[#allocation71_spill] sm:$0xff] }
 0x22f   :  { %10226 = vst [vmem:[#allocation96_spill] sm:$0xff] %v6279_v25  ;;  %v6283_v63 = vpop.eup %4585  ;;  %4597 = vpow2.f32 %v4418_v42  ;;  %v742_v42 = vmul.f32 %v6241_v32, %v6021_v14  ;;  %v4417_v1 = vmul.f32 -1.442695, %v792_v45  ;;  %v4419_v9 = vmul.f32 -1.442695, %v794_v8 }
 0x230   :  { %10227 = vst [vmem:[#allocation97_spill] sm:$0xff] %v6285_v38  ;;  %v6289_v5 = vpop.eup %4587  ;;  %4599 = vpow2.f32 %v4420_v46  ;;  %v800_v46 = vadd.f32 1e-08, %v736_v39  ;;  %v4421_v53 = vmul.f32 -1.442695, %v796_v50  ;;  %v748_v47 = vmul.f32 %v6241_v32, %v6060_v23 }
 0x231   :  { %v6293_v2 = vpop.eup %4589  ;;  %4601 = vpow2.f32 %v4422_v48  ;;  %v802_v48 = vadd.f32 1e-08, %v738_v41  ;;  %v806_v22 = vadd.f32 1e-08, %v742_v42  ;;  %v4423_v20 = vmul.f32 -1.442695, %v798_v21 }
 0x232   :  { %v6297_v30 = vpop.eup %4591  ;;  %4603 = vpow2.f32 %v4424_v24  ;;  %v804_v24 = vadd.f32 1e-08, %v740_v56  ;;  %v808_v58 = vadd.f32 1e-08, %v744_v31  ;;  %v749_v29 = vmul.f32 %v6237_v28, %v10230_v6 }
 0x233   :  { %v6301_v4 = vpop.eup %4593  ;;  %4605 = vrcp.f32 %v6285_v38  ;;  %v810_v41 = vadd.f32 1e-08, %v746_v17  ;;  %v4431_v8 = vmul.f32 -1.442695, %v806_v22  ;;  %v4432_v50 = vmul.f32 -1.442695, %v807_v10 }
 0x234   :  { %v6306_v52 = vpop.eup %4595  ;;  %4607 = vpow2.f32 %v4426_v0  ;;  %v10229_v0 = vld [vmem:[#allocation70_spill] sm:$0xff]  ;;  %v4429_v39 = vmul.f32 -1.442695, %v804_v24  ;;  %v752_v42 = vmul.f32 %v6241_v32, %v6086_v60  ;;  %v812_v21 = vadd.f32 1e-08, %v748_v47 }
 0x235   :  { %v6310_v54 = vpop.eup %4597  ;;  %4609 = vpow2.f32 %v4428_v37  ;;  %v747_v33 = vmul.f32 %v6237_v28, %v10229_v0  ;;  %v4425_v37 = vmul.f32 -1.442695, %v800_v46  ;;  %v753_v44 = vmul.f32 %v6237_v28, %v5989_v57 }
 0x236   :  { %v6314_v3 = vpop.eup %4599  ;;  %4611 = vpow2.f32 %v4430_v59  ;;  %v4427_v59 = vmul.f32 -1.442695, %v802_v48  ;;  %v813_v46 = vadd.f32 1e-08, %v749_v29  ;;  %v754_v31 = vmul.f32 %v6241_v32, %v6099_v27 }
 0x237   :  { %v6318_v12 = vpop.eup %4601  ;;  %4613 = vpow2.f32 %v4407_v19  ;;  %v809_v19 = vadd.f32 1e-08, %v745_v7  ;;  %v811_v56 = vadd.f32 1e-08, %v747_v33  ;;  %v10231_v7 = vld [vmem:[#allocation72_spill] sm:$0xff]  ;;  %v756_v22 = vmul.f32 %v6241_v32, %v6112_v34  ;;  %v10232_v33 = vld [vmem:[#allocation73_spill] sm:$0xff] }
 0x238   :  { %v6322_v15 = vpop.eup %4603  ;;  %4615 = vpow2.f32 %v4409_v16  ;;  %v750_v16 = vmul.f32 %v6241_v32, %v6073_v26  ;;  %v755_v24 = vmul.f32 %v6237_v28, %v10231_v7  ;;  %v4437_v0 = vmul.f32 -1.442695, %v812_v21  ;;  %v10235_v21 = vld [vmem:[#allocation75_spill] sm:$0xff] }
 0x239   :  { %v6326_v11 = vpop.eup %4605  ;;  %4617 = vpow2.f32 %v4411_v61  ;;  %v751_v61 = vmul.f32 %v6237_v28, %v5976_v55  ;;  %v4436_v17 = vmul.f32 -1.442695, %v811_v56  ;;  %v757_v10 = vmul.f32 %v6237_v28, %v10232_v33  ;;  %v10238_v33 = vld [vmem:[#allocation85_spill] sm:$0xff] }
 0x23a   :  { %10228 = vst [vmem:[#allocation98_spill] sm:$0xff] %v6326_v11  ;;  %v6330_v14 = vpop.eup %4607  ;;  %4619 = vpow2.f32 %v4413_v18  ;;  %v814_v48 = vadd.f32 1e-08, %v750_v16  ;;  %v4438_v47 = vmul.f32 -1.442695, %v813_v46 }
 0x23b   :  { %v6334_v13 = vpop.eup %4609  ;;  %4621 = vpow2.f32 %v4415_v35  ;;  %v4433_v35 = vmul.f32 -1.442695, %v808_v58  ;;  %v818_v6 = vadd.f32 1e-08, %v754_v31  ;;  %v819_v16 = vadd.f32 1e-08, %v755_v24 }
 0x23c   :  { %v6338_v51 = vpop.eup %4611  ;;  %4623 = vpow2.f32 %v4417_v1  ;;  %v4434_v1 = vmul.f32 -1.442695, %v809_v19  ;;  %v4439_v29 = vmul.f32 -1.442695, %v814_v48  ;;  %v10233_v19 = vld [vmem:[#allocation74_spill] sm:$0xff]  ;;  %v10236_v31 = vld [vmem:[#allocation84_spill] sm:$0xff] }
 0x23d   :  { %v6342_v62 = vpop.eup %4613  ;;  %4625 = vpow2.f32 %v4419_v9  ;;  %v4435_v9 = vmul.f32 -1.442695, %v810_v41  ;;  %v762_v48 = vmul.f32 %v6241_v32, %v10236_v31  ;;  %v4443_v7 = vmul.f32 -1.442695, %v818_v6 }
 0x23e   :  { %v6346_v49 = vpop.eup %4615  ;;  %4627 = vpow2.f32 %v4421_v53  ;;  %v815_v53 = vadd.f32 1e-08, %v751_v61  ;;  %v10234_v61 = vld [vmem:[#allocation82_spill] sm:$0xff] }
 0x23f   :  { %v6350_v45 = vpop.eup %4617  ;;  %4629 = vpow2.f32 %v4423_v20  ;;  %v816_v20 = vadd.f32 1e-08, %v752_v42  ;;  %v760_v56 = vmul.f32 %v6241_v32, %v10234_v61 }
 0x240   :  { %v6354_v23 = vpop.eup %4619  ;;  %4631 = vpow2.f32 %v4425_v37  ;;  %v817_v37 = vadd.f32 1e-08, %v753_v44  ;;  %v4440_v41 = vmul.f32 -1.442695, %v815_v53  ;;  %v821_v44 = vadd.f32 1e-08, %v757_v10 }
 0x241   :  { %v6358_v18 = vpop.eup %4621  ;;  %4633 = vpow2.f32 %v4427_v59  ;;  %v758_v59 = vmul.f32 %v6241_v32, %v6125_v36  ;;  %v4441_v42 = vmul.f32 -1.442695, %v816_v20  ;;  %v10237_v53 = vld [vmem:[#allocation76_spill] sm:$0xff]  ;;  %v4444_v20 = vmul.f32 -1.442695, %v819_v16 }
 0x242   :  { %v6362_v26 = vpop.eup %4623  ;;  %4635 = vpow2.f32 %v4429_v39  ;;  %v759_v39 = vmul.f32 %v6237_v28, %v10233_v19  ;;  %v4442_v46 = vmul.f32 -1.442695, %v817_v37  ;;  %v764_v10 = vmul.f32 %v6241_v32, %v10238_v33 }
 0x243   :  { %v6366_v55 = vpop.eup %4625  ;;  %4637 = vpow2.f32 %v4431_v8  ;;  %v824_v37 = vadd.f32 1e-08, %v760_v56  ;;  %v4446_v61 = vmul.f32 -1.442695, %v821_v44  ;;  %v10241_v56 = vld [vmem:[#allocation78_spill] sm:$0xff] }
 0x244   :  { %v6370_v60 = vpop.eup %4627  ;;  %4639 = vpow2.f32 %v4432_v50  ;;  %v820_v50 = vadd.f32 1e-08, %v756_v22  ;;  %v823_v22 = vadd.f32 1e-08, %v759_v39  ;;  %v10240_v39 = vld [vmem:[#allocation87_spill] sm:$0xff] }
 0x245   :  { %v6374_v57 = vpop.eup %4629  ;;  %4641 = vpow2.f32 %v4433_v35  ;;  %v761_v35 = vmul.f32 %v6237_v28, %v10235_v21  ;;  %v766_v16 = vmul.f32 %v6241_v32, %v10240_v39  ;;  %v4449_v43 = vmul.f32 -1.442695, %v824_v37 }
 0x246   :  { %v6378_v27 = vpop.eup %4631  ;;  %4643 = vpow2.f32 %v4434_v1  ;;  %v4448_v33 = vmul.f32 -1.442695, %v823_v22 }
 0x247   :  { %v6382_v58 = vpop.eup %4633  ;;  %4645 = vpow2.f32 %v4435_v9  ;;  %v822_v9 = vadd.f32 1e-08, %v758_v59  ;;  %v10239_v59 = vld [vmem:[#allocation77_spill] sm:$0xff] }
 0x248   :  { %v6386_v34 = vpop.eup %4635  ;;  %4647 = vpow2.f32 %v4436_v17  ;;  %v763_v17 = vmul.f32 %v6237_v28, %v10237_v53  ;;  %v765_v6 = vmul.f32 %v6237_v28, %v10239_v59 }
 0x249   :  { %v6390_v8 = vpop.eup %4637  ;;  %4649 = vpow2.f32 %v4437_v0  ;;  %v4447_v31 = vmul.f32 -1.442695, %v822_v9 }
 0x24a   :  { %v6394_v36 = vpop.eup %4639  ;;  %4651 = vpow2.f32 %v4438_v47  ;;  %v4445_v47 = vmul.f32 -1.442695, %v820_v50  ;;  %v767_v50 = vmul.f32 %v6237_v28, %v10241_v56 }
 0x24b   :  { %v6398_v1 = vpop.eup %4641  ;;  %4653 = vpow2.f32 %v4439_v29  ;;  %v825_v29 = vadd.f32 1e-08, %v761_v35  ;;  %v10242_v35 = vld [vmem:[#allocation88_spill] sm:$0xff] }
 0x24c   :  { %v6402_v24 = vpop.eup %4643  ;;  %4655 = vpow2.f32 %v4440_v41  ;;  %v826_v41 = vadd.f32 1e-08, %v762_v48  ;;  %v768_v44 = vmul.f32 %v6241_v32, %v10242_v35  ;;  %v10243_v48 = vld [vmem:[#allocation79_spill] sm:$0xff] }
 0x24d   :  { %v6406_v0 = vpop.eup %4645  ;;  %4657 = vpow2.f32 %v4441_v42  ;;  %v827_v42 = vadd.f32 1e-08, %v763_v17  ;;  %v769_v9 = vmul.f32 %v6237_v28, %v10243_v48  ;;  %v4450_v11 = vmul.f32 -1.442695, %v825_v29  ;;  %v10244_v17 = vld [vmem:[#allocation89_spill] sm:$0xff] }
 0x24e   :  { %v6410_v19 = vpop.eup %4647  ;;  %4659 = vpow2.f32 %v4442_v46  ;;  %v828_v46 = vadd.f32 1e-08, %v764_v10  ;;  %v770_v22 = vmul.f32 %v6241_v32, %v10244_v17  ;;  %v4451_v38 = vmul.f32 -1.442695, %v826_v41  ;;  %v10246_v10 = vld [vmem:[#allocation80_spill] sm:$0xff] }
 0x24f   :  { %v6414_v21 = vpop.eup %4649  ;;  %4661 = vpow2.f32 %v4443_v7  ;;  %v829_v7 = vadd.f32 1e-08, %v765_v6  ;;  %v771_v37 = vmul.f32 %v6237_v28, %v10246_v10  ;;  %v4452_v25 = vmul.f32 -1.442695, %v827_v42  ;;  %v10248_v6 = vld [vmem:[#allocation90_spill] sm:$0xff] }
 0x250   :  { %v6418_v53 = vpop.eup %4651  ;;  %4663 = vpow2.f32 %v4444_v20  ;;  %v830_v20 = vadd.f32 1e-08, %v766_v16  ;;  %v772_v29 = vmul.f32 %v6241_v32, %v10248_v6  ;;  %v4453_v40 = vmul.f32 -1.442695, %v828_v46  ;;  %v10250_v16 = vld [vmem:[#allocation81_spill] sm:$0xff] }
 0x251   :  { %v6422_v59 = vpop.eup %4653  ;;  %4665 = vpow2.f32 %v4445_v47  ;;  %v831_v47 = vadd.f32 1e-08, %v767_v50  ;;  %v773_v41 = vmul.f32 %v6237_v28, %v10250_v16  ;;  %v10252_v50 = vld [vmem:[#allocation91_spill] sm:$0xff]  ;;  %v835_v46 = vadd.f32 1e-08, %v771_v37 }
 0x252   :  { %v6426_v39 = vpop.eup %4655  ;;  %4667 = vpow2.f32 %v4446_v61  ;;  %v832_v61 = vadd.f32 1e-08, %v768_v44  ;;  %v774_v42 = vmul.f32 %v6241_v32, %v10252_v50 }
 0x253   :  { %v6430_v56 = vpop.eup %4657  ;;  %4669 = vpow2.f32 %v4447_v31  ;;  %v833_v31 = vadd.f32 1e-08, %v769_v9 }
 0x254   :  { %v6434_v35 = vpop.eup %4659  ;;  %4671 = vpow2.f32 %v4448_v33  ;;  %v834_v33 = vadd.f32 1e-08, %v770_v22 }
 0x255   :  { %10245 = vst [vmem:[#allocation70_spill] sm:$0xff] %v6434_v35  ;;  %v6438_v48 = vpop.eup %4661  ;;  %4673 = vpow2.f32 %v4449_v43  ;;  %v4454_v35 = vmul.f32 -1.442695, %v829_v7  ;;  %v10254_v43 = vld [vmem:[#allocation83_spill] sm:$0xff]  ;;  %v836_v7 = vadd.f32 1e-08, %v772_v29 }
 0x256   :  { %10247 = vst [vmem:[#allocation71_spill] sm:$0xff] %v6438_v48  ;;  %v6442_v17 = vpop.eup %4663  ;;  %4675 = vpow2.f32 %v4450_v11  ;;  %v4455_v48 = vmul.f32 -1.442695, %v830_v20  ;;  %v775_v44 = vmul.f32 %v6237_v28, %v10254_v43  ;;  %v10256_v11 = vld [vmem:[#allocation92_spill] sm:$0xff]  ;;  %v837_v20 = vadd.f32 1e-08, %v773_v41 }
 0x257   :  { %10249 = vst [vmem:[#allocation72_spill] sm:$0xff] %v6442_v17  ;;  %v6446_v10 = vpop.eup %4665  ;;  %4677 = vpow2.f32 %v4451_v38  ;;  %v4456_v17 = vmul.f32 -1.442695, %v831_v47  ;;  %v776_v9 = vmul.f32 %v6241_v32, %v10256_v11  ;;  %v10258_v38 = vld [vmem:[#allocation86_spill] sm:$0xff]  ;;  %v4459_v37 = vmul.f32 -1.442695, %v834_v33 }
 0x258   :  { %10251 = vst [vmem:[#allocation73_spill] sm:$0xff] %v6446_v10  ;;  %v6450_v6 = vpop.eup %4667  ;;  %4679 = vpow2.f32 %v4452_v25  ;;  %v4457_v10 = vmul.f32 -1.442695, %v832_v61  ;;  %v777_v22 = vmul.f32 %v6237_v28, %v10258_v38  ;;  %v838_v25 = vadd.f32 1e-08, %v774_v42 }
 0x259   :  { %10253 = vst [vmem:[#allocation74_spill] sm:$0xff] %v6450_v6  ;;  %v6454_v16 = vpop.eup %4669  ;;  %4681 = vpow2.f32 %v4453_v40  ;;  %v4458_v6 = vmul.f32 -1.442695, %v833_v31  ;;  %v4460_v29 = vmul.f32 -1.442695, %v835_v46  ;;  %v10259_v31 = vld [vmem:[#allocation93_spill] sm:$0xff] }
 0x25a   :  { %10255 = vst [vmem:[#allocation82_spill] sm:$0xff] %v6454_v16  ;;  %v6458_v50 = vpop.eup %4671  ;;  %4683 = vpow2.f32 %v4454_v35  ;;  %v839_v16 = vadd.f32 1e-08, %v775_v44  ;;  %v840_v61 = vadd.f32 1e-08, %v776_v9  ;;  %v2270_v9 = vld [vmem:[%s9888_s3 + $0x70] sm:$0xff] }
 0x25b   :  { %10257 = vst [vmem:[#allocation75_spill] sm:$0xff] %v6458_v50  ;;  %v6462_v43 = vpop.eup %4673  ;;  %4685 = vpow2.f32 %v4455_v48  ;;  %v4461_v11 = vmul.f32 -1.442695, %v836_v7  ;;  %v841_v28 = vadd.f32 1e-08, %v777_v22  ;;  %v778_v48 = vmul.f32 %v6241_v32, %v10259_v31 }
 0x25c   :  { %v6464_v47 = vpop.eup %4675  ;;  %4687 = vpow2.f32 %v4456_v17  ;;  %v4462_v35 = vmul.f32 -1.442695, %v837_v20  ;;  %v4463_v42 = vmul.f32 -1.442695, %v838_v25  ;;  %v4464_v17 = vmul.f32 -1.442695, %v839_v16 }
 0x25d   :  { %v6466_v40 = vpop.eup %4677  ;;  %4689 = vpow2.f32 %v4457_v10  ;;  %v2271_v10 = vld [vmem:[%s9888_s3 + $0x78] sm:$0xff]  ;;  %v4466_v32 = vmul.f32 -1.442695, %v841_v28  ;;  %v842_v7 = vadd.f32 1e-08, %v778_v48  ;;  %v6491_v38 = vadd.f32 1.0, %v6283_v63 }
 0x25e   :  { %v6468_v50 = vpop.eup %4679  ;;  %4691 = vpow2.f32 %v4458_v6  ;;  %v4465_v6 = vmul.f32 -1.442695, %v840_v61  ;;  %2381 = vmatpush.msra.mxu2 %v2271_v10  ;;  %v6496_v20 = vadd.f32 1.0, %v6289_v5  ;;  %v2269_v25 = vld [vmem:[%s9888_s3 + $0x68] sm:$0xff]  ;;  %v6509_v61 = vadd.f32 1.0, %v6346_v49  ;;  %v2268_v5 = vld [vmem:[%s9888_s3 + $0x60] sm:$0xff] }
 0x25f   :  { %v6470_v41 = vpop.eup %4681  ;;  %4693 = vpow2.f32 %v4459_v37  ;;  %v4467_v28 = vmul.f32 -1.442695, %v842_v7  ;;  %v2267_v49 = vld [vmem:[%s9888_s3 + $0x58] sm:$0xff]  ;;  %v6530_v48 = vadd.f32 1.0, %v6350_v45  ;;  %v6545_v45 = vadd.f32 1.0, %v6354_v23 }
 0x260   :  { %v6474_v33 = vpop.eup %4683  ;;  %4695 = vpow2.f32 %v4460_v29  ;;  %2382 = vmatpush.msra.mxu2 %v2270_v9  ;;  %v6504_v29 = vadd.f32 1.0, %v6342_v62  ;;  %v6520_v62 = vadd.f32 1.0, %v6293_v2  ;;  %v6536_v2 = vadd.f32 1.0, %v6297_v30  ;;  %v2265_v30 = vld [vmem:[%s9888_s3 + $0x48] sm:$0xff] }
 0x261   :  { %10260 = vst [vmem:[#allocation84_spill] sm:$0xff] %v6474_v33  ;;  %v6479_v44 = vpop.eup %4685  ;;  %4697 = vpow2.f32 %v4461_v11  ;;  %v6558_v7 = vstv %s2061_s20  ;;  %v1110_v23 = vand.u32 2147483647, %v6491_v38  ;;  %vm1106_vm9 = vweird.f32 %v6491_v38 }
 0x262   :  { %10261 = vst [vmem:[#allocation76_spill] sm:$0xff] %v6479_v44  ;;  %v6483_v46 = vpop.eup %4687  ;;  %4699 = vpow2.f32 %v4462_v35  ;;  %2383 = vmatpush.msra.mxu2 %v2269_v25  ;;  %v6561_v25 = vstv %s6481_s11  ;;  %vm1136_vm11 = vweird.f32 %v6496_v20  ;;  %vm1121_vm12 = vweird.f32 %v6504_v29 }
 0x263   :  { %10262 = vst [vmem:[#allocation85_spill] sm:$0xff] %v6483_v46  ;;  %v6488_v16 = vpop.eup %4689  ;;  %4701 = vpow2.f32 %v4463_v42  ;;  %vm6610_vm10 = vcmp.eq.f32.partialorder %v1110_v23, 8.507059e+37  ;;  %v1140_v46 = vand.u32 2147483647, %v6496_v20  ;;  %vm1151_vm4 = vweird.f32 %v6509_v61 }
 0x264   :  { %10263 = vst [vmem:[#allocation77_spill] sm:$0xff] %v6488_v16  ;;  %v6493_v22 = vpop.eup %4691  ;;  %4703 = vpow2.f32 %v4464_v17  ;;  %2384 = vmatpush.msra.mxu2 %v2268_v5  ;;  %v2266_v17 = vld [vmem:[%s9888_s3 + $0x50] sm:$0xff] }
 0x265   :  { %10264 = vst [vmem:[#allocation87_spill] sm:$0xff] %v6493_v22  ;;  %v6501_v37 = vpop.eup %4693  ;;  %4705 = vpow2.f32 %v4465_v6  ;;  %vm1141_vm7 = vcmp.eq.f32.partialorder %v1140_v46, 8.507059e+37  ;;  %v2257_v46 = vld [vmem:[%s9888_s3 + $0x8] sm:$0xff] }
 0x266   :  { %10265 = vst [vmem:[#allocation78_spill] sm:$0xff] %v6501_v37  ;;  %v6506_v63 = vpop.eup %4695  ;;  %4707 = vpow2.f32 %v4466_v32  ;;  %2385 = vmatpush.msra.mxu2 %v2267_v49  ;;  %v6550_v32 = vadd.f32 1.0, %v6301_v4  ;;  %v6568_v4 = vadd.f32 1.0, %v6358_v18  ;;  %v2264_v49 = vld [vmem:[%s9888_s3 + $0x40] sm:$0xff]  ;;  %v6587_v18 = vadd.f32 1.0, %v6366_v55 }
 0x267   :  { %10266 = vst [vmem:[#allocation88_spill] sm:$0xff] %v6506_v63  ;;  %v6514_v11 = vpop.eup %4697  ;;  %4709 = vrcp.f32 %v6491_v38  ;;  %v1142_v63 = vand.u32 2147483648, %v6496_v20 }
 0x268   :  { %10267 = vst [vmem:[#allocation79_spill] sm:$0xff] %v6514_v11  ;;  %v6517_v35 = vpop.eup %4699  ;;  %4711 = vrcp.f32 %v6496_v20  ;;  %2386 = vmatpush.msra.mxu2 %v2266_v17  ;;  %v1112_v17 = vand.u32 2147483648, %v6491_v38 }
 0x269   :  { %10268 = vst [vmem:[#allocation89_spill] sm:$0xff] %v6517_v35  ;;  %v6526_v31 = vpop.eup %4701  ;;  %4713 = vrcp.f32 %v6504_v29 }
 0x26a   :  { %10269 = vst [vmem:[#allocation80_spill] sm:$0xff] %v6526_v31  ;;  %v6533_v42 = vpop.eup %4703  ;;  %4715 = vrcp.f32 %v6509_v61  ;;  %2387 = vmatpush.msra.mxu2 %v2265_v30  ;;  %v6581_v30 = vadd.f32 1.0, %v6362_v26  ;;  %v2280_v26 = vld [vmem:[%s9888_s3 + $0xc0] sm:$0xff]  ;;  %v1113_v23 = vor.u32 1.1754944e-38, %v1112_v17  ;;  %v1127_v31 = vand.u32 2147483648, %v6504_v29  ;;  %v2261_v17 = vld [vmem:[%s9888_s3 + $0x28] sm:$0xff] }
 0x26b   :  { %10270 = vst [vmem:[#allocation90_spill] sm:$0xff] %v6533_v42  ;;  %v6542_v10 = vpop.eup %4705  ;;  %4717 = vpow2.f32 %v4467_v28  ;;  %v6571_v28 = vadd.f32 1.0, %v6306_v52  ;;  %v6593_v42 = vadd.f32 1.0, %v6314_v3  ;;  %2501 = vmatpush.msra.mxu3 %v2280_v26  ;;  %v2275_v3 = vld [vmem:[%s9888_s3 + $0x98] sm:$0xff] }
 0x26c   :  { %10271 = vst [vmem:[#allocation81_spill] sm:$0xff] %v6536_v2  ;;  %v6547_v6 = vpop.eup %4707  ;;  %4719 = vrcp.f32 %v6520_v62  ;;  %2388 = vmatpush.msra.mxu2 %v2264_v49 }
 0x26d   :  { %10272 = vst [vmem:[#allocation91_spill] sm:$0xff] %v6542_v10  ;;  %v6556_v9 = vpop.eup %4709  ;;  %4721 = vrcp.f32 %v6530_v48  ;;  %v6584_v10 = vadd.f32 1.0, %v6310_v54  ;;  %v2263_v54 = vld [vmem:[%s9888_s3 + $0x38] sm:$0xff] }
 0x26e   :  { %10273 = vst [vmem:[#allocation83_spill] sm:$0xff] %v6545_v45  ;;  %v6565_v5 = vpop.eup %4711  ;;  %4723 = vrcp.f32 %v6536_v2  ;;  %v6596_v2 = vadd.f32 1.0, %v6370_v60  ;;  %v1102_v55 = vmul.f32 %v6556_v9, %v6491_v38  ;;  %2389 = vmatpush.msra.mxu2 %v2263_v54  ;;  %v2279_v54 = vld [vmem:[%s9888_s3 + $0xb8] sm:$0xff]  ;;  %vm1107_vm13 = vweird.f32 %v6556_v9 }
 0x26f   :  { %10274 = vst [vmem:[#allocation92_spill] sm:$0xff] %v6547_v6  ;;  %v6578_v6 = vpop.eup %4713  ;;  %4725 = vrcp.f32 %v6545_v45  ;;  %v1132_v60 = vmul.f32 %v6565_v5, %v6496_v20  ;;  %v2262_v45 = vld [vmem:[%s9888_s3 + $0x30] sm:$0xff]  ;;  %2502 = vmatpush.msra.mxu3 %v2279_v54  ;;  %v1125_v54 = vand.u32 2147483647, %v6504_v29  ;;  %vm1137_vm14 = vweird.f32 %v6565_v5  ;;  %vm1108_vm1 = vmor %vm1106_vm9, %vm1107_vm13 }
 0x270   :  { %10275 = vst [vmem:[#allocation86_spill] sm:$0xff] %v6550_v32  ;;  %v6590_v52 = vpop.eup %4715  ;;  %4727 = vrcp.f32 %v6550_v32  ;;  %v1103_v26 = vsub.f32 1.0, %v1102_v55  ;;  %2390 = vmatpush.msra.mxu2 %v2262_v45  ;;  %v2278_v55 = vld [vmem:[%s9888_s3 + $0xb0] sm:$0xff]  ;;  %vm1122_vm15 = vweird.f32 %v6578_v6  ;;  %vm6680_vm3 = vmor %vm1136_vm11, %vm1137_vm14  ;;  %vm1166_vm11 = vweird.f32 %v6520_v62 }
 0x271   :  { %v6607_v49 = vpop.eup %4717  ;;  %v1133_v11 = vsub.f32 1.0, %v1132_v60  ;;  %v1147_v37 = vmul.f32 %v6590_v52, %v6509_v61  ;;  %2503 = vmatpush.msra.mxu3 %v2278_v55  ;;  %vm1152_vm2 = vweird.f32 %v6590_v52  ;;  %vm1123_vm5 = vmor %vm1121_vm12, %vm1122_vm15  ;;  %vm1126_vm6 = vcmp.eq.f32.partialorder %v1125_v54, 8.507059e+37 }
 0x272   :  { %10276 = vst [vmem:[#allocation93_spill] sm:$0xff] %v6607_v49  ;;  %v6617_v32 = vpop.eup %4719  ;;  %v1117_v49 = vmul.f32 %v6578_v6, %v6504_v29  ;;  %v1104_v45 = vmul.f32 %v6556_v9, %v1103_v26  ;;  %2391 = vmatpush.msra.mxu2 %v2261_v17  ;;  %v2260_v26 = vld [vmem:[%s9888_s3 + $0x20] sm:$0xff]  ;;  %vm6709_vm8 = vmor %vm1151_vm4, %vm1152_vm2  ;;  %4729 = vrcp.f32 %v6568_v4  ;;  %vm1181_vm15 = vweird.f32 %v6530_v48 }
 0x273   :  { %v6628_v35 = vpop.eup %4721  ;;  %v1148_v44 = vsub.f32 1.0, %v1147_v37  ;;  %4731 = vrcp.f32 %v6571_v28 }
 0x274   :  { %v6634_v22 = vpop.eup %4723  ;;  %v1118_v60 = vsub.f32 1.0, %v1117_v49  ;;  %v2277_v49 = vld [vmem:[%s9888_s3 + $0xa8] sm:$0xff]  ;;  %v1105_v17 = vadd.f32 %v6556_v9, %v1104_v45  ;;  %2392 = vmatpush.msra.mxu2 %v2260_v26  ;;  %v2259_v45 = vld [vmem:[%s9888_s3 + $0x18] sm:$0xff]  ;;  %v1155_v26 = vand.u32 2147483647, %v6509_v61  ;;  %4733 = vrcp.f32 %v6581_v30 }
 0x275   :  { %10279 = vst [vmem:[#allocation99_spill] sm:$0xff] %v6634_v22  ;;  %v6645_v16 = vpop.eup %4725  ;;  %v1134_v22 = vmul.f32 %v6565_v5, %v1133_v11  ;;  %v1128_v11 = vor.u32 1.1754944e-38, %v1127_v31  ;;  %2504 = vmatpush.msra.mxu3 %v2277_v49  ;;  %v2276_v31 = vld [vmem:[%s9888_s3 + $0xa0] sm:$0xff]  ;;  %v2258_v49 = vld [vmem:[%s9888_s3 + $0x10] sm:$0xff]  ;;  %4735 = vrcp.f32 %v6584_v10  ;;  %vm1182_vm14 = vweird.f32 %v6628_v35 }
 0x276   :  { %10280 = vst [vmem:[#allocation100_spill] sm:$0xff] %v6645_v16  ;;  %v6650_v33 = vpop.eup %4727  ;;  %v1119_v55 = vmul.f32 %v6578_v6, %v1118_v60  ;;  %v1149_v16 = vmul.f32 %v6590_v52, %v1148_v44  ;;  %v1109_v60 = vsel %vm1108_vm1, %v6556_v9, %v1105_v17  ;;  %2393 = vmatpush.msra.mxu2 %v2259_v45  ;;  %vm1156_vm9 = vcmp.eq.f32.partialorder %v1155_v26, 8.507059e+37  ;;  %v2273_v45 = vld [vmem:[%s9888_s3 + $0x88] sm:$0xff]  ;;  %v2272_v26 = vld [vmem:[%s9888_s3 + $0x80] sm:$0xff]  ;;  %vm6903_vm1 = vmor %vm1181_vm15, %vm1182_vm14 }
 0x277   :  { %10281 = vst [vmem:[#allocation101_spill] sm:$0xff] %v6650_v33  ;;  %v1135_v37 = vadd.f32 %v6565_v5, %v1134_v22  ;;  %v1143_v33 = vor.u32 1.1754944e-38, %v1142_v63  ;;  %v1157_v22 = vand.u32 2147483648, %v6509_v61  ;;  %2505 = vmatpush.msra.mxu3 %v2276_v31  ;;  %v1114_v63 = vsel %vm6610_vm10, %v1113_v23, %v1109_v60  ;;  %v2274_v61 = vld [vmem:[%s9888_s3 + $0x90] sm:$0xff]  ;;  %v10286_v31 = vld [vmem:[#allocation6_spill] sm:$0xff] }
 0x278   :  { %v1120_v38 = vadd.f32 %v6578_v6, %v1119_v55  ;;  %v1150_v9 = vadd.f32 %v6590_v52, %v1149_v16  ;;  %v2063_v23 = vmul.f32 %v6558_v7, %v1114_v63  ;;  %2394 = vmatpush.msra.mxu2 %v2258_v49  ;;  %v6745_v63 = vadd.f32 1.0, %v6322_v15 }
 0x279   :  { %v1139_v20 = vsel %vm6680_vm3, %v6565_v5, %v1135_v37  ;;  %2506 = vmatpush.msra.mxu3 %v2275_v3  ;;  %v2256_v37 = vld [vmem:[%s9888_s3] sm:$0xff]  ;;  %4737 = vrcp.f32 %v6587_v18  ;;  %v6757_v3 = vpop.eup %4729  ;;  %vm1167_vm10 = vweird.f32 %v6617_v32 }
 0x27a   :  { %v1124_v29 = vsel %vm1123_vm5, %v6578_v6, %v1120_v38  ;;  %v1144_v17 = vsel %vm1141_vm7, %v1143_v33, %v1139_v20  ;;  %v1154_v6 = vsel %vm6709_vm8, %v6590_v52, %v1150_v9  ;;  %v2128_v54 = vadd.f32 %v6561_v25, %v2063_v23  ;;  %2395 = vmatpush.msra.mxu2 %v2257_v46  ;;  %vm1168_vm12 = vmor %vm1166_vm11, %vm1167_vm10 }
 0x27b   :  { %v1129_v5 = vsel %vm1126_vm6, %v1128_v11, %v1124_v29  ;;  %v1158_v11 = vor.u32 1.1754944e-38, %v1157_v22  ;;  %v6727_v33 = vadd.f32 1.0, %v6318_v12  ;;  %2507 = vmatpush.msra.mxu3 %v2274_v61  ;;  %v1162_v52 = vmul.f32 %v6617_v32, %v6520_v62  ;;  %v6763_v29 = vpop.eup %4731 }
 0x27c   :  { %v2064_v55 = vmul.f32 %v6558_v7, %v1129_v5  ;;  %v2192_v60 = vmul.f32 %v2128_v54, %v10286_v31  ;;  %v2065_v38 = vmul.f32 %v6558_v7, %v1144_v17  ;;  %v6742_v22 = vadd.f32 1.0, %v6374_v57  ;;  %2396 = vmatpush.msra.mxu2 %v2256_v37  ;;  %v10287_v57 = vld [vmem:[#allocation12_spill] sm:$0xff] }
 0x27d   :  { %v1159_v44 = vsel %vm1156_vm9, %v1158_v11, %v1154_v6  ;;  %2508 = vmatpush.msra.mxu3 %v2273_v45  ;;  %v1163_v20 = vsub.f32 1.0, %v1162_v52  ;;  %v6749_v9 = vadd.f32 1.0, %v6378_v27  ;;  %4739 = vrcp.f32 %v6593_v42  ;;  %v6771_v6 = vpop.eup %4733 }
 0x27e   :  { %v2129_v12 = vadd.f32 %v6561_v25, %v2064_v55  ;;  %2397 = vmatmul.f32.vlgmr.msra.gmra.mxu2 %v2192_v60  ;;  %v2066_v15 = vmul.f32 %v6558_v7, %v1159_v44  ;;  %v1172_v27 = vand.u32 2147483648, %v6520_v62  ;;  %4741 = vrcp.f32 %v6596_v2  ;;  %v10290_v44 = vld [vmem:[#allocation10_spill] sm:$0xff] }
 0x27f   :  { %2509 = vmatpush.msra.mxu3 %v2272_v26  ;;  %v1164_v23 = vmul.f32 %v6617_v32, %v1163_v20  ;;  %v2130_v16 = vadd.f32 %v6561_v25, %v2065_v38  ;;  %v1170_v5 = vand.u32 2147483647, %v6520_v62  ;;  %v1177_v17 = vmul.f32 %v6628_v35, %v6530_v48 }
 0x280   :  { %v2193_v49 = vmul.f32 %v2129_v12, %v10287_v57  ;;  %v6774_v46 = vadd.f32 1.0, %v6330_v14  ;;  %4743 = vrcp.f32 %v6727_v33  ;;  %v6780_v54 = vadd.f32 1.0, %v6382_v58  ;;  %v6789_v14 = vpop.eup %4735 }
 0x281   :  { %v1165_v61 = vadd.f32 %v6617_v32, %v1164_v23  ;;  %v6783_v55 = vadd.f32 1.0, %v6334_v13  ;;  %4745 = vrcp.f32 %v6742_v22  ;;  %v2131_v11 = vadd.f32 %v6561_v25, %v2066_v15  ;;  %v6796_v37 = vpop.eup %4737  ;;  %v10288_v13 = vld [vmem:[#allocation5_spill] sm:$0xff] }
 0x282   :  { %4470 = vmatmul.msk.f32.vlgmr.msra.gmra.mxu3 %vm375_vm0, %v2193_v49  ;;  %v6792_v52 = vadd.f32 1.0, %v6386_v34  ;;  %4747 = vrcp.f32 %v6745_v63  ;;  %v1173_v62 = vor.u32 1.1754944e-38, %v1172_v27  ;;  %v2194_v45 = vmul.f32 %v2130_v16, %v10288_v13 }
 0x283   :  { %v1169_v58 = vsel %vm1168_vm12, %v6617_v32, %v1165_v61  ;;  %4749 = vrcp.f32 %v6749_v9  ;;  %vm1171_vm13 = vcmp.eq.f32.partialorder %v1170_v5, 8.507059e+37  ;;  %v1178_v31 = vsub.f32 1.0, %v1177_v17  ;;  %v6800_v60 = vpop.eup %4739 }
 0x284   :  { %v6803_v12 = vadd.f32 1.0, %v6338_v51  ;;  %4751 = vrcp.f32 %v6774_v46  ;;  %v1174_v34 = vsel %vm1171_vm13, %v1173_v62, %v1169_v58  ;;  %v6806_v38 = vpop.eup %4741  ;;  %v6809_v32 = vadd.f32 1.0, %v6390_v8  ;;  %v10301_v58 = vld [vmem:[#allocation70_spill] sm:$0xff] }
 0x285   :  { %4753 = vrcp.f32 %v6780_v54  ;;  %v2195_v20 = vmul.f32 %v2131_v11, %v10290_v44  ;;  %v6816_v57 = vadd.f32 1.0, %v6394_v36  ;;  %v2067_v51 = vmul.f32 %v6558_v7, %v1174_v34 }
 0x286   :  { %10289 = vst [vmem:[#allocation6_spill] sm:$0xff] %v6809_v32  ;;  %2400 = vmatmul.f32.gmra.mxu2 %v2194_v45  ;;  %v6813_v26 = vpop.eup %4743  ;;  %4755 = vrcp.f32 %v6783_v55  ;;  %v6823_v15 = vadd.f32 1.0, %v6398_v1  ;;  %v6826_v8 = vadd.f32 1.0, %v6402_v24  ;;  %v1179_v23 = vmul.f32 %v6628_v35, %v1178_v31  ;;  %v10304_v45 = vld [vmem:[#allocation71_spill] sm:$0xff]  ;;  %v10306_v31 = vld [vmem:[#allocation72_spill] sm:$0xff] }
 0x287   :  { %10291 = vst [vmem:[#allocation12_spill] sm:$0xff] %v6816_v57  ;;  %v6820_v49 = vpop.eup %4745  ;;  %4757 = vrcp.f32 %v6792_v52  ;;  %v6834_v27 = vadd.f32 1.0, %v6406_v0  ;;  %v6837_v16 = vadd.f32 1.0, %v6410_v19  ;;  %v2132_v1 = vadd.f32 %v6561_v25, %v2067_v51  ;;  %v10308_v51 = vld [vmem:[#allocation73_spill] sm:$0xff] }
 0x288   :  { %10292 = vst [vmem:[#allocation5_spill] sm:$0xff] %v6823_v15  ;;  %v6831_v36 = vpop.eup %4747  ;;  %4759 = vrcp.f32 %v6803_v12  ;;  %v6844_v5 = vadd.f32 1.0, %v6414_v21  ;;  %v6847_v17 = vadd.f32 1.0, %v6418_v53  ;;  %v6850_v61 = vadd.f32 1.0, %v6422_v59  ;;  %v10303_v53 = vld [vmem:[#allocation7_spill] sm:$0xff] }
 0x289   :  { %10293 = vst [vmem:[#allocation10_spill] sm:$0xff] %v6826_v8  ;;  %v6841_v24 = vpop.eup %4749  ;;  %4761 = vrcp.f32 %v6809_v32  ;;  %v6856_v19 = vadd.f32 1.0, %v6426_v39  ;;  %v6859_v11 = vadd.f32 1.0, %v6430_v56  ;;  %v6862_v62 = vadd.f32 1.0, %v10301_v58 }
 0x28a   :  { %4471 = vmatmul.msk.f32.gmra.mxu3 %vm375_vm0, %v2195_v20  ;;  %10294 = vst [vmem:[#allocation102_spill] sm:$0xff] %v6834_v27  ;;  %v6853_v0 = vpop.eup %4751  ;;  %4763 = vrcp.f32 %v6816_v57  ;;  %v2196_v59 = vmul.f32 %v2132_v1, %v10303_v53  ;;  %v1180_v13 = vadd.f32 %v6628_v35, %v1179_v23  ;;  %v6874_v56 = vadd.f32 1.0, %v10304_v45  ;;  %v10310_v53 = vld [vmem:[#allocation74_spill] sm:$0xff] }
 0x28b   :  { %10295 = vst [vmem:[#allocation103_spill] sm:$0xff] %v6837_v16  ;;  %v6865_v21 = vpop.eup %4753  ;;  %4765 = vrcp.f32 %v6823_v15  ;;  %v6877_v34 = vadd.f32 1.0, %v10306_v31  ;;  %v1187_v44 = vand.u32 2147483648, %v6530_v48  ;;  %v6884_v1 = vadd.f32 1.0, %v10308_v51  ;;  %v10312_v31 = vld [vmem:[#allocation82_spill] sm:$0xff]  ;;  %v10314_v15 = vld [vmem:[#allocation75_spill] sm:$0xff] }
 0x28c   :  { %10296 = vst [vmem:[#allocation104_spill] sm:$0xff] %v6844_v5  ;;  %v6871_v39 = vpop.eup %4755  ;;  %4767 = vrcp.f32 %v6826_v8  ;;  %v1185_v23 = vand.u32 2147483647, %v6530_v48  ;;  %v6892_v45 = vadd.f32 1.0, %v10310_v53  ;;  %v6895_v8 = vadd.f32 1.0, %v10312_v31 }
 0x28d   :  { %10297 = vst [vmem:[#allocation105_spill] sm:$0xff] %v6847_v17  ;;  %v6881_v20 = vpop.eup %4757  ;;  %4769 = vrcp.f32 %v6834_v27  ;;  %v6898_v57 = vadd.f32 1.0, %v10314_v15  ;;  %v6910_v51 = vadd.f32 1.0, %v6462_v43  ;;  %v6913_v53 = vadd.f32 1.0, %v6464_v47 }
 0x28e   :  { %10298 = vst [vmem:[#allocation106_spill] sm:$0xff] %v6850_v61  ;;  %2403 = vmatmul.f32.gmra.mxu2 %v2196_v59  ;;  %v6889_v58 = vpop.eup %4759  ;;  %4771 = vrcp.f32 %v6837_v16  ;;  %v1184_v15 = vsel %vm6903_vm1, %v6628_v35, %v1180_v13  ;;  %v6922_v16 = vadd.f32 1.0, %v6466_v40  ;;  %v6925_v27 = vadd.f32 1.0, %v6468_v50  ;;  %v10323_v40 = vld [vmem:[#allocation76_spill] sm:$0xff]  ;;  %v10324_v50 = vld [vmem:[#allocation85_spill] sm:$0xff] }
 0x28f   :  { %10299 = vst [vmem:[#allocation107_spill] sm:$0xff] %v6856_v19  ;;  %v6907_v48 = vpop.eup %4761  ;;  %4773 = vrcp.f32 %v6844_v5  ;;  %v1188_v43 = vor.u32 1.1754944e-38, %v1187_v44  ;;  %v6931_v47 = vadd.f32 1.0, %v6470_v41  ;;  %v10321_v5 = vld [vmem:[#allocation84_spill] sm:$0xff]  ;;  %vm1186_vm2 = vcmp.eq.f32.partialorder %v1185_v23, 8.507059e+37  ;;  %v10326_v41 = vld [vmem:[#allocation77_spill] sm:$0xff] }
 0x290   :  { %10300 = vst [vmem:[#allocation108_spill] sm:$0xff] %v6859_v11  ;;  %v6919_v31 = vpop.eup %4763  ;;  %4775 = vrcp.f32 %v6847_v17  ;;  %v6934_v32 = vadd.f32 1.0, %v10321_v5  ;;  %v6940_v13 = vadd.f32 1.0, %v10323_v40  ;;  %v6943_v59 = vadd.f32 1.0, %v10324_v50  ;;  %v10328_v5 = vld [vmem:[#allocation87_spill] sm:$0xff]  ;;  %v10330_v23 = vld [vmem:[#allocation78_spill] sm:$0xff] }
 0x291   :  { %10302 = vst [vmem:[#allocation70_spill] sm:$0xff] %v6862_v62  ;;  %4777 = vrcp.f32 %v6850_v61  ;;  %v1189_v44 = vsel %vm1186_vm2, %v1188_v43, %v1184_v15  ;;  %v6955_v61 = vadd.f32 1.0, %v10330_v23  ;;  %v10333_v50 = vld [vmem:[#allocation88_spill] sm:$0xff]  ;;  %vm1241_vm13 = vweird.f32 %v6568_v4 }
 0x292   :  { %10305 = vst [vmem:[#allocation7_spill] sm:$0xff] %v6874_v56  ;;  %4779 = vrcp.f32 %v6856_v19  ;;  %v10335_v19 = vld [vmem:[#allocation79_spill] sm:$0xff]  ;;  %v2068_v43 = vmul.f32 %v6558_v7, %v1189_v44  ;;  %v10340_v23 = vld [vmem:[#allocation80_spill] sm:$0xff]  ;;  %vm1242_vm15 = vweird.f32 %v6757_v3 }
 0x293   :  { %10307 = vst [vmem:[#allocation71_spill] sm:$0xff] %v6877_v34  ;;  %4781 = vrcp.f32 %v6859_v11  ;;  %v6964_v15 = vadd.f32 1.0, %v10335_v19  ;;  %v10345_v19 = vld [vmem:[#allocation90_spill] sm:$0xff] }
 0x294   :  { %10309 = vst [vmem:[#allocation72_spill] sm:$0xff] %v6884_v1  ;;  %4783 = vrcp.f32 %v6862_v62  ;;  %v10347_v62 = vld [vmem:[#allocation91_spill] sm:$0xff] }
 0x295   :  { %10311 = vst [vmem:[#allocation73_spill] sm:$0xff] %v6892_v45  ;;  %4785 = vrcp.f32 %v6874_v56  ;;  %v6985_v44 = vadd.f32 1.0, %v10347_v62  ;;  %v10355_v62 = vld [vmem:[#allocation13_spill] sm:$0xff] }
 0x296   :  { %10313 = vst [vmem:[#allocation74_spill] sm:$0xff] %v6895_v8  ;;  %4787 = vrcp.f32 %v6877_v34 }
 0x297   :  { %10315 = vst [vmem:[#allocation82_spill] sm:$0xff] %v6898_v57  ;;  %4789 = vrcp.f32 %v6884_v1 }
 0x298   :  { %10318 = vst [vmem:[#allocation75_spill] sm:$0xff] %v6907_v48  ;;  %v6928_v48 = vpop.eup %4765  ;;  %4791 = vrcp.f32 %v6892_v45 }
 0x299   :  { %10319 = vst [vmem:[#allocation109_spill] sm:$0xff] %v6925_v27  ;;  %v6937_v35 = vpop.eup %4767  ;;  %4793 = vrcp.f32 %v6895_v8 }
 0x29a   :  { %10320 = vst [vmem:[#allocation110_spill] sm:$0xff] %v6931_v47  ;;  %v6946_v17 = vpop.eup %4769  ;;  %v6949_v47 = vadd.f32 1.0, %v10326_v41  ;;  %4795 = vrcp.f32 %v6898_v57 }
 0x29b   :  { %10322 = vst [vmem:[#allocation84_spill] sm:$0xff] %v6934_v32  ;;  %v6952_v32 = vadd.f32 1.0, %v10328_v5  ;;  %v6958_v40 = vpop.eup %4771  ;;  %v10338_v5 = vld [vmem:[#allocation89_spill] sm:$0xff]  ;;  %4797 = vrcp.f32 %v6910_v51 }
 0x29c   :  { %10325 = vst [vmem:[#allocation76_spill] sm:$0xff] %v6943_v59  ;;  %v6961_v59 = vadd.f32 1.0, %v10333_v50  ;;  %v6968_v41 = vpop.eup %4773  ;;  %v10343_v50 = vld [vmem:[#allocation99_spill] sm:$0xff]  ;;  %4799 = vrcp.f32 %v6913_v53 }
 0x29d   :  { %10327 = vst [vmem:[#allocation85_spill] sm:$0xff] %v6949_v47  ;;  %v10342_v47 = vld [vmem:[#allocation81_spill] sm:$0xff]  ;;  %v6979_v11 = vpop.eup %4775  ;;  %vm1197_vm3 = vweird.f32 %v10343_v50  ;;  %4801 = vrcp.f32 %v6922_v16 }
 0x29e   :  { %10329 = vst [vmem:[#allocation77_spill] sm:$0xff] %v6952_v32  ;;  %v6971_v32 = vadd.f32 1.0, %v10338_v5  ;;  %v2133_v5 = vadd.f32 %v6561_v25, %v2068_v43  ;;  %v1202_v43 = vand.u32 2147483648, %v10342_v47  ;;  %vm1196_vm4 = vweird.f32 %v10342_v47 }
 0x29f   :  { %10331 = vst [vmem:[#allocation87_spill] sm:$0xff] %v6955_v61  ;;  %v6974_v61 = vadd.f32 1.0, %v10340_v23  ;;  %v10350_v23 = vld [vmem:[#allocation92_spill] sm:$0xff]  ;;  %vm1198_vm6 = vmor %vm1196_vm4, %vm1197_vm3  ;;  %vm1257_vm3 = vweird.f32 %v6763_v29 }
 0x2a0   :  { %10332 = vst [vmem:[#allocation78_spill] sm:$0xff] %v6958_v40  ;;  %v1203_v8 = vor.u32 1.1754944e-38, %v1202_v43  ;;  %v1237_v40 = vmul.f32 %v6757_v3, %v6568_v4  ;;  %vm1243_vm4 = vmor %vm1241_vm13, %vm1242_vm15  ;;  %vm1287_vm13 = vweird.f32 %v6789_v14  ;;  %vm1302_vm15 = vweird.f32 %v6796_v37 }
 0x2a1   :  { %10334 = vst [vmem:[#allocation88_spill] sm:$0xff] %v6961_v59  ;;  %v1192_v59 = vmul.f32 %v10343_v50, %v10342_v47 }
 0x2a2   :  { %10336 = vst [vmem:[#allocation79_spill] sm:$0xff] %v6964_v15  ;;  %v6982_v15 = vadd.f32 1.0, %v10345_v19  ;;  %v10353_v19 = vld [vmem:[#allocation93_spill] sm:$0xff] }
 0x2a3   :  { %10337 = vst [vmem:[#allocation111_spill] sm:$0xff] %v6968_v41  ;;  %v1193_v56 = vsub.f32 1.0, %v1192_v59 }
 0x2a4   :  { %10339 = vst [vmem:[#allocation89_spill] sm:$0xff] %v6971_v32  ;;  %v6989_v32 = vpop.eup %4777 }
 0x2a5   :  { %10341 = vst [vmem:[#allocation80_spill] sm:$0xff] %v6974_v61  ;;  %v6992_v61 = vadd.f32 1.0, %v10350_v23  ;;  %v6996_v41 = vpop.eup %4779  ;;  %v1194_v59 = vmul.f32 %v10343_v50, %v1193_v56 }
 0x2a6   :  { %10344 = vst [vmem:[#allocation81_spill] sm:$0xff] %v6979_v11  ;;  %v1200_v11 = vand.u32 2147483647, %v10342_v47  ;;  %v7004_v34 = vpop.eup %4781 }
 0x2a7   :  { %10346 = vst [vmem:[#allocation99_spill] sm:$0xff] %v6982_v15  ;;  %v6999_v15 = vadd.f32 1.0, %v10353_v19  ;;  %v10360_v19 = vld [vmem:[#allocation83_spill] sm:$0xff]  ;;  %v1195_v56 = vadd.f32 %v10343_v50, %v1194_v59 }
 0x2a8   :  { %10348 = vst [vmem:[#allocation90_spill] sm:$0xff] %v6985_v44  ;;  %v2197_v44 = vmul.f32 %v2133_v5, %v10355_v62  ;;  %vm7015_vm5 = vcmp.eq.f32.partialorder %v1200_v11, 8.507059e+37  ;;  %v10361_v62 = vld [vmem:[#allocation100_spill] sm:$0xff]  ;;  %v1215_v45 = vand.u32 2147483647, %v10360_v19  ;;  %v1217_v57 = vand.u32 2147483648, %v10360_v19 }
 0x2a9   :  { %10349 = vst [vmem:[#allocation91_spill] sm:$0xff] %v6989_v32  ;;  %vm1211_vm7 = vweird.f32 %v10360_v19  ;;  %vm1212_vm8 = vweird.f32 %v10361_v62  ;;  %v10364_v11 = vld [vmem:[#allocation86_spill] sm:$0xff]  ;;  %v1199_v59 = vsel %vm1198_vm6, %v10343_v50, %v1195_v56 }
 0x2aa   :  { %10351 = vst [vmem:[#allocation92_spill] sm:$0xff] %v6992_v61  ;;  %v7010_v61 = vpop.eup %4783  ;;  %4472 = vmatmul.msk.f32.gmra.mxu3 %vm375_vm0, %v2197_v44  ;;  %v10365_v44 = vld [vmem:[#allocation101_spill] sm:$0xff]  ;;  %vm7035_vm9 = vcmp.eq.f32.partialorder %v1215_v45, 8.507059e+37  ;;  %vm1226_vm10 = vweird.f32 %v10364_v11  ;;  %v1218_v50 = vor.u32 1.1754944e-38, %v1217_v57  ;;  %v1232_v56 = vand.u32 2147483648, %v10364_v11  ;;  %vm1213_vm14 = vmor %vm1211_vm7, %vm1212_vm8 }
 0x2ab   :  { %10352 = vst [vmem:[#allocation112_spill] sm:$0xff] %v6996_v41  ;;  %v7021_v23 = vpop.eup %4785  ;;  %vm1227_vm11 = vweird.f32 %v10365_v44  ;;  %v1238_v57 = vsub.f32 1.0, %v1237_v40  ;;  %vm1272_vm8 = vweird.f32 %v6771_v6 }
 0x2ac   :  { %10354 = vst [vmem:[#allocation93_spill] sm:$0xff] %v6999_v15  ;;  %v1207_v15 = vmul.f32 %v10361_v62, %v10360_v19  ;;  %v7026_v1 = vpop.eup %4787  ;;  %vm1228_vm1 = vmor %vm1226_vm10, %vm1227_vm11  ;;  %v1233_v40 = vor.u32 1.1754944e-38, %v1232_v56  ;;  %vm1286_vm11 = vweird.f32 %v6584_v10 }
 0x2ad   :  { %10356 = vst [vmem:[#allocation13_spill] sm:$0xff] %v7004_v34  ;;  %v7032_v34 = vpop.eup %4789 }
 0x2ae   :  { %10357 = vst [vmem:[#allocation113_spill] sm:$0xff] %v7010_v61  ;;  %v1208_v47 = vsub.f32 1.0, %v1207_v15  ;;  %v1222_v61 = vmul.f32 %v10365_v44, %v10364_v11  ;;  %v7041_v15 = vpop.eup %4791 }
 0x2af   :  { %10362 = vst [vmem:[#allocation83_spill] sm:$0xff] %v7021_v23  ;;  %v7047_v32 = vpop.eup %4793 }
 0x2b0   :  { %10363 = vst [vmem:[#allocation100_spill] sm:$0xff] %v7026_v1  ;;  %v1204_v1 = vsel %vm7015_vm5, %v1203_v8, %v1199_v59  ;;  %v1209_v23 = vmul.f32 %v10361_v62, %v1208_v47  ;;  %v1223_v41 = vsub.f32 1.0, %v1222_v61  ;;  %v7053_v27 = vpop.eup %4795  ;;  %v1247_v47 = vand.u32 2147483648, %v6568_v4 }
 0x2b1   :  { %10366 = vst [vmem:[#allocation86_spill] sm:$0xff] %v7032_v34  ;;  %v1230_v34 = vand.u32 2147483647, %v10364_v11  ;;  %v2069_v45 = vmul.f32 %v6558_v7, %v1204_v1  ;;  %v1252_v59 = vmul.f32 %v6763_v29, %v6571_v28  ;;  %vm1256_vm5 = vweird.f32 %v6571_v28 }
 0x2b2   :  { %10369 = vst [vmem:[#allocation101_spill] sm:$0xff] %v7047_v32  ;;  %v1210_v5 = vadd.f32 %v10361_v62, %v1209_v23  ;;  %v1224_v8 = vmul.f32 %v10365_v44, %v1223_v41  ;;  %v1245_v23 = vand.u32 2147483647, %v6568_v4  ;;  %v1248_v11 = vor.u32 1.1754944e-38, %v1247_v47  ;;  %vm1258_vm6 = vmor %vm1256_vm5, %vm1257_vm3 }
 0x2b3   :  { %10370 = vst [vmem:[#allocation114_spill] sm:$0xff] %v7053_v27  ;;  %vm7057_vm12 = vcmp.eq.f32.partialorder %v1230_v34, 8.507059e+37  ;;  %v2134_v1 = vadd.f32 %v6561_v25, %v2069_v45  ;;  %v10373_v45 = vld [vmem:[#allocation8_spill] sm:$0xff]  ;;  %v1275_v32 = vand.u32 2147483647, %v6581_v30  ;;  %vm1316_vm3 = vweird.f32 %v6593_v42 }
 0x2b4   :  { %v1214_v41 = vsel %vm1213_vm14, %v10361_v62, %v1210_v5  ;;  %v1225_v34 = vadd.f32 %v10365_v44, %v1224_v8  ;;  %v1239_v62 = vmul.f32 %v6757_v3, %v1238_v57  ;;  %vm7084_vm2 = vcmp.eq.f32.partialorder %v1245_v23, 8.507059e+37 }
 0x2b5   :  { %v2198_v27 = vmul.f32 %v2134_v1, %v10373_v45  ;;  %v1219_v19 = vsel %vm7035_vm9, %v1218_v50, %v1214_v41  ;;  %v1253_v1 = vsub.f32 1.0, %v1252_v59  ;;  %v1262_v23 = vand.u32 2147483648, %v6571_v28 }
 0x2b6   :  { %v2070_v5 = vmul.f32 %v6558_v7, %v1219_v19  ;;  %v1229_v8 = vsel %vm1228_vm1, %v10365_v44, %v1225_v34  ;;  %v1240_v50 = vadd.f32 %v6757_v3, %v1239_v62  ;;  %v1267_v41 = vmul.f32 %v6771_v6, %v6581_v30  ;;  %v10376_v34 = vld [vmem:[#allocation15_spill] sm:$0xff] }
 0x2b7   :  { %2406 = vmatmul.f32.gmra.mxu2 %v2198_v27  ;;  %v1234_v43 = vsel %vm7057_vm12, %v1233_v40, %v1229_v8  ;;  %v1254_v44 = vmul.f32 %v6763_v29, %v1253_v1  ;;  %v1260_v27 = vand.u32 2147483647, %v6571_v28  ;;  %v10377_v40 = vld [vmem:[#allocation9_spill] sm:$0xff]  ;;  %vm1271_vm9 = vweird.f32 %v6581_v30 }
 0x2b8   :  { %v2135_v56 = vadd.f32 %v6561_v25, %v2070_v5  ;;  %v2071_v57 = vmul.f32 %v6558_v7, %v1234_v43  ;;  %v1244_v61 = vsel %vm1243_vm4, %v6757_v3, %v1240_v50  ;;  %v1263_v3 = vor.u32 1.1754944e-38, %v1262_v23  ;;  %vm1273_vm12 = vmor %vm1271_vm9, %vm1272_vm8 }
 0x2b9   :  { %v1249_v4 = vsel %vm7084_vm2, %v1248_v11, %v1244_v61  ;;  %v1255_v45 = vadd.f32 %v6763_v29, %v1254_v44  ;;  %vm1261_vm7 = vcmp.eq.f32.partialorder %v1260_v27, 8.507059e+37  ;;  %v1268_v28 = vsub.f32 1.0, %v1267_v41  ;;  %v10378_v41 = vld [vmem:[#allocation17_spill] sm:$0xff]  ;;  %vm1288_vm2 = vmor %vm1286_vm11, %vm1287_vm13 }
 0x2ba   :  { %v2199_v47 = vmul.f32 %v2135_v56, %v10376_v34  ;;  %v2136_v59 = vadd.f32 %v6561_v25, %v2071_v57  ;;  %v2072_v19 = vmul.f32 %v6558_v7, %v1249_v4  ;;  %v1277_v50 = vand.u32 2147483648, %v6581_v30 }
 0x2bb   :  { %v1259_v5 = vsel %vm1258_vm6, %v6763_v29, %v1255_v45  ;;  %v1269_v43 = vmul.f32 %v6771_v6, %v1268_v28  ;;  %v1847_v11 = vand.u32 2147483648, %v6940_v13  ;;  %v1282_v29 = vmul.f32 %v6789_v14, %v6584_v10 }
 0x2bc   :  { %4473 = vmatmul.msk.f32.gmra.mxu3 %vm375_vm0, %v2199_v47  ;;  %v2200_v62 = vmul.f32 %v2136_v59, %v10377_v40  ;;  %v2137_v8 = vadd.f32 %v6561_v25, %v2072_v19  ;;  %v1264_v1 = vsel %vm1261_vm7, %v1263_v3, %v1259_v5  ;;  %vm1276_vm10 = vcmp.eq.f32.partialorder %v1275_v32, 8.507059e+37  ;;  %v10379_v19 = vld [vmem:[#allocation11_spill] sm:$0xff] }
 0x2bd   :  { %v2073_v56 = vmul.f32 %v6558_v7, %v1264_v1  ;;  %v1270_v57 = vadd.f32 %v6771_v6, %v1269_v43  ;;  %v1278_v27 = vor.u32 1.1754944e-38, %v1277_v50  ;;  %v1283_v61 = vsub.f32 1.0, %v1282_v29 }
 0x2be   :  { %v1290_v23 = vand.u32 2147483647, %v6584_v10  ;;  %v2201_v34 = vmul.f32 %v2137_v8, %v10378_v41  ;;  %v1292_v59 = vand.u32 2147483648, %v6584_v10  ;;  %v1297_v30 = vmul.f32 %v6796_v37, %v6587_v18 }
 0x2bf   :  { %2409 = vmatmul.f32.gmra.mxu2 %v2200_v62  ;;  %v2138_v44 = vadd.f32 %v6561_v25, %v2073_v56  ;;  %v1274_v47 = vsel %vm1273_vm12, %v6771_v6, %v1270_v57  ;;  %v1284_v45 = vmul.f32 %v6789_v14, %v1283_v61  ;;  %vm1301_vm14 = vweird.f32 %v6587_v18  ;;  %v7144_v6 = vpop.eup %4797 }
 0x2c0   :  { %v1279_v4 = vsel %vm1276_vm10, %v1278_v27, %v1274_v47  ;;  %v1298_v40 = vsub.f32 1.0, %v1297_v30  ;;  %vm1291_vm1 = vcmp.eq.f32.partialorder %v1290_v23, 8.507059e+37  ;;  %v1307_v5 = vand.u32 2147483648, %v6587_v18  ;;  %vm1303_vm5 = vmor %vm1301_vm14, %vm1302_vm15 }
 0x2c1   :  { %v2202_v3 = vmul.f32 %v2138_v44, %v10379_v19  ;;  %v2074_v28 = vmul.f32 %v6558_v7, %v1279_v4  ;;  %v1285_v62 = vadd.f32 %v6789_v14, %v1284_v45  ;;  %v1312_v32 = vmul.f32 %v6800_v60, %v6593_v42 }
 0x2c2   :  { %v1293_v1 = vor.u32 1.1754944e-38, %v1292_v59  ;;  %v1299_v43 = vmul.f32 %v6796_v37, %v1298_v40  ;;  %v1305_v50 = vand.u32 2147483647, %v6587_v18  ;;  %vm1317_vm4 = vweird.f32 %v6800_v60 }
 0x2c3   :  { %v2139_v8 = vadd.f32 %v6561_v25, %v2074_v28  ;;  %v1289_v56 = vsel %vm1288_vm2, %v6789_v14, %v1285_v62  ;;  %v1313_v29 = vsub.f32 1.0, %v1312_v32  ;;  %v1308_v27 = vor.u32 1.1754944e-38, %v1307_v5  ;;  %vm1318_vm7 = vmor %vm1316_vm3, %vm1317_vm4  ;;  %v10381_v32 = vld [vmem:[#allocation14_spill] sm:$0xff] }
 0x2c4   :  { %4474 = vmatmul.msk.f32.gmra.mxu3 %vm375_vm0, %v2201_v34  ;;  %v1294_v57 = vsel %vm1291_vm1, %v1293_v1, %v1289_v56  ;;  %v1300_v44 = vadd.f32 %v6796_v37, %v1299_v43  ;;  %v1322_v10 = vand.u32 2147483648, %v6593_v42  ;;  %v1320_v23 = vand.u32 2147483647, %v6593_v42  ;;  %v10380_v34 = vld [vmem:[#allocation19_spill] sm:$0xff] }
 0x2c5   :  { %v2075_v61 = vmul.f32 %v6558_v7, %v1294_v57  ;;  %v1314_v14 = vmul.f32 %v6800_v60, %v1313_v29  ;;  %v1327_v41 = vmul.f32 %v6806_v38, %v6596_v2  ;;  %v2203_v47 = vmul.f32 %v2139_v8, %v10380_v34 }
 0x2c6   :  { %v1304_v59 = vsel %vm1303_vm5, %v6796_v37, %v1300_v44  ;;  %vm1306_vm6 = vcmp.eq.f32.partialorder %v1305_v50, 8.507059e+37  ;;  %v1323_v30 = vor.u32 1.1754944e-38, %v1322_v10  ;;  %v1335_v28 = vand.u32 2147483647, %v6596_v2 }
 0x2c7   :  { %2412 = vmatmul.f32.gmra.mxu2 %v2202_v3  ;;  %v2140_v4 = vadd.f32 %v6561_v25, %v2075_v61  ;;  %v1309_v45 = vsel %vm1306_vm6, %v1308_v27, %v1304_v59  ;;  %v1315_v19 = vadd.f32 %v6800_v60, %v1314_v14  ;;  %v1328_v18 = vsub.f32 1.0, %v1327_v41  ;;  %v10382_v61 = vld [vmem:[#allocation21_spill] sm:$0xff] }
 0x2c8   :  { %v2076_v3 = vmul.f32 %v6558_v7, %v1309_v45  ;;  %v1337_v40 = vand.u32 2147483648, %v6596_v2  ;;  %v1342_v37 = vmul.f32 %v6813_v26, %v6727_v33  ;;  %vm1321_vm8 = vcmp.eq.f32.partialorder %v1320_v23, 8.507059e+37  ;;  %v10383_v45 = vld [vmem:[#allocation16_spill] sm:$0xff] }
 0x2c9   :  { %v1319_v62 = vsel %vm1318_vm7, %v6800_v60, %v1315_v19  ;;  %v1329_v5 = vmul.f32 %v6806_v38, %v1328_v18  ;;  %vm1332_vm9 = vweird.f32 %v6806_v38  ;;  %v2204_v8 = vmul.f32 %v2140_v4, %v10381_v32 }
 0x2ca   :  { %v2141_v42 = vadd.f32 %v6561_v25, %v2076_v3  ;;  %v1324_v1 = vsel %vm1321_vm8, %v1323_v30, %v1319_v62  ;;  %vm1331_vm10 = vweird.f32 %v6596_v2  ;;  %vm1336_vm11 = vcmp.eq.f32.partialorder %v1335_v28, 8.507059e+37 }
 0x2cb   :  { %v2077_v43 = vmul.f32 %v6558_v7, %v1324_v1  ;;  %v1330_v50 = vadd.f32 %v6806_v38, %v1329_v5  ;;  %v1343_v56 = vsub.f32 1.0, %v1342_v37  ;;  %vm1333_vm12 = vmor %vm1331_vm10, %vm1332_vm9  ;;  %v1338_v60 = vor.u32 1.1754944e-38, %v1337_v40 }
 0x2cc   :  { %4475 = vmatmul.msk.f32.gmra.mxu3 %vm375_vm0, %v2203_v47  ;;  %vm1347_vm13 = vweird.f32 %v6813_v26  ;;  %v1352_v29 = vand.u32 2147483648, %v6727_v33  ;;  %v1357_v57 = vmul.f32 %v6820_v49, %v6742_v22  ;;  %v1350_v10 = vand.u32 2147483647, %v6727_v33 }
 0x2cd   :  { %v2142_v44 = vadd.f32 %v6561_v25, %v2077_v43  ;;  %v1334_v2 = vsel %vm1333_vm12, %v6806_v38, %v1330_v50  ;;  %v1344_v27 = vmul.f32 %v6813_v26, %v1343_v56  ;;  %v2205_v14 = vmul.f32 %v2141_v42, %v10382_v61  ;;  %v10384_v50 = vld [vmem:[#allocation23_spill] sm:$0xff]  ;;  %v10385_v61 = vld [vmem:[#allocation18_spill] sm:$0xff] }
 0x2ce   :  { %v1339_v23 = vsel %vm1336_vm11, %v1338_v60, %v1334_v2  ;;  %vm1346_vm14 = vweird.f32 %v6727_v33  ;;  %v1358_v41 = vsub.f32 1.0, %v1357_v57  ;;  %v1353_v59 = vor.u32 1.1754944e-38, %v1352_v29 }
 0x2cf   :  { %2415 = vmatmul.f32.gmra.mxu2 %v2204_v8  ;;  %v2078_v34 = vmul.f32 %v6558_v7, %v1339_v23  ;;  %v1345_v47 = vadd.f32 %v6813_v26, %v1344_v27  ;;  %vm1362_vm15 = vweird.f32 %v6820_v49  ;;  %vm1348_vm1 = vmor %vm1346_vm14, %vm1347_vm13  ;;  %v1365_v30 = vand.u32 2147483647, %v6742_v22 }
 0x2d0   :  { %v1359_v38 = vmul.f32 %v6820_v49, %v1358_v41  ;;  %v1367_v4 = vand.u32 2147483648, %v6742_v22  ;;  %v1372_v33 = vmul.f32 %v6831_v36, %v6745_v63  ;;  %v2206_v19 = vmul.f32 %v2142_v44, %v10383_v45 }
 0x2d1   :  { %v1349_v18 = vsel %vm1348_vm1, %v6813_v26, %v1345_v47  ;;  %vm1351_vm2 = vcmp.eq.f32.partialorder %v1350_v10, 8.507059e+37  ;;  %vm1361_vm3 = vweird.f32 %v6742_v22  ;;  %v2143_v3 = vadd.f32 %v6561_v25, %v2078_v34 }
 0x2d2   :  { %v1354_v28 = vsel %vm1351_vm2, %v1353_v59, %v1349_v18  ;;  %v1360_v40 = vadd.f32 %v6820_v49, %v1359_v38  ;;  %vm1376_vm4 = vweird.f32 %v6745_v63  ;;  %vm1363_vm5 = vmor %vm1361_vm3, %vm1362_vm15  ;;  %v1368_v62 = vor.u32 1.1754944e-38, %v1367_v4 }
 0x2d3   :  { %v2079_v37 = vmul.f32 %v6558_v7, %v1354_v28  ;;  %v1373_v5 = vsub.f32 1.0, %v1372_v33  ;;  %v1380_v32 = vand.u32 2147483647, %v6745_v63  ;;  %vm1366_vm6 = vcmp.eq.f32.partialorder %v1365_v30, 8.507059e+37 }
 0x2d4   :  { %4476 = vmatmul.msk.f32.gmra.mxu3 %vm375_vm0, %v2205_v14  ;;  %v1364_v26 = vsel %vm1363_vm5, %v6820_v49, %v1360_v40  ;;  %v1382_v22 = vand.u32 2147483648, %v6745_v63  ;;  %v1387_v8 = vmul.f32 %v6841_v24, %v6749_v9  ;;  %vm1377_vm7 = vweird.f32 %v6831_v36 }
 0x2d5   :  { %v2144_v42 = vadd.f32 %v6561_v25, %v2079_v37  ;;  %v1369_v1 = vsel %vm1366_vm6, %v1368_v62, %v1364_v26  ;;  %v1374_v43 = vmul.f32 %v6831_v36, %v1373_v5  ;;  %v2207_v56 = vmul.f32 %v2143_v3, %v10384_v50  ;;  %vm1378_vm10 = vmor %vm1376_vm4, %vm1377_vm7 }
 0x2d6   :  { %v2080_v60 = vmul.f32 %v6558_v7, %v1369_v1  ;;  %v1388_v29 = vsub.f32 1.0, %v1387_v8  ;;  %vm1391_vm8 = vweird.f32 %v6749_v9  ;;  %vm1381_vm9 = vcmp.eq.f32.partialorder %v1380_v32, 8.507059e+37 }
 0x2d7   :  { %2418 = vmatmul.f32.gmra.mxu2 %v2206_v19  ;;  %v1375_v49 = vadd.f32 %v6831_v36, %v1374_v43  ;;  %v1383_v57 = vor.u32 1.1754944e-38, %v1382_v22  ;;  %v1397_v44 = vand.u32 2147483648, %v6749_v9  ;;  %vm1392_vm11 = vweird.f32 %v6841_v24  ;;  %v10386_v19 = vld [vmem:[#allocation25_spill] sm:$0xff] }
 0x2d8   :  { %v1389_v2 = vmul.f32 %v6841_v24, %v1388_v29  ;;  %v1395_v27 = vand.u32 2147483647, %v6749_v9  ;;  %v1402_v10 = vmul.f32 %v6853_v0, %v6774_v46  ;;  %v2208_v14 = vmul.f32 %v2144_v42, %v10385_v61  ;;  %vm1393_vm13 = vmor %vm1391_vm8, %vm1392_vm11  ;;  %v10387_v42 = vld [vmem:[#allocation20_spill] sm:$0xff] }
 0x2d9   :  { %v2145_v23 = vadd.f32 %v6561_v25, %v2080_v60  ;;  %v1379_v41 = vsel %vm1378_vm10, %v6831_v36, %v1375_v49  ;;  %vm1406_vm12 = vweird.f32 %v6774_v46  ;;  %v1398_v47 = vor.u32 1.1754944e-38, %v1397_v44  ;;  %v10388_v44 = vld [vmem:[#allocation27_spill] sm:$0xff] }
 0x2da   :  { %v1384_v63 = vsel %vm1381_vm9, %v1383_v57, %v1379_v41  ;;  %v1390_v34 = vadd.f32 %v6841_v24, %v1389_v2  ;;  %v1403_v59 = vsub.f32 1.0, %v1402_v10  ;;  %v1410_v30 = vand.u32 2147483647, %v6774_v46 }
 0x2db   :  { %v2081_v38 = vmul.f32 %v6558_v7, %v1384_v63  ;;  %v1412_v4 = vand.u32 2147483648, %v6774_v46  ;;  %v1417_v33 = vmul.f32 %v6865_v21, %v6780_v54  ;;  %vm1396_vm14 = vcmp.eq.f32.partialorder %v1395_v27, 8.507059e+37 }
 0x2dc   :  { %4477 = vmatmul.msk.f32.gmra.mxu3 %vm375_vm0, %v2207_v56  ;;  %v1394_v36 = vsel %vm1393_vm13, %v6841_v24, %v1390_v34  ;;  %v1404_v45 = vmul.f32 %v6853_v0, %v1403_v59  ;;  %vm1407_vm15 = vweird.f32 %v6853_v0  ;;  %v2209_v18 = vmul.f32 %v2145_v23, %v10386_v19 }
 0x2dd   :  { %v2146_v9 = vadd.f32 %v6561_v25, %v2081_v38  ;;  %v1399_v3 = vsel %vm1396_vm14, %v1398_v47, %v1394_v36  ;;  %vm1421_vm1 = vweird.f32 %v6780_v54  ;;  %v1418_v37 = vsub.f32 1.0, %v1417_v33  ;;  %vm1408_vm3 = vmor %vm1406_vm12, %vm1407_vm15  ;;  %v10389_v38 = vld [vmem:[#allocation22_spill] sm:$0xff] }
 0x2de   :  { %v2082_v28 = vmul.f32 %v6558_v7, %v1399_v3  ;;  %v1405_v40 = vadd.f32 %v6853_v0, %v1404_v45  ;;  %vm1422_vm2 = vweird.f32 %v6865_v21  ;;  %vm1411_vm4 = vcmp.eq.f32.partialorder %v1410_v30, 8.507059e+37 }
 0x2df   :  { %2421 = vmatmul.f32.gmra.mxu2 %v2208_v14  ;;  %v1413_v24 = vor.u32 1.1754944e-38, %v1412_v4  ;;  %v1427_v62 = vand.u32 2147483648, %v6780_v54  ;;  %v1432_v5 = vmul.f32 %v6871_v39, %v6783_v55  ;;  %v1419_v22 = vmul.f32 %v6865_v21, %v1418_v37  ;;  %vm1423_vm6 = vmor %vm1421_vm1, %vm1422_vm2 }
 0x2e0   :  { %v2147_v32 = vadd.f32 %v6561_v25, %v2082_v28  ;;  %v1409_v26 = vsel %vm1408_vm3, %v6853_v0, %v1405_v40  ;;  %v1425_v8 = vand.u32 2147483647, %v6780_v54  ;;  %v2210_v46 = vmul.f32 %v2146_v9, %v10387_v42  ;;  %v10391_v9 = vld [vmem:[#allocation75_spill] sm:$0xff]  ;;  %v10392_v42 = vld [vmem:[#allocation12_spill] sm:$0xff] }
 0x2e1   :  { %v1414_v1 = vsel %vm1411_vm4, %v1413_v24, %v1409_v26  ;;  %v1433_v43 = vsub.f32 1.0, %v1432_v5  ;;  %vm1436_vm5 = vweird.f32 %v6783_v55  ;;  %v1420_v56 = vadd.f32 %v6865_v21, %v1419_v22  ;;  %v7321_v26 = vpop.eup %4799 }
 0x2e2   :  { %v2083_v50 = vmul.f32 %v6558_v7, %v1414_v1  ;;  %v1428_v60 = vor.u32 1.1754944e-38, %v1427_v62  ;;  %v1440_v29 = vand.u32 2147483647, %v6783_v55  ;;  %vm1437_vm7 = vweird.f32 %v6871_v39 }
 0x2e3   :  { %v1434_v0 = vmul.f32 %v6871_v39, %v1433_v43  ;;  %v1442_v49 = vand.u32 2147483648, %v6783_v55  ;;  %v1447_v57 = vmul.f32 %v6881_v20, %v6792_v52  ;;  %v2211_v2 = vmul.f32 %v2147_v32, %v10388_v44  ;;  %vm1438_vm10 = vmor %vm1436_vm5, %vm1437_vm7 }
 0x2e4   :  { %4478 = vmatmul.msk.f32.gmra.mxu3 %vm375_vm0, %v2209_v18  ;;  %v2148_v27 = vadd.f32 %v6561_v25, %v2083_v50  ;;  %v1424_v10 = vsel %vm1423_vm6, %v6865_v21, %v1420_v56  ;;  %vm1426_vm8 = vcmp.eq.f32.partialorder %v1425_v8, 8.507059e+37  ;;  %vm1441_vm9 = vcmp.eq.f32.partialorder %v1440_v29, 8.507059e+37  ;;  %v10390_v18 = vld [vmem:[#allocation6_spill] sm:$0xff] }
 0x2e5   :  { %v1429_v61 = vsel %vm1426_vm8, %v1428_v60, %v1424_v10  ;;  %v1435_v54 = vadd.f32 %v6871_v39, %v1434_v0  ;;  %v1448_v14 = vsub.f32 1.0, %v1447_v57  ;;  %v1443_v41 = vor.u32 1.1754944e-38, %v1442_v49  ;;  %v10394_v0 = vld [vmem:[#allocation24_spill] sm:$0xff] }
 0x2e6   :  { %v2084_v23 = vmul.f32 %v6558_v7, %v1429_v61  ;;  %v1455_v63 = vand.u32 2147483647, %v6792_v52  ;;  %v1457_v34 = vand.u32 2147483648, %v6792_v52  ;;  %vm1452_vm11 = vweird.f32 %v6881_v20  ;;  %v10395_v61 = vld [vmem:[#allocation5_spill] sm:$0xff] }
 0x2e7   :  { %2424 = vmatmul.f32.gmra.mxu2 %v2210_v46  ;;  %v1439_v47 = vsel %vm1438_vm10, %v6871_v39, %v1435_v54  ;;  %v1449_v21 = vmul.f32 %v6881_v20, %v1448_v14  ;;  %v1462_v59 = vmul.f32 %v6889_v58, %v6803_v12  ;;  %v2212_v30 = vmul.f32 %v2148_v27, %v10389_v38  ;;  %v10393_v46 = vld [vmem:[#allocation29_spill] sm:$0xff] }
 0x2e8   :  { %v1444_v55 = vsel %vm1441_vm9, %v1443_v41, %v1439_v47  ;;  %vm1451_vm12 = vweird.f32 %v6792_v52  ;;  %v2149_v4 = vadd.f32 %v6561_v25, %v2084_v23  ;;  %vm1456_vm14 = vcmp.eq.f32.partialorder %v1455_v63, 8.507059e+37  ;;  %v10396_v63 = vld [vmem:[#allocation31_spill] sm:$0xff] }
 0x2e9   :  { %v2085_v39 = vmul.f32 %v6558_v7, %v1444_v55  ;;  %v1450_v33 = vadd.f32 %v6881_v20, %v1449_v21  ;;  %v1463_v36 = vsub.f32 1.0, %v1462_v59  ;;  %vm1453_vm13 = vmor %vm1451_vm12, %vm1452_vm11  ;;  %v1458_v45 = vor.u32 1.1754944e-38, %v1457_v34 }
 0x2ea   :  { %v1472_v19 = vand.u32 2147483648, %v6803_v12  ;;  %v1477_v3 = vmul.f32 %v10391_v9, %v10390_v18  ;;  %vm1467_vm15 = vweird.f32 %v6889_v58  ;;  %v1470_v40 = vand.u32 2147483647, %v6803_v12 }
 0x2eb   :  { %v1454_v28 = vsel %vm1453_vm13, %v6881_v20, %v1450_v33  ;;  %v1464_v52 = vmul.f32 %v6889_v58, %v1463_v36  ;;  %vm1466_vm1 = vweird.f32 %v6803_v12  ;;  %v2150_v62 = vadd.f32 %v6561_v25, %v2085_v39  ;;  %v10397_v39 = vld [vmem:[#allocation10_spill] sm:$0xff] }
 0x2ec   :  { %4479 = vmatmul.msk.f32.gmra.mxu3 %vm375_vm0, %v2211_v2  ;;  %v1459_v37 = vsel %vm1456_vm14, %v1458_v45, %v1454_v28  ;;  %v1478_v24 = vsub.f32 1.0, %v1477_v3  ;;  %v1473_v20 = vor.u32 1.1754944e-38, %v1472_v19  ;;  %vm1468_vm2 = vmor %vm1466_vm1, %vm1467_vm15  ;;  %vm1482_vm3 = vweird.f32 %v10391_v9  ;;  %v10398_v36 = vld [vmem:[#allocation26_spill] sm:$0xff] }
 0x2ed   :  { %v2086_v5 = vmul.f32 %v6558_v7, %v1459_v37  ;;  %v1465_v32 = vadd.f32 %v6889_v58, %v1464_v52  ;;  %v1487_v8 = vand.u32 2147483648, %v10390_v18  ;;  %v1492_v12 = vmul.f32 %v6919_v31, %v10392_v42 }
 0x2ee   :  { %v1479_v22 = vmul.f32 %v10391_v9, %v1478_v24  ;;  %v2213_v1 = vmul.f32 %v2149_v4, %v10393_v46  ;;  %vm1471_vm4 = vcmp.eq.f32.partialorder %v1470_v40, 8.507059e+37  ;;  %v1485_v50 = vand.u32 2147483647, %v10390_v18 }
 0x2ef   :  { %2427 = vmatmul.f32.gmra.mxu2 %v2212_v30  ;;  %v1469_v43 = vsel %vm1468_vm2, %v6889_v58, %v1465_v32  ;;  %v2151_v56 = vadd.f32 %v6561_v25, %v2086_v5  ;;  %vm1481_vm5 = vweird.f32 %v10390_v18  ;;  %v2214_v49 = vmul.f32 %v2150_v62, %v10394_v0  ;;  %v7338_v58 = vpop.eup %4801  ;;  %v10399_v62 = vld [vmem:[#allocation102_spill] sm:$0xff] }
 0x2f0   :  { %v1474_v60 = vsel %vm1471_vm4, %v1473_v20, %v1469_v43  ;;  %v1480_v29 = vadd.f32 %v10391_v9, %v1479_v22  ;;  %vm1483_vm6 = vmor %vm1481_vm5, %vm1482_vm3  ;;  %v1493_v44 = vsub.f32 1.0, %v1492_v12  ;;  %vm1497_vm7 = vweird.f32 %v6919_v31  ;;  %v10400_v20 = vld [vmem:[#allocation109_spill] sm:$0xff]  ;;  %v10401_v43 = vld [vmem:[#allocation103_spill] sm:$0xff] }
 0x2f1   :  { %v2087_v57 = vmul.f32 %v6558_v7, %v1474_v60  ;;  %v1488_v27 = vor.u32 1.1754944e-38, %v1487_v8  ;;  %v1502_v10 = vand.u32 2147483648, %v10392_v42  ;;  %v1507_v54 = vmul.f32 %v6928_v48, %v10395_v61 }
 0x2f2   :  { %v1484_v2 = vsel %vm1483_vm6, %v10391_v9, %v1480_v29  ;;  %vm1486_vm8 = vcmp.eq.f32.partialorder %v1485_v50, 8.507059e+37  ;;  %v1494_v23 = vmul.f32 %v6919_v31, %v1493_v44  ;;  %v1500_v41 = vand.u32 2147483647, %v10392_v42  ;;  %v10402_v50 = vld [vmem:[#allocation78_spill] sm:$0xff] }
 0x2f3   :  { %v2152_v14 = vadd.f32 %v6561_v25, %v2087_v57  ;;  %v2215_v34 = vmul.f32 %v2151_v56, %v10396_v63  ;;  %v1489_v47 = vsel %vm1486_vm8, %v1488_v27, %v1484_v2  ;;  %vm1496_vm9 = vweird.f32 %v10392_v42  ;;  %v10405_v63 = vld [vmem:[#allocation104_spill] sm:$0xff] }
 0x2f4   :  { %4480 = vmatmul.msk.f32.gmra.mxu3 %vm375_vm0, %v2213_v1  ;;  %v1508_v21 = vsub.f32 1.0, %v1507_v54  ;;  %v1495_v59 = vadd.f32 %v6919_v31, %v1494_v23  ;;  %v1503_v38 = vor.u32 1.1754944e-38, %v1502_v10  ;;  %vm1511_vm10 = vweird.f32 %v10395_v61  ;;  %vm1498_vm11 = vmor %vm1496_vm9, %vm1497_vm7  ;;  %v10404_v10 = vld [vmem:[#allocation28_spill] sm:$0xff] }
 0x2f5   :  { %v1517_v30 = vand.u32 2147483648, %v10395_v61  ;;  %vm1512_vm12 = vweird.f32 %v6928_v48  ;;  %v1515_v4 = vand.u32 2147483647, %v10395_v61  ;;  %v1522_v33 = vmul.f32 %v6937_v35, %v10397_v39 }
 0x2f6   :  { %v1509_v55 = vmul.f32 %v6928_v48, %v1508_v21  ;;  %v2216_v45 = vmul.f32 %v2152_v14, %v10398_v36  ;;  %v2088_v19 = vmul.f32 %v6558_v7, %v1489_v47  ;;  %v1499_v18 = vsel %vm1498_vm11, %v6919_v31, %v1495_v59  ;;  %vm1513_vm14 = vmor %vm1511_vm10, %vm1512_vm12 }
 0x2f7   :  { %2430 = vmatmul.f32.gmra.mxu2 %v2214_v49  ;;  %vm1501_vm13 = vcmp.eq.f32.partialorder %v1500_v41, 8.507059e+37  ;;  %v1518_v28 = vor.u32 1.1754944e-38, %v1517_v30  ;;  %v1523_v52 = vsub.f32 1.0, %v1522_v33  ;;  %v1530_v37 = vand.u32 2147483647, %v10397_v39  ;;  %v10403_v49 = vld [vmem:[#allocation33_spill] sm:$0xff] }
 0x2f8   :  { %v1504_v9 = vsel %vm1501_vm13, %v1503_v38, %v1499_v18  ;;  %v1510_v3 = vadd.f32 %v6928_v48, %v1509_v55  ;;  %v1532_v24 = vand.u32 2147483648, %v10397_v39  ;;  %v1537_v31 = vmul.f32 %v6946_v17, %v10399_v62  ;;  %v10408_v18 = vld [vmem:[#allocation81_spill] sm:$0xff] }
 0x2f9   :  { %v2089_v40 = vmul.f32 %v6558_v7, %v1504_v9  ;;  %vm1516_vm15 = vcmp.eq.f32.partialorder %v1515_v4, 8.507059e+37  ;;  %v1524_v32 = vmul.f32 %v6937_v35, %v1523_v52  ;;  %vm1527_vm1 = vweird.f32 %v6937_v35 }
 0x2fa   :  { %v1514_v5 = vsel %vm1513_vm14, %v6928_v48, %v1510_v3  ;;  %4803 = vrcp.f32 %v10400_v20  ;;  %v7377_v22 = vor.u32 1.1754944e-38, %v1847_v11  ;;  %v2153_v8 = vadd.f32 %v6561_v25, %v2088_v19  ;;  %v10409_v3 = vld [vmem:[#allocation35_spill] sm:$0xff] }
 0x2fb   :  { %v1519_v42 = vsel %vm1516_vm15, %v1518_v28, %v1514_v5  ;;  %v2154_v12 = vadd.f32 %v6561_v25, %v2089_v40  ;;  %v1525_v46 = vadd.f32 %v6937_v35, %v1524_v32  ;;  %vm1526_vm2 = vweird.f32 %v10397_v39  ;;  %v10410_v5 = vld [vmem:[#allocation110_spill] sm:$0xff] }
 0x2fc   :  { %4481 = vmatmul.msk.f32.gmra.mxu3 %vm375_vm0, %v2215_v34  ;;  %v1538_v48 = vsub.f32 1.0, %v1537_v31  ;;  %vm1528_vm3 = vmor %vm1526_vm2, %vm1527_vm1  ;;  %vm1531_vm4 = vcmp.eq.f32.partialorder %v1530_v37, 8.507059e+37  ;;  %v1533_v1 = vor.u32 1.1754944e-38, %v1532_v24  ;;  %vm1542_vm5 = vweird.f32 %v6946_v17  ;;  %v10406_v34 = vld [vmem:[#allocation111_spill] sm:$0xff] }
 0x2fd   :  { %v1552_v11 = vmul.f32 %v10402_v50, %v10401_v43  ;;  %v2090_v56 = vmul.f32 %v6558_v7, %v1519_v42  ;;  %v1529_v60 = vsel %vm1528_vm3, %v6937_v35, %v1525_v46  ;;  %v1547_v0 = vand.u32 2147483648, %v10399_v62  ;;  %v10411_v42 = vld [vmem:[#allocation106_spill] sm:$0xff] }
 0x2fe   :  { %v1539_v29 = vmul.f32 %v6946_v17, %v1538_v48  ;;  %v2217_v57 = vmul.f32 %v2153_v8, %v10403_v49  ;;  %v1534_v44 = vsel %vm1531_vm4, %v1533_v1, %v1529_v60  ;;  %v1545_v2 = vand.u32 2147483647, %v10399_v62 }
 0x2ff   :  { %2433 = vmatmul.f32.gmra.mxu2 %v2216_v45  ;;  %v1553_v27 = vsub.f32 1.0, %v1552_v11  ;;  %v2218_v61 = vmul.f32 %v2154_v12, %v10404_v10  ;;  %vm1541_vm6 = vweird.f32 %v10399_v62  ;;  %v1560_v14 = vand.u32 2147483647, %v10401_v43  ;;  %v10412_v12 = vld [vmem:[#allocation91_spill] sm:$0xff] }
 0x300   :  { %v1540_v54 = vadd.f32 %v6946_v17, %v1539_v29  ;;  %v7396_v23 = vpop.eup %4803  ;;  %vm1543_vm7 = vmor %vm1541_vm6, %vm1542_vm5  ;;  %vm1557_vm8 = vweird.f32 %v10402_v50  ;;  %v1562_v41 = vand.u32 2147483648, %v10401_v43  ;;  %v1567_v47 = vmul.f32 %v10406_v34, %v10405_v63 }
 0x301   :  { %v1554_v35 = vmul.f32 %v10402_v50, %v1553_v27  ;;  %v2155_v21 = vadd.f32 %v6561_v25, %v2090_v56  ;;  %v2091_v59 = vmul.f32 %v6558_v7, %v1534_v44  ;;  %v1548_v30 = vor.u32 1.1754944e-38, %v1547_v0 }
 0x302   :  { %v1544_v38 = vsel %vm1543_vm7, %v6946_v17, %v1540_v54  ;;  %vm1546_vm9 = vcmp.eq.f32.partialorder %v1545_v2, 8.507059e+37  ;;  %vm1556_vm10 = vweird.f32 %v10401_v43  ;;  %v1568_v4 = vsub.f32 1.0, %v1567_v47  ;;  %v10407_v17 = vld [vmem:[#allocation105_spill] sm:$0xff]  ;;  %v10416_v54 = vld [vmem:[#allocation107_spill] sm:$0xff] }
 0x303   :  { %v1555_v55 = vadd.f32 %v10402_v50, %v1554_v35  ;;  %v1549_v39 = vsel %vm1546_vm9, %v1548_v30, %v1544_v38  ;;  %vm1558_vm11 = vmor %vm1556_vm10, %vm1557_vm8  ;;  %vm1561_vm12 = vcmp.eq.f32.partialorder %v1560_v14, 8.507059e+37  ;;  %v1563_v33 = vor.u32 1.1754944e-38, %v1562_v41  ;;  %v10417_v14 = vld [vmem:[#allocation112_spill] sm:$0xff] }
 0x304   :  { %4482 = vmatmul.msk.f32.gmra.mxu3 %vm375_vm0, %v2217_v57  ;;  %v1577_v36 = vand.u32 2147483648, %v10405_v63  ;;  %v1569_v19 = vmul.f32 %v10406_v34, %v1568_v4  ;;  %vm1572_vm13 = vweird.f32 %v10406_v34  ;;  %v1582_v9 = vmul.f32 %v10408_v18, %v10407_v17 }
 0x305   :  { %v1559_v45 = vsel %vm1558_vm11, %v10402_v50, %v1555_v55  ;;  %v2219_v28 = vmul.f32 %v2155_v21, %v10409_v3  ;;  %v2156_v52 = vadd.f32 %v6561_v25, %v2091_v59  ;;  %v1575_v37 = vand.u32 2147483647, %v10405_v63  ;;  %v10413_v50 = vld [vmem:[#allocation30_spill] sm:$0xff]  ;;  %v10418_v21 = vld [vmem:[#allocation84_spill] sm:$0xff]  ;;  %v10419_v59 = vld [vmem:[#allocation37_spill] sm:$0xff] }
 0x306   :  { %v1564_v40 = vsel %vm1561_vm12, %v1563_v33, %v1559_v45  ;;  %v2092_v24 = vmul.f32 %v6558_v7, %v1549_v39  ;;  %v1570_v62 = vadd.f32 %v10406_v34, %v1569_v19  ;;  %vm1571_vm14 = vweird.f32 %v10405_v63  ;;  %v10424_v3 = vld [vmem:[#allocation32_spill] sm:$0xff] }
 0x307   :  { %2436 = vmatmul.f32.gmra.mxu2 %v2218_v61  ;;  %v1583_v31 = vsub.f32 1.0, %v1582_v9  ;;  %4805 = vrcp.f32 %v10410_v5  ;;  %v2093_v32 = vmul.f32 %v6558_v7, %v1564_v40  ;;  %vm1573_vm15 = vmor %vm1571_vm14, %vm1572_vm13  ;;  %v1578_v8 = vor.u32 1.1754944e-38, %v1577_v36 }
 0x308   :  { %v1597_v46 = vmul.f32 %v10412_v12, %v10411_v42  ;;  %v1574_v48 = vsel %vm1573_vm15, %v10406_v34, %v1570_v62  ;;  %vm1587_vm1 = vweird.f32 %v10408_v18  ;;  %v1592_v43 = vand.u32 2147483648, %v10407_v17 }
 0x309   :  { %v1584_v1 = vmul.f32 %v10408_v18, %v1583_v31  ;;  %v2220_v11 = vmul.f32 %v2156_v52, %v10413_v50  ;;  %vm1576_vm2 = vcmp.eq.f32.partialorder %v1575_v37, 8.507059e+37  ;;  %v1590_v56 = vand.u32 2147483647, %v10407_v17 }
 0x30a   :  { %v1598_v60 = vsub.f32 1.0, %v1597_v46  ;;  %v2157_v29 = vadd.f32 %v6561_v25, %v2092_v24  ;;  %v1579_v0 = vsel %vm1576_vm2, %v1578_v8, %v1574_v48  ;;  %vm1586_vm3 = vweird.f32 %v10407_v17  ;;  %v10422_v17 = vld [vmem:[#allocation108_spill] sm:$0xff]  ;;  %v10425_v48 = vld [vmem:[#allocation70_spill] sm:$0xff] }
 0x30b   :  { %v1585_v49 = vadd.f32 %v10408_v18, %v1584_v1  ;;  %v2158_v57 = vadd.f32 %v6561_v25, %v2093_v32  ;;  %vm7438_vm4 = vmor %vm1586_vm3, %vm1587_vm1  ;;  %vm1601_vm5 = vweird.f32 %v10411_v42  ;;  %vm1602_vm6 = vweird.f32 %v10412_v12  ;;  %v10426_v1 = vld [vmem:[#allocation113_spill] sm:$0xff] }
 0x30c   :  { %4483 = vmatmul.msk.f32.gmra.mxu3 %vm375_vm0, %v2219_v28  ;;  %v1599_v2 = vmul.f32 %v10412_v12, %v1598_v60  ;;  %v1593_v10 = vor.u32 1.1754944e-38, %v1592_v43  ;;  %v1607_v61 = vand.u32 2147483648, %v10411_v42  ;;  %v1612_v35 = vmul.f32 %v10417_v14, %v10416_v54  ;;  %vm7458_vm8 = vmor %vm1601_vm5, %vm1602_vm6 }
 0x30d   :  { %v1589_v27 = vsel %vm7438_vm4, %v10408_v18, %v1585_v49  ;;  %v7451_v41 = vpop.eup %4805  ;;  %v2094_v63 = vmul.f32 %v6558_v7, %v1579_v0  ;;  %vm1591_vm7 = vcmp.eq.f32.partialorder %v1590_v56, 8.507059e+37  ;;  %v1605_v47 = vand.u32 2147483647, %v10411_v42  ;;  %v10423_v18 = vld [vmem:[#allocation13_spill] sm:$0xff] }
 0x30e   :  { %v1600_v34 = vadd.f32 %v10412_v12, %v1599_v2  ;;  %4807 = vrcp.f32 %v10418_v21  ;;  %v2221_v38 = vmul.f32 %v2157_v29, %v10419_v59  ;;  %v1594_v30 = vsel %vm1591_vm7, %v1593_v10, %v1589_v27  ;;  %v10432_v59 = vld [vmem:[#allocation76_spill] sm:$0xff] }
 0x30f   :  { %2439 = vmatmul.f32.gmra.mxu2 %v2220_v11  ;;  %v1613_v4 = vsub.f32 1.0, %v1612_v35  ;;  %4809 = vrcp.f32 %v6940_v13  ;;  %v1620_v33 = vand.u32 2147483647, %v10416_v54  ;;  %v1622_v36 = vand.u32 2147483648, %v10416_v54  ;;  %v10427_v11 = vld [vmem:[#allocation39_spill] sm:$0xff] }
 0x310   :  { %v1604_v39 = vsel %vm7458_vm8, %v10412_v12, %v1600_v34  ;;  %v1608_v45 = vor.u32 1.1754944e-38, %v1607_v61  ;;  %vm1617_vm9 = vweird.f32 %v10417_v14  ;;  %v1627_v9 = vmul.f32 %v10423_v18, %v10422_v17  ;;  %v10431_v34 = vld [vmem:[#allocation83_spill] sm:$0xff] }
 0x311   :  { %v1614_v19 = vmul.f32 %v10417_v14, %v1613_v4  ;;  %v2222_v28 = vmul.f32 %v2158_v57, %v10424_v3  ;;  %v2159_v52 = vadd.f32 %v6561_v25, %v2094_v63  ;;  %v2095_v40 = vmul.f32 %v6558_v7, %v1594_v30  ;;  %v10430_v63 = vld [vmem:[#allocation7_spill] sm:$0xff] }
 0x312   :  { %vm1606_vm10 = vcmp.eq.f32.partialorder %v1605_v47, 8.507059e+37  ;;  %vm1616_vm11 = vweird.f32 %v10416_v54  ;;  %v1628_v62 = vsub.f32 1.0, %v1627_v9  ;;  %vm1621_vm13 = vcmp.eq.f32.partialorder %v1620_v33, 8.507059e+37  ;;  %v7504_v54 = vpop.f32.mrf.mxu2 }
 0x313   :  { %v1609_v37 = vsel %vm1606_vm10, %v1608_v45, %v1604_v39  ;;  %v1615_v24 = vadd.f32 %v10417_v14, %v1614_v19  ;;  %vm1618_vm12 = vmor %vm1616_vm11, %vm1617_vm9  ;;  %v1623_v31 = vor.u32 1.1754944e-38, %v1622_v36  ;;  %vm1632_vm14 = vweird.f32 %v10423_v18  ;;  %v10434_v45 = vld [vmem:[#allocation85_spill] sm:$0xff] }
 0x314   :  { %4484 = vmatmul.msk.f32.gmra.mxu3 %vm375_vm0, %v2221_v38  ;;  %v1635_v32 = vand.u32 2147483647, %v10422_v17  ;;  %v7480_v8 = vpop.eup %4807  ;;  %v1629_v12 = vmul.f32 %v10423_v18, %v1628_v62  ;;  %v1637_v46 = vand.u32 2147483648, %v10422_v17  ;;  %v1642_v43 = vmul.f32 %v10426_v1, %v10425_v48  ;;  %v10433_v38 = vld [vmem:[#allocation34_spill] sm:$0xff]  ;;  %v10436_v62 = vld [vmem:[#allocation71_spill] sm:$0xff] }
 0x315   :  { %v1619_v42 = vsel %vm1618_vm12, %v10417_v14, %v1615_v24  ;;  %v7487_v50 = vpop.eup %4809  ;;  %v2223_v56 = vmul.f32 %v2159_v52, %v10427_v11  ;;  %v2160_v60 = vadd.f32 %v6561_v25, %v2095_v40  ;;  %v2096_v29 = vmul.f32 %v6558_v7, %v1609_v37  ;;  %v7526_v40 = vpop.f32.mrf.mxu3 }
 0x316   :  { %v1624_v0 = vsel %vm1621_vm13, %v1623_v31, %v1619_v42  ;;  %v1630_v49 = vadd.f32 %v10423_v18, %v1629_v12  ;;  %vm1631_vm15 = vweird.f32 %v10422_v17  ;;  %vm7494_vm1 = vcmp.eq.f32.partialorder %v1635_v32, 8.507059e+37  ;;  %v10437_v31 = vld [vmem:[#allocation100_spill] sm:$0xff] }
 0x317   :  { %2442 = vmatmul.f32.gmra.mxu2 %v2222_v28  ;;  %v1643_v44 = vsub.f32 1.0, %v1642_v43  ;;  %v2097_v2 = vmul.f32 %v6558_v7, %v1624_v0  ;;  %vm1633_vm2 = vmor %vm1631_vm15, %vm1632_vm14  ;;  %v1638_v27 = vor.u32 1.1754944e-38, %v1637_v46  ;;  %v1650_v10 = vand.u32 2147483647, %v10425_v48  ;;  %v10435_v28 = vld [vmem:[#allocation41_spill] sm:$0xff]  ;;  %v10439_v43 = vld [vmem:[#allocation36_spill] sm:$0xff] }
 0x318   :  { %v1652_v61 = vand.u32 2147483648, %v10425_v48  ;;  %v1634_v14 = vsel %vm1633_vm2, %v10423_v18, %v1630_v49  ;;  %vm1647_vm3 = vweird.f32 %v10426_v1  ;;  %v1657_v47 = vmul.f32 %v10431_v34, %v10430_v63 }
 0x319   :  { %v1644_v35 = vmul.f32 %v10426_v1, %v1643_v44  ;;  %4811 = vrcp.f32 %v10432_v59  ;;  %v2224_v30 = vmul.f32 %v2160_v60, %v10433_v38  ;;  %v2161_v55 = vadd.f32 %v6561_v25, %v2096_v29 }
 0x31a   :  { %v1639_v4 = vsel %vm7494_vm1, %v1638_v27, %v1634_v14  ;;  %vm1646_vm4 = vweird.f32 %v10425_v48  ;;  %v1658_v36 = vsub.f32 1.0, %v1657_v47  ;;  %4813 = vrcp.f32 %v10434_v45  ;;  %v10440_v27 = vld [vmem:[#allocation72_spill] sm:$0xff]  ;;  %v10442_v14 = vld [vmem:[#allocation87_spill] sm:$0xff] }
 0x31b   :  { %v2098_v39 = vmul.f32 %v6558_v7, %v1639_v4  ;;  %v1645_v33 = vadd.f32 %v10426_v1, %v1644_v35  ;;  %v2162_v19 = vadd.f32 %v6561_v25, %v2097_v2  ;;  %vm1648_vm5 = vmor %vm1646_vm4, %vm1647_vm3  ;;  %vm1651_vm6 = vcmp.eq.f32.partialorder %v1650_v10, 8.507059e+37  ;;  %v10441_v10 = vld [vmem:[#allocation86_spill] sm:$0xff]  ;;  %v10443_v35 = vld [vmem:[#allocation43_spill] sm:$0xff] }
 0x31c   :  { %4485 = vmatmul.msk.f32.gmra.mxu3 %vm375_vm0, %v2223_v56  ;;  %v1653_v17 = vor.u32 1.1754944e-38, %v1652_v61  ;;  %v1659_v9 = vmul.f32 %v10431_v34, %v1658_v36  ;;  %vm1662_vm7 = vweird.f32 %v10431_v34  ;;  %v1665_v3 = vand.u32 2147483647, %v10430_v63 }
 0x31d   :  { %v1649_v18 = vsel %vm1648_vm5, %v10426_v1, %v1645_v33  ;;  %v2225_v52 = vmul.f32 %v2161_v55, %v10435_v28  ;;  %v1667_v24 = vand.u32 2147483648, %v10430_v63  ;;  %v1672_v32 = vmul.f32 %v10437_v31, %v10436_v62  ;;  %v10438_v1 = vld [vmem:[#allocation77_spill] sm:$0xff] }
 0x31e   :  { %v1654_v37 = vsel %vm1651_vm6, %v1653_v17, %v1649_v18  ;;  %v2163_v42 = vadd.f32 %v6561_v25, %v2098_v39  ;;  %v1660_v46 = vadd.f32 %v10431_v34, %v1659_v9  ;;  %vm1661_vm8 = vweird.f32 %v10430_v63  ;;  %v10444_v33 = vld [vmem:[#allocation73_spill] sm:$0xff] }
 0x31f   :  { %2445 = vmatmul.f32.gmra.mxu2 %v2224_v30  ;;  %v2099_v12 = vmul.f32 %v6558_v7, %v1654_v37  ;;  %v7535_v48 = vpop.eup %4811  ;;  %4815 = vrcp.f32 %v10438_v1  ;;  %v2226_v11 = vmul.f32 %v2162_v19, %v10439_v43  ;;  %vm1663_vm9 = vmor %vm1661_vm8, %vm1662_vm7  ;;  %v1668_v56 = vor.u32 1.1754944e-38, %v1667_v24 }
 0x320   :  { %v1673_v60 = vsub.f32 1.0, %v1672_v32  ;;  %v1664_v29 = vsel %vm1663_vm9, %v10431_v34, %v1660_v46  ;;  %vm1666_vm10 = vcmp.eq.f32.partialorder %v1665_v3, 8.507059e+37  ;;  %v1680_v0 = vand.u32 2147483647, %v10436_v62  ;;  %v7543_v57 = vpop.eup %4813  ;;  %v7551_v34 = vpop.f32.mrf.mxu2  ;;  %v10445_v3 = vld [vmem:[#allocation38_spill] sm:$0xff] }
 0x321   :  { %v1682_v49 = vand.u32 2147483648, %v10436_v62  ;;  %v1669_v44 = vsel %vm1666_vm10, %v1668_v56, %v1664_v29  ;;  %vm1677_vm11 = vweird.f32 %v10437_v31  ;;  %v1687_v61 = vmul.f32 %v10441_v10, %v10440_v27  ;;  %v10446_v56 = vld [vmem:[#allocation74_spill] sm:$0xff] }
 0x322   :  { %v1674_v2 = vmul.f32 %v10437_v31, %v1673_v60  ;;  %4817 = vrcp.f32 %v10442_v14  ;;  %v2227_v63 = vmul.f32 %v2163_v42, %v10443_v35  ;;  %v2164_v47 = vadd.f32 %v6561_v25, %v2099_v12  ;;  %v10447_v60 = vld [vmem:[#allocation101_spill] sm:$0xff] }
 0x323   :  { %v2100_v38 = vmul.f32 %v6558_v7, %v1669_v44  ;;  %vm1676_vm12 = vweird.f32 %v10436_v62  ;;  %v1688_v55 = vsub.f32 1.0, %v1687_v61  ;;  %vm1691_vm13 = vweird.f32 %v10440_v27  ;;  %v7569_v62 = vpop.f32.mrf.mxu3 }
 0x324   :  { %4486 = vmatmul.msk.f32.gmra.mxu3 %vm375_vm0, %v2225_v52  ;;  %v1675_v30 = vadd.f32 %v10437_v31, %v1674_v2  ;;  %vm1678_vm14 = vmor %vm1676_vm12, %vm1677_vm11  ;;  %vm1681_vm15 = vcmp.eq.f32.partialorder %v1680_v0, 8.507059e+37  ;;  %v1683_v4 = vor.u32 1.1754944e-38, %v1682_v49  ;;  %v1697_v39 = vand.u32 2147483648, %v10440_v27 }
 0x325   :  { %v1702_v36 = vmul.f32 %v7041_v15, %v10444_v33  ;;  %v7561_v19 = vpop.eup %4815  ;;  %v1689_v18 = vmul.f32 %v10441_v10, %v1688_v55  ;;  %vm1692_vm1 = vweird.f32 %v10441_v10  ;;  %v1695_v9 = vand.u32 2147483647, %v10440_v27 }
 0x326   :  { %v1679_v17 = vsel %vm1678_vm14, %v10437_v31, %v1675_v30  ;;  %v2228_v28 = vmul.f32 %v2164_v47, %v10445_v3  ;;  %v2165_v52 = vadd.f32 %v6561_v25, %v2100_v38  ;;  %vm1707_vm2 = vweird.f32 %v7041_v15  ;;  %vm1693_vm3 = vmor %vm1691_vm13, %vm1692_vm1  ;;  %v10448_v47 = vld [vmem:[#allocation82_spill] sm:$0xff]  ;;  %v10451_v3 = vld [vmem:[#allocation40_spill] sm:$0xff] }
 0x327   :  { %2448 = vmatmul.f32.gmra.mxu2 %v2226_v11  ;;  %v1684_v37 = vsel %vm1681_vm15, %v1683_v4, %v1679_v17  ;;  %v1703_v24 = vsub.f32 1.0, %v1702_v36  ;;  %v1690_v42 = vadd.f32 %v10441_v10, %v1689_v18  ;;  %v1712_v31 = vand.u32 2147483648, %v10444_v33  ;;  %v10450_v36 = vld [vmem:[#allocation45_spill] sm:$0xff] }
 0x328   :  { %v2101_v32 = vmul.f32 %v6558_v7, %v1684_v37  ;;  %v7575_v12 = vpop.eup %4817  ;;  %v1698_v46 = vor.u32 1.1754944e-38, %v1697_v39  ;;  %v1710_v11 = vand.u32 2147483647, %v10444_v33  ;;  %v1717_v29 = vmul.f32 %v10447_v60, %v10446_v56  ;;  %v7595_v30 = vpop.f32.mrf.mxu2 }
 0x329   :  { %v1704_v43 = vmul.f32 %v7041_v15, %v1703_v24  ;;  %v1694_v49 = vsel %vm1693_vm3, %v10441_v10, %v1690_v42  ;;  %vm1696_vm4 = vcmp.eq.f32.partialorder %v1695_v9, 8.507059e+37  ;;  %vm1706_vm5 = vweird.f32 %v10444_v33  ;;  %v10449_v10 = vld [vmem:[#allocation114_spill] sm:$0xff] }
 0x32a   :  { %v2166_v0 = vadd.f32 %v6561_v25, %v2101_v32  ;;  %v1699_v44 = vsel %vm1696_vm4, %v1698_v46, %v1694_v49  ;;  %v1718_v27 = vsub.f32 1.0, %v1717_v29  ;;  %v1725_v61 = vand.u32 2147483647, %v10446_v56  ;;  %vm1708_vm6 = vmor %vm1706_vm5, %vm1707_vm2 }
 0x32b   :  { %v1705_v2 = vadd.f32 %v7041_v15, %v1704_v43  ;;  %v1713_v35 = vor.u32 1.1754944e-38, %v1712_v31  ;;  %vm1722_vm7 = vweird.f32 %v10447_v60  ;;  %v1732_v38 = vmul.f32 %v10449_v10, %v10448_v47 }
 0x32c   :  { %4487 = vmatmul.msk.f32.gmra.mxu3 %vm375_vm0, %v2227_v63  ;;  %v1727_v63 = vand.u32 2147483648, %v10446_v56  ;;  %v2102_v55 = vmul.f32 %v6558_v7, %v1699_v44  ;;  %vm1711_vm8 = vcmp.eq.f32.partialorder %v1710_v11, 8.507059e+37  ;;  %v1719_v39 = vmul.f32 %v10447_v60, %v1718_v27  ;;  %v10452_v44 = vld [vmem:[#allocation88_spill] sm:$0xff] }
 0x32d   :  { %v1709_v4 = vsel %vm1708_vm6, %v7041_v15, %v1705_v2  ;;  %v7602_v33 = vmul.f32 %v7487_v50, %v6940_v13  ;;  %v2229_v17 = vmul.f32 %v2165_v52, %v10450_v36  ;;  %v1733_v9 = vsub.f32 1.0, %v1732_v38  ;;  %v7618_v43 = vpop.f32.mrf.mxu3 }
 0x32e   :  { %v1714_v18 = vsel %vm1711_vm8, %v1713_v35, %v1709_v4  ;;  %v1720_v37 = vadd.f32 %v10447_v60, %v1719_v39  ;;  %vm1721_vm9 = vweird.f32 %v10446_v56  ;;  %vm1726_vm10 = vcmp.eq.f32.partialorder %v1725_v61, 8.507059e+37 }
 0x32f   :  { %2451 = vmatmul.f32.gmra.mxu2 %v2228_v28  ;;  %v2230_v28 = vmul.f32 %v2166_v0, %v10451_v3  ;;  %v2103_v15 = vmul.f32 %v6558_v7, %v1714_v18  ;;  %vm1723_vm11 = vmor %vm1721_vm9, %vm1722_vm7  ;;  %v1728_v24 = vor.u32 1.1754944e-38, %v1727_v63  ;;  %v1734_v32 = vmul.f32 %v10449_v10, %v1733_v9 }
 0x330   :  { %vm1737_vm12 = vweird.f32 %v10449_v10  ;;  %v2167_v52 = vadd.f32 %v6561_v25, %v2102_v55  ;;  %v1724_v42 = vsel %vm1723_vm11, %v10447_v60, %v1720_v37  ;;  %v1740_v31 = vand.u32 2147483647, %v10448_v47 }
 0x331   :  { %v1742_v46 = vand.u32 2147483648, %v10448_v47  ;;  %v1729_v11 = vsel %vm1726_vm10, %v1728_v24, %v1724_v42  ;;  %v1735_v56 = vadd.f32 %v10449_v10, %v1734_v32  ;;  %vm1736_vm13 = vweird.f32 %v10448_v47  ;;  %v10455_v47 = vld [vmem:[#allocation47_spill] sm:$0xff] }
 0x332   :  { %v1747_v29 = vmul.f32 %v7144_v6, %v6910_v51  ;;  %v1875_v0 = vand.u32 2147483647, %v10434_v45  ;;  %v1877_v49 = vand.u32 2147483648, %v10434_v45  ;;  %4819 = vrcp.f32 %v10452_v44  ;;  %vm7630_vm14 = vmor %vm1736_vm13, %vm1737_vm12 }
 0x333   :  { %v2104_v60 = vmul.f32 %v6558_v7, %v1729_v11  ;;  %v1838_v27 = vsub.f32 1.0, %v7602_v33  ;;  %v2168_v61 = vadd.f32 %v6561_v25, %v2103_v15  ;;  %v1739_v35 = vsel %vm7630_vm14, %v10449_v10, %v1735_v56  ;;  %v7649_v10 = vld [vmem:[%s9889_s4] ss:$0 sm:$0xff] }
 0x334   :  { %4488 = vmatmul.msk.f32.gmra.mxu3 %vm375_vm0, %v2229_v17  ;;  %v1748_v63 = vsub.f32 1.0, %v1747_v29  ;;  %v2231_v38 = vmul.f32 %v2167_v52, %v10455_v47  ;;  %vm1741_vm15 = vcmp.eq.f32.partialorder %v1740_v31, 8.507059e+37  ;;  %v1743_v55 = vor.u32 1.1754944e-38, %v1742_v46  ;;  %v10457_v29 = vld [vmem:[#allocation49_spill] sm:$0xff] }
 0x335   :  { %v1762_v4 = vmul.f32 %v7321_v26, %v6913_v53  ;;  %vm1752_vm1 = vweird.f32 %v7144_v6  ;;  %v1755_v33 = vand.u32 2147483647, %v6910_v51  ;;  %v1757_v36 = vand.u32 2147483648, %v6910_v51 }
 0x336   :  { %v1749_v39 = vmul.f32 %v7144_v6, %v1748_v63  ;;  %v2169_v18 = vadd.f32 %v6561_v25, %v2104_v60  ;;  %v1744_v9 = vsel %vm1741_vm15, %v1743_v55, %v1739_v35  ;;  %vm1751_vm2 = vweird.f32 %v6910_v51 }
 0x337   :  { %2454 = vmatmul.f32.gmra.mxu2 %v2230_v28  ;;  %v1763_v3 = vsub.f32 1.0, %v1762_v4  ;;  %v10456_v28 = vld [vmem:[#allocation42_spill] sm:$0xff]  ;;  %vm1767_vm3 = vweird.f32 %v7321_v26  ;;  %v1770_v24 = vand.u32 2147483647, %v6913_v53  ;;  %vm1753_vm4 = vmor %vm1751_vm2, %vm1752_vm1  ;;  %v1772_v42 = vand.u32 2147483648, %v6913_v53 }
 0x338   :  { %v2232_v37 = vmul.f32 %v2168_v61, %v10456_v28  ;;  %v1750_v15 = vadd.f32 %v7144_v6, %v1749_v39  ;;  %v7657_v32 = vpop.eup %4819  ;;  %v1777_v31 = vmul.f32 %v7338_v58, %v6922_v16  ;;  %v2105_v46 = vmul.f32 %v6558_v7, %v1744_v9 }
 0x339   :  { %v1764_v51 = vmul.f32 %v7321_v26, %v1763_v3  ;;  %vm1756_vm5 = vcmp.eq.f32.partialorder %v1755_v33, 8.507059e+37  ;;  %v1758_v56 = vor.u32 1.1754944e-38, %v1757_v36  ;;  %v2233_v60 = vmul.f32 %v2169_v18, %v10457_v29 }
 0x33a   :  { %v2407_v17 = vpop.f32.mrf.mxu2  ;;  %v1754_v11 = vsel %vm1753_vm4, %v7144_v6, %v1750_v15  ;;  %vm1766_vm6 = vweird.f32 %v6913_v53  ;;  %v1778_v61 = vsub.f32 1.0, %v1777_v31  ;;  %vm1771_vm8 = vcmp.eq.f32.partialorder %v1770_v24, 8.507059e+37 }
 0x33b   :  { %v2408_v52 = vadd.f32 %v7649_v10, %v2407_v17  ;;  %v1765_v2 = vadd.f32 %v7321_v26, %v1764_v51  ;;  %v1759_v63 = vsel %vm1756_vm5, %v1758_v56, %v1754_v11  ;;  %vm1768_vm7 = vmor %vm1766_vm6, %vm1767_vm3  ;;  %v1773_v47 = vor.u32 1.1754944e-38, %v1772_v42  ;;  %v10460_v51 = vld [vmem:[#allocation44_spill] sm:$0xff] }
 0x33c   :  { %4489 = vmatmul.msk.f32.gmra.mxu3 %vm375_vm0, %v2231_v38  ;;  %v1792_v6 = vmul.f32 %v7396_v23, %v10400_v20  ;;  %v1779_v4 = vmul.f32 %v7338_v58, %v1778_v61  ;;  %vm1782_vm9 = vweird.f32 %v7338_v58  ;;  %v2170_v53 = vadd.f32 %v6561_v25, %v2105_v46 }
 0x33d   :  { %v1769_v55 = vsel %vm1768_vm7, %v7321_v26, %v1765_v2  ;;  %vm1781_vm10 = vweird.f32 %v6922_v16  ;;  %v1787_v33 = vand.u32 2147483648, %v6922_v16  ;;  %v2106_v17 = vmul.f32 %v6558_v7, %v1759_v63 }
 0x33e   :  { %v1774_v39 = vsel %vm1771_vm8, %v1773_v47, %v1769_v55  ;;  %v1780_v18 = vadd.f32 %v7338_v58, %v1779_v4  ;;  %v1785_v9 = vand.u32 2147483647, %v6922_v16  ;;  %v1793_v3 = vsub.f32 1.0, %v1792_v6  ;;  %vm7694_vm11 = vmor %vm1781_vm10, %vm1782_vm9 }
 0x33f   :  { %v2520_v35 = vpop.f32.mrf.mxu3  ;;  %2457 = vmatmul.f32.gmra.mxu2 %v2232_v37  ;;  %v1839_v26 = vmul.f32 %v7487_v50, %v1838_v27  ;;  %v7690_v28 = vmul.f32 %v7543_v57, %v10434_v45  ;;  %v2107_v15 = vmul.f32 %v6558_v7, %v1774_v39  ;;  %vm1797_vm12 = vweird.f32 %v7396_v23 }
 0x340   :  { %v7676_v38 = vadd.f32 %v2520_v35, %v2408_v52  ;;  %v1784_v16 = vsel %vm7694_vm11, %v7338_v58, %v1780_v18  ;;  %v1794_v27 = vmul.f32 %v7396_v23, %v1793_v3  ;;  %v1800_v52 = vand.u32 2147483647, %v10400_v20 }
 0x341   :  { %v2234_v42 = vmul.f32 %v2170_v53, %v10460_v51  ;;  %v1788_v31 = vor.u32 1.1754944e-38, %v1787_v33  ;;  %v1802_v46 = vand.u32 2147483648, %v10400_v20  ;;  %v1807_v11 = vmul.f32 %v7451_v41, %v10410_v5  ;;  %v10461_v53 = vld [vmem:[#allocation51_spill] sm:$0xff] }
 0x342   :  { %v2410_v36 = vpop.f32.mrf.mxu2  ;;  %v2171_v56 = vadd.f32 %v6561_v25, %v2106_v17  ;;  %vm1786_vm13 = vcmp.eq.f32.partialorder %v1785_v9, 8.507059e+37  ;;  %v1795_v29 = vadd.f32 %v7396_v23, %v1794_v27  ;;  %vm1796_vm14 = vweird.f32 %v10400_v20  ;;  %v10462_v17 = vld [vmem:[#allocation46_spill] sm:$0xff] }
 0x343   :  { %v2411_v37 = vadd.f32 %v7649_v10, %v2410_v36  ;;  %vm1842_vm15 = vweird.f32 %v7487_v50  ;;  %v1789_v2 = vsel %vm1786_vm13, %v1788_v31, %v1784_v16  ;;  %vm1798_vm1 = vmor %vm1796_vm14, %vm1797_vm12  ;;  %v1803_v61 = vor.u32 1.1754944e-38, %v1802_v46 }
 0x344   :  { %4490 = vmatmul.msk.f32.gmra.mxu3 %vm375_vm0, %v2233_v60  ;;  %v2172_v60 = vadd.f32 %v6561_v25, %v2107_v15  ;;  %v1808_v35 = vsub.f32 1.0, %v1807_v11  ;;  %v1799_v47 = vsel %vm1798_vm1, %v7396_v23, %v1795_v29  ;;  %vm1801_vm2 = vcmp.eq.f32.partialorder %v1800_v52, 8.507059e+37 }
 0x345   :  { %v1817_v6 = vand.u32 2147483648, %v10410_v5  ;;  %vm1841_vm3 = vweird.f32 %v6940_v13  ;;  %v1804_v20 = vsel %vm1801_vm2, %v1803_v61, %v1799_v47  ;;  %vm1812_vm4 = vweird.f32 %v7451_v41 }
 0x346   :  { %v1809_v55 = vmul.f32 %v7451_v41, %v1808_v35  ;;  %v1822_v4 = vmul.f32 %v7480_v8, %v10418_v21  ;;  %v2235_v39 = vmul.f32 %v2171_v56, %v10461_v53  ;;  %v2108_v36 = vmul.f32 %v6558_v7, %v1789_v2  ;;  %vm7772_vm13 = vmor %vm1841_vm3, %vm1842_vm15 }
 0x347   :  { %v2523_v58 = vpop.f32.mrf.mxu3  ;;  %2460 = vmatmul.f32.gmra.mxu2 %v2234_v42  ;;  %vm1811_vm5 = vweird.f32 %v10410_v5  ;;  %v1815_v23 = vand.u32 2147483647, %v10410_v5  ;;  %v2236_v18 = vmul.f32 %v2172_v60, %v10462_v17  ;;  %v2109_v9 = vmul.f32 %v6558_v7, %v1804_v20 }
 0x348   :  { %v7716_v63 = vadd.f32 %v2523_v58, %v2411_v37  ;;  %v1810_v3 = vadd.f32 %v7451_v41, %v1809_v55  ;;  %v1823_v37 = vsub.f32 1.0, %v1822_v4  ;;  %vm7734_vm6 = vmor %vm1811_vm5, %vm1812_vm4  ;;  %v1818_v16 = vor.u32 1.1754944e-38, %v1817_v6  ;;  %v10470_v55 = vld [vmem:[#allocation79_spill] sm:$0xff]  ;;  %v10471_v4 = vld [vmem:[#allocation53_spill] sm:$0xff] }
 0x349   :  { %vm1827_vm7 = vweird.f32 %v7480_v8  ;;  %v1830_v5 = vand.u32 2147483647, %v10418_v21  ;;  %v1832_v51 = vand.u32 2147483648, %v10418_v21  ;;  %v1852_v42 = vmul.f32 %v7535_v48, %v10432_v59 }
 0x34a   :  { %v2413_v33 = vpop.f32.mrf.mxu2  ;;  %v1814_v27 = vsel %vm7734_vm6, %v7451_v41, %v1810_v3  ;;  %v1824_v52 = vmul.f32 %v7480_v8, %v1823_v37  ;;  %v1840_v31 = vadd.f32 %v7487_v50, %v1839_v26  ;;  %v10465_v46 = vand.u32 2147483647, %v6940_v13  ;;  %v10472_v37 = vld [vmem:[#allocation48_spill] sm:$0xff] }
 0x34b   :  { %v2414_v15 = vadd.f32 %v7649_v10, %v2413_v33  ;;  %v1868_v56 = vsub.f32 1.0, %v7690_v28  ;;  %v2173_v29 = vadd.f32 %v6561_v25, %v2108_v36  ;;  %vm1816_vm9 = vcmp.eq.f32.partialorder %v1815_v23, 8.507059e+37 }
 0x34c   :  { %4491 = vmatmul.msk.f32.gmra.mxu3 %vm375_vm0, %v2235_v39  ;;  %vm7750_vm8 = vcmp.eq.f32.partialorder %v10465_v46, 8.507059e+37  ;;  %v1819_v58 = vsel %vm1816_vm9, %v1818_v16, %v1814_v27  ;;  %v1825_v60 = vadd.f32 %v7480_v8, %v1824_v52  ;;  %vm1826_vm10 = vweird.f32 %v10418_v21 }
 0x34d   :  { %v1853_v2 = vsub.f32 1.0, %v1852_v42  ;;  %v1905_v26 = vand.u32 2147483647, %v10442_v14  ;;  %v2174_v35 = vadd.f32 %v6561_v25, %v2109_v9  ;;  %vm1828_vm11 = vmor %vm1826_vm10, %vm1827_vm7  ;;  %v1833_v28 = vor.u32 1.1754944e-38, %v1832_v51 }
 0x34e   :  { %v1829_v47 = vsel %vm1828_vm11, %v7480_v8, %v1825_v60  ;;  %vm1831_vm12 = vcmp.eq.f32.partialorder %v1830_v5, 8.507059e+37  ;;  %v1882_v20 = vmul.f32 %v7561_v19, %v10438_v1  ;;  %vm1871_vm14 = vweird.f32 %v10434_v45  ;;  %v10473_v5 = vld [vmem:[#allocation89_spill] sm:$0xff] }
 0x34f   :  { %v2526_v41 = vpop.f32.mrf.mxu3  ;;  %2463 = vmatmul.f32.gmra.mxu2 %v2236_v18  ;;  %v1854_v6 = vmul.f32 %v7535_v48, %v1853_v2  ;;  %4821 = vrcp.f32 %v10470_v55  ;;  %v2237_v8 = vmul.f32 %v2173_v29, %v10471_v4  ;;  %v2110_v39 = vmul.f32 %v6558_v7, %v1819_v58  ;;  %v10478_v2 = vld [vmem:[#allocation80_spill] sm:$0xff] }
 0x350   :  { %v7759_v61 = vadd.f32 %v2526_v41, %v2414_v15  ;;  %v1834_v33 = vsel %vm1831_vm12, %v1833_v28, %v1829_v47  ;;  %v1844_v36 = vsel %vm7772_vm13, %v7487_v50, %v1840_v31  ;;  %v1869_v13 = vmul.f32 %v7543_v57, %v1868_v56  ;;  %v10479_v28 = vld [vmem:[#allocation55_spill] sm:$0xff] }
 0x351   :  { %v1897_v23 = vmul.f32 %v7575_v12, %v10442_v14  ;;  %vm1857_vm15 = vweird.f32 %v7535_v48  ;;  %v1855_v18 = vadd.f32 %v7535_v48, %v1854_v6  ;;  %v1862_v9 = vand.u32 2147483648, %v10432_v59 }
 0x352   :  { %v2416_v53 = vpop.f32.mrf.mxu2  ;;  %v1883_v3 = vsub.f32 1.0, %v1882_v20  ;;  %v2238_v15 = vmul.f32 %v2174_v35, %v10472_v37  ;;  %v2111_v50 = vmul.f32 %v6558_v7, %v1834_v33  ;;  %vm1856_vm1 = vweird.f32 %v10432_v59 }
 0x353   :  { %v2417_v17 = vadd.f32 %v7649_v10, %v2416_v53  ;;  %v1860_v24 = vand.u32 2147483647, %v10432_v59  ;;  %vm1872_vm2 = vweird.f32 %v7543_v57  ;;  %v1907_v16 = vand.u32 2147483648, %v10442_v14  ;;  %vm7799_vm3 = vmor %vm1856_vm1, %vm1857_vm15 }
 0x354   :  { %4492 = vmatmul.msk.f32.gmra.mxu3 %vm375_vm0, %v2237_v8  ;;  %4823 = vrcp.f32 %v10473_v5  ;;  %v2175_v27 = vadd.f32 %v6561_v25, %v2110_v39  ;;  %v1849_v51 = vsel %vm7750_vm8, %v7377_v22, %v1844_v36  ;;  %v1859_v59 = vsel %vm7799_vm3, %v7535_v48, %v1855_v18  ;;  %vm7834_vm7 = vmor %vm1871_vm14, %vm1872_vm2  ;;  %v10482_v36 = vld [vmem:[#allocation50_spill] sm:$0xff]  ;;  %v10485_v18 = vld [vmem:[#allocation99_spill] sm:$0xff] }
 0x355   :  { %v1884_v31 = vmul.f32 %v7561_v19, %v1883_v3  ;;  %v1912_v46 = vmul.f32 %v7657_v32, %v10452_v44  ;;  %v7812_v56 = vpop.eup %4821  ;;  %v1870_v29 = vadd.f32 %v7543_v57, %v1869_v13  ;;  %v1898_v41 = vsub.f32 1.0, %v1897_v23 }
 0x356   :  { %v1863_v11 = vor.u32 1.1754944e-38, %v1862_v9  ;;  %vm7819_vm4 = vcmp.eq.f32.partialorder %v1875_v0, 8.507059e+37  ;;  %v1878_v48 = vor.u32 1.1754944e-38, %v1877_v49  ;;  %v2176_v60 = vadd.f32 %v6561_v25, %v2111_v50 }
 0x357   :  { %v2529_v42 = vpop.f32.mrf.mxu3  ;;  %2466 = vmatmul.f32.gmra.mxu2 %v2238_v15  ;;  %vm1861_vm5 = vcmp.eq.f32.partialorder %v1860_v24, 8.507059e+37  ;;  %vm1901_vm6 = vweird.f32 %v10442_v14  ;;  %4825 = vrcp.f32 %v10478_v2  ;;  %v2112_v35 = vmul.f32 %v6558_v7, %v1849_v51 }
 0x358   :  { %v7815_v58 = vadd.f32 %v2529_v42, %v2417_v17  ;;  %v2239_v47 = vmul.f32 %v2175_v27, %v10479_v28  ;;  %v1864_v20 = vsel %vm1861_vm5, %v1863_v11, %v1859_v59  ;;  %v1927_v49 = vmul.f32 %v7812_v56, %v10470_v55 }
 0x359   :  { %v1885_v21 = vadd.f32 %v7561_v19, %v1884_v31  ;;  %vm1887_vm8 = vweird.f32 %v7561_v19  ;;  %v1913_v4 = vsub.f32 1.0, %v1912_v46  ;;  %v1874_v53 = vsel %vm7834_vm7, %v7543_v57, %v1870_v29  ;;  %v10488_v31 = vld [vmem:[#allocation90_spill] sm:$0xff] }
 0x35a   :  { %v2419_v6 = vpop.f32.mrf.mxu2  ;;  %v7842_v8 = vpop.eup %4823  ;;  %v1899_v45 = vmul.f32 %v7575_v12, %v1898_v41  ;;  %v1892_v33 = vand.u32 2147483648, %v10438_v1  ;;  %v2240_v13 = vmul.f32 %v2176_v60, %v10482_v36  ;;  %v2113_v23 = vmul.f32 %v6558_v7, %v1864_v20  ;;  %v10489_v41 = vld [vmem:[#allocation57_spill] sm:$0xff] }
 0x35b   :  { %v2420_v39 = vadd.f32 %v7649_v10, %v2419_v6  ;;  %vm1886_vm9 = vweird.f32 %v10438_v1  ;;  %v1890_v17 = vand.u32 2147483647, %v10438_v1  ;;  %vm1902_vm10 = vweird.f32 %v7575_v12 }
 0x35c   :  { %4493 = vmatmul.msk.f32.gmra.mxu3 %vm375_vm0, %v2239_v47  ;;  %vm7858_vm11 = vcmp.eq.f32.partialorder %v1905_v26, 8.507059e+37  ;;  %4827 = vrcp.f32 %v10485_v18  ;;  %v2177_v9 = vadd.f32 %v6561_v25, %v2112_v35  ;;  %vm7866_vm12 = vmor %vm1886_vm9, %vm1887_vm8  ;;  %v1879_v1 = vsel %vm7819_vm4, %v1878_v48, %v1874_v53 }
 0x35d   :  { %v1889_v26 = vsel %vm7866_vm12, %v7561_v19, %v1885_v21  ;;  %v1914_v15 = vmul.f32 %v7657_v32, %v1913_v4  ;;  %v1942_v50 = vmul.f32 %v7842_v8, %v10473_v5  ;;  %v7878_v24 = vpop.eup %4825  ;;  %v1900_v27 = vadd.f32 %v7575_v12, %v1899_v45  ;;  %vm7892_vm14 = vmor %vm1901_vm6, %vm1902_vm10 }
 0x35e   :  { %v1928_v52 = vsub.f32 1.0, %v1927_v49  ;;  %v1893_v42 = vor.u32 1.1754944e-38, %v1892_v33  ;;  %v1908_v59 = vor.u32 1.1754944e-38, %v1907_v16  ;;  %4829 = vrcp.f32 %v10488_v31  ;;  %v10492_v49 = vld [vmem:[#allocation52_spill] sm:$0xff] }
 0x35f   :  { %v2532_v37 = vpop.f32.mrf.mxu3  ;;  %2469 = vmatmul.f32.gmra.mxu2 %v2240_v13  ;;  %v2178_v46 = vadd.f32 %v6561_v25, %v2113_v23  ;;  %vm1891_vm13 = vcmp.eq.f32.partialorder %v1890_v17, 8.507059e+37  ;;  %v1937_v19 = vand.u32 2147483648, %v10470_v55  ;;  %v2114_v29 = vmul.f32 %v6558_v7, %v1879_v1 }
 0x360   :  { %v7881_v51 = vadd.f32 %v2532_v37, %v2420_v39  ;;  %v2241_v11 = vmul.f32 %v2177_v9, %v10489_v41  ;;  %v1894_v48 = vsel %vm1891_vm13, %v1893_v42, %v1889_v26  ;;  %v1957_v16 = vmul.f32 %v7878_v24, %v10478_v2 }
 0x361   :  { %v1915_v35 = vadd.f32 %v7657_v32, %v1914_v15  ;;  %vm1917_vm15 = vweird.f32 %v7657_v32  ;;  %v1943_v28 = vsub.f32 1.0, %v1942_v50  ;;  %v1904_v6 = vsel %vm7892_vm14, %v7575_v12, %v1900_v27  ;;  %v10493_v12 = vld [vmem:[#allocation92_spill] sm:$0xff]  ;;  %v10496_v27 = vld [vmem:[#allocation59_spill] sm:$0xff] }
 0x362   :  { %v2422_v22 = vpop.f32.mrf.mxu2  ;;  %v7900_v47 = vpop.eup %4827  ;;  %v1929_v14 = vmul.f32 %v7812_v56, %v1928_v52  ;;  %v1922_v0 = vand.u32 2147483648, %v10452_v44  ;;  %v2242_v21 = vmul.f32 %v2178_v46, %v10492_v49  ;;  %v2115_v4 = vmul.f32 %v6558_v7, %v1894_v48 }
 0x363   :  { %v2423_v20 = vadd.f32 %v7649_v10, %v2422_v22  ;;  %vm1916_vm1 = vweird.f32 %v10452_v44  ;;  %v1920_v53 = vand.u32 2147483647, %v10452_v44  ;;  %vm1931_vm2 = vweird.f32 %v10470_v55 }
 0x364   :  { %4494 = vmatmul.msk.f32.gmra.mxu3 %vm375_vm0, %v2241_v11  ;;  %vm1932_vm3 = vweird.f32 %v7812_v56  ;;  %4831 = vrcp.f32 %v10493_v12  ;;  %v2179_v45 = vadd.f32 %v6561_v25, %v2114_v29  ;;  %vm7919_vm4 = vmor %vm1916_vm1, %vm1917_vm15  ;;  %v7923_v33 = vpop.eup %4829  ;;  %v1909_v36 = vsel %vm7858_vm11, %v1908_v59, %v1904_v6 }
 0x365   :  { %v1919_v13 = vsel %vm7919_vm4, %v7657_v32, %v1915_v35  ;;  %v1944_v23 = vmul.f32 %v7842_v8, %v1943_v28  ;;  %v1972_v17 = vmul.f32 %v7900_v47, %v10485_v18  ;;  %v1930_v9 = vadd.f32 %v7812_v56, %v1929_v14  ;;  %vm7946_vm6 = vmor %vm1931_vm2, %vm1932_vm3 }
 0x366   :  { %v1958_v3 = vsub.f32 1.0, %v1957_v16  ;;  %v1923_v37 = vor.u32 1.1754944e-38, %v1922_v0  ;;  %v1935_v57 = vand.u32 2147483647, %v10470_v55  ;;  %v1938_v26 = vor.u32 1.1754944e-38, %v1937_v19  ;;  %v10499_v19 = vld [vmem:[#allocation93_spill] sm:$0xff] }
 0x367   :  { %v2535_v44 = vpop.f32.mrf.mxu3  ;;  %2472 = vmatmul.f32.gmra.mxu2 %v2242_v21  ;;  %v2180_v15 = vadd.f32 %v6561_v25, %v2115_v4  ;;  %vm1921_vm5 = vcmp.eq.f32.partialorder %v1920_v53, 8.507059e+37  ;;  %v1987_v32 = vmul.f32 %v7923_v33, %v10488_v31  ;;  %v2116_v50 = vmul.f32 %v6558_v7, %v1909_v36  ;;  %v10500_v16 = vld [vmem:[#allocation54_spill] sm:$0xff] }
 0x368   :  { %v7934_v1 = vadd.f32 %v2535_v44, %v2423_v20  ;;  %v2243_v52 = vmul.f32 %v2179_v45, %v10496_v27  ;;  %v1924_v59 = vsel %vm1921_vm5, %v1923_v37, %v1919_v13  ;;  %4833 = vrcp.f32 %v10499_v19 }
 0x369   :  { %v1945_v29 = vadd.f32 %v7842_v8, %v1944_v23  ;;  %vm1947_vm7 = vweird.f32 %v7842_v8  ;;  %v1973_v41 = vsub.f32 1.0, %v1972_v17  ;;  %v1934_v22 = vsel %vm7946_vm6, %v7812_v56, %v1930_v9  ;;  %v10504_v9 = vld [vmem:[#allocation61_spill] sm:$0xff] }
 0x36a   :  { %v2425_v42 = vpop.f32.mrf.mxu2  ;;  %v7953_v11 = vpop.eup %4831  ;;  %v1959_v48 = vmul.f32 %v7878_v24, %v1958_v3  ;;  %v1952_v60 = vand.u32 2147483648, %v10473_v5  ;;  %v2244_v35 = vmul.f32 %v2180_v15, %v10500_v16  ;;  %v2117_v28 = vmul.f32 %v6558_v7, %v1924_v59  ;;  %v10507_v59 = vld [vmem:[#allocation56_spill] sm:$0xff] }
 0x36b   :  { %v2426_v55 = vadd.f32 %v7649_v10, %v2425_v42  ;;  %vm1946_vm8 = vweird.f32 %v10473_v5  ;;  %v1950_v6 = vand.u32 2147483647, %v10473_v5  ;;  %vm1936_vm9 = vcmp.eq.f32.partialorder %v1935_v57, 8.507059e+37 }
 0x36c   :  { %4495 = vmatmul.msk.f32.gmra.mxu3 %vm375_vm0, %v2243_v52  ;;  %v1967_v14 = vand.u32 2147483648, %v10478_v2  ;;  %v1988_v56 = vsub.f32 1.0, %v1987_v32  ;;  %v2181_v20 = vadd.f32 %v6561_v25, %v2116_v50  ;;  %vm7970_vm10 = vmor %vm1946_vm8, %vm1947_vm7  ;;  %v1939_v49 = vsel %vm1936_vm9, %v1938_v26, %v1934_v22 }
 0x36d   :  { %v1949_v4 = vsel %vm7970_vm10, %v7842_v8, %v1945_v29  ;;  %v1974_v5 = vmul.f32 %v7900_v47, %v1973_v41  ;;  %v2002_v53 = vmul.f32 %v7953_v11, %v10493_v12  ;;  %v1960_v45 = vadd.f32 %v7878_v24, %v1959_v48 }
 0x36e   :  { %vm1962_vm11 = vweird.f32 %v7878_v24  ;;  %v1953_v36 = vor.u32 1.1754944e-38, %v1952_v60  ;;  %v7984_v44 = vpop.eup %4833  ;;  %vm1961_vm12 = vweird.f32 %v10478_v2  ;;  %v1965_v13 = vand.u32 2147483647, %v10478_v2 }
 0x36f   :  { %v2538_v21 = vpop.f32.mrf.mxu3  ;;  %2475 = vmatmul.f32.gmra.mxu2 %v2244_v35  ;;  %v2182_v8 = vadd.f32 %v6561_v25, %v2117_v28  ;;  %vm1951_vm13 = vcmp.eq.f32.partialorder %v1950_v6, 8.507059e+37  ;;  %v1968_v23 = vor.u32 1.1754944e-38, %v1967_v14  ;;  %v2118_v17 = vmul.f32 %v6558_v7, %v1939_v49  ;;  %vm7991_vm14 = vmor %vm1961_vm12, %vm1962_vm11  ;;  %v10510_v35 = vld [vmem:[#allocation95_spill] sm:$0xff]  ;;  %v10511_v28 = vld [vmem:[#allocation96_spill] sm:$0xff] }
 0x370   :  { %v7982_v39 = vadd.f32 %v2538_v21, %v2426_v55  ;;  %v2245_v3 = vmul.f32 %v2181_v20, %v10504_v9  ;;  %v1954_v57 = vsel %vm1951_vm13, %v1953_v36, %v1949_v4  ;;  %v1989_v15 = vmul.f32 %v7923_v33, %v1988_v56  ;;  %v10513_v49 = vld [vmem:[#allocation97_spill] sm:$0xff]  ;;  %v10514_v21 = vld [vmem:[#allocation98_spill] sm:$0xff] }
 0x371   :  { %v1975_v32 = vadd.f32 %v7900_v47, %v1974_v5  ;;  %vm1977_vm15 = vweird.f32 %v7900_v47  ;;  %v2003_v2 = vsub.f32 1.0, %v2002_v53  ;;  %v1964_v50 = vsel %vm7991_vm14, %v7878_v24, %v1960_v45  ;;  %v10515_v45 = vld [vmem:[#allocation63_spill] sm:$0xff] }
 0x372   :  { %10503 = vst [vmem:[#allocation8_spill] sm:$0xff] %v7982_v39  ;;  %v2428_v37 = vpop.f32.mrf.mxu2  ;;  %v2017_v27 = vmul.f32 %v7984_v44, %v10499_v19  ;;  %v1982_v42 = vand.u32 2147483648, %v10485_v18  ;;  %v2246_v46 = vmul.f32 %v2182_v8, %v10507_v59  ;;  %v2119_v29 = vmul.f32 %v6558_v7, %v1954_v57 }
 0x373   :  { %v2429_v52 = vadd.f32 %v7649_v10, %v2428_v37  ;;  %vm1976_vm1 = vweird.f32 %v10485_v18  ;;  %v1980_v41 = vand.u32 2147483647, %v10485_v18  ;;  %vm1966_vm2 = vcmp.eq.f32.partialorder %v1965_v13, 8.507059e+37 }
 0x374   :  { %4496 = vmatmul.msk.f32.gmra.mxu3 %vm375_vm0, %v2245_v3  ;;  %vm1992_vm3 = vweird.f32 %v7923_v33  ;;  %v1997_v24 = vand.u32 2147483648, %v10488_v31  ;;  %v2183_v22 = vadd.f32 %v6561_v25, %v2118_v17  ;;  %vm8015_vm4 = vmor %vm1976_vm1, %vm1977_vm15  ;;  %v1969_v55 = vsel %vm1966_vm2, %v1968_v23, %v1964_v50 }
 0x375   :  { %v1979_v18 = vsel %vm8015_vm4, %v7900_v47, %v1975_v32  ;;  %v2004_v16 = vmul.f32 %v7953_v11, %v2003_v2  ;;  %v2032_v6 = vmul.f32 %v10511_v28, %v10510_v35  ;;  %v1990_v14 = vadd.f32 %v7923_v33, %v1989_v15  ;;  %v10518_v15 = vld [vmem:[#allocation58_spill] sm:$0xff] }
 0x376   :  { %v2018_v56 = vsub.f32 1.0, %v2017_v27  ;;  %v1983_v0 = vor.u32 1.1754944e-38, %v1982_v42  ;;  %v2047_v4 = vmul.f32 %v10514_v21, %v10513_v49  ;;  %vm1991_vm5 = vweird.f32 %v10488_v31 }
 0x377   :  { %v2541_v60 = vpop.f32.mrf.mxu3  ;;  %2478 = vmatmul.f32.gmra.mxu2 %v2246_v46  ;;  %v2184_v5 = vadd.f32 %v6561_v25, %v2119_v29  ;;  %vm1981_vm6 = vcmp.eq.f32.partialorder %v1980_v41, 8.507059e+37  ;;  %v1995_v47 = vand.u32 2147483647, %v10488_v31  ;;  %v2120_v53 = vmul.f32 %v6558_v7, %v1969_v55  ;;  %vm8037_vm7 = vmor %vm1991_vm5, %vm1992_vm3 }
 0x378   :  { %v8026_v20 = vadd.f32 %v2541_v60, %v2429_v52  ;;  %v2247_v36 = vmul.f32 %v2183_v22, %v10515_v45  ;;  %v1984_v8 = vsel %vm1981_vm6, %v1983_v0, %v1979_v18  ;;  %v1998_v17 = vor.u32 1.1754944e-38, %v1997_v24  ;;  %v10521_v18 = vld [vmem:[#allocation64_spill] sm:$0xff] }
 0x379   :  { %v2005_v9 = vadd.f32 %v7953_v11, %v2004_v16  ;;  %vm2007_vm8 = vweird.f32 %v7953_v11  ;;  %v2033_v3 = vsub.f32 1.0, %v2032_v6  ;;  %v1994_v31 = vsel %vm8037_vm7, %v7923_v33, %v1990_v14 }
 0x37a   :  { %10512 = vst [vmem:[#allocation15_spill] sm:$0xff] %v8026_v20  ;;  %v2431_v13 = vpop.f32.mrf.mxu2  ;;  %v2019_v37 = vmul.f32 %v7984_v44, %v2018_v56  ;;  %v2012_v26 = vand.u32 2147483648, %v10493_v12  ;;  %v2248_v32 = vmul.f32 %v2184_v5, %v10518_v15  ;;  %v2121_v2 = vmul.f32 %v6558_v7, %v1984_v8 }
 0x37b   :  { %v2432_v57 = vadd.f32 %v7649_v10, %v2431_v13  ;;  %vm2006_vm9 = vweird.f32 %v10493_v12  ;;  %v2010_v50 = vand.u32 2147483647, %v10493_v12  ;;  %v2048_v27 = vsub.f32 1.0, %v2047_v4 }
 0x37c   :  { %4497 = vmatmul.msk.f32.gmra.mxu3 %vm375_vm0, %v2247_v36  ;;  %vm1996_vm10 = vcmp.eq.f32.partialorder %v1995_v47, 8.507059e+37  ;;  %v2185_v33 = vadd.f32 %v6561_v25, %v2120_v53  ;;  %vm8055_vm11 = vmor %vm2006_vm9, %vm2007_vm8  ;;  %v2027_v59 = vand.u32 2147483648, %v10499_v19  ;;  %v2034_v41 = vmul.f32 %v10511_v28, %v2033_v3  ;;  %v10524_v53 = vld [vmem:[#allocation60_spill] sm:$0xff] }
 0x37d   :  { %v1999_v42 = vsel %vm1996_vm10, %v1998_v17, %v1994_v31  ;;  %v2009_v29 = vsel %vm8055_vm11, %v7953_v11, %v2005_v9  ;;  %v2020_v12 = vadd.f32 %v7984_v44, %v2019_v37  ;;  %vm2022_vm12 = vweird.f32 %v7984_v44 }
 0x37e   :  { %v2013_v22 = vor.u32 1.1754944e-38, %v2012_v26  ;;  %vm2021_vm13 = vweird.f32 %v10499_v19  ;;  %v2186_v48 = vadd.f32 %v6561_v25, %v2121_v2  ;;  %vm2011_vm14 = vcmp.eq.f32.partialorder %v2010_v50, 8.507059e+37 }
 0x37f   :  { %v2544_v46 = vpop.f32.mrf.mxu3  ;;  %2481 = vmatmul.f32.gmra.mxu2 %v2248_v32  ;;  %v2025_v55 = vand.u32 2147483647, %v10499_v19  ;;  %v2122_v60 = vmul.f32 %v6558_v7, %v1999_v42  ;;  %v2249_v11 = vmul.f32 %v2185_v33, %v10521_v18  ;;  %v2049_v14 = vmul.f32 %v10514_v21, %v2048_v27  ;;  %vm8074_vm15 = vmor %vm2021_vm13, %vm2022_vm12  ;;  %v10528_v32 = vld [vmem:[#allocation66_spill] sm:$0xff] }
 0x380   :  { %v8066_v24 = vadd.f32 %v2544_v46, %v2432_v57  ;;  %v2014_v6 = vsel %vm2011_vm14, %v2013_v22, %v2009_v29  ;;  %v2035_v0 = vadd.f32 %v10511_v28, %v2034_v41  ;;  %vm2037_vm1 = vweird.f32 %v10511_v28  ;;  %v10529_v42 = vld [vmem:[#allocation62_spill] sm:$0xff] }
 0x381   :  { %v2024_v19 = vsel %vm8074_vm15, %v7984_v44, %v2020_v12  ;;  %v2028_v4 = vor.u32 1.1754944e-38, %v2027_v59  ;;  %v2042_v47 = vand.u32 2147483648, %v10510_v35  ;;  %v2250_v45 = vmul.f32 %v2186_v48, %v10524_v53  ;;  %v10531_v48 = vld [vmem:[#allocation67_spill] sm:$0xff] }
 0x382   :  { %v2434_v16 = vpop.f32.mrf.mxu2  ;;  %v2123_v36 = vmul.f32 %v6558_v7, %v2014_v6  ;;  %vm2036_vm2 = vweird.f32 %v10510_v35  ;;  %v2040_v13 = vand.u32 2147483647, %v10510_v35  ;;  %vm2026_vm3 = vcmp.eq.f32.partialorder %v2025_v55, 8.507059e+37 }
 0x383   :  { %v2435_v5 = vadd.f32 %v7649_v10, %v2434_v16  ;;  %v2187_v8 = vadd.f32 %v6561_v25, %v2122_v60  ;;  %vm8091_vm4 = vmor %vm2036_vm2, %vm2037_vm1  ;;  %v2029_v23 = vsel %vm2026_vm3, %v2028_v4, %v2024_v19  ;;  %v2050_v3 = vadd.f32 %v10514_v21, %v2049_v14 }
 0x384   :  { %4498 = vmatmul.msk.f32.gmra.mxu3 %vm375_vm0, %v2249_v11  ;;  %v2039_v9 = vsel %vm8091_vm4, %v10511_v28, %v2035_v0  ;;  %vm2052_vm5 = vweird.f32 %v10514_v21  ;;  %v2043_v35 = vor.u32 1.1754944e-38, %v2042_v47  ;;  %vm2051_vm6 = vweird.f32 %v10513_v49  ;;  %v10532_v11 = vld [vmem:[#allocation65_spill] sm:$0xff]  ;;  %v10534_v0 = vld [vmem:[#allocation68_spill] sm:$0xff] }
 0x385   :  { %v2057_v37 = vand.u32 2147483648, %v10513_v49  ;;  %v2188_v57 = vadd.f32 %v6561_v25, %v2123_v36  ;;  %vm2041_vm7 = vcmp.eq.f32.partialorder %v2040_v13, 8.507059e+37  ;;  %v2055_v26 = vand.u32 2147483647, %v10513_v49  ;;  %vm2053_vm8 = vmor %vm2051_vm6, %vm2052_vm5 }
 0x386   :  { %v2124_v15 = vmul.f32 %v6558_v7, %v2029_v23  ;;  %v2251_v28 = vmul.f32 %v2187_v8, %v10528_v32  ;;  %v2044_v50 = vsel %vm2041_vm7, %v2043_v35, %v2039_v9  ;;  %v2054_v27 = vsel %vm2053_vm8, %v10514_v21, %v2050_v3 }
 0x387   :  { %v2547_v17 = vpop.f32.mrf.mxu3  ;;  %2484 = vmatmul.f32.gmra.mxu2 %v2250_v45  ;;  %v2058_v52 = vor.u32 1.1754944e-38, %v2057_v37  ;;  %v2252_v59 = vmul.f32 %v2188_v57, %v10529_v42  ;;  %v2125_v46 = vmul.f32 %v6558_v7, %v2044_v50  ;;  %vm2056_vm9 = vcmp.eq.f32.partialorder %v2055_v26, 8.507059e+37 }
 0x388   :  { %v8100_v31 = vadd.f32 %v2547_v17, %v2435_v5  ;;  %v2189_v49 = vadd.f32 %v6561_v25, %v2124_v15 }
 0x389   :  { %v2059_v29 = vsel %vm2056_vm9, %v2058_v52, %v2054_v27  ;;  %v2190_v22 = vadd.f32 %v6561_v25, %v2125_v46  ;;  %v2402_v46 = vadd.f32 %v7649_v10, %v7551_v34 }
 0x38a   :  { %10527 = vst [vmem:[#allocation9_spill] sm:$0xff] %v8100_v31  ;;  %v2437_v2 = vpop.f32.mrf.mxu2  ;;  %v2126_v21 = vmul.f32 %v6558_v7, %v2059_v29  ;;  %v2253_v55 = vmul.f32 %v2189_v49, %v10531_v48  ;;  %v2399_v49 = vadd.f32 %v7649_v10, %v7504_v54  ;;  %v2405_v29 = vadd.f32 %v7649_v10, %v7595_v30 }
 0x38b   :  { %v2438_v33 = vadd.f32 %v7649_v10, %v2437_v2  ;;  %v2254_v16 = vmul.f32 %v2190_v22, %v10532_v11  ;;  %v8156_v22 = vadd.f32 %v7569_v62, %v2402_v46 }
 0x38c   :  { %4499 = vmatmul.msk.f32.gmra.mxu3 %vm375_vm0, %v2251_v28  ;;  %v2191_v6 = vadd.f32 %v6561_v25, %v2126_v21  ;;  %v8159_v21 = vadd.f32 %v7526_v40, %v2399_v49  ;;  %v8162_v48 = vadd.f32 %v7618_v43, %v2405_v29 }
 0x38e   :  { %v2255_v19 = vmul.f32 %v2191_v6, %v10534_v0 }
 0x38f   :  { %v2550_v41 = vpop.f32.mrf.mxu3  ;;  %2487 = vmatmul.f32.gmra.mxu2 %v2252_v59 }
 0x390   :  { %v8114_v12 = vadd.f32 %v2550_v41, %v2438_v33 }
 0x392   :  { %10530 = vst [vmem:[#allocation17_spill] sm:$0xff] %v8114_v12  ;;  %v2440_v60 = vpop.f32.mrf.mxu2 }
 0x393   :  { %v2441_v18 = vadd.f32 %v7649_v10, %v2440_v60 }
 0x394   :  { %4500 = vmatmul.msk.f32.gmra.mxu3 %vm375_vm0, %v2253_v55 }
 0x397   :  { %v2553_v14 = vpop.f32.mrf.mxu3  ;;  %2490 = vmatmul.f32.gmra.mxu2 %v2254_v16 }
 0x398   :  { %v8123_v56 = vadd.f32 %v2553_v14, %v2441_v18 }
 0x39a   :  { %10533 = vst [vmem:[#allocation11_spill] sm:$0xff] %v8123_v56  ;;  %v2443_v4 = vpop.f32.mrf.mxu2 }
 0x39b   :  { %v2444_v7 = vadd.f32 %v7649_v10, %v2443_v4 }
 0x39c   :  { %4501 = vmatmul.msk.f32.gmra.mxu3 %vm375_vm0, %v2255_v19  ;;  %vm2607_vm0 = vcmask 654336  }
 0x39d   :  { %v2609_v34 = vsel %vm2607_vm0, %v8156_v22, 0.0  ;;  %v2608_v54 = vsel %vm2607_vm0, %v8159_v21, 0.0  ;;  %v2611_v30 = vsel %vm2607_vm0, %v8162_v48, 0.0  ;;  %v2613_v40 = vsel %vm2607_vm0, %v7676_v38, 0.0 }
 0x39e   :  { %v2610_v60 = vadd.f32 %v2609_v34, %v2608_v54  ;;  %v2615_v43 = vsel %vm2607_vm0, %v7716_v63, 0.0  ;;  %v2617_v6 = vsel %vm2607_vm0, %v7759_v61, 0.0  ;;  %v2619_v0 = vsel %vm2607_vm0, %v7815_v58, 0.0 }
 0x39f   :  { %v2556_v5 = vpop.f32.mrf.mxu3  ;;  %v2635_v46 = vsel %vm2607_vm0, %v8123_v56, 0.0 }
 0x3a0   :  { %v8128_v47 = vadd.f32 %v2556_v5, %v2444_v7  ;;  %v2612_v18 = vadd.f32 %v2611_v30, %v2610_v60  ;;  %v2621_v7 = vsel %vm2607_vm0, %v7881_v51, 0.0 }
 0x3a2   :  { %10535 = vst [vmem:[#allocation19_spill] sm:$0xff] %v8128_v47  ;;  %v2446_v53 = vpop.f32.mrf.mxu2  ;;  %v2614_v16 = vadd.f32 %v2613_v40, %v2612_v18  ;;  %v2637_v34 = vsel %vm2607_vm0, %v8128_v47, 0.0 }
 0x3a3   :  { %v2447_v45 = vadd.f32 %v7649_v10, %v2446_v53  ;;  %v2623_v53 = vsel %vm2607_vm0, %v7934_v1, 0.0 }
 0x3a4   :  { %v2616_v14 = vadd.f32 %v2615_v43, %v2614_v16 }
 0x3a6   :  { %v2618_v19 = vadd.f32 %v2617_v6, %v2616_v14 }
 0x3a7   :  { %v2559_v36 = vpop.f32.mrf.mxu3 }
 0x3a8   :  { %v8131_v13 = vadd.f32 %v2559_v36, %v2447_v45  ;;  %v2620_v5 = vadd.f32 %v2619_v0, %v2618_v19 }
 0x3aa   :  { %10536 = vst [vmem:[#allocation14_spill] sm:$0xff] %v8131_v13  ;;  %v2449_v25 = vpop.f32.mrf.mxu2  ;;  %v2622_v36 = vadd.f32 %v2621_v7, %v2620_v5  ;;  %v2639_v30 = vsel %vm2607_vm0, %v8131_v13, 0.0 }
 0x3ab   :  { %v2450_v8 = vadd.f32 %v7649_v10, %v2449_v25  ;;  %v2625_v25 = vsel %vm2607_vm0, %v7982_v39, 0.0 }
 0x3af   :  { %v2562_v44 = vpop.f32.mrf.mxu3 }
 0x3b0   :  { %v8134_v23 = vadd.f32 %v2562_v44, %v2450_v8  ;;  %v2624_v8 = vadd.f32 %v2623_v53, %v2622_v36  ;;  %v2627_v44 = vsel %vm2607_vm0, %v8026_v20, 0.0 }
 0x3b2   :  { %10537 = vst [vmem:[#allocation21_spill] sm:$0xff] %v8134_v23  ;;  %v2452_v17 = vpop.f32.mrf.mxu2  ;;  %v2641_v18 = vsel %vm2607_vm0, %v8134_v23, 0.0 }
 0x3b3   :  { %v2453_v9 = vadd.f32 %v7649_v10, %v2452_v17  ;;  %v2626_v17 = vadd.f32 %v2625_v25, %v2624_v8 }
 0x3b7   :  { %v2565_v3 = vpop.f32.mrf.mxu3 }
 0x3b8   :  { %v8137_v35 = vadd.f32 %v2565_v3, %v2453_v9  ;;  %v2629_v3 = vsel %vm2607_vm0, %v8066_v24, 0.0 }
 0x3ba   :  { %10538 = vst [vmem:[#allocation16_spill] sm:$0xff] %v8137_v35  ;;  %v2455_v37 = vpop.f32.mrf.mxu2  ;;  %v2643_v6 = vsel %vm2607_vm0, %v8137_v35, 0.0 }
 0x3bb   :  { %v2456_v57 = vadd.f32 %v7649_v10, %v2455_v37  ;;  %v2628_v37 = vadd.f32 %v2627_v44, %v2626_v17 }
 0x3bf   :  { %v2568_v26 = vpop.f32.mrf.mxu3 }
 0x3c0   :  { %v8140_v15 = vadd.f32 %v2568_v26, %v2456_v57  ;;  %v2631_v57 = vsel %vm2607_vm0, %v8100_v31, 0.0 }
 0x3c2   :  { %10539 = vst [vmem:[#allocation23_spill] sm:$0xff] %v8140_v15  ;;  %v2458_v32 = vpop.f32.mrf.mxu2  ;;  %v2645_v7 = vsel %vm2607_vm0, %v8140_v15, 0.0 }
 0x3c3   :  { %v2459_v28 = vadd.f32 %v7649_v10, %v2458_v32  ;;  %v2630_v32 = vadd.f32 %v2629_v3, %v2628_v37 }
 0x3c7   :  { %v2571_v2 = vpop.f32.mrf.mxu3 }
 0x3c8   :  { %v8143_v50 = vadd.f32 %v2571_v2, %v2459_v28  ;;  %v2633_v28 = vsel %vm2607_vm0, %v8114_v12, 0.0  ;;  %v2632_v2 = vadd.f32 %v2631_v57, %v2630_v32 }
 0x3ca   :  { %10540 = vst [vmem:[#allocation18_spill] sm:$0xff] %v8143_v50  ;;  %v2461_v27 = vpop.f32.mrf.mxu2  ;;  %v2634_v49 = vadd.f32 %v2633_v28, %v2632_v2  ;;  %v2647_v25 = vsel %vm2607_vm0, %v8143_v50, 0.0 }
 0x3cb   :  { %v2462_v43 = vadd.f32 %v7649_v10, %v2461_v27 }
 0x3cc   :  { %v2636_v54 = vadd.f32 %v2635_v46, %v2634_v49 }
 0x3ce   :  { %v2638_v40 = vadd.f32 %v2637_v34, %v2636_v54 }
 0x3cf   :  { %v2574_v33 = vpop.f32.mrf.mxu3 }
 0x3d0   :  { %v2640_v16 = vadd.f32 %v2639_v30, %v2638_v40  ;;  %v8206_v5 = vadd.f32 %v2574_v33, %v2462_v43  ;;  %v5093_v33 = vld [vmem:[%s9889_s4] ss:$0 sm:$0xff]  ;;  %s8485_s4 = sld [smem:[#allocation2 + $0x2]] }
 0x3d2   :  { %v2464_v52 = vpop.f32.mrf.mxu2  ;;  %v2642_v0 = vadd.f32 %v2641_v18, %v2640_v16  ;;  %10541 = vst [vmem:[#allocation25_spill] sm:$0xff] %v8206_v5  ;;  %v2649_v17 = vsel %vm2607_vm0, %v8206_v5, 0.0 }
 0x3d3   :  { %v2465_v14 = vadd.f32 %v7649_v10, %v2464_v52 }
 0x3d4   :  { %v2644_v36 = vadd.f32 %v2643_v6, %v2642_v0 }
 0x3d6   :  { %v2646_v52 = vadd.f32 %v2645_v7, %v2644_v36  ;;  %s3494_s6 = ssub.f32 1.0, %s8485_s4 }
 0x3d7   :  { %v8145_v42 = vpop.f32.mrf.mxu3 }
 0x3d8   :  { %v8212_v27 = vadd.f32 %v8145_v42, %v2465_v14  ;;  %v2648_v37 = vadd.f32 %v2647_v25, %v2646_v52 }
 0x3da   :  { %v2467_v59 = vpop.f32.mrf.mxu2  ;;  %10542 = vst [vmem:[#allocation20_spill] sm:$0xff] %v8212_v27  ;;  %v2651_v42 = vsel %vm2607_vm0, %v8212_v27, 0.0 }
 0x3db   :  { %v2468_v53 = vadd.f32 %v7649_v10, %v2467_v59 }
 0x3df   :  { %v8153_v41 = vpop.f32.mrf.mxu3 }
 0x3e0   :  { %v8218_v3 = vadd.f32 %v8153_v41, %v2468_v53 }
 0x3e2   :  { %v2470_v55 = vpop.f32.mrf.mxu2  ;;  %10543 = vst [vmem:[#allocation27_spill] sm:$0xff] %v8218_v3  ;;  %v2653_v28 = vsel %vm2607_vm0, %v8218_v3, 0.0 }
 0x3e3   :  { %v2471_v8 = vadd.f32 %v7649_v10, %v2470_v55  ;;  %v2650_v55 = vadd.f32 %v2649_v17, %v2648_v37 }
 0x3e5   :  { %v2652_v46 = vadd.f32 %v2651_v42, %v2650_v55 }
 0x3e7   :  { %v2583_v62 = vpop.f32.mrf.mxu3  ;;  %v2654_v30 = vadd.f32 %v2653_v28, %v2652_v46 }
 0x3e8   :  { %v8225_v57 = vadd.f32 %v2583_v62, %v2471_v8 }
 0x3ea   :  { %v2473_v11 = vpop.f32.mrf.mxu2  ;;  %10544 = vst [vmem:[#allocation22_spill] sm:$0xff] %v8225_v57  ;;  %v2655_v49 = vsel %vm2607_vm0, %v8225_v57, 0.0 }
 0x3eb   :  { %v2474_v59 = vadd.f32 %v5093_v33, %v2473_v11  ;;  %v2656_v18 = vadd.f32 %v2655_v49, %v2654_v30 }
 0x3ef   :  { %v2586_v4 = vpop.f32.mrf.mxu3 }
 0x3f0   :  { %v8229_v2 = vadd.f32 %v2586_v4, %v2474_v59 }
 0x3f2   :  { %v2476_v45 = vpop.f32.mrf.mxu2  ;;  %10545 = vst [vmem:[#allocation6_spill] sm:$0xff] %v8229_v2  ;;  %v2657_v62 = vsel %vm2607_vm0, %v8229_v2, 0.0 }
 0x3f3   :  { %v2477_v10 = vadd.f32 %v5093_v33, %v2476_v45  ;;  %v2658_v16 = vadd.f32 %v2657_v62, %v2656_v18 }
 0x3f7   :  { %v2589_v9 = vpop.f32.mrf.mxu3 }
 0x3f8   :  { %v8233_v11 = vadd.f32 %v2589_v9, %v2477_v10 }
 0x3fa   :  { %v2479_v26 = vpop.f32.mrf.mxu2  ;;  %10546 = vst [vmem:[#allocation75_spill] sm:$0xff] %v8233_v11  ;;  %v2659_v4 = vsel %vm2607_vm0, %v8233_v11, 0.0 }
 0x3fb   :  { %v2480_v41 = vadd.f32 %v5093_v33, %v2479_v26  ;;  %v2660_v14 = vadd.f32 %v2659_v4, %v2658_v16 }
 0x3ff   :  { %v2592_v29 = vpop.f32.mrf.mxu3 }
 0x400   :  { %v8237_v45 = vadd.f32 %v2592_v29, %v2480_v41 }
 0x402   :  { %v2482_v60 = vpop.f32.mrf.mxu2  ;;  %10547 = vst [vmem:[#allocation12_spill] sm:$0xff] %v8237_v45  ;;  %v2661_v9 = vsel %vm2607_vm0, %v8237_v45, 0.0 }
 0x403   :  { %v2483_v34 = vadd.f32 %v5093_v33, %v2482_v60  ;;  %v2662_v53 = vadd.f32 %v2661_v9, %v2660_v14 }
 0x407   :  { %v2595_v19 = vpop.f32.mrf.mxu3 }
 0x408   :  { %v8241_v26 = vadd.f32 %v2595_v19, %v2483_v34 }
 0x40a   :  { %v2485_v44 = vpop.f32.mrf.mxu2  ;;  %10548 = vst [vmem:[#allocation29_spill] sm:$0xff] %v8241_v26  ;;  %v2663_v29 = vsel %vm2607_vm0, %v8241_v26, 0.0 }
 0x40b   :  { %v2486_v40 = vadd.f32 %v5093_v33, %v2485_v44  ;;  %v2664_v25 = vadd.f32 %v2663_v29, %v2662_v53 }
 0x40f   :  { %v2598_v32 = vpop.f32.mrf.mxu3 }
 0x410   :  { %v8245_v60 = vadd.f32 %v2598_v32, %v2486_v40 }
 0x412   :  { %v2488_v54 = vpop.f32.mrf.mxu2  ;;  %10549 = vst [vmem:[#allocation24_spill] sm:$0xff] %v8245_v60  ;;  %v2665_v19 = vsel %vm2607_vm0, %v8245_v60, 0.0 }
 0x413   :  { %v2489_v43 = vadd.f32 %v5093_v33, %v2488_v54  ;;  %v2666_v44 = vadd.f32 %v2665_v19, %v2664_v25 }
 0x417   :  { %v2601_v6 = vpop.f32.mrf.mxu3 }
 0x418   :  { %v8249_v0 = vadd.f32 %v2601_v6, %v2489_v43 }
 0x41a   :  { %10550 = vst [vmem:[#allocation5_spill] sm:$0xff] %v8249_v0  ;;  %v2491_v7 = vpop.f32.mrf.mxu2  ;;  %v2667_v8 = vsel %vm2607_vm0, %v8249_v0, 0.0 }
 0x41b   :  { %v2492_v36 = vadd.f32 %v5093_v33, %v2491_v7  ;;  %v2668_v59 = vadd.f32 %v2667_v8, %v2666_v44  ;;  %v10552_v33 = vld [vmem:[#allocation69_spill] sm:$0xff] }
 0x41f   :  { %v2604_v52 = vpop.f32.mrf.mxu3 }
 0x420   :  { %v8255_v17 = vadd.f32 %v2604_v52, %v2492_v36 }
 0x422   :  { %10551 = vst [vmem:[#allocation31_spill] sm:$0xff] %v8255_v17  ;;  %v2669_v37 = vsel %vm2607_vm0, %v8255_v17, 0.0 }
 0x423   :  { %v2670_v42 = vadd.f32 %v2669_v37, %v2668_v59 }
 0x425   :  { %v2671_v10 = vrot.slane %v2670_v42, 4 }
 0x427   :  { %v2672_v55 = vadd.f32 %v2671_v10, %v2670_v42 }
 0x429   :  { %v2673_v32 = vrot.slane %v2672_v55, 2 }
 0x42b   :  { %v2674_v28 = vadd.f32 %v2673_v32, %v2672_v55 }
 0x42d   :  { %v2675_v41 = vrot.slane %v2674_v28, 1 }
 0x42f   :  { %v2676_v46 = vadd.f32 %v2675_v41, %v2674_v28 }
 0x431   :  { %v8260_v49 = vmul.f32 %v2676_v46, %v10552_v33 }
 0x433   :  { %v8264_v34 = vsub.f32 %v8159_v21, %v8260_v49  ;;  %v8268_v54 = vsub.f32 %v8156_v22, %v8260_v49  ;;  %v8272_v30 = vsub.f32 %v8162_v48, %v8260_v49  ;;  %v8276_v62 = vsub.f32 %v7676_v38, %v8260_v49 }
 0x434   :  { %v8284_v4 = vsub.f32 %v7716_v63, %v8260_v49  ;;  %v8290_v16 = vsub.f32 %v7759_v61, %v8260_v49  ;;  %v8298_v7 = vsub.f32 %v7815_v58, %v8260_v49  ;;  %v8305_v25 = vsub.f32 %v7881_v51, %v8260_v49 }
 0x435   :  { %v2710_v40 = vmul.f32 %v8264_v34, %v8264_v34  ;;  %v2711_v18 = vmul.f32 %v8268_v54, %v8268_v54  ;;  %v2712_v43 = vmul.f32 %v8272_v30, %v8272_v30  ;;  %v2713_v6 = vmul.f32 %v8276_v62, %v8276_v62 }
 0x436   :  { %v2714_v53 = vmul.f32 %v8284_v4, %v8284_v4  ;;  %v2715_v8 = vmul.f32 %v8290_v16, %v8290_v16  ;;  %v8312_v59 = vsub.f32 %v7934_v1, %v8260_v49  ;;  %v2716_v37 = vmul.f32 %v8298_v7, %v8298_v7 }
 0x437   :  { %v2742_v9 = vsel %vm2607_vm0, %v2710_v40, 0.0  ;;  %v2743_v14 = vsel %vm2607_vm0, %v2711_v18, 0.0  ;;  %v2745_v19 = vsel %vm2607_vm0, %v2712_v43, 0.0  ;;  %v2747_v44 = vsel %vm2607_vm0, %v2713_v6, 0.0 }
 0x438   :  { %v2744_v29 = vadd.f32 %v2743_v14, %v2742_v9  ;;  %v2749_v42 = vsel %vm2607_vm0, %v2714_v53, 0.0  ;;  %v8319_v55 = vsub.f32 %v7982_v39, %v8260_v49  ;;  %v2717_v32 = vmul.f32 %v8305_v25, %v8305_v25 }
 0x439   :  { %v2751_v28 = vsel %vm2607_vm0, %v2715_v8, 0.0  ;;  %v8326_v46 = vsub.f32 %v8026_v20, %v8260_v49  ;;  %v2718_v33 = vmul.f32 %v8312_v59, %v8312_v59  ;;  %v2753_v40 = vsel %vm2607_vm0, %v2716_v37, 0.0 }
 0x43a   :  { %v2746_v36 = vadd.f32 %v2745_v19, %v2744_v29  ;;  %v8333_v43 = vsub.f32 %v8066_v24, %v8260_v49  ;;  %v2719_v6 = vmul.f32 %v8319_v55, %v8319_v55  ;;  %v2755_v9 = vsel %vm2607_vm0, %v2717_v32, 0.0 }
 0x43b   :  { %v8340_v29 = vsub.f32 %v8100_v31, %v8260_v49  ;;  %v2720_v53 = vmul.f32 %v8326_v46, %v8326_v46  ;;  %v2757_v19 = vsel %vm2607_vm0, %v2718_v33, 0.0  ;;  %v8347_v8 = vsub.f32 %v8114_v12, %v8260_v49 }
 0x43c   :  { %v2748_v52 = vadd.f32 %v2747_v44, %v2746_v36  ;;  %v2721_v44 = vmul.f32 %v8333_v43, %v8333_v43 }
 0x43d   :  { %v2761_v32 = vsel %vm2607_vm0, %v2720_v53, 0.0  ;;  %v2723_v33 = vmul.f32 %v8347_v8, %v8347_v8 }
 0x43e   :  { %v2750_v10 = vadd.f32 %v2749_v42, %v2748_v52  ;;  %v2759_v52 = vsel %vm2607_vm0, %v2719_v6, 0.0  ;;  %v8354_v42 = vsub.f32 %v8123_v56, %v8260_v49  ;;  %v8368_v6 = vsub.f32 %v8131_v13, %v8260_v49  ;;  %v10553_v56 = vld [vmem:[#allocation94_spill] sm:$0xff] }
 0x440   :  { %v2752_v41 = vadd.f32 %v2751_v28, %v2750_v10  ;;  %v2722_v10 = vmul.f32 %v8340_v29, %v8340_v29 }
 0x442   :  { %v2754_v18 = vadd.f32 %v2753_v40, %v2752_v41  ;;  %v8361_v41 = vsub.f32 %v8128_v47, %v8260_v49  ;;  %v2763_v40 = vsel %vm2607_vm0, %v2721_v44, 0.0  ;;  %v2767_v44 = vsel %vm2607_vm0, %v2723_v33, 0.0 }
 0x444   :  { %v2756_v14 = vadd.f32 %v2755_v9, %v2754_v18  ;;  %v2724_v9 = vmul.f32 %v8354_v42, %v8354_v42 }
 0x446   :  { %v2758_v36 = vadd.f32 %v2757_v19, %v2756_v14  ;;  %v2765_v14 = vsel %vm2607_vm0, %v2722_v10, 0.0  ;;  %v8375_v19 = vsub.f32 %v8134_v23, %v8260_v49  ;;  %v2769_v10 = vsel %vm2607_vm0, %v2724_v9, 0.0 }
 0x448   :  { %v2760_v37 = vadd.f32 %v2759_v52, %v2758_v36  ;;  %v2725_v36 = vmul.f32 %v8361_v41, %v8361_v41 }
 0x44a   :  { %v2762_v28 = vadd.f32 %v2761_v32, %v2760_v37  ;;  %v8382_v37 = vsub.f32 %v8137_v35, %v8260_v49  ;;  %v2726_v32 = vmul.f32 %v8368_v6, %v8368_v6  ;;  %v2771_v33 = vsel %vm2607_vm0, %v2725_v36, 0.0 }
 0x44c   :  { %v2764_v18 = vadd.f32 %v2763_v40, %v2762_v28  ;;  %v8389_v40 = vsub.f32 %v8140_v15, %v8260_v49  ;;  %v2773_v9 = vsel %vm2607_vm0, %v2726_v32, 0.0 }
 0x44e   :  { %v2766_v53 = vadd.f32 %v2765_v14, %v2764_v18  ;;  %v2727_v18 = vmul.f32 %v8375_v19, %v8375_v19  ;;  %v2729_v35 = vmul.f32 %v8389_v40, %v8389_v40 }
 0x450   :  { %v2768_v52 = vadd.f32 %v2767_v44, %v2766_v53  ;;  %v8396_v53 = vsub.f32 %v8143_v50, %v8260_v49  ;;  %v2728_v44 = vmul.f32 %v8382_v37, %v8382_v37  ;;  %v2775_v36 = vsel %vm2607_vm0, %v2727_v18, 0.0 }
 0x451   :  { %v2779_v18 = vsel %vm2607_vm0, %v2729_v35, 0.0 }
 0x452   :  { %v2770_v28 = vadd.f32 %v2769_v10, %v2768_v52  ;;  %v8403_v10 = vsub.f32 %v8206_v5, %v8260_v49  ;;  %v2730_v15 = vmul.f32 %v8396_v53, %v8396_v53  ;;  %v2777_v32 = vsel %vm2607_vm0, %v2728_v44, 0.0 }
 0x454   :  { %v2772_v14 = vadd.f32 %v2771_v33, %v2770_v28  ;;  %v8410_v33 = vsub.f32 %v8212_v27, %v8260_v49  ;;  %v2731_v5 = vmul.f32 %v8403_v10, %v8403_v10  ;;  %v2781_v44 = vsel %vm2607_vm0, %v2730_v15, 0.0 }
 0x456   :  { %v2774_v52 = vadd.f32 %v2773_v9, %v2772_v14  ;;  %v8417_v9 = vsub.f32 %v8218_v3, %v8260_v49  ;;  %v2732_v27 = vmul.f32 %v8410_v33, %v8410_v33  ;;  %v2783_v35 = vsel %vm2607_vm0, %v2731_v5, 0.0 }
 0x458   :  { %v2776_v28 = vadd.f32 %v2775_v36, %v2774_v52  ;;  %v8424_v36 = vsub.f32 %v8225_v57, %v8260_v49  ;;  %v2733_v3 = vmul.f32 %v8417_v9, %v8417_v9  ;;  %v2785_v15 = vsel %vm2607_vm0, %v2732_v27, 0.0 }
 0x45a   :  { %v2778_v14 = vadd.f32 %v2777_v32, %v2776_v28  ;;  %v8431_v32 = vsub.f32 %v8229_v2, %v8260_v49  ;;  %v2734_v57 = vmul.f32 %v8424_v36, %v8424_v36  ;;  %v2787_v5 = vsel %vm2607_vm0, %v2733_v3, 0.0 }
 0x45c   :  { %v2780_v52 = vadd.f32 %v2779_v18, %v2778_v14  ;;  %v8438_v18 = vsub.f32 %v8233_v11, %v8260_v49  ;;  %v2735_v2 = vmul.f32 %v8431_v32, %v8431_v32  ;;  %v2789_v27 = vsel %vm2607_vm0, %v2734_v57, 0.0 }
 0x45e   :  { %v2782_v28 = vadd.f32 %v2781_v44, %v2780_v52  ;;  %v8445_v44 = vsub.f32 %v8237_v45, %v8260_v49  ;;  %v2736_v11 = vmul.f32 %v8438_v18, %v8438_v18  ;;  %v2791_v3 = vsel %vm2607_vm0, %v2735_v2, 0.0 }
 0x460   :  { %v2784_v14 = vadd.f32 %v2783_v35, %v2782_v28  ;;  %v8452_v35 = vsub.f32 %v8241_v26, %v8260_v49  ;;  %v2737_v45 = vmul.f32 %v8445_v44, %v8445_v44  ;;  %v2793_v57 = vsel %vm2607_vm0, %v2736_v11, 0.0 }
 0x462   :  { %v2786_v52 = vadd.f32 %v2785_v15, %v2784_v14  ;;  %v8459_v15 = vsub.f32 %v8245_v60, %v8260_v49  ;;  %v2738_v26 = vmul.f32 %v8452_v35, %v8452_v35  ;;  %v2795_v50 = vsel %vm2607_vm0, %v2737_v45, 0.0 }
 0x464   :  { %v2788_v28 = vadd.f32 %v2787_v5, %v2786_v52  ;;  %v8466_v5 = vsub.f32 %v8249_v0, %v8260_v49  ;;  %v2739_v60 = vmul.f32 %v8459_v15, %v8459_v15 }
 0x466   :  { %v2790_v14 = vadd.f32 %v2789_v27, %v2788_v28  ;;  %v2709_v27 = vsub.f32 %v8255_v17, %v8260_v49  ;;  %v2799_v13 = vsel %vm2607_vm0, %v2739_v60, 0.0 }
 0x468   :  { %v2792_v52 = vadd.f32 %v2791_v3, %v2790_v14  ;;  %v2740_v14 = vmul.f32 %v8466_v5, %v8466_v5  ;;  %v2797_v3 = vsel %vm2607_vm0, %v2738_v26, 0.0  ;;  %v2741_v47 = vmul.f32 %v2709_v27, %v2709_v27 }
 0x46a   :  { %v2794_v28 = vadd.f32 %v2793_v57, %v2792_v52  ;;  %v2801_v52 = vsel %vm2607_vm0, %v2740_v14, 0.0  ;;  %v2803_v49 = vsel %vm2607_vm0, %v2741_v47, 0.0 }
 0x46c   :  { %v2796_v2 = vadd.f32 %v2795_v50, %v2794_v28 }
 0x46e   :  { %v2798_v0 = vadd.f32 %v2797_v3, %v2796_v2 }
 0x470   :  { %v2800_v11 = vadd.f32 %v2799_v13, %v2798_v0 }
 0x472   :  { %v2802_v57 = vadd.f32 %v2801_v52, %v2800_v11 }
 0x474   :  { %v2804_v17 = vadd.f32 %v2803_v49, %v2802_v57 }
 0x476   :  { %v2805_v23 = vrot.slane %v2804_v17, 4 }
 0x478   :  { %v2806_v31 = vadd.f32 %v2805_v23, %v2804_v17 }
 0x47a   :  { %v2807_v45 = vrot.slane %v2806_v31, 2 }
 0x47c   :  { %v2808_v50 = vadd.f32 %v2807_v45, %v2806_v31 }
 0x47e   :  { %v2809_v28 = vrot.slane %v2808_v50, 1 }
 0x480   :  { %v2810_v12 = vadd.f32 %v2809_v28, %v2808_v50 }
 0x482   :  { %v2811_v39 = vmul.f32 %v2810_v12, %v10553_v56 }
 0x484   :  { %4835 = vrsqrt.f32 %v2811_v39  ;;  %vm2818_vm11 = vweird.f32 %v2811_v39 }
 0x48a   :  { %v4836_v26 = vpop.eup %4835 }
 0x48b   :  { %v2813_v2 = vmul.f32 %v4836_v26, %v2811_v39  ;;  %vm2819_vm10 = vweird.f32 %v4836_v26 }
 0x48c   :  { %vm2820_vm12 = vmor %vm2818_vm11, %vm2819_vm10 }
 0x48d   :  { %v2814_v3 = vmul.f32 %v4836_v26, %v2813_v2 }
 0x48f   :  { %v2815_v60 = vmul.f32 0.5, %v2814_v3 }
 0x491   :  { %v2816_v13 = vsub.f32 1.5, %v2815_v60 }
 0x493   :  { %v2817_v0 = vmul.f32 %v4836_v26, %v2816_v13  ;;  %v8533_v13 = vstv %s3494_s6 }
 0x495   :  { %v2821_v47 = vsel %vm2820_vm12, %v4836_v26, %v2817_v0 }
 0x496   :  { %v2826_v14 = vmul.f32 %v2821_v47, %v8284_v4  ;;  %v2853_v17 = vmul.f32 %v2821_v47, %v2709_v27  ;;  %v2824_v56 = vmul.f32 %v2821_v47, %v8272_v30  ;;  %v2822_v49 = vmul.f32 %v2821_v47, %v8264_v34 }
 0x497   :  { %v2823_v39 = vmul.f32 %v2821_v47, %v8268_v54  ;;  %v2825_v45 = vmul.f32 %v2821_v47, %v8276_v62  ;;  %v2827_v4 = vmul.f32 %v2821_v47, %v8290_v16  ;;  %v2828_v27 = vmul.f32 %v2821_v47, %v8298_v7 }
 0x498   :  { %v2858_v23 = vadd.f32 1e-08, %v2826_v14  ;;  %v2885_v11 = vadd.f32 1e-08, %v2853_v17  ;;  %v2856_v50 = vadd.f32 1e-08, %v2824_v56  ;;  %v2829_v30 = vmul.f32 %v2821_v47, %v8305_v25 }
 0x499   :  { %v2830_v28 = vmul.f32 %v2821_v47, %v8312_v59  ;;  %v2831_v26 = vmul.f32 %v2821_v47, %v8319_v55  ;;  %v2832_v34 = vmul.f32 %v2821_v47, %v8326_v46  ;;  %v2833_v54 = vmul.f32 %v2821_v47, %v8333_v43 }
 0x49a   :  { %v4506_v31 = vmul.f32 -1.442695, %v2858_v23  ;;  %v4533_v12 = vmul.f32 -1.442695, %v2885_v11  ;;  %v2834_v62 = vmul.f32 %v2821_v47, %v8340_v29  ;;  %v2835_v2 = vmul.f32 %v2821_v47, %v8347_v8 }
 0x49b   :  { %v2836_v16 = vmul.f32 %v2821_v47, %v8354_v42  ;;  %v2837_v7 = vmul.f32 %v2821_v47, %v8361_v41  ;;  %v2838_v3 = vmul.f32 %v2821_v47, %v8368_v6  ;;  %v2839_v25 = vmul.f32 %v2821_v47, %v8375_v19 }
 0x49c   :  { %4837 = vpow2.f32 %v4506_v31  ;;  %v2840_v59 = vmul.f32 %v2821_v47, %v8382_v37  ;;  %v2841_v55 = vmul.f32 %v2821_v47, %v8389_v40  ;;  %v8509_v46 = vmul.f32 %v2821_v47, %v8396_v53 }
 0x49d   :  { %v2843_v43 = vmul.f32 %v2821_v47, %v8403_v10  ;;  %v4504_v29 = vmul.f32 -1.442695, %v2856_v50  ;;  %v2844_v42 = vmul.f32 %v2821_v47, %v8410_v33  ;;  %v2845_v41 = vmul.f32 %v2821_v47, %v8417_v9 }
 0x49e   :  { %v2846_v6 = vmul.f32 %v2821_v47, %v8424_v36  ;;  %v2854_v60 = vadd.f32 1e-08, %v2822_v49  ;;  %v2847_v37 = vmul.f32 %v2821_v47, %v8431_v32  ;;  %v8518_v40 = vmul.f32 %v2821_v47, %v8438_v18 }
 0x49f   :  { %v8522_v10 = vmul.f32 %v2821_v47, %v8445_v44  ;;  %v8525_v33 = vmul.f32 %v2821_v47, %v8452_v35  ;;  %v8528_v9 = vmul.f32 %v2821_v47, %v8459_v15  ;;  %v8531_v36 = vmul.f32 %v2821_v47, %v8466_v5 }
 0x4a0   :  { %v2855_v18 = vadd.f32 1e-08, %v2823_v39  ;;  %v2857_v0 = vadd.f32 1e-08, %v2825_v45  ;;  %v2859_v23 = vadd.f32 1e-08, %v2827_v4  ;;  %v8540_v11 = vstv %s8485_s4 }
 0x4a1   :  { %v4502_v17 = vmul.f32 -1.442695, %v2854_v60  ;;  %v2860_v15 = vadd.f32 1e-08, %v2828_v27  ;;  %v2861_v5 = vadd.f32 1e-08, %v2829_v30 }
 0x4a2   :  { %v4838_v52 = vpop.eup %4837  ;;  %v2862_v47 = vadd.f32 1e-08, %v2830_v28  ;;  %v2864_v49 = vadd.f32 1e-08, %v2832_v34  ;;  %v2865_v45 = vadd.f32 1e-08, %v2833_v54 }
 0x4a3   :  { %v8487_v57 = vadd.f32 1.0, %v4838_v52  ;;  %v2863_v52 = vadd.f32 1e-08, %v2831_v26  ;;  %v2866_v4 = vadd.f32 1e-08, %v2834_v62 }
 0x4a4   :  { %v2867_v27 = vadd.f32 1e-08, %v2835_v2  ;;  %v2868_v60 = vadd.f32 1e-08, %v2836_v16  ;;  %v2869_v30 = vadd.f32 1e-08, %v2837_v7 }
 0x4a5   :  { %4839 = vrcp.f32 %v8487_v57  ;;  %v3085_v44 = vand.u32 2147483648, %v8487_v57  ;;  %v3083_v35 = vand.u32 2147483647, %v8487_v57  ;;  %vm3079_vm14 = vweird.f32 %v8487_v57 }
 0x4a6   :  { %4841 = vpow2.f32 %v4533_v12  ;;  %v4503_v28 = vmul.f32 -1.442695, %v2855_v18  ;;  %v2870_v34 = vadd.f32 1e-08, %v2838_v3  ;;  %v2871_v54 = vadd.f32 1e-08, %v2839_v25 }
 0x4a7   :  { %4843 = vpow2.f32 %v4504_v29  ;;  %v3086_v39 = vor.u32 1.1754944e-38, %v3085_v44  ;;  %vm3084_vm1 = vcmp.eq.f32.partialorder %v3083_v35, 8.507059e+37  ;;  %v4505_v62 = vmul.f32 -1.442695, %v2857_v0 }
 0x4a8   :  { %4845 = vpow2.f32 %v4502_v17  ;;  %v8555_v2 = vadd.f32 1e-08, %v2841_v55  ;;  %v4507_v16 = vmul.f32 -1.442695, %v2859_v23  ;;  %v8561_v18 = vadd.f32 1e-08, %v2843_v43 }
 0x4a9   :  { %v4508_v44 = vmul.f32 -1.442695, %v2860_v15  ;;  %v8563_v17 = vadd.f32 1e-08, %v2844_v42  ;;  %v8565_v3 = vadd.f32 1e-08, %v2845_v41 }
 0x4aa   :  { %v8567_v25 = vadd.f32 1e-08, %v2846_v6  ;;  %v8570_v55 = vadd.f32 1e-08, %v2847_v37  ;;  %v4509_v0 = vmul.f32 -1.442695, %v2861_v5 }
 0x4ab   :  { %v4840_v8 = vpop.eup %4839  ;;  %v4510_v43 = vmul.f32 -1.442695, %v2862_v47  ;;  %v4511_v6 = vmul.f32 -1.442695, %v2863_v52  ;;  %v8585_v37 = vadd.f32 1e-08, %v8525_v33 }
 0x4ac   :  { %v4842_v19 = vpop.eup %4841  ;;  %v3075_v53 = vmul.f32 %v4840_v8, %v8487_v57  ;;  %vm3080_vm13 = vweird.f32 %v4840_v8  ;;  %v8550_v57 = vld [vmem:[%s9890_s5] ss:$0 sm:$0xff]  ;;  %v4513_v47 = vmul.f32 -1.442695, %v2865_v45  ;;  %v8599_v45 = vadd.f32 1e-08, %v8531_v36 }
 0x4ad   :  { %v8535_v14 = vadd.f32 1.0, %v4842_v19  ;;  %v4844_v12 = vpop.eup %4843  ;;  %vm3081_vm15 = vmor %vm3079_vm14, %vm3080_vm13 }
 0x4ae   :  { %v3076_v32 = vsub.f32 1.0, %v3075_v53  ;;  %v8543_v50 = vadd.f32 1.0, %v4844_v12  ;;  %v4846_v7 = vpop.eup %4845 }
 0x4af   :  { %10554 = vst [vmem:[#allocation10_spill] sm:$0xff] %v8535_v14 }
 0x4b0   :  { %v3077_v31 = vmul.f32 %v4840_v8, %v3076_v32  ;;  %4847 = vrcp.f32 %v8543_v50  ;;  %v8559_v32 = vadd.f32 1e-08, %v8509_v46  ;;  %v8573_v46 = vadd.f32 1e-08, %v8518_v40 }
 0x4b1   :  { %4849 = vrcp.f32 %v8535_v14  ;;  %v4512_v40 = vmul.f32 -1.442695, %v2864_v49  ;;  %v3055_v52 = vand.u32 2147483648, %v8543_v50  ;;  %v3053_v49 = vand.u32 2147483647, %v8543_v50 }
 0x4b2   :  { %v3078_v56 = vadd.f32 %v4840_v8, %v3077_v31  ;;  %4851 = vpow2.f32 %v4503_v28  ;;  %v8575_v31 = vadd.f32 1.0, %v4846_v7  ;;  %v4516_v28 = vmul.f32 -1.442695, %v2868_v60 }
 0x4b3   :  { %4853 = vpow2.f32 %v4505_v62  ;;  %vm3049_vm3 = vweird.f32 %v8543_v50  ;;  %v4518_v7 = vmul.f32 -1.442695, %v2870_v34  ;;  %vm3054_vm5 = vcmp.eq.f32.partialorder %v3053_v49, 8.507059e+37 }
 0x4b4   :  { %v3082_v29 = vsel %vm3081_vm15, %v4840_v8, %v3078_v56  ;;  %v8553_v8 = vadd.f32 1e-08, %v2840_v59  ;;  %4855 = vpow2.f32 %v4507_v16  ;;  %v4514_v56 = vmul.f32 -1.442695, %v2866_v4 }
 0x4b5   :  { %v3087_v19 = vsel %vm3084_vm1, %v3086_v39, %v3082_v29  ;;  %4857 = vpow2.f32 %v4508_v44  ;;  %v4515_v39 = vmul.f32 -1.442695, %v2867_v27  ;;  %v4517_v27 = vmul.f32 -1.442695, %v2869_v30 }
 0x4b6   :  { %v3500_v26 = vmul.f32 %v8533_v13, %v3087_v19  ;;  %v4848_v23 = vpop.eup %4847  ;;  %4859 = vrcp.f32 %v8575_v31  ;;  %v8596_v19 = vadd.f32 1e-08, %v8528_v9  ;;  %v3056_v16 = vor.u32 1.1754944e-38, %v3055_v52 }
 0x4b7   :  { %v3045_v41 = vmul.f32 %v4848_v23, %v8543_v50  ;;  %v8579_v35 = vpop.eup %4849  ;;  %4861 = vpow2.f32 %v4509_v0  ;;  %vm3050_vm2 = vweird.f32 %v4848_v23  ;;  %v4520_v50 = vmul.f32 -1.442695, %v8553_v8 }
 0x4b8   :  { %v3533_v53 = vadd.f32 %v8540_v11, %v3500_v26  ;;  %10555 = vst [vmem:[#allocation26_spill] sm:$0xff] %v8579_v35  ;;  %v8589_v12 = vpop.eup %4851  ;;  %4863 = vpow2.f32 %v4510_v43  ;;  %vm3051_vm4 = vmor %vm3049_vm3, %vm3050_vm2  ;;  %v4521_v30 = vmul.f32 -1.442695, %v8555_v2  ;;  %vm3019_vm7 = vweird.f32 %v8575_v31 }
 0x4b9   :  { %v3046_v5 = vsub.f32 1.0, %v3045_v41  ;;  %4865 = vpow2.f32 %v4511_v6  ;;  %v3023_v41 = vand.u32 2147483647, %v8575_v31  ;;  %v3025_v6 = vand.u32 2147483648, %v8575_v31 }
 0x4ba   :  { %v3565_v59 = vmul.f32 %v3533_v53, %v7716_v63  ;;  %v8582_v63 = vadd.f32 1e-08, %v8522_v10  ;;  %v8592_v10 = vpop.eup %4853  ;;  %4867 = vpow2.f32 %v4512_v40  ;;  %v4519_v53 = vmul.f32 -1.442695, %v2871_v54 }
 0x4bb   :  { %v3047_v33 = vmul.f32 %v4848_v23, %v3046_v5  ;;  %v4856_v29 = vpop.eup %4855  ;;  %4869 = vpow2.f32 %v4513_v47  ;;  %v4522_v54 = vmul.f32 -1.442695, %v8559_v32  ;;  %v4524_v32 = vmul.f32 -1.442695, %v8563_v17 }
 0x4bc   :  { %v3601_v42 = vmul.f32 %v8550_v57, %v3565_v59  ;;  %v8601_v26 = vpop.eup %4857  ;;  %4871 = vpow2.f32 %v4514_v56  ;;  %v4525_v5 = vmul.f32 -1.442695, %v8565_v3  ;;  %v8629_v56 = vadd.f32 1.0, %v4856_v29 }
 0x4bd   :  { %v3048_v4 = vadd.f32 %v4848_v23, %v3047_v33  ;;  %v4860_v62 = vpop.eup %4859  ;;  %4873 = vpow2.f32 %v4515_v39  ;;  %v4526_v33 = vmul.f32 -1.442695, %v8567_v25  ;;  %v4527_v49 = vmul.f32 -1.442695, %v8570_v55 }
 0x4be   :  { %v3641_v15 = vsel %vm2607_vm0, %v3601_v42, 0.0  ;;  %v8604_v9 = vpop.eup %4861  ;;  %v3015_v36 = vmul.f32 %v4860_v62, %v8575_v31  ;;  %4875 = vpow2.f32 %v4516_v28  ;;  %v4523_v42 = vmul.f32 -1.442695, %v8561_v18 }
 0x4bf   :  { %3642 = vadd.xlane.f32.xlu2 %v3641_v15  ;;  %v3052_v44 = vsel %vm3051_vm4, %v4848_v23, %v3048_v4  ;;  %v8607_v60 = vpop.eup %4863  ;;  %4877 = vpow2.f32 %v4517_v27  ;;  %vm3020_vm6 = vweird.f32 %v4860_v62  ;;  %v3026_v17 = vor.u32 1.1754944e-38, %v3025_v6 }
 0x4c0   :  { %v3057_v59 = vsel %vm3054_vm5, %v3056_v16, %v3052_v44  ;;  %v8611_v0 = vpop.eup %4865  ;;  %v3016_v43 = vsub.f32 1.0, %v3015_v36  ;;  %4879 = vpow2.f32 %v4518_v7  ;;  %vm3021_vm8 = vmor %vm3019_vm7, %vm3020_vm6  ;;  %vm3024_vm9 = vcmp.eq.f32.partialorder %v3023_v41, 8.507059e+37 }
 0x4c1   :  { %v3498_v34 = vmul.f32 %v8533_v13, %v3057_v59  ;;  %v8615_v23 = vpop.eup %4867  ;;  %4881 = vpow2.f32 %v4519_v53  ;;  %v4528_v4 = vmul.f32 -1.442695, %v8573_v46  ;;  %v4529_v29 = vmul.f32 -1.442695, %v8582_v63 }
 0x4c2   :  { %v8620_v8 = vpop.eup %4869  ;;  %v3017_v40 = vmul.f32 %v4860_v62, %v3016_v43  ;;  %4883 = vpow2.f32 %v4520_v50  ;;  %v3100_v7 = vand.u32 2147483648, %v8629_v56  ;;  %v4531_v46 = vmul.f32 -1.442695, %v8596_v19 }
 0x4c3   :  { %v3531_v2 = vadd.f32 %v8540_v11, %v3498_v34  ;;  %v8623_v15 = vpop.eup %4871  ;;  %4885 = vpow2.f32 %v4521_v30  ;;  %v4532_v59 = vmul.f32 -1.442695, %v8599_v45  ;;  %v3098_v34 = vand.u32 2147483647, %v8629_v56 }
 0x4c4   :  { %v4874_v18 = vpop.eup %4873  ;;  %v3018_v52 = vadd.f32 %v4860_v62, %v3017_v40  ;;  %4887 = vpow2.f32 %v4522_v54  ;;  %v8646_v54 = vor.u32 1.1754944e-38, %v3100_v7  ;;  %v8649_v43 = vadd.f32 1.0, %v8589_v12 }
 0x4c5   :  { %v3563_v47 = vmul.f32 %v3531_v2, %v8162_v48  ;;  %v4876_v39 = vpop.eup %4875  ;;  %4889 = vpow2.f32 %v4523_v42  ;;  %v8652_v19 = vadd.f32 1.0, %v8592_v10  ;;  %v8655_v42 = vadd.f32 1.0, %v8601_v26 }
 0x4c6   :  { %v4878_v3 = vpop.eup %4877  ;;  %v3022_v28 = vsel %vm3021_vm8, %v4860_v62, %v3018_v52  ;;  %4891 = vpow2.f32 %v4524_v32  ;;  %v4530_v62 = vmul.f32 -1.442695, %v8585_v37  ;;  %v8662_v6 = vadd.f32 1.0, %v8607_v60 }
 0x4c7   :  { %v3599_v31 = vmul.f32 %v8550_v57, %v3563_v47  ;;  %v4880_v48 = vpop.eup %4879  ;;  %v3027_v27 = vsel %vm3024_vm9, %v3026_v17, %v3022_v28  ;;  %4893 = vpow2.f32 %v4525_v5  ;;  %v8665_v12 = vadd.f32 1.0, %v8611_v0 }
 0x4c8   :  { %v4882_v25 = vpop.eup %4881  ;;  %v3496_v16 = vmul.f32 %v8533_v13, %v3027_v27  ;;  %4895 = vpow2.f32 %v4526_v33  ;;  %v8668_v10 = vadd.f32 1.0, %v8615_v23  ;;  %v8671_v26 = vadd.f32 1.0, %v8620_v8 }
 0x4c9   :  { %v3635_v55 = vsel %vm2607_vm0, %v3599_v31, 0.0  ;;  %v4884_v53 = vpop.eup %4883  ;;  %4897 = vpow2.f32 %v4527_v49  ;;  %v8678_v60 = vadd.f32 1.0, %v4874_v18  ;;  %v8680_v0 = vadd.f32 1.0, %v4876_v39 }
 0x4ca   :  { %3636 = vadd.xlane.f32.xlu1 %v3635_v55  ;;  %v4886_v44 = vpop.eup %4885  ;;  %v3529_v63 = vadd.f32 %v8540_v11, %v3496_v16  ;;  %4899 = vpow2.f32 %v4528_v4  ;;  %v8682_v47 = vadd.f32 1.0, %v4878_v3  ;;  %v8684_v23 = vadd.f32 1.0, %v4880_v48 }
 0x4cb   :  { %v4888_v36 = vpop.eup %4887  ;;  %4901 = vpow2.f32 %v4529_v29  ;;  %v8686_v8 = vadd.f32 1.0, %v4882_v25  ;;  %v8688_v33 = vadd.f32 1.0, %v4884_v53  ;;  %v8690_v49 = vadd.f32 1.0, %v4886_v44 }
 0x4cc   :  { %v4890_v50 = vpop.eup %4889  ;;  %v3561_v30 = vmul.f32 %v3529_v63, %v8159_v21  ;;  %4903 = vpow2.f32 %v4530_v62  ;;  %v8659_v21 = vadd.f32 1.0, %v8604_v9  ;;  %v8676_v9 = vadd.f32 1.0, %v8623_v15  ;;  %10557 = vst [vmem:[#allocation109_spill] sm:$0xff] %v8682_v47 }
 0x4cd   :  { %v4892_v37 = vpop.eup %4891  ;;  %4905 = vpow2.f32 %v4531_v46  ;;  %v8692_v17 = vadd.f32 1.0, %v4888_v36  ;;  %v8695_v18 = vadd.f32 1.0, %v4890_v50  ;;  %v3070_v3 = vand.u32 2147483648, %v8652_v19 }
 0x4ce   :  { %v4894_v45 = vpop.eup %4893  ;;  %v3597_v41 = vmul.f32 %v8550_v57, %v3561_v30  ;;  %4907 = vpow2.f32 %v4532_v59  ;;  %10556 = vst [vmem:[#allocation102_spill] sm:$0xff] %v8676_v9  ;;  %v8697_v39 = vadd.f32 1.0, %v4892_v37  ;;  %vm3094_vm10 = vweird.f32 %v8629_v56 }
 0x4cf   :  { %v4896_v2 = vpop.eup %4895  ;;  %4909 = vrcp.f32 %v8629_v56  ;;  %v8701_v28 = vadd.f32 1.0, %v4894_v45  ;;  %v3068_v55 = vand.u32 2147483647, %v8652_v19  ;;  %v3038_v53 = vand.u32 2147483647, %v8649_v43 }
 0x4d0   :  { %v4898_v40 = vpop.eup %4897  ;;  %v3629_v32 = vsel %vm2607_vm0, %v3597_v41, 0.0  ;;  %4911 = vrcp.f32 %v8652_v19  ;;  %v8703_v48 = vadd.f32 1.0, %v4896_v2  ;;  %v3040_v62 = vand.u32 2147483648, %v8649_v43 }
 0x4d1   :  { %v4900_v5 = vpop.eup %4899  ;;  %3630 = vadd.xlane.f32.xlu0 %v3629_v32  ;;  %4913 = vrcp.f32 %v8649_v43  ;;  %v8705_v4 = vadd.f32 1.0, %v4898_v40  ;;  %vm8721_vm11 = vcmp.eq.f32.partialorder %v3098_v34, 8.507059e+37  ;;  %vm3064_vm12 = vweird.f32 %v8652_v19 }
 0x4d2   :  { %v4902_v52 = vpop.eup %4901  ;;  %4915 = vrcp.f32 %v8655_v42  ;;  %v8709_v27 = vadd.f32 1.0, %v4900_v5  ;;  %v3071_v36 = vor.u32 1.1754944e-38, %v3070_v3  ;;  %vm3034_vm14 = vweird.f32 %v8649_v43 }
 0x4d3   :  { %v4904_v15 = vpop.eup %4903  ;;  %v8711_v25 = vadd.f32 1.0, %v4902_v52  ;;  %4917 = vrcp.f32 %v8659_v21  ;;  %v3145_v30 = vand.u32 2147483648, %v8662_v6  ;;  %vm8737_vm15 = vcmp.eq.f32.partialorder %v3068_v55, 8.507059e+37 }
 0x4d4   :  { %v4906_v31 = vpop.eup %4905  ;;  %v8715_v7 = vadd.f32 1.0, %v4904_v15  ;;  %4919 = vrcp.f32 %v8662_v6  ;;  %v3041_v2 = vor.u32 1.1754944e-38, %v3040_v62  ;;  %vm8747_vm2 = vcmp.eq.f32.partialorder %v3038_v53, 8.507059e+37 }
 0x4d5   :  { %v4908_v29 = vpop.eup %4907  ;;  %v8725_v63 = vadd.f32 1.0, %v4906_v31  ;;  %4921 = vrcp.f32 %v8665_v12  ;;  %v3143_v52 = vand.u32 2147483647, %v8662_v6  ;;  %vm3139_vm4 = vweird.f32 %v8662_v6 }
 0x4d6   :  { %v4910_v16 = vpop.eup %4909  ;;  %v8729_v50 = vadd.f32 1.0, %v4908_v29  ;;  %4923 = vrcp.f32 %v8668_v10  ;;  %v3146_v53 = vor.u32 1.1754944e-38, %v3145_v30 }
 0x4d7   :  { %v3090_v44 = vmul.f32 %v4910_v16, %v8629_v56  ;;  %v4912_v59 = vpop.eup %4911  ;;  %vm3095_vm13 = vweird.f32 %v4910_v16  ;;  %4925 = vrcp.f32 %v8671_v26  ;;  %vm8775_vm7 = vcmp.eq.f32.partialorder %v3143_v52, 8.507059e+37 }
 0x4d8   :  { %v8734_v34 = vpop.eup %4913  ;;  %v3060_v45 = vmul.f32 %v4912_v59, %v8652_v19  ;;  %vm3065_vm1 = vweird.f32 %v4912_v59  ;;  %4927 = vrcp.f32 %v8676_v9  ;;  %vm3096_vm5 = vmor %vm3094_vm10, %vm3095_vm13 }
 0x4d9   :  { %v3091_v37 = vsub.f32 1.0, %v3090_v44  ;;  %v8742_v40 = vpop.eup %4915  ;;  %v3030_v32 = vmul.f32 %v8734_v34, %v8649_v43  ;;  %4929 = vrcp.f32 %v8678_v60  ;;  %vm3035_vm3 = vweird.f32 %v8734_v34  ;;  %vm3066_vm8 = vmor %vm3064_vm12, %vm3065_vm1 }
 0x4da   :  { %v8752_v15 = vpop.eup %4917  ;;  %v3061_v31 = vsub.f32 1.0, %v3060_v45  ;;  %4931 = vrcp.f32 %v8680_v0  ;;  %vm3036_vm9 = vmor %vm3034_vm14, %vm3035_vm3  ;;  %vm3124_vm12 = vweird.f32 %v8659_v21  ;;  %vm3110_vm1 = vweird.f32 %v8742_v40 }
 0x4db   :  { %v3092_v3 = vmul.f32 %v4910_v16, %v3091_v37  ;;  %v8756_v29 = vpop.eup %4919  ;;  %v3031_v55 = vsub.f32 1.0, %v3030_v32  ;;  %v3120_v62 = vmul.f32 %v8752_v15, %v8659_v21  ;;  %4933 = vrcp.f32 %v8682_v47 }
 0x4dc   :  { %v8762_v44 = vpop.eup %4921  ;;  %v3062_v37 = vmul.f32 %v4912_v59, %v3061_v31  ;;  %v3135_v45 = vmul.f32 %v8756_v29, %v8662_v6  ;;  %4935 = vrcp.f32 %v8684_v23  ;;  %vm3140_vm6 = vweird.f32 %v8756_v29 }
 0x4dd   :  { %v3093_v35 = vadd.f32 %v4910_v16, %v3092_v3  ;;  %v8767_v14 = vpop.eup %4923  ;;  %v3032_v30 = vmul.f32 %v8734_v34, %v3031_v55  ;;  %v3121_v3 = vsub.f32 1.0, %v3120_v62  ;;  %4937 = vrcp.f32 %v8686_v8 }
 0x4de   :  { %v8779_v31 = vpop.eup %4925  ;;  %v3063_v9 = vadd.f32 %v4912_v59, %v3062_v37  ;;  %v3136_v20 = vsub.f32 1.0, %v3135_v45  ;;  %4939 = vrcp.f32 %v8688_v33  ;;  %vm3125_vm10 = vweird.f32 %v8752_v15 }
 0x4df   :  { %v3097_v47 = vsel %vm3096_vm5, %v4910_v16, %v3093_v35  ;;  %v8782_v56 = vpop.eup %4927  ;;  %v3033_v52 = vadd.f32 %v8734_v34, %v3032_v30  ;;  %v3122_v35 = vmul.f32 %v8752_v15, %v3121_v3  ;;  %4941 = vrcp.f32 %v8690_v49  ;;  %vm8847_vm13 = vmor %vm3124_vm12, %vm3125_vm10 }
 0x4e0   :  { %v3102_v55 = vsel %vm8721_vm11, %v8646_v54, %v3097_v47  ;;  %v8793_v16 = vpop.eup %4929  ;;  %v3067_v37 = vsel %vm3066_vm8, %v4912_v59, %v3063_v9  ;;  %v3137_v54 = vmul.f32 %v8756_v29, %v3136_v20  ;;  %4943 = vrcp.f32 %v8692_v17  ;;  %vm3141_vm11 = vmor %vm3139_vm4, %vm3140_vm6 }
 0x4e1   :  { %v3501_v62 = vmul.f32 %v8533_v13, %v3102_v55  ;;  %v8802_v19 = vpop.eup %4931  ;;  %v3072_v47 = vsel %vm8737_vm15, %v3071_v36, %v3067_v37  ;;  %v3037_v46 = vsel %vm3036_vm9, %v8734_v34, %v3033_v52  ;;  %v3123_v9 = vadd.f32 %v8752_v15, %v3122_v35 }
 0x4e2   :  { %v8809_v59 = vpop.eup %4933  ;;  %v3499_v43 = vmul.f32 %v8533_v13, %v3072_v47  ;;  %4945 = vrcp.f32 %v8695_v18  ;;  %v3042_v20 = vsel %vm8747_vm2, %v3041_v2, %v3037_v46  ;;  %v3138_v34 = vadd.f32 %v8756_v29, %v3137_v54 }
 0x4e3   :  { %v3534_v45 = vadd.f32 %v8540_v11, %v3501_v62  ;;  %v8816_v30 = vpop.eup %4935  ;;  %4947 = vrcp.f32 %v8697_v39  ;;  %v3497_v36 = vmul.f32 %v8533_v13, %v3042_v20  ;;  %vm3109_vm15 = vweird.f32 %v8655_v42 }
 0x4e4   :  { %v8822_v41 = vpop.eup %4937  ;;  %v3532_v55 = vadd.f32 %v8540_v11, %v3499_v43  ;;  %4949 = vrcp.f32 %v8701_v28  ;;  %v3142_v52 = vsel %vm3141_vm11, %v8756_v29, %v3138_v34  ;;  %v3130_v43 = vand.u32 2147483648, %v8659_v21  ;;  %vm3111_vm5 = vmor %vm3109_vm15, %vm3110_vm1 }
 0x4e5   :  { %v3566_v3 = vmul.f32 %v3534_v45, %v7759_v61  ;;  %v8832_v2 = vpop.eup %4939  ;;  %4951 = vrcp.f32 %v8703_v48  ;;  %v3530_v5 = vadd.f32 %v8540_v11, %v3497_v36  ;;  %v3128_v61 = vand.u32 2147483647, %v8659_v21 }
 0x4e6   :  { %v8838_v35 = vpop.eup %4941  ;;  %v3564_v37 = vmul.f32 %v3532_v55, %v7676_v38  ;;  %4953 = vrcp.f32 %v8705_v4  ;;  %v3147_v6 = vsel %vm8775_vm7, %v3146_v53, %v3142_v52  ;;  %v3127_v38 = vsel %vm8847_vm13, %v8752_v15, %v3123_v9 }
 0x4e7   :  { %v3602_v62 = vmul.f32 %v8550_v57, %v3566_v3  ;;  %v8851_v29 = vpop.eup %4943  ;;  %4955 = vrcp.f32 %v8709_v27  ;;  %v3562_v47 = vmul.f32 %v3530_v5, %v8156_v22  ;;  %v3504_v46 = vmul.f32 %v8533_v13, %v3147_v6 }
 0x4e8   :  { %v8859_v32 = vpop.eup %4945  ;;  %v3600_v45 = vmul.f32 %v8550_v57, %v3564_v37  ;;  %4957 = vrcp.f32 %v8711_v25  ;;  %v3105_v15 = vmul.f32 %v8742_v40, %v8655_v42  ;;  %vm3129_vm14 = vcmp.eq.f32.partialorder %v3128_v61, 8.507059e+37 }
 0x4e9   :  { %v3644_v53 = vsel %vm2607_vm0, %v3602_v62, 0.0  ;;  %v8865_v20 = vpop.eup %4947  ;;  %4959 = vrcp.f32 %v8715_v7  ;;  %v3598_v22 = vmul.f32 %v8550_v57, %v3562_v47  ;;  %v3537_v36 = vadd.f32 %v8540_v11, %v3504_v46 }
 0x4ea   :  { %3645 = vadd.xlane.f32.xlu2 %v3644_v53  ;;  %v8872_v9 = vpop.eup %4949  ;;  %v3638_v34 = vsel %vm2607_vm0, %v3600_v45, 0.0  ;;  %4961 = vrcp.f32 %v8725_v63  ;;  %v3131_v21 = vor.u32 1.1754944e-38, %v3130_v43  ;;  %v3106_v52 = vsub.f32 1.0, %v3105_v15 }
 0x4eb   :  { %v8876_v3 = vpop.eup %4951  ;;  %3639 = vadd.xlane.f32.xlu1 %v3638_v34  ;;  %v3632_v55 = vsel %vm2607_vm0, %v3598_v22, 0.0  ;;  %v3569_v5 = vmul.f32 %v3537_v36, %v7934_v1  ;;  %v3113_v6 = vand.u32 2147483647, %v8655_v42  ;;  %v3115_v61 = vand.u32 2147483648, %v8655_v42 }
 0x4ec   :  { %v8881_v62 = vpop.eup %4953  ;;  %3633 = vadd.xlane.f32.xlu0 %v3632_v55  ;;  %v3132_v37 = vsel %vm3129_vm14, %v3131_v21, %v3127_v38  ;;  %v3107_v1 = vmul.f32 %v8742_v40, %v3106_v52  ;;  %v3180_v53 = vmul.f32 %v8779_v31, %v8671_v26  ;;  %4963 = vrcp.f32 %v8729_v50 }
 0x4ed   :  { %v8886_v54 = vpop.eup %4955  ;;  %v3605_v47 = vmul.f32 %v8550_v57, %v3569_v5  ;;  %v3503_v46 = vmul.f32 %v8533_v13, %v3132_v37  ;;  %vm8896_vm2 = vcmp.eq.f32.partialorder %v3113_v6, 8.507059e+37  ;;  %v3116_v43 = vor.u32 1.1754944e-38, %v3115_v61 }
 0x4ee   :  { %v8893_v45 = vpop.eup %4957  ;;  %vm3184_vm3 = vweird.f32 %v8671_v26  ;;  %v3108_v15 = vadd.f32 %v8742_v40, %v3107_v1  ;;  %v3181_v34 = vsub.f32 1.0, %v3180_v53  ;;  %vm3185_vm4 = vweird.f32 %v8779_v31 }
 0x4ef   :  { %v8901_v22 = vpop.eup %4959  ;;  %v3536_v36 = vadd.f32 %v8540_v11, %v3503_v46  ;;  %v3653_v55 = vsel %vm2607_vm0, %v3605_v47, 0.0  ;;  %v3188_v5 = vand.u32 2147483647, %v8671_v26  ;;  %v3190_v52 = vand.u32 2147483648, %v8671_v26  ;;  %vm3186_vm9 = vmor %vm3184_vm3, %vm3185_vm4 }
 0x4f0   :  { %v8906_v21 = vpop.eup %4961  ;;  %v3165_v37 = vmul.f32 %v8767_v14, %v8668_v10  ;;  %v3112_v61 = vsel %vm3111_vm5, %v8742_v40, %v3108_v15  ;;  %v3182_v46 = vmul.f32 %v8779_v31, %v3181_v34  ;;  %vm3169_vm6 = vweird.f32 %v8668_v10 }
 0x4f1   :  { %v3568_v6 = vmul.f32 %v3536_v36, %v7881_v51  ;;  %v3117_v42 = vsel %vm8896_vm2, %v3116_v43, %v3112_v61  ;;  %vm8923_vm7 = vcmp.eq.f32.partialorder %v3188_v5, 8.507059e+37  ;;  %vm3170_vm8 = vweird.f32 %v8767_v14 }
 0x4f2   :  { %3654 = vadd.xlane.f32.xlu2 %v3653_v55  ;;  %v3166_v1 = vsub.f32 1.0, %v3165_v37  ;;  %v3502_v51 = vmul.f32 %v8533_v13, %v3117_v42  ;;  %v3183_v40 = vadd.f32 %v8779_v31, %v3182_v46  ;;  %v3173_v36 = vand.u32 2147483647, %v8668_v10  ;;  %v8932_v15 = vpop.eup %4963  ;;  %vm3171_vm11 = vmor %vm3169_vm6, %vm3170_vm8 }
 0x4f3   :  { %v3604_v53 = vmul.f32 %v8550_v57, %v3568_v6  ;;  %v3191_v38 = vor.u32 1.1754944e-38, %v3190_v52  ;;  %v3175_v34 = vand.u32 2147483648, %v8668_v10  ;;  %v3150_v55 = vmul.f32 %v8762_v44, %v8665_v12 }
 0x4f4   :  { %v3167_v43 = vmul.f32 %v8767_v14, %v3166_v1  ;;  %v3535_v37 = vadd.f32 %v8540_v11, %v3502_v51  ;;  %v3187_v6 = vsel %vm3186_vm9, %v8779_v31, %v3183_v40  ;;  %vm8945_vm10 = vcmp.eq.f32.partialorder %v3173_v36, 8.507059e+37 }
 0x4f5   :  { %v3650_v5 = vsel %vm2607_vm0, %v3604_v53, 0.0  ;;  %v3192_v26 = vsel %vm8923_vm7, %v3191_v38, %v3187_v6  ;;  %v3176_v46 = vor.u32 1.1754944e-38, %v3175_v34  ;;  %v3151_v42 = vsub.f32 1.0, %v3150_v55 }
 0x4f6   :  { %3651 = vadd.xlane.f32.xlu1 %v3650_v5  ;;  %v3168_v52 = vadd.f32 %v8767_v14, %v3167_v43  ;;  %v3567_v1 = vmul.f32 %v3535_v37, %v7815_v58  ;;  %v3507_v53 = vmul.f32 %v8533_v13, %v3192_v26  ;;  %vm3155_vm12 = vweird.f32 %v8762_v44 }
 0x4f7   :  { %v3158_v31 = vand.u32 2147483647, %v8665_v12  ;;  %v3152_v51 = vmul.f32 %v8762_v44, %v3151_v42  ;;  %v3160_v40 = vand.u32 2147483648, %v8665_v12  ;;  %v3225_v58 = vmul.f32 %v8802_v19, %v8680_v0 }
 0x4f8   :  { %v3172_v47 = vsel %vm3171_vm11, %v8767_v14, %v3168_v52  ;;  %v3603_v36 = vmul.f32 %v8550_v57, %v3567_v1  ;;  %v3540_v38 = vadd.f32 %v8540_v11, %v3507_v53  ;;  %vm3154_vm13 = vweird.f32 %v8665_v12  ;;  %v10574_v1 = vld [vmem:[#allocation15_spill] sm:$0xff] }
 0x4f9   :  { %v3177_v10 = vsel %vm8945_vm10, %v3176_v46, %v3172_v47  ;;  %v3153_v14 = vadd.f32 %v8762_v44, %v3152_v51  ;;  %vm3159_vm14 = vcmp.eq.f32.partialorder %v3158_v31, 8.507059e+37  ;;  %v3226_v34 = vsub.f32 1.0, %v3225_v58  ;;  %vm3156_vm15 = vmor %vm3154_vm13, %vm3155_vm12 }
 0x4fa   :  { %v3506_v43 = vmul.f32 %v8533_v13, %v3177_v10  ;;  %v3647_v55 = vsel %vm2607_vm0, %v3603_v36, 0.0  ;;  %v3572_v5 = vmul.f32 %v3540_v38, %v8066_v24  ;;  %v3161_v37 = vor.u32 1.1754944e-38, %v3160_v40 }
 0x4fb   :  { %vm3230_vm1 = vweird.f32 %v8802_v19  ;;  %3648 = vadd.xlane.f32.xlu0 %v3647_v55  ;;  %v3157_v12 = vsel %vm3156_vm15, %v8762_v44, %v3153_v14  ;;  %v3227_v61 = vmul.f32 %v8802_v19, %v3226_v34  ;;  %v3233_v26 = vand.u32 2147483647, %v8680_v0  ;;  %v10575_v55 = vld [vmem:[#allocation8_spill] sm:$0xff] }
 0x4fc   :  { %v3539_v6 = vadd.f32 %v8540_v11, %v3506_v43  ;;  %v3608_v52 = vmul.f32 %v8550_v57, %v3572_v5  ;;  %v3162_v46 = vsel %vm3159_vm14, %v3161_v37, %v3157_v12  ;;  %v3235_v24 = vand.u32 2147483648, %v8680_v0 }
 0x4fd   :  { %v3210_v42 = vmul.f32 %v8793_v16, %v8678_v60  ;;  %v3505_v31 = vmul.f32 %v8533_v13, %v3162_v46  ;;  %v3228_v47 = vadd.f32 %v8802_v19, %v3227_v61  ;;  %vm3229_vm2 = vweird.f32 %v8680_v0 }
 0x4fe   :  { %v3571_v53 = vmul.f32 %v3539_v6, %v10574_v1  ;;  %v3662_v44 = vsel %vm2607_vm0, %v3608_v52, 0.0  ;;  %vm3231_vm3 = vmor %vm3229_vm2, %vm3230_vm1  ;;  %vm3234_vm4 = vcmp.eq.f32.partialorder %v3233_v26, 8.507059e+37  ;;  %v3236_v51 = vor.u32 1.1754944e-38, %v3235_v24  ;;  %v10576_v6 = vld [vmem:[#allocation102_spill] sm:$0xff] }
 0x4ff   :  { %v3211_v40 = vsub.f32 1.0, %v3210_v42  ;;  %3663 = vadd.xlane.f32.xlu2 %v3662_v44  ;;  %v3538_v36 = vadd.f32 %v8540_v11, %v3505_v31  ;;  %v3232_v38 = vsel %vm3231_vm3, %v8802_v19, %v3228_v47  ;;  %vm3215_vm5 = vweird.f32 %v8793_v16  ;;  %v10577_v31 = vld [vmem:[#allocation11_spill] sm:$0xff] }
 0x500   :  { %v3607_v58 = vmul.f32 %v8550_v57, %v3571_v53  ;;  %v3237_v10 = vsel %vm3234_vm4, %v3236_v51, %v3232_v38  ;;  %v3218_v43 = vand.u32 2147483647, %v8678_v60  ;;  %v3220_v14 = vand.u32 2147483648, %v8678_v60 }
 0x501   :  { %v3212_v0 = vmul.f32 %v8793_v16, %v3211_v40  ;;  %v3570_v5 = vmul.f32 %v3538_v36, %v10575_v55  ;;  %v3510_v37 = vmul.f32 %v8533_v13, %v3237_v10  ;;  %v3195_v12 = vmul.f32 %v8782_v56, %v10576_v6 }
 0x502   :  { %v3659_v34 = vsel %vm2607_vm0, %v3607_v58, 0.0  ;;  %vm3214_vm6 = vweird.f32 %v8678_v60  ;;  %vm3219_vm7 = vcmp.eq.f32.partialorder %v3218_v43, 8.507059e+37  ;;  %v3221_v61 = vor.u32 1.1754944e-38, %v3220_v14 }
 0x503   :  { %3660 = vadd.xlane.f32.xlu1 %v3659_v34  ;;  %v3213_v19 = vadd.f32 %v8793_v16, %v3212_v0  ;;  %v3606_v26 = vmul.f32 %v8550_v57, %v3570_v5  ;;  %v3543_v52 = vadd.f32 %v8540_v11, %v3510_v37  ;;  %vm3216_vm8 = vmor %vm3214_vm6, %vm3215_vm5  ;;  %v3196_v46 = vsub.f32 1.0, %v3195_v12 }
 0x504   :  { %vm3200_vm9 = vweird.f32 %v8782_v56  ;;  %v3203_v42 = vand.u32 2147483647, %v10576_v6  ;;  %v3205_v1 = vand.u32 2147483648, %v10576_v6  ;;  %v3270_v60 = vmul.f32 %v8822_v41, %v8686_v8 }
 0x505   :  { %v3217_v24 = vsel %vm3216_vm8, %v8793_v16, %v3213_v19  ;;  %v3656_v53 = vsel %vm2607_vm0, %v3606_v26, 0.0  ;;  %v3575_v47 = vmul.f32 %v3543_v52, %v10577_v31  ;;  %v3197_v51 = vmul.f32 %v8782_v56, %v3196_v46  ;;  %v10581_v31 = vld [vmem:[#allocation109_spill] sm:$0xff] }
 0x506   :  { %v3222_v44 = vsel %vm3219_vm7, %v3221_v61, %v3217_v24  ;;  %3657 = vadd.xlane.f32.xlu0 %v3656_v53  ;;  %vm3199_vm10 = vweird.f32 %v10576_v6  ;;  %vm9021_vm11 = vcmp.eq.f32.partialorder %v3203_v42, 8.507059e+37  ;;  %v3271_v58 = vsub.f32 1.0, %v3270_v60  ;;  %v10580_v6 = vld [vmem:[#allocation17_spill] sm:$0xff] }
 0x507   :  { %v3509_v40 = vmul.f32 %v8533_v13, %v3222_v44  ;;  %v3611_v36 = vmul.f32 %v8550_v57, %v3575_v47  ;;  %v3198_v38 = vadd.f32 %v8782_v56, %v3197_v51  ;;  %v3206_v10 = vor.u32 1.1754944e-38, %v3205_v1  ;;  %vm3201_vm13 = vmor %vm3199_vm10, %vm3200_vm9 }
 0x508   :  { %vm3275_vm12 = vweird.f32 %v8822_v41  ;;  %v3272_v43 = vmul.f32 %v8822_v41, %v3271_v58  ;;  %v3278_v14 = vand.u32 2147483647, %v8686_v8  ;;  %v3280_v34 = vand.u32 2147483648, %v8686_v8 }
 0x509   :  { %v3542_v0 = vadd.f32 %v8540_v11, %v3509_v40  ;;  %v3671_v55 = vsel %vm2607_vm0, %v3611_v36, 0.0  ;;  %v3202_v5 = vsel %vm3201_vm13, %v8782_v56, %v3198_v38  ;;  %vm3274_vm14 = vweird.f32 %v8686_v8  ;;  %v10584_v40 = vld [vmem:[#allocation9_spill] sm:$0xff] }
 0x50a   :  { %v3255_v37 = vmul.f32 %v8816_v30, %v8684_v23  ;;  %3672 = vadd.xlane.f32.xlu2 %v3671_v55  ;;  %v3207_v19 = vsel %vm9021_vm11, %v3206_v10, %v3202_v5  ;;  %v3273_v61 = vadd.f32 %v8822_v41, %v3272_v43  ;;  %vm3279_vm15 = vcmp.eq.f32.partialorder %v3278_v14, 8.507059e+37  ;;  %vm3276_vm1 = vmor %vm3274_vm14, %vm3275_vm12  ;;  %v10585_v5 = vld [vmem:[#allocation21_spill] sm:$0xff] }
 0x50b   :  { %v3574_v12 = vmul.f32 %v3542_v0, %v10580_v6  ;;  %v3508_v26 = vmul.f32 %v8533_v13, %v3207_v19  ;;  %v3281_v56 = vor.u32 1.1754944e-38, %v3280_v34  ;;  %vm3260_vm2 = vweird.f32 %v8816_v30 }
 0x50c   :  { %v3256_v52 = vsub.f32 1.0, %v3255_v37  ;;  %v3277_v46 = vsel %vm3276_vm1, %v8822_v41, %v3273_v61  ;;  %v3263_v24 = vand.u32 2147483647, %v8684_v23  ;;  %v3265_v42 = vand.u32 2147483648, %v8684_v23 }
 0x50d   :  { %v3610_v8 = vmul.f32 %v8550_v57, %v3574_v12  ;;  %v3541_v1 = vadd.f32 %v8540_v11, %v3508_v26  ;;  %v3282_v60 = vsel %vm3279_vm15, %v3281_v56, %v3277_v46  ;;  %v3240_v47 = vmul.f32 %v8809_v59, %v10581_v31 }
 0x50e   :  { %v3257_v53 = vmul.f32 %v8816_v30, %v3256_v52  ;;  %v3513_v51 = vmul.f32 %v8533_v13, %v3282_v60  ;;  %vm3259_vm3 = vweird.f32 %v8684_v23  ;;  %vm9058_vm4 = vcmp.eq.f32.partialorder %v3263_v24, 8.507059e+37 }
 0x50f   :  { %v3668_v44 = vsel %vm2607_vm0, %v3610_v8, 0.0  ;;  %v3573_v16 = vmul.f32 %v3541_v1, %v10584_v40  ;;  %v3266_v36 = vor.u32 1.1754944e-38, %v3265_v42  ;;  %v3241_v38 = vsub.f32 1.0, %v3240_v47  ;;  %vm3261_vm5 = vmor %vm3259_vm3, %vm3260_vm2  ;;  %v9111_v40 = vld [vmem:[%s9890_s5] ss:$0 sm:$0xff]  ;;  %s9342_s5 = sld [smem:[#allocation2]] }
 0x510   :  { %3669 = vadd.xlane.f32.xlu1 %v3668_v44  ;;  %v3258_v58 = vadd.f32 %v8816_v30, %v3257_v53  ;;  %v3546_v10 = vadd.f32 %v8540_v11, %v3513_v51  ;;  %vm3245_vm6 = vweird.f32 %v8809_v59  ;;  %v3248_v23 = vand.u32 2147483647, %v10581_v31 }
 0x511   :  { %v3250_v0 = vand.u32 2147483648, %v10581_v31  ;;  %v3609_v43 = vmul.f32 %v8550_v57, %v3573_v16  ;;  %v3242_v34 = vmul.f32 %v8809_v59, %v3241_v38  ;;  %v3315_v55 = vmul.f32 %v8851_v29, %v8692_v17 }
 0x512   :  { %v3262_v14 = vsel %vm3261_vm5, %v8816_v30, %v3258_v58  ;;  %v3578_v37 = vmul.f32 %v3546_v10, %v10585_v5  ;;  %vm3244_vm7 = vweird.f32 %v10581_v31  ;;  %vm9079_vm8 = vcmp.eq.f32.partialorder %v3248_v23, 8.507059e+37  ;;  %v10588_v31 = vld [vmem:[#allocation14_spill] sm:$0xff] }
 0x513   :  { %v3267_v6 = vsel %vm9058_vm4, %v3266_v36, %v3262_v14  ;;  %v3665_v19 = vsel %vm2607_vm0, %v3609_v43, 0.0  ;;  %v3243_v61 = vadd.f32 %v8809_v59, %v3242_v34  ;;  %v3316_v26 = vsub.f32 1.0, %v3315_v55  ;;  %vm3246_vm9 = vmor %vm3244_vm7, %vm3245_vm6  ;;  %v10589_v14 = vld [vmem:[#allocation19_spill] sm:$0xff] }
 0x514   :  { %v3512_v30 = vmul.f32 %v8533_v13, %v3267_v6  ;;  %3666 = vadd.xlane.f32.xlu0 %v3665_v19  ;;  %v3614_v56 = vmul.f32 %v8550_v57, %v3578_v37  ;;  %v3251_v52 = vor.u32 1.1754944e-38, %v3250_v0  ;;  %vm3320_vm10 = vweird.f32 %v8851_v29 }
 0x515   :  { %v3323_v8 = vand.u32 2147483647, %v8692_v17  ;;  %v3247_v24 = vsel %vm3246_vm9, %v8809_v59, %v3243_v61  ;;  %v3317_v42 = vmul.f32 %v8851_v29, %v3316_v26  ;;  %v3325_v1 = vand.u32 2147483648, %v8692_v17 }
 0x516   :  { %v3545_v46 = vadd.f32 %v8540_v11, %v3512_v30  ;;  %v3680_v60 = vsel %vm2607_vm0, %v3614_v56, 0.0  ;;  %v3252_v57 = vsel %vm9079_vm8, %v3251_v52, %v3247_v24  ;;  %vm3319_vm11 = vweird.f32 %v8692_v17 }
 0x517   :  { %v3300_v53 = vmul.f32 %v8838_v35, %v8690_v49  ;;  %3681 = vadd.xlane.f32.xlu2 %v3680_v60  ;;  %v3511_v44 = vmul.f32 %v8533_v13, %v3252_v57  ;;  %v3318_v59 = vadd.f32 %v8851_v29, %v3317_v42  ;;  %vm3324_vm12 = vcmp.eq.f32.partialorder %v3323_v8, 8.507059e+37  ;;  %vm3321_vm13 = vmor %vm3319_vm11, %vm3320_vm10 }
 0x518   :  { %v3577_v47 = vmul.f32 %v3545_v46, %v10588_v31  ;;  %v3326_v51 = vor.u32 1.1754944e-38, %v3325_v1  ;;  %vm3304_vm14 = vweird.f32 %v8690_v49  ;;  %v3308_v17 = vand.u32 2147483647, %v8690_v49  ;;  %v10592_v46 = vld [vmem:[#allocation18_spill] sm:$0xff] }
 0x519   :  { %v3301_v41 = vsub.f32 1.0, %v3300_v53  ;;  %v3544_v58 = vadd.f32 %v8540_v11, %v3511_v44  ;;  %v3322_v36 = vsel %vm3321_vm13, %v8851_v29, %v3318_v59  ;;  %v3310_v38 = vand.u32 2147483648, %v8690_v49 }
 0x51a   :  { %v3613_v16 = vmul.f32 %v9111_v40, %v3577_v47  ;;  %v3327_v10 = vsel %vm3324_vm12, %v3326_v51, %v3322_v36  ;;  %vm3305_vm15 = vweird.f32 %v8838_v35  ;;  %v3285_v0 = vmul.f32 %v8832_v2, %v8688_v33 }
 0x51b   :  { %v3302_v23 = vmul.f32 %v8838_v35, %v3301_v41  ;;  %v3576_v34 = vmul.f32 %v3544_v58, %v10589_v14  ;;  %v3516_v55 = vmul.f32 %v8533_v13, %v3327_v10  ;;  %vm9124_vm1 = vcmp.eq.f32.partialorder %v3308_v17, 8.507059e+37  ;;  %vm3306_vm3 = vmor %vm3304_vm14, %vm3305_vm15 }
 0x51c   :  { %v3677_v43 = vsel %vm2607_vm0, %v3613_v16, 0.0  ;;  %v3311_v37 = vor.u32 1.1754944e-38, %v3310_v38  ;;  %v3286_v6 = vsub.f32 1.0, %v3285_v0  ;;  %vm3289_vm2 = vweird.f32 %v8688_v33  ;;  %v10595_v16 = vld [vmem:[#allocation23_spill] sm:$0xff] }
 0x51d   :  { %3678 = vadd.xlane.f32.xlu1 %v3677_v43  ;;  %v3303_v29 = vadd.f32 %v8838_v35, %v3302_v23  ;;  %v3612_v12 = vmul.f32 %v9111_v40, %v3576_v34  ;;  %v3549_v19 = vadd.f32 %v8540_v11, %v3516_v55  ;;  %v3293_v30 = vand.u32 2147483647, %v8688_v33 }
 0x51e   :  { %v3295_v61 = vand.u32 2147483648, %v8688_v33  ;;  %v3287_v56 = vmul.f32 %v8832_v2, %v3286_v6  ;;  %vm3290_vm4 = vweird.f32 %v8832_v2  ;;  %v3360_v52 = vmul.f32 %v8872_v9, %v8701_v28  ;;  %v10598_v6 = vld [vmem:[#allocation16_spill] sm:$0xff] }
 0x51f   :  { %v3307_v26 = vsel %vm3306_vm3, %v8838_v35, %v3303_v29  ;;  %v3674_v8 = vsel %vm2607_vm0, %v3612_v12, 0.0  ;;  %v3581_v24 = vmul.f32 %v3549_v19, %v10592_v46  ;;  %vm9145_vm5 = vcmp.eq.f32.partialorder %v3293_v30, 8.507059e+37  ;;  %vm3291_vm6 = vmor %vm3289_vm2, %vm3290_vm4 }
 0x520   :  { %v3312_v49 = vsel %vm9124_vm1, %v3311_v37, %v3307_v26  ;;  %3675 = vadd.xlane.f32.xlu0 %v3674_v8  ;;  %v3288_v1 = vadd.f32 %v8832_v2, %v3287_v56  ;;  %v3296_v60 = vor.u32 1.1754944e-38, %v3295_v61  ;;  %v3361_v57 = vsub.f32 1.0, %v3360_v52 }
 0x521   :  { %v3515_v35 = vmul.f32 %v8533_v13, %v3312_v49  ;;  %v3617_v53 = vmul.f32 %v9111_v40, %v3581_v24  ;;  %vm3365_vm7 = vweird.f32 %v8872_v9  ;;  %v3368_v31 = vand.u32 2147483647, %v8701_v28 }
 0x522   :  { %v3370_v47 = vand.u32 2147483648, %v8701_v28  ;;  %v3292_v59 = vsel %vm3291_vm6, %v8832_v2, %v3288_v1  ;;  %v3362_v51 = vmul.f32 %v8872_v9, %v3361_v57  ;;  %v3345_v41 = vmul.f32 %v8865_v20, %v8697_v39 }
 0x523   :  { %v3548_v44 = vadd.f32 %v8540_v11, %v3515_v35  ;;  %v3689_v17 = vsel %vm2607_vm0, %v3617_v53, 0.0  ;;  %v3297_v33 = vsel %vm9145_vm5, %v3296_v60, %v3292_v59  ;;  %vm3364_vm8 = vweird.f32 %v8701_v28  ;;  %v10599_v35 = vld [vmem:[#allocation27_spill] sm:$0xff] }
 0x524   :  { %vm3369_vm9 = vcmp.eq.f32.partialorder %v3368_v31, 8.507059e+37  ;;  %3690 = vadd.xlane.f32.xlu2 %v3689_v17  ;;  %v3514_v36 = vmul.f32 %v8533_v13, %v3297_v33  ;;  %v3363_v2 = vadd.f32 %v8872_v9, %v3362_v51  ;;  %v3346_v38 = vsub.f32 1.0, %v3345_v41  ;;  %vm3366_vm10 = vmor %vm3364_vm8, %vm3365_vm7 }
 0x525   :  { %v3580_v58 = vmul.f32 %v3548_v44, %v10595_v16  ;;  %v3371_v10 = vor.u32 1.1754944e-38, %v3370_v47  ;;  %vm3350_vm11 = vweird.f32 %v8865_v20  ;;  %v3353_v23 = vand.u32 2147483647, %v8697_v39 }
 0x526   :  { %v3355_v0 = vand.u32 2147483648, %v8697_v39  ;;  %v3547_v43 = vadd.f32 %v8540_v11, %v3514_v36  ;;  %v3367_v14 = vsel %vm3366_vm10, %v8872_v9, %v3363_v2  ;;  %v3347_v34 = vmul.f32 %v8865_v20, %v3346_v38 }
 0x527   :  { %v3616_v28 = vmul.f32 %v9111_v40, %v3580_v58  ;;  %v3372_v55 = vsel %vm3369_vm9, %v3371_v10, %v3367_v14  ;;  %vm3349_vm12 = vweird.f32 %v8697_v39  ;;  %vm9179_vm13 = vcmp.eq.f32.partialorder %v3353_v23, 8.507059e+37  ;;  %v10602_v58 = vld [vmem:[#allocation20_spill] sm:$0xff] }
 0x528   :  { %v3330_v29 = vmul.f32 %v8859_v32, %v8695_v18  ;;  %v3579_v12 = vmul.f32 %v3547_v43, %v10598_v6  ;;  %v3519_v19 = vmul.f32 %v8533_v13, %v3372_v55  ;;  %v3348_v9 = vadd.f32 %v8865_v20, %v3347_v34  ;;  %vm3351_vm14 = vmor %vm3349_vm12, %vm3350_vm11 }
 0x529   :  { %v3686_v37 = vsel %vm2607_vm0, %v3616_v28, 0.0  ;;  %v3356_v39 = vor.u32 1.1754944e-38, %v3355_v0  ;;  %vm3334_vm15 = vweird.f32 %v8695_v18  ;;  %v3338_v61 = vand.u32 2147483647, %v8695_v18 }
 0x52a   :  { %3687 = vadd.xlane.f32.xlu1 %v3686_v37  ;;  %v3331_v30 = vsub.f32 1.0, %v3330_v29  ;;  %v3615_v26 = vmul.f32 %v9111_v40, %v3579_v12  ;;  %v3552_v56 = vadd.f32 %v8540_v11, %v3519_v19  ;;  %v3352_v52 = vsel %vm3351_vm14, %v8865_v20, %v3348_v9  ;;  %v10605_v37 = vld [vmem:[#allocation25_spill] sm:$0xff] }
 0x52b   :  { %v3340_v8 = vand.u32 2147483648, %v8695_v18  ;;  %v3357_v46 = vsel %vm9179_vm13, %v3356_v39, %v3352_v52  ;;  %vm3335_vm1 = vweird.f32 %v8859_v32  ;;  %v3405_v49 = vmul.f32 %v8886_v54, %v8709_v27 }
 0x52c   :  { %v3332_v24 = vmul.f32 %v8859_v32, %v3331_v30  ;;  %v3683_v42 = vsel %vm2607_vm0, %v3615_v26, 0.0  ;;  %v3584_v1 = vmul.f32 %v3552_v56, %v10599_v35  ;;  %v3518_v60 = vmul.f32 %v8533_v13, %v3357_v46  ;;  %vm3336_vm4 = vmor %vm3334_vm15, %vm3335_vm1 }
 0x52d   :  { %vm9206_vm2 = vcmp.eq.f32.partialorder %v3338_v61, 8.507059e+37  ;;  %3684 = vadd.xlane.f32.xlu0 %v3683_v42  ;;  %v3341_v53 = vor.u32 1.1754944e-38, %v3340_v8  ;;  %v3406_v31 = vsub.f32 1.0, %v3405_v49  ;;  %vm3409_vm3 = vweird.f32 %v8709_v27  ;;  %v10608_v49 = vld [vmem:[#allocation75_spill] sm:$0xff] }
 0x52e   :  { %v3333_v57 = vadd.f32 %v8859_v32, %v3332_v24  ;;  %v3620_v47 = vmul.f32 %v9111_v40, %v3584_v1  ;;  %v3551_v44 = vadd.f32 %v8540_v11, %v3518_v60  ;;  %v3413_v59 = vand.u32 2147483647, %v8709_v27 }
 0x52f   :  { %v3415_v51 = vand.u32 2147483648, %v8709_v27  ;;  %v3407_v17 = vmul.f32 %v8886_v54, %v3406_v31  ;;  %vm3410_vm5 = vweird.f32 %v8886_v54  ;;  %v3390_v33 = vmul.f32 %v8881_v62, %v8705_v4 }
 0x530   :  { %v3337_v41 = vsel %vm3336_vm4, %v8859_v32, %v3333_v57  ;;  %v3698_v16 = vsel %vm2607_vm0, %v3620_v47, 0.0  ;;  %v3583_v36 = vmul.f32 %v3551_v44, %v10602_v58  ;;  %vm9227_vm6 = vcmp.eq.f32.partialorder %v3413_v59, 8.507059e+37  ;;  %vm3411_vm7 = vmor %vm3409_vm3, %vm3410_vm5 }
 0x531   :  { %v3342_v18 = vsel %vm9206_vm2, %v3341_v53, %v3337_v41  ;;  %3699 = vadd.xlane.f32.xlu2 %v3698_v16  ;;  %v3408_v38 = vadd.f32 %v8886_v54, %v3407_v17  ;;  %v3416_v10 = vor.u32 1.1754944e-38, %v3415_v51  ;;  %v3391_v23 = vsub.f32 1.0, %v3390_v33  ;;  %v10609_v41 = vld [vmem:[#allocation6_spill] sm:$0xff] }
 0x532   :  { %v3517_v32 = vmul.f32 %v8533_v13, %v3342_v18  ;;  %v3619_v0 = vmul.f32 %v9111_v40, %v3583_v36  ;;  %vm3395_vm8 = vweird.f32 %v8881_v62  ;;  %v3398_v28 = vand.u32 2147483647, %v8705_v4 }
 0x533   :  { %v3400_v43 = vand.u32 2147483648, %v8705_v4  ;;  %v3412_v34 = vsel %vm3411_vm7, %v8886_v54, %v3408_v38  ;;  %v3392_v55 = vmul.f32 %v8881_v62, %v3391_v23  ;;  %v3375_v5 = vmul.f32 %v8876_v3, %v8703_v48 }
 0x534   :  { %v3550_v14 = vadd.f32 %v8540_v11, %v3517_v32  ;;  %v3695_v29 = vsel %vm2607_vm0, %v3619_v0, 0.0  ;;  %v3417_v27 = vsel %vm9227_vm6, %v3416_v10, %v3412_v34  ;;  %vm3394_vm9 = vweird.f32 %v8705_v4 }
 0x535   :  { %vm3399_vm10 = vcmp.eq.f32.partialorder %v3398_v28, 8.507059e+37  ;;  %3696 = vadd.xlane.f32.xlu1 %v3695_v29  ;;  %v3522_v12 = vmul.f32 %v8533_v13, %v3417_v27  ;;  %v3393_v54 = vadd.f32 %v8881_v62, %v3392_v55  ;;  %v3376_v19 = vsub.f32 1.0, %v3375_v5  ;;  %vm3396_vm11 = vmor %vm3394_vm9, %vm3395_vm8 }
 0x536   :  { %v3582_v6 = vmul.f32 %v3550_v14, %v10605_v37  ;;  %v3401_v9 = vor.u32 1.1754944e-38, %v3400_v43  ;;  %vm3380_vm12 = vweird.f32 %v8876_v3  ;;  %v3383_v39 = vand.u32 2147483647, %v8703_v48  ;;  %v10612_v43 = vld [vmem:[#allocation22_spill] sm:$0xff] }
 0x537   :  { %v3385_v30 = vand.u32 2147483648, %v8703_v48  ;;  %v3555_v61 = vadd.f32 %v8540_v11, %v3522_v12  ;;  %v3397_v26 = vsel %vm3396_vm11, %v8881_v62, %v3393_v54  ;;  %v3377_v56 = vmul.f32 %v8876_v3, %v3376_v19 }
 0x538   :  { %v3618_v4 = vmul.f32 %v9111_v40, %v3582_v6  ;;  %v3402_v52 = vsel %vm3399_vm10, %v3401_v9, %v3397_v26  ;;  %vm3379_vm13 = vweird.f32 %v8703_v48  ;;  %vm9261_vm14 = vcmp.eq.f32.partialorder %v3383_v39, 8.507059e+37  ;;  %v10615_v9 = vld [vmem:[#allocation10_spill] sm:$0xff]  ;;  %v10619_v26 = vld [vmem:[#allocation24_spill] sm:$0xff] }
 0x539   :  { %v3450_v46 = vmul.f32 %v8906_v21, %v8725_v63  ;;  %v3587_v42 = vmul.f32 %v3555_v61, %v10608_v49  ;;  %v3521_v35 = vmul.f32 %v8533_v13, %v3402_v52  ;;  %v3378_v62 = vadd.f32 %v8876_v3, %v3377_v56  ;;  %vm3381_vm15 = vmor %vm3379_vm13, %vm3380_vm12  ;;  %v10616_v39 = vld [vmem:[#allocation26_spill] sm:$0xff] }
 0x53a   :  { %v3692_v24 = vsel %vm2607_vm0, %v3618_v4, 0.0  ;;  %v3386_v48 = vor.u32 1.1754944e-38, %v3385_v30  ;;  %vm3454_vm1 = vweird.f32 %v8725_v63  ;;  %v3458_v60 = vand.u32 2147483647, %v8725_v63 }
 0x53b   :  { %3693 = vadd.xlane.f32.xlu0 %v3692_v24  ;;  %v3451_v1 = vsub.f32 1.0, %v3450_v46  ;;  %v3623_v20 = vmul.f32 %v9111_v40, %v3587_v42  ;;  %v3554_v57 = vadd.f32 %v8540_v11, %v3521_v35  ;;  %v3382_v53 = vsel %vm3381_vm15, %v8876_v3, %v3378_v62 }
 0x53c   :  { %v3460_v31 = vand.u32 2147483648, %v8725_v63  ;;  %v3387_v47 = vsel %vm9261_vm14, %v3386_v48, %v3382_v53  ;;  %vm3455_vm2 = vweird.f32 %v8906_v21  ;;  %v3435_v59 = vmul.f32 %v8901_v22, %v8715_v7 }
 0x53d   :  { %v3452_v44 = vmul.f32 %v8906_v21, %v3451_v1  ;;  %v3707_v51 = vsel %vm2607_vm0, %v3623_v20, 0.0  ;;  %v3586_v17 = vmul.f32 %v3554_v57, %v10609_v41  ;;  %v3520_v33 = vmul.f32 %v8533_v13, %v3387_v47  ;;  %vm3456_vm5 = vmor %vm3454_vm1, %vm3455_vm2  ;;  %v10620_v20 = vld [vmem:[#allocation29_spill] sm:$0xff] }
 0x53e   :  { %vm9288_vm3 = vcmp.eq.f32.partialorder %v3458_v60, 8.507059e+37  ;;  %3708 = vadd.xlane.f32.xlu2 %v3707_v51  ;;  %v3461_v58 = vor.u32 1.1754944e-38, %v3460_v31  ;;  %v3436_v36 = vsub.f32 1.0, %v3435_v59  ;;  %vm3439_vm4 = vweird.f32 %v8715_v7 }
 0x53f   :  { %v3453_v16 = vadd.f32 %v8906_v21, %v3452_v44  ;;  %v3622_v18 = vmul.f32 %v9111_v40, %v3586_v17  ;;  %v3553_v2 = vadd.f32 %v8540_v11, %v3520_v33  ;;  %v3443_v32 = vand.u32 2147483647, %v8715_v7 }
 0x540   :  { %v3445_v38 = vand.u32 2147483648, %v8715_v7  ;;  %v3437_v23 = vmul.f32 %v8901_v22, %v3436_v36  ;;  %vm3440_vm6 = vweird.f32 %v8901_v22  ;;  %v3420_v0 = vmul.f32 %v8893_v45, %v8711_v25  ;;  %v10621_v36 = vld [vmem:[#allocation12_spill] sm:$0xff] }
 0x541   :  { %v3457_v10 = vsel %vm3456_vm5, %v8906_v21, %v3453_v16  ;;  %v3704_v28 = vsel %vm2607_vm0, %v3622_v18, 0.0  ;;  %v3585_v14 = vmul.f32 %v3553_v2, %v10612_v43  ;;  %vm9309_vm7 = vcmp.eq.f32.partialorder %v3443_v32, 8.507059e+37  ;;  %vm3441_vm8 = vmor %vm3439_vm4, %vm3440_vm6  ;;  %v3643_v16 = vpop.xlane.xlu2 %3642  ;;  %v3637_v32 = vpop.xlane.xlu1 %3636 }
 0x542   :  { %v3462_v63 = vsel %vm9288_vm3, %v3461_v58, %v3457_v10  ;;  %3705 = vadd.xlane.f32.xlu1 %v3704_v28  ;;  %v3438_v55 = vadd.f32 %v8901_v22, %v3437_v23  ;;  %v3446_v5 = vor.u32 1.1754944e-38, %v3445_v38  ;;  %v3421_v29 = vsub.f32 1.0, %v3420_v0 }
 0x543   :  { %v3525_v21 = vmul.f32 %v8533_v13, %v3462_v63  ;;  %v3621_v27 = vmul.f32 %v9111_v40, %v3585_v14  ;;  %vm3425_vm9 = vweird.f32 %v8893_v45  ;;  %v3428_v37 = vand.u32 2147483647, %v8711_v25 }
 0x544   :  { %v3430_v6 = vand.u32 2147483648, %v8711_v25  ;;  %v3442_v54 = vsel %vm3441_vm8, %v8901_v22, %v3438_v55  ;;  %v3422_v19 = vmul.f32 %v8893_v45, %v3421_v29  ;;  %v3480_v30 = vmul.f32 %v10616_v39, %v10615_v9  ;;  %v3631_v0 = vpop.xlane.xlu0 %3630  ;;  %v10622_v55 = vld [vmem:[#allocation31_spill] sm:$0xff] }
 0x545   :  { %v3558_v12 = vadd.f32 %v8540_v11, %v3525_v21  ;;  %v3701_v4 = vsel %vm2607_vm0, %v3621_v27, 0.0  ;;  %v3447_v7 = vsel %vm9309_vm7, %v3446_v5, %v3442_v54  ;;  %vm3424_vm10 = vweird.f32 %v8711_v25 }
 0x546   :  { %vm9330_vm11 = vcmp.eq.f32.partialorder %v3428_v37, 8.507059e+37  ;;  %3702 = vadd.xlane.f32.xlu0 %v3701_v4  ;;  %v3524_v22 = vmul.f32 %v8533_v13, %v3447_v7  ;;  %v3423_v52 = vadd.f32 %v8893_v45, %v3422_v19  ;;  %v3481_v8 = vsub.f32 1.0, %v3480_v30  ;;  %vm3426_vm12 = vmor %vm3424_vm10, %vm3425_vm9 }
 0x547   :  { %v3590_v56 = vmul.f32 %v3558_v12, %v10619_v26  ;;  %v3431_v46 = vor.u32 1.1754944e-38, %v3430_v6  ;;  %vm3485_vm13 = vweird.f32 %v10616_v39  ;;  %v3488_v25 = vand.u32 2147483647, %v10615_v9 }
 0x548   :  { %v3490_v24 = vand.u32 2147483648, %v10615_v9  ;;  %v3557_v42 = vadd.f32 %v8540_v11, %v3524_v22  ;;  %v3427_v35 = vsel %vm3426_vm12, %v8893_v45, %v3423_v52  ;;  %v3482_v62 = vmul.f32 %v10616_v39, %v3481_v8 }
 0x549   :  { %v3626_v49 = vmul.f32 %v9111_v40, %v3590_v56  ;;  %v3432_v48 = vsel %vm9330_vm11, %v3431_v46, %v3427_v35  ;;  %vm3484_vm14 = vweird.f32 %v10615_v9  ;;  %v3465_v1 = vmul.f32 %v8932_v15, %v8729_v50  ;;  %v10623_v9 = vld [vmem:[#allocation5_spill] sm:$0xff] }
 0x54a   :  { %v3589_v57 = vmul.f32 %v3557_v42, %v10620_v20  ;;  %v3523_v53 = vmul.f32 %v8533_v13, %v3432_v48  ;;  %v3483_v31 = vadd.f32 %v10616_v39, %v3482_v62  ;;  %vm3486_vm15 = vmor %vm3484_vm14, %vm3485_vm13  ;;  %vm3489_vm1 = vcmp.eq.f32.partialorder %v3488_v25, 8.507059e+37 }
 0x54b   :  { %v3716_v60 = vsel %vm2607_vm0, %v3626_v49, 0.0  ;;  %v3491_v45 = vor.u32 1.1754944e-38, %v3490_v24  ;;  %v3466_v47 = vsub.f32 1.0, %v3465_v1  ;;  %v3475_v41 = vand.u32 2147483648, %v8729_v50 }
 0x54c   :  { %3717 = vadd.xlane.f32.xlu2 %v3716_v60  ;;  %v3625_v44 = vmul.f32 %v9111_v40, %v3589_v57  ;;  %v3556_v59 = vadd.f32 %v8540_v11, %v3523_v53  ;;  %v3487_v51 = vsel %vm3486_vm15, %v10616_v39, %v3483_v31  ;;  %vm3470_vm2 = vweird.f32 %v8932_v15 }
 0x54d   :  { %v3492_v17 = vsel %vm3489_vm1, %v3491_v45, %v3487_v51  ;;  %v3467_v33 = vmul.f32 %v8932_v15, %v3466_v47  ;;  %v3473_v3 = vand.u32 2147483647, %v8729_v50  ;;  %vm3469_vm3 = vweird.f32 %v8729_v50 }
 0x54e   :  { %v3713_v58 = vsel %vm2607_vm0, %v3625_v44, 0.0  ;;  %v3588_v18 = vmul.f32 %v3556_v59, %v10621_v36  ;;  %v3527_v2 = vmul.f32 %v8533_v13, %v3492_v17  ;;  %v3476_v10 = vor.u32 1.1754944e-38, %v3475_v41  ;;  %vm3471_vm4 = vmor %vm3469_vm3, %vm3470_vm2 }
 0x54f   :  { %3714 = vadd.xlane.f32.xlu1 %v3713_v58  ;;  %v3468_v38 = vadd.f32 %v8932_v15, %v3467_v33  ;;  %v9372_v23 = vstv %s9342_s5  ;;  %vm3474_vm5 = vcmp.eq.f32.partialorder %v3473_v3, 8.507059e+37 }
 0x550   :  { %v3624_v28 = vmul.f32 %v9111_v40, %v3588_v18  ;;  %v3560_v43 = vadd.f32 %v8540_v11, %v3527_v2  ;;  %v3730_v14 = vadd.f32 %v9372_v23, %v3643_v16  ;;  %v3728_v63 = vadd.f32 %v9372_v23, %v3637_v32 }
 0x551   :  { %v3472_v34 = vsel %vm3471_vm4, %v8932_v15, %v3468_v38  ;;  %v3726_v50 = vadd.f32 %v9372_v23, %v3631_v0 }
 0x552   :  { %v3710_v21 = vsel %vm2607_vm0, %v3624_v28, 0.0  ;;  %v3592_v5 = vmul.f32 %v3560_v43, %v10622_v55  ;;  %v3477_v29 = vsel %vm3474_vm5, %v3476_v10, %v3472_v34  ;;  %v4538_v27 = vmul.f32 -1.442695, %v3730_v14 }
 0x553   :  { %3711 = vadd.xlane.f32.xlu0 %v3710_v21  ;;  %v3526_v37 = vmul.f32 %v8533_v13, %v3477_v29  ;;  %v4536_v6 = vmul.f32 -1.442695, %v3728_v63  ;;  %v4534_v12 = vmul.f32 -1.442695, %v3726_v50 }
 0x554   :  { %v3628_v54 = vmul.f32 %v9111_v40, %v3592_v5  ;;  %4965 = vpow2.f32 %v4538_v27 }
 0x555   :  { %v3559_v19 = vadd.f32 %v8540_v11, %v3526_v37  ;;  %4967 = vpow2.f32 %v4536_v6 }
 0x556   :  { %v3722_v15 = vsel %vm2607_vm0, %v3628_v54, 0.0  ;;  %4969 = vpow2.f32 %v4534_v12 }
 0x557   :  { %3723 = vadd.xlane.f32.xlu1 %v3722_v15  ;;  %v3591_v39 = vmul.f32 %v3559_v19, %v10623_v9 }
 0x559   :  { %v3627_v30 = vmul.f32 %v9111_v40, %v3591_v39 }
 0x55a   :  { %v4966_v4 = vpop.eup %4965 }
 0x55b   :  { %v4968_v7 = vpop.eup %4967  ;;  %v3719_v13 = vsel %vm2607_vm0, %v3627_v30, 0.0  ;;  %v3858_v61 = vadd.f32 1.0, %v4966_v4  ;;  %vm4366_vm0 = vcmask 7168  }
 0x55c   :  { %v4970_v56 = vpop.eup %4969  ;;  %3720 = vadd.xlane.f32.xlu0 %v3719_v13  ;;  %v3856_v22 = vadd.f32 1.0, %v4968_v7 }
 0x55d   :  { %v3646_v26 = vpop.xlane.xlu2 %3645  ;;  %4971 = vrcp.f32 %v3858_v61  ;;  %v9392_v8 = vadd.f32 1.0, %v4970_v56  ;;  %v3955_v62 = vand.u32 2147483647, %v3858_v61  ;;  %v3957_v57 = vand.u32 2147483648, %v3858_v61 }
 0x55e   :  { %v3731_v11 = vadd.f32 %v9372_v23, %v3646_v26  ;;  %v3640_v52 = vpop.xlane.xlu1 %3639  ;;  %4973 = vrcp.f32 %v3856_v22  ;;  %v3925_v45 = vand.u32 2147483647, %v3856_v22  ;;  %v3927_v47 = vand.u32 2147483648, %v3856_v22 }
 0x55f   :  { %v3634_v25 = vpop.xlane.xlu0 %3633  ;;  %v3729_v40 = vadd.f32 %v9372_v23, %v3640_v52  ;;  %4975 = vrcp.f32 %v9392_v8  ;;  %vm3951_vm6 = vweird.f32 %v3858_v61  ;;  %vm9398_vm7 = vcmp.eq.f32.partialorder %v3955_v62, 8.507059e+37 }
 0x560   :  { %v4539_v46 = vmul.f32 -1.442695, %v3731_v11  ;;  %v3727_v24 = vadd.f32 %v9372_v23, %v3634_v25  ;;  %vm3921_vm8 = vweird.f32 %v3856_v22  ;;  %v3958_v16 = vor.u32 1.1754944e-38, %v3957_v57 }
 0x561   :  { %v4537_v49 = vmul.f32 -1.442695, %v3729_v40  ;;  %vm9405_vm11 = vcmp.eq.f32.partialorder %v3925_v45, 8.507059e+37  ;;  %v3928_v38 = vor.u32 1.1754944e-38, %v3927_v47  ;;  %v3895_v43 = vand.u32 2147483647, %v9392_v8 }
 0x562   :  { %4977 = vpow2.f32 %v4539_v46  ;;  %v4535_v42 = vmul.f32 -1.442695, %v3727_v24  ;;  %v3897_v14 = vand.u32 2147483648, %v9392_v8  ;;  %vm3891_vm15 = vweird.f32 %v9392_v8 }
 0x563   :  { %v4972_v35 = vpop.eup %4971  ;;  %4979 = vpow2.f32 %v4537_v49  ;;  %vm3896_vm2 = vcmp.eq.f32.partialorder %v3895_v43, 8.507059e+37 }
 0x564   :  { %v4974_v1 = vpop.eup %4973  ;;  %v3947_v60 = vmul.f32 %v4972_v35, %v3858_v61  ;;  %4981 = vpow2.f32 %v4535_v42  ;;  %vm3952_vm9 = vweird.f32 %v4972_v35  ;;  %v3898_v54 = vor.u32 1.1754944e-38, %v3897_v14 }
 0x565   :  { %v3655_v48 = vpop.xlane.xlu2 %3654  ;;  %v3917_v53 = vmul.f32 %v4974_v1, %v3856_v22  ;;  %v4976_v59 = vpop.eup %4975  ;;  %vm3922_vm10 = vweird.f32 %v4974_v1  ;;  %vm3953_vm12 = vmor %vm3951_vm6, %vm3952_vm9 }
 0x566   :  { %v3734_v20 = vadd.f32 %v9372_v23, %v3655_v48  ;;  %v3948_v31 = vsub.f32 1.0, %v3947_v60  ;;  %v3887_v3 = vmul.f32 %v4976_v59, %v9392_v8  ;;  %vm3923_vm13 = vmor %vm3921_vm8, %vm3922_vm10  ;;  %vm3892_vm14 = vweird.f32 %v4976_v59 }
 0x567   :  { %v3918_v41 = vsub.f32 1.0, %v3917_v53  ;;  %vm3893_vm1 = vmor %vm3891_vm15, %vm3892_vm14 }
 0x568   :  { %v4542_v44 = vmul.f32 -1.442695, %v3734_v20  ;;  %v4978_v17 = vpop.eup %4977  ;;  %v3949_v33 = vmul.f32 %v4972_v35, %v3948_v31  ;;  %v3888_v10 = vsub.f32 1.0, %v3887_v3 }
 0x569   :  { %v3919_v58 = vmul.f32 %v4974_v1, %v3918_v41  ;;  %v9403_v36 = vadd.f32 1.0, %v4978_v17  ;;  %v4980_v18 = vpop.eup %4979  ;;  %v3652_v21 = vpop.xlane.xlu1 %3651 }
 0x56a   :  { %4983 = vpow2.f32 %v4542_v44  ;;  %v3950_v2 = vadd.f32 %v4972_v35, %v3949_v33  ;;  %v4982_v0 = vpop.eup %4981  ;;  %v3889_v34 = vmul.f32 %v4976_v59, %v3888_v10  ;;  %v9414_v50 = vadd.f32 1.0, %v4980_v18 }
 0x56b   :  { %v3920_v28 = vadd.f32 %v4974_v1, %v3919_v58  ;;  %4985 = vrcp.f32 %v9403_v36  ;;  %v9419_v29 = vadd.f32 1.0, %v4982_v0  ;;  %v3970_v12 = vand.u32 2147483647, %v9403_v36 }
 0x56c   :  { %v3954_v63 = vsel %vm3953_vm12, %v4972_v35, %v3950_v2  ;;  %v3890_v6 = vadd.f32 %v4976_v59, %v3889_v34  ;;  %4987 = vrcp.f32 %v9414_v50  ;;  %v3972_v19 = vand.u32 2147483648, %v9403_v36 }
 0x56d   :  { %v3959_v55 = vsel %vm9398_vm7, %v3958_v16, %v3954_v63  ;;  %v3924_v5 = vsel %vm3923_vm13, %v4974_v1, %v3920_v28  ;;  %4989 = vrcp.f32 %v9419_v29  ;;  %v3733_v9 = vadd.f32 %v9372_v23, %v3652_v21 }
 0x56e   :  { %4371 = vst.msk [vmem:[%s9892_s7 + $0x20] sm:$0xff] %vm4366_vm0, %v3959_v55  ;;  %v3929_v37 = vsel %vm9405_vm11, %v3928_v38, %v3924_v5  ;;  %v3894_v15 = vsel %vm3893_vm1, %v4976_v59, %v3890_v6  ;;  %v3649_v39 = vpop.xlane.xlu0 %3648  ;;  %v3940_v7 = vand.u32 2147483647, %v9414_v50  ;;  %v3942_v13 = vand.u32 2147483648, %v9414_v50 }
 0x56f   :  { %4369 = vst.msk [vmem:[%s9892_s7 + $0x10] sm:$0xff] %vm4366_vm0, %v3929_v37  ;;  %v3899_v4 = vsel %vm3896_vm2, %v3898_v54, %v3894_v15  ;;  %vm3966_vm3 = vweird.f32 %v9403_v36  ;;  %vm9446_vm4 = vcmp.eq.f32.partialorder %v3970_v12, 8.507059e+37  ;;  %v3910_v22 = vand.u32 2147483647, %v9419_v29 }
 0x570   :  { %v4984_v27 = vpop.eup %4983  ;;  %4367 = vst.msk [vmem:[%s9892_s7] sm:$0xff] %vm4366_vm0, %v3899_v4  ;;  %v3973_v11 = vor.u32 1.1754944e-38, %v3972_v19  ;;  %vm3936_vm5 = vweird.f32 %v9414_v50  ;;  %v3912_v52 = vand.u32 2147483648, %v9419_v29  ;;  %vm3906_vm6 = vweird.f32 %v9419_v29 }
 0x571   :  { %v4986_v30 = vpop.eup %4985  ;;  %v9438_v61 = vadd.f32 1.0, %v4984_v27  ;;  %v4541_v40 = vmul.f32 -1.442695, %v3733_v9  ;;  %v3732_v24 = vadd.f32 %v9372_v23, %v3649_v39  ;;  %vm9458_vm8 = vcmp.eq.f32.partialorder %v3940_v7, 8.507059e+37 }
 0x572   :  { %v3962_v26 = vmul.f32 %v4986_v30, %v9403_v36  ;;  %v3664_v8 = vpop.xlane.xlu2 %3663  ;;  %v4988_v46 = vpop.eup %4987  ;;  %vm3967_vm7 = vweird.f32 %v4986_v30  ;;  %v3943_v48 = vor.u32 1.1754944e-38, %v3942_v13  ;;  %vm9463_vm9 = vcmp.eq.f32.partialorder %v3910_v22, 8.507059e+37 }
 0x573   :  { %4991 = vrcp.f32 %v9438_v61  ;;  %v3737_v49 = vadd.f32 %v9372_v23, %v3664_v8  ;;  %v4990_v42 = vpop.eup %4989  ;;  %v3932_v35 = vmul.f32 %v4988_v46, %v9414_v50  ;;  %v4540_v31 = vmul.f32 -1.442695, %v3732_v24  ;;  %vm3968_vm10 = vmor %vm3966_vm3, %vm3967_vm7 }
 0x574   :  { %v3963_v25 = vsub.f32 1.0, %v3962_v26  ;;  %v3902_v60 = vmul.f32 %v4990_v42, %v9419_v29  ;;  %4993 = vpow2.f32 %v4541_v40  ;;  %v3913_v51 = vor.u32 1.1754944e-38, %v3912_v52 }
 0x575   :  { %v3933_v53 = vsub.f32 1.0, %v3932_v35  ;;  %v4545_v45 = vmul.f32 -1.442695, %v3737_v49  ;;  %v4015_v41 = vand.u32 2147483647, %v9438_v61  ;;  %vm3937_vm11 = vweird.f32 %v4988_v46 }
 0x576   :  { %v3964_v1 = vmul.f32 %v4986_v30, %v3963_v25  ;;  %v3661_v57 = vpop.xlane.xlu1 %3660  ;;  %v3903_v59 = vsub.f32 1.0, %v3902_v60  ;;  %4995 = vpow2.f32 %v4540_v31  ;;  %vm3907_vm12 = vweird.f32 %v4990_v42  ;;  %vm3938_vm13 = vmor %vm3936_vm5, %vm3937_vm11 }
 0x577   :  { %v3736_v47 = vadd.f32 %v9372_v23, %v3661_v57  ;;  %v3934_v33 = vmul.f32 %v4988_v46, %v3933_v53  ;;  %4997 = vpow2.f32 %v4545_v45  ;;  %v4017_v43 = vand.u32 2147483648, %v9438_v61  ;;  %vm3908_vm14 = vmor %vm3906_vm6, %vm3907_vm12 }
 0x578   :  { %v3965_v44 = vadd.f32 %v4986_v30, %v3964_v1  ;;  %v3904_v18 = vmul.f32 %v4990_v42, %v3903_v59  ;;  %vm4011_vm1 = vweird.f32 %v9438_v61  ;;  %vm4016_vm3 = vcmp.eq.f32.partialorder %v4015_v41, 8.507059e+37 }
 0x579   :  { %v4992_v17 = vpop.eup %4991  ;;  %v4544_v3 = vmul.f32 -1.442695, %v3736_v47  ;;  %v3658_v16 = vpop.xlane.xlu0 %3657  ;;  %v3935_v38 = vadd.f32 %v4988_v46, %v3934_v33  ;;  %v4018_v19 = vor.u32 1.1754944e-38, %v4017_v43 }
 0x57a   :  { %v3969_v58 = vsel %vm3968_vm10, %v4986_v30, %v3965_v44  ;;  %v4007_v2 = vmul.f32 %v4992_v17, %v9438_v61  ;;  %v3735_v10 = vadd.f32 %v9372_v23, %v3658_v16  ;;  %v4994_v0 = vpop.eup %4993  ;;  %v3905_v36 = vadd.f32 %v4990_v42, %v3904_v18 }
 0x57b   :  { %v3974_v32 = vsel %vm9446_vm4, %v3973_v11, %v3969_v58  ;;  %4999 = vpow2.f32 %v4544_v3  ;;  %v3939_v14 = vsel %vm3938_vm13, %v4988_v46, %v3935_v38  ;;  %vm4012_vm15 = vweird.f32 %v4992_v17 }
 0x57c   :  { %4372 = vst.msk [vmem:[%s9892_s7 + $0x28] sm:$0xff] %vm4366_vm0, %v3974_v32  ;;  %v4008_v28 = vsub.f32 1.0, %v4007_v2  ;;  %v9485_v63 = vadd.f32 1.0, %v4994_v0  ;;  %v4543_v34 = vmul.f32 -1.442695, %v3735_v10  ;;  %v3944_v55 = vsel %vm9458_vm8, %v3943_v48, %v3939_v14  ;;  %v4996_v37 = vpop.eup %4995  ;;  %vm4013_vm2 = vmor %vm4011_vm1, %vm4012_vm15 }
 0x57d   :  { %v3673_v21 = vpop.xlane.xlu2 %3672  ;;  %v3909_v5 = vsel %vm3908_vm14, %v4990_v42, %v3905_v36  ;;  %4370 = vst.msk [vmem:[%s9892_s7 + $0x18] sm:$0xff] %vm4366_vm0, %v3944_v55  ;;  %v9502_v12 = vadd.f32 1.0, %v4996_v37  ;;  %v4998_v54 = vpop.eup %4997 }
 0x57e   :  { %v4009_v50 = vmul.f32 %v4992_v17, %v4008_v28  ;;  %v3740_v27 = vadd.f32 %v9372_v23, %v3673_v21  ;;  %v3914_v29 = vsel %vm9463_vm9, %v3913_v51, %v3909_v5  ;;  %5001 = vrcp.f32 %v9485_v63 }
 0x57f   :  { %4368 = vst.msk [vmem:[%s9892_s7 + $0x8] sm:$0xff] %vm4366_vm0, %v3914_v29  ;;  %5003 = vpow2.f32 %v4543_v34  ;;  %v4000_v30 = vand.u32 2147483647, %v9485_v63  ;;  %v4002_v7 = vand.u32 2147483648, %v9485_v63  ;;  %v9508_v13 = vadd.f32 1.0, %v4998_v54 }
 0x580   :  { %v4010_v6 = vadd.f32 %v4992_v17, %v4009_v50  ;;  %v4548_v15 = vmul.f32 -1.442695, %v3740_v27  ;;  %5005 = vrcp.f32 %v9502_v12  ;;  %v3985_v56 = vand.u32 2147483647, %v9502_v12 }
 0x581   :  { %v5000_v9 = vpop.eup %4999  ;;  %v3987_v22 = vand.u32 2147483648, %v9502_v12  ;;  %vm3996_vm4 = vweird.f32 %v9485_v63  ;;  %vm9521_vm5 = vcmp.eq.f32.partialorder %v4000_v30, 8.507059e+37  ;;  %v4003_v25 = vor.u32 1.1754944e-38, %v4002_v7 }
 0x582   :  { %v4014_v39 = vsel %vm4013_vm2, %v4992_v17, %v4010_v6  ;;  %v9514_v61 = vadd.f32 1.0, %v5000_v9  ;;  %5007 = vpow2.f32 %v4548_v15  ;;  %vm3981_vm6 = vweird.f32 %v9502_v12 }
 0x583   :  { %v4019_v4 = vsel %vm4016_vm3, %v4018_v19, %v4014_v39  ;;  %5009 = vrcp.f32 %v9508_v13  ;;  %v3670_v11 = vpop.xlane.xlu1 %3669  ;;  %v4062_v40 = vand.u32 2147483648, %v9508_v13  ;;  %v4060_v42 = vand.u32 2147483647, %v9508_v13 }
 0x584   :  { %4375 = vst.msk [vmem:[%s9892_s7 + $0x40] sm:$0xff] %vm4366_vm0, %v4019_v4  ;;  %v5002_v26 = vpop.eup %5001  ;;  %5011 = vrcp.f32 %v9514_v61  ;;  %v3739_v62 = vadd.f32 %v9372_v23, %v3670_v11  ;;  %vm9533_vm7 = vcmp.eq.f32.partialorder %v3985_v56, 8.507059e+37  ;;  %v3988_v60 = vor.u32 1.1754944e-38, %v3987_v22 }
 0x585   :  { %v5004_v52 = vpop.eup %5003  ;;  %v3992_v8 = vmul.f32 %v5002_v26, %v9485_v63  ;;  %v4047_v20 = vand.u32 2147483648, %v9514_v61  ;;  %vm3997_vm8 = vweird.f32 %v5002_v26  ;;  %vm4056_vm9 = vweird.f32 %v9508_v13 }
 0x586   :  { %v5006_v24 = vpop.eup %5005  ;;  %v9529_v35 = vadd.f32 1.0, %v5004_v52  ;;  %v4045_v31 = vand.u32 2147483647, %v9514_v61  ;;  %v4063_v59 = vor.u32 1.1754944e-38, %v4062_v40  ;;  %vm9545_vm11 = vcmp.eq.f32.partialorder %v4060_v42, 8.507059e+37  ;;  %vm3998_vm13 = vmor %vm3996_vm4, %vm3997_vm8 }
 0x587   :  { %v3993_v49 = vsub.f32 1.0, %v3992_v8  ;;  %v3977_v48 = vmul.f32 %v5006_v24, %v9502_v12  ;;  %v3667_v45 = vpop.xlane.xlu0 %3666  ;;  %vm3982_vm10 = vweird.f32 %v5006_v24  ;;  %vm4041_vm12 = vweird.f32 %v9514_v61 }
 0x588   :  { %v5008_v57 = vpop.eup %5007  ;;  %5013 = vrcp.f32 %v9529_v35  ;;  %v4032_v51 = vand.u32 2147483648, %v9529_v35  ;;  %v4547_v16 = vmul.f32 -1.442695, %v3739_v62  ;;  %v4048_v2 = vor.u32 1.1754944e-38, %v4047_v20  ;;  %vm3983_vm3 = vmor %vm3981_vm6, %vm3982_vm10 }
 0x589   :  { %v3994_v53 = vmul.f32 %v5002_v26, %v3993_v49  ;;  %v5010_v47 = vpop.eup %5009  ;;  %v3978_v44 = vsub.f32 1.0, %v3977_v48  ;;  %v9542_v41 = vadd.f32 1.0, %v5008_v57  ;;  %v4030_v32 = vand.u32 2147483647, %v9529_v35 }
 0x58a   :  { %v4052_v33 = vmul.f32 %v5010_v47, %v9508_v13  ;;  %v5012_v58 = vpop.eup %5011  ;;  %vm4057_vm14 = vweird.f32 %v5010_v47  ;;  %vm9556_vm15 = vcmp.eq.f32.partialorder %v4045_v31, 8.507059e+37  ;;  %vm4026_vm2 = vweird.f32 %v9529_v35  ;;  %v3682_v63 = vpop.xlane.xlu2 %3681 }
 0x58b   :  { %v3995_v17 = vadd.f32 %v5002_v26, %v3994_v53  ;;  %v3979_v18 = vmul.f32 %v5006_v24, %v3978_v44  ;;  %5015 = vrcp.f32 %v9542_v41  ;;  %v4037_v0 = vmul.f32 %v5012_v58, %v9514_v61 }
 0x58c   :  { %v4053_v10 = vsub.f32 1.0, %v4052_v33  ;;  %vm4042_vm1 = vweird.f32 %v5012_v58  ;;  %v4033_v14 = vor.u32 1.1754944e-38, %v4032_v51  ;;  %5017 = vpow2.f32 %v4547_v16 }
 0x58d   :  { %v3999_v38 = vsel %vm3998_vm13, %v5002_v26, %v3995_v17  ;;  %v3980_v43 = vadd.f32 %v5006_v24, %v3979_v18  ;;  %v4038_v55 = vsub.f32 1.0, %v4037_v0  ;;  %v3738_v5 = vadd.f32 %v9372_v23, %v3667_v45 }
 0x58e   :  { %v4004_v28 = vsel %vm9521_vm5, %v4003_v25, %v3999_v38  ;;  %v5014_v34 = vpop.eup %5013  ;;  %v4054_v21 = vmul.f32 %v5010_v47, %v4053_v10  ;;  %v4105_v37 = vand.u32 2147483647, %v9542_v41  ;;  %v4107_v29 = vand.u32 2147483648, %v9542_v41  ;;  %vm4058_vm5 = vmor %vm4056_vm9, %vm4057_vm14 }
 0x58f   :  { %4374 = vst.msk [vmem:[%s9892_s7 + $0x38] sm:$0xff] %vm4366_vm0, %v4004_v28  ;;  %v3984_v50 = vsel %vm3983_vm3, %v5006_v24, %v3980_v43  ;;  %v4022_v27 = vmul.f32 %v5014_v34, %v9529_v35  ;;  %v4039_v19 = vmul.f32 %v5012_v58, %v4038_v55  ;;  %vm4027_vm4 = vweird.f32 %v5014_v34 }
 0x590   :  { %v3989_v6 = vsel %vm9533_vm7, %v3988_v60, %v3984_v50  ;;  %v4055_v54 = vadd.f32 %v5010_v47, %v4054_v21  ;;  %v3679_v12 = vpop.xlane.xlu1 %3678  ;;  %v4546_v39 = vmul.f32 -1.442695, %v3738_v5  ;;  %v3743_v30 = vadd.f32 %v9372_v23, %v3682_v63  ;;  %vm4043_vm7 = vmor %vm4041_vm12, %vm4042_vm1 }
 0x591   :  { %v5016_v15 = vpop.eup %5015  ;;  %4373 = vst.msk [vmem:[%s9892_s7 + $0x30] sm:$0xff] %vm4366_vm0, %v3989_v6  ;;  %v4023_v9 = vsub.f32 1.0, %v4022_v27  ;;  %v3742_v4 = vadd.f32 %v9372_v23, %v3679_v12  ;;  %v4040_v56 = vadd.f32 %v5012_v58, %v4039_v19  ;;  %vm4028_vm8 = vmor %vm4026_vm2, %vm4027_vm4  ;;  %vm4031_vm9 = vcmp.eq.f32.partialorder %v4030_v32, 8.507059e+37 }
 0x592   :  { %v4059_v26 = vsel %vm4058_vm5, %v5010_v47, %v4055_v54  ;;  %v4097_v22 = vmul.f32 %v5016_v15, %v9542_v41  ;;  %vm4102_vm6 = vweird.f32 %v5016_v15  ;;  %5019 = vpow2.f32 %v4546_v39  ;;  %v5018_v8 = vpop.eup %5017 }
 0x593   :  { %v3676_v7 = vpop.xlane.xlu0 %3675  ;;  %v4064_v11 = vsel %vm9545_vm11, %v4063_v59, %v4059_v26  ;;  %v4024_v13 = vmul.f32 %v5014_v34, %v4023_v9  ;;  %v4551_v52 = vmul.f32 -1.442695, %v3743_v30  ;;  %v4044_v46 = vsel %vm4043_vm7, %v5012_v58, %v4040_v56 }
 0x594   :  { %4378 = vst.msk [vmem:[%s9892_s7 + $0x58] sm:$0xff] %vm4366_vm0, %v4064_v11  ;;  %v4098_v25 = vsub.f32 1.0, %v4097_v22  ;;  %v4550_v40 = vmul.f32 -1.442695, %v3742_v4  ;;  %v3741_v24 = vadd.f32 %v9372_v23, %v3676_v7  ;;  %v4049_v49 = vsel %vm9556_vm15, %v4048_v2, %v4044_v46 }
 0x595   :  { %v4025_v42 = vadd.f32 %v5014_v34, %v4024_v13  ;;  %v9598_v61 = vadd.f32 1.0, %v5018_v8  ;;  %5021 = vpow2.f32 %v4551_v52  ;;  %4377 = vst.msk [vmem:[%s9892_s7 + $0x50] sm:$0xff] %vm4366_vm0, %v4049_v49  ;;  %vm4101_vm10 = vweird.f32 %v9542_v41 }
 0x596   :  { %v4099_v48 = vmul.f32 %v5016_v15, %v4098_v25  ;;  %5023 = vpow2.f32 %v4550_v40  ;;  %v4549_v1 = vmul.f32 -1.442695, %v3741_v24  ;;  %vm4103_vm11 = vmor %vm4101_vm10, %vm4102_vm6  ;;  %v4108_v45 = vor.u32 1.1754944e-38, %v4107_v29 }
 0x597   :  { %v3691_v62 = vpop.xlane.xlu2 %3690  ;;  %v4029_v20 = vsel %vm4028_vm8, %v5014_v34, %v4025_v42  ;;  %5025 = vrcp.f32 %v9598_v61  ;;  %vm4106_vm12 = vcmp.eq.f32.partialorder %v4105_v37, 8.507059e+37  ;;  %v4090_v41 = vand.u32 2147483647, %v9598_v61 }
 0x598   :  { %v3746_v60 = vadd.f32 %v9372_v23, %v3691_v62  ;;  %v4034_v57 = vsel %vm4031_vm9, %v4033_v14, %v4029_v20  ;;  %v4100_v53 = vadd.f32 %v5016_v15, %v4099_v48  ;;  %5027 = vpow2.f32 %v4549_v1  ;;  %v5020_v31 = vpop.eup %5019 }
 0x599   :  { %4376 = vst.msk [vmem:[%s9892_s7 + $0x48] sm:$0xff] %vm4366_vm0, %v4034_v57  ;;  %v9617_v35 = vadd.f32 1.0, %v5020_v31  ;;  %v4092_v58 = vand.u32 2147483648, %v9598_v61  ;;  %vm4086_vm13 = vweird.f32 %v9598_v61  ;;  %vm9633_vm14 = vcmp.eq.f32.partialorder %v4090_v41, 8.507059e+37 }
 0x59a   :  { %v4554_v47 = vmul.f32 -1.442695, %v3746_v60  ;;  %v4104_v44 = vsel %vm4103_vm11, %v5016_v15, %v4100_v53 }
 0x59b   :  { %v5022_v51 = vpop.eup %5021  ;;  %v4109_v17 = vsel %vm4106_vm12, %v4108_v45, %v4104_v44  ;;  %v4075_v28 = vand.u32 2147483647, %v9617_v35  ;;  %v4077_v43 = vand.u32 2147483648, %v9617_v35  ;;  %v4093_v63 = vor.u32 1.1754944e-38, %v4092_v58 }
 0x59c   :  { %5029 = vpow2.f32 %v4554_v47  ;;  %v5024_v3 = vpop.eup %5023  ;;  %4381 = vst.msk [vmem:[%s9892_s7 + $0x70] sm:$0xff] %vm4366_vm0, %v4109_v17  ;;  %v9627_v18 = vadd.f32 1.0, %v5022_v51  ;;  %vm4071_vm1 = vweird.f32 %v9617_v35 }
 0x59d   :  { %v3688_v59 = vpop.xlane.xlu1 %3687  ;;  %5031 = vrcp.f32 %v9617_v35  ;;  %v5026_v16 = vpop.eup %5025  ;;  %v9629_v2 = vadd.f32 1.0, %v5024_v3  ;;  %vm9651_vm2 = vcmp.eq.f32.partialorder %v4075_v28, 8.507059e+37  ;;  %v4078_v19 = vor.u32 1.1754944e-38, %v4077_v43 }
 0x59e   :  { %v3745_v33 = vadd.f32 %v9372_v23, %v3688_v59  ;;  %v5028_v32 = vpop.eup %5027  ;;  %v4082_v38 = vmul.f32 %v5026_v16, %v9598_v61  ;;  %5033 = vrcp.f32 %v9627_v18  ;;  %vm4087_vm15 = vweird.f32 %v5026_v16 }
 0x59f   :  { %5035 = vrcp.f32 %v9629_v2  ;;  %v4150_v34 = vand.u32 2147483647, %v9627_v18  ;;  %v9642_v21 = vadd.f32 1.0, %v5028_v32  ;;  %v4152_v50 = vand.u32 2147483648, %v9627_v18  ;;  %vm4088_vm3 = vmor %vm4086_vm13, %vm4087_vm15 }
 0x5a0   :  { %v4553_v10 = vmul.f32 -1.442695, %v3745_v33  ;;  %v4083_v36 = vsub.f32 1.0, %v4082_v38  ;;  %v4135_v29 = vand.u32 2147483647, %v9629_v2  ;;  %v4137_v12 = vand.u32 2147483648, %v9629_v2  ;;  %v3685_v56 = vpop.xlane.xlu0 %3684 }
 0x5a1   :  { %vm4146_vm4 = vweird.f32 %v9627_v18  ;;  %vm4131_vm5 = vweird.f32 %v9629_v2  ;;  %vm9663_vm6 = vcmp.eq.f32.partialorder %v4150_v34, 8.507059e+37  ;;  %v4153_v26 = vor.u32 1.1754944e-38, %v4152_v50 }
 0x5a2   :  { %v5030_v14 = vpop.eup %5029  ;;  %v4084_v5 = vmul.f32 %v5026_v16, %v4083_v36  ;;  %5037 = vpow2.f32 %v4553_v10  ;;  %vm9670_vm8 = vcmp.eq.f32.partialorder %v4135_v29, 8.507059e+37  ;;  %v4138_v25 = vor.u32 1.1754944e-38, %v4137_v12 }
 0x5a3   :  { %v5032_v55 = vpop.eup %5031  ;;  %v9645_v27 = vadd.f32 1.0, %v5030_v14  ;;  %5039 = vrcp.f32 %v9642_v21  ;;  %vm4116_vm9 = vweird.f32 %v9642_v21  ;;  %v4120_v40 = vand.u32 2147483647, %v9642_v21 }
 0x5a4   :  { %v4067_v37 = vmul.f32 %v5032_v55, %v9617_v35  ;;  %v4085_v6 = vadd.f32 %v5026_v16, %v4084_v5  ;;  %v5034_v15 = vpop.eup %5033  ;;  %vm4072_vm7 = vweird.f32 %v5032_v55  ;;  %v4122_v61 = vand.u32 2147483648, %v9642_v21  ;;  %v3700_v20 = vpop.xlane.xlu2 %3699 }
 0x5a5   :  { %5041 = vrcp.f32 %v9645_v27  ;;  %v5036_v39 = vpop.eup %5035  ;;  %v4142_v4 = vmul.f32 %v5034_v15, %v9627_v18  ;;  %vm4073_vm10 = vmor %vm4071_vm1, %vm4072_vm7  ;;  %vm4147_vm11 = vweird.f32 %v5034_v15  ;;  %v3744_v60 = vadd.f32 %v9372_v23, %v3685_v56 }
 0x5a6   :  { %v4068_v9 = vsub.f32 1.0, %v4067_v37  ;;  %v4089_v30 = vsel %vm4088_vm3, %v5026_v16, %v4085_v6  ;;  %v4127_v13 = vmul.f32 %v5036_v39, %v9629_v2  ;;  %vm4132_vm12 = vweird.f32 %v5036_v39  ;;  %vm4148_vm13 = vmor %vm4146_vm4, %vm4147_vm11 }
 0x5a7   :  { %v4094_v22 = vsel %vm9633_vm14, %v4093_v63, %v4089_v30  ;;  %v4143_v46 = vsub.f32 1.0, %v4142_v4  ;;  %vm4191_vm15 = vweird.f32 %v9645_v27  ;;  %v4195_v51 = vand.u32 2147483647, %v9645_v27  ;;  %vm4133_vm1 = vmor %vm4131_vm5, %vm4132_vm12 }
 0x5a8   :  { %v4069_v11 = vmul.f32 %v5032_v55, %v4068_v9  ;;  %v5038_v8 = vpop.eup %5037  ;;  %4380 = vst.msk [vmem:[%s9892_s7 + $0x68] sm:$0xff] %vm4366_vm0, %v4094_v22  ;;  %v4128_v42 = vsub.f32 1.0, %v4127_v13  ;;  %v4552_v3 = vmul.f32 -1.442695, %v3744_v60  ;;  %v4197_v18 = vand.u32 2147483648, %v9645_v27  ;;  %v3697_v32 = vpop.xlane.xlu1 %3696 }
 0x5a9   :  { %v5040_v24 = vpop.eup %5039  ;;  %v9681_v62 = vadd.f32 1.0, %v5038_v8  ;;  %v4144_v48 = vmul.f32 %v5034_v15, %v4143_v46  ;;  %v4123_v28 = vor.u32 1.1754944e-38, %v4122_v61  ;;  %v3749_v43 = vadd.f32 %v9372_v23, %v3700_v20 }
 0x5aa   :  { %v4070_v49 = vadd.f32 %v5032_v55, %v4069_v11  ;;  %v4112_v1 = vmul.f32 %v5040_v24, %v9642_v21  ;;  %v4129_v31 = vmul.f32 %v5036_v39, %v4128_v42  ;;  %vm4117_vm14 = vweird.f32 %v5040_v24 }
 0x5ab   :  { %v5042_v57 = vpop.eup %5041  ;;  %5043 = vrcp.f32 %v9681_v62  ;;  %v4145_v47 = vadd.f32 %v5034_v15, %v4144_v48  ;;  %vm4118_vm3 = vmor %vm4116_vm9, %vm4117_vm14  ;;  %v3748_v14 = vadd.f32 %v9372_v23, %v3697_v32  ;;  %vm4121_vm4 = vcmp.eq.f32.partialorder %v4120_v40, 8.507059e+37 }
 0x5ac   :  { %v4074_v53 = vsel %vm4073_vm10, %v5032_v55, %v4070_v49  ;;  %v4113_v44 = vsub.f32 1.0, %v4112_v1  ;;  %v4187_v35 = vmul.f32 %v5042_v57, %v9645_v27  ;;  %v4130_v59 = vadd.f32 %v5036_v39, %v4129_v31 }
 0x5ad   :  { %v4079_v45 = vsel %vm9651_vm2, %v4078_v19, %v4074_v53  ;;  %v4149_v17 = vsel %vm4148_vm13, %v5034_v15, %v4145_v47  ;;  %vm4192_vm2 = vweird.f32 %v5042_v57  ;;  %5045 = vpow2.f32 %v4552_v3 }
 0x5ae   :  { %4379 = vst.msk [vmem:[%s9892_s7 + $0x60] sm:$0xff] %vm4366_vm0, %v4079_v45  ;;  %v4114_v41 = vmul.f32 %v5040_v24, %v4113_v44  ;;  %v4188_v33 = vsub.f32 1.0, %v4187_v35  ;;  %v4154_v16 = vsel %vm9663_vm6, %v4153_v26, %v4149_v17  ;;  %v4134_v58 = vsel %vm4133_vm1, %v5036_v39, %v4130_v59  ;;  %v3694_v0 = vpop.xlane.xlu0 %3693  ;;  %vm4193_vm5 = vmor %vm4191_vm15, %vm4192_vm2 }
 0x5af   :  { %4384 = vst.msk [vmem:[%s9892_s7 + $0x88] sm:$0xff] %vm4366_vm0, %v4154_v16  ;;  %v4139_v2 = vsel %vm9670_vm8, %v4138_v25, %v4134_v58  ;;  %v3747_v63 = vadd.f32 %v9372_v23, %v3694_v0  ;;  %v4198_v37 = vor.u32 1.1754944e-38, %v4197_v18  ;;  %v4557_v21 = vmul.f32 -1.442695, %v3749_v43 }
 0x5b0   :  { %v4115_v38 = vadd.f32 %v5040_v24, %v4114_v41  ;;  %v4189_v10 = vmul.f32 %v5042_v57, %v4188_v33  ;;  %4383 = vst.msk [vmem:[%s9892_s7 + $0x80] sm:$0xff] %vm4366_vm0, %v4139_v2  ;;  %v4556_v29 = vmul.f32 -1.442695, %v3748_v14  ;;  %vm4196_vm6 = vcmp.eq.f32.partialorder %v4195_v51, 8.507059e+37 }
 0x5b1   :  { %v5044_v36 = vpop.eup %5043  ;;  %v4555_v19 = vmul.f32 -1.442695, %v3747_v63  ;;  %v3709_v12 = vpop.xlane.xlu2 %3708  ;;  %v4182_v9 = vand.u32 2147483648, %v9681_v62  ;;  %5047 = vpow2.f32 %v4557_v21  ;;  %v4180_v4 = vand.u32 2147483647, %v9681_v62 }
 0x5b2   :  { %v4119_v34 = vsel %vm4118_vm3, %v5040_v24, %v4115_v38  ;;  %v4190_v55 = vadd.f32 %v5042_v57, %v4189_v10  ;;  %v4172_v5 = vmul.f32 %v5044_v36, %v9681_v62  ;;  %v3752_v27 = vadd.f32 %v9372_v23, %v3709_v12 }
 0x5b3   :  { %v4124_v50 = vsel %vm4121_vm4, %v4123_v28, %v4119_v34  ;;  %v5046_v39 = vpop.eup %5045  ;;  %vm4177_vm7 = vweird.f32 %v5044_v36  ;;  %5049 = vpow2.f32 %v4556_v29  ;;  %vm4176_vm8 = vweird.f32 %v9681_v62 }
 0x5b4   :  { %4382 = vst.msk [vmem:[%s9892_s7 + $0x78] sm:$0xff] %vm4366_vm0, %v4124_v50  ;;  %v4194_v6 = vsel %vm4193_vm5, %v5042_v57, %v4190_v55  ;;  %v4173_v54 = vsub.f32 1.0, %v4172_v5  ;;  %v3872_v7 = vadd.f32 1.0, %v5046_v39  ;;  %v4560_v26 = vmul.f32 -1.442695, %v3752_v27  ;;  %vm4178_vm9 = vmor %vm4176_vm8, %vm4177_vm7 }
 0x5b5   :  { %v4199_v15 = vsel %vm4196_vm6, %v4198_v37, %v4194_v6  ;;  %v3706_v56 = vpop.xlane.xlu1 %3705  ;;  %5051 = vpow2.f32 %v4555_v19  ;;  %v4183_v13 = vor.u32 1.1754944e-38, %v4182_v9  ;;  %vm4181_vm10 = vcmp.eq.f32.partialorder %v4180_v4, 8.507059e+37 }
 0x5b6   :  { %4387 = vst.msk [vmem:[%s9892_s7 + $0xa0] sm:$0xff] %vm4366_vm0, %v4199_v15  ;;  %v4174_v30 = vmul.f32 %v5044_v36, %v4173_v54  ;;  %v3751_v11 = vadd.f32 %v9372_v23, %v3706_v56  ;;  %5053 = vrcp.f32 %v3872_v7  ;;  %v4165_v60 = vand.u32 2147483647, %v3872_v7 }
 0x5b7   :  { %5055 = vpow2.f32 %v4560_v26  ;;  %v5048_v25 = vpop.eup %5047  ;;  %v4167_v20 = vand.u32 2147483648, %v3872_v7  ;;  %vm4161_vm11 = vweird.f32 %v3872_v7 }
 0x5b8   :  { %v4175_v22 = vadd.f32 %v5044_v36, %v4174_v30  ;;  %v4559_v8 = vmul.f32 -1.442695, %v3751_v11  ;;  %v9742_v42 = vadd.f32 1.0, %v5048_v25  ;;  %vm9756_vm12 = vcmp.eq.f32.partialorder %v4165_v60, 8.507059e+37 }
 0x5b9   :  { %v3703_v46 = vpop.xlane.xlu0 %3702  ;;  %v5050_v49 = vpop.eup %5049  ;;  %v4168_v3 = vor.u32 1.1754944e-38, %v4167_v20 }
 0x5ba   :  { %v4179_v52 = vsel %vm4178_vm9, %v5044_v36, %v4175_v22  ;;  %v3750_v24 = vadd.f32 %v9372_v23, %v3703_v46  ;;  %v9744_v61 = vadd.f32 1.0, %v5050_v49  ;;  %5057 = vpow2.f32 %v4559_v8 }
 0x5bb   :  { %v4184_v40 = vsel %vm4181_vm10, %v4183_v13, %v4179_v52  ;;  %v5052_v62 = vpop.eup %5051  ;;  %5059 = vrcp.f32 %v9742_v42  ;;  %v4240_v31 = vand.u32 2147483647, %v9742_v42  ;;  %v4242_v45 = vand.u32 2147483648, %v9742_v42 }
 0x5bc   :  { %4386 = vst.msk [vmem:[%s9892_s7 + $0x98] sm:$0xff] %vm4366_vm0, %v4184_v40  ;;  %v4558_v48 = vmul.f32 -1.442695, %v3750_v24  ;;  %v5054_v1 = vpop.eup %5053  ;;  %5061 = vrcp.f32 %v9744_v61  ;;  %v9750_v47 = vadd.f32 1.0, %v5052_v62  ;;  %v4225_v59 = vand.u32 2147483647, %v9744_v61 }
 0x5bd   :  { %v5056_v57 = vpop.eup %5055  ;;  %v4157_v53 = vmul.f32 %v5054_v1, %v3872_v7  ;;  %v4227_v51 = vand.u32 2147483648, %v9744_v61  ;;  %vm4236_vm13 = vweird.f32 %v9742_v42  ;;  %vm4162_vm14 = vweird.f32 %v5054_v1 }
 0x5be   :  { %v9752_v44 = vadd.f32 1.0, %v5056_v57  ;;  %5063 = vpow2.f32 %v4558_v48  ;;  %vm4221_vm15 = vweird.f32 %v9744_v61  ;;  %vm9765_vm1 = vcmp.eq.f32.partialorder %v4240_v31, 8.507059e+37  ;;  %vm4163_vm3 = vmor %vm4161_vm11, %vm4162_vm14 }
 0x5bf   :  { %v4158_v35 = vsub.f32 1.0, %v4157_v53  ;;  %v3718_v17 = vpop.xlane.xlu2 %3717  ;;  %5065 = vrcp.f32 %v9750_v47  ;;  %v4243_v38 = vor.u32 1.1754944e-38, %v4242_v45  ;;  %vm9771_vm2 = vcmp.eq.f32.partialorder %v4225_v59, 8.507059e+37 }
 0x5c0   :  { %v5058_v41 = vpop.eup %5057  ;;  %5067 = vrcp.f32 %v9752_v44  ;;  %v3755_v10 = vadd.f32 %v9372_v23, %v3718_v17  ;;  %v4228_v43 = vor.u32 1.1754944e-38, %v4227_v51  ;;  %v4210_v63 = vand.u32 2147483647, %v9750_v47 }
 0x5c1   :  { %v5060_v16 = vpop.eup %5059  ;;  %v4159_v58 = vmul.f32 %v5054_v1, %v4158_v35  ;;  %v4212_v34 = vand.u32 2147483648, %v9750_v47  ;;  %v9778_v55 = vadd.f32 1.0, %v5058_v41  ;;  %vm4206_vm5 = vweird.f32 %v9750_v47 }
 0x5c2   :  { %v5062_v18 = vpop.eup %5061  ;;  %v4232_v32 = vmul.f32 %v5060_v16, %v9742_v42  ;;  %v3715_v5 = vpop.xlane.xlu1 %3714  ;;  %vm4237_vm4 = vweird.f32 %v5060_v16  ;;  %vm4281_vm6 = vweird.f32 %v9752_v44  ;;  %v4563_v19 = vmul.f32 -1.442695, %v3755_v10 }
 0x5c3   :  { %v4160_v0 = vadd.f32 %v5054_v1, %v4159_v58  ;;  %v4217_v36 = vmul.f32 %v5062_v18, %v9744_v61  ;;  %5069 = vrcp.f32 %v9778_v55  ;;  %vm4222_vm7 = vweird.f32 %v5062_v18  ;;  %vm4238_vm9 = vmor %vm4236_vm13, %vm4237_vm4 }
 0x5c4   :  { %v4233_v14 = vsub.f32 1.0, %v4232_v32  ;;  %v5064_v50 = vpop.eup %5063  ;;  %v4285_v27 = vand.u32 2147483647, %v9752_v44  ;;  %vm9791_vm8 = vcmp.eq.f32.partialorder %v4210_v63, 8.507059e+37  ;;  %v4213_v4 = vor.u32 1.1754944e-38, %v4212_v34  ;;  %vm4223_vm10 = vmor %vm4221_vm15, %vm4222_vm7 }
 0x5c5   :  { %v4164_v37 = vsel %vm4163_vm3, %v5054_v1, %v4160_v0  ;;  %v4218_v21 = vsub.f32 1.0, %v4217_v36  ;;  %v5066_v29 = vpop.eup %5065  ;;  %v4287_v22 = vand.u32 2147483648, %v9752_v44  ;;  %v9800_v11 = vadd.f32 1.0, %v5064_v50 }
 0x5c6   :  { %v4169_v6 = vsel %vm9756_vm12, %v4168_v3, %v4164_v37  ;;  %v4234_v54 = vmul.f32 %v5060_v16, %v4233_v14  ;;  %v5068_v12 = vpop.eup %5067  ;;  %v4202_v9 = vmul.f32 %v5066_v29, %v9750_v47  ;;  %5071 = vpow2.f32 %v4563_v19  ;;  %v3712_v46 = vpop.xlane.xlu0 %3711 }
 0x5c7   :  { %4385 = vst.msk [vmem:[%s9892_s7 + $0x90] sm:$0xff] %vm4366_vm0, %v4169_v6  ;;  %v4219_v15 = vmul.f32 %v5062_v18, %v4218_v21  ;;  %v4277_v7 = vmul.f32 %v5068_v12, %v9752_v44  ;;  %v3754_v8 = vadd.f32 %v9372_v23, %v3715_v5  ;;  %vm4207_vm11 = vweird.f32 %v5066_v29 }
 0x5c8   :  { %v4235_v39 = vadd.f32 %v5060_v16, %v4234_v54  ;;  %v4203_v56 = vsub.f32 1.0, %v4202_v9  ;;  %vm4282_vm12 = vweird.f32 %v5068_v12  ;;  %5073 = vrcp.f32 %v9800_v11  ;;  %vm4208_vm14 = vmor %vm4206_vm5, %vm4207_vm11 }
 0x5c9   :  { %v4220_v26 = vadd.f32 %v5062_v18, %v4219_v15  ;;  %v4278_v52 = vsub.f32 1.0, %v4277_v7  ;;  %v5070_v49 = vpop.eup %5069  ;;  %vm9818_vm13 = vcmp.eq.f32.partialorder %v4285_v27, 8.507059e+37  ;;  %v4288_v1 = vor.u32 1.1754944e-38, %v4287_v22  ;;  %vm4283_vm15 = vmor %vm4281_vm6, %vm4282_vm12 }
 0x5ca   :  { %v4239_v13 = vsel %vm4238_vm9, %v5060_v16, %v4235_v39  ;;  %v4204_v24 = vmul.f32 %v5066_v29, %v4203_v56  ;;  %v4262_v60 = vmul.f32 %v5070_v49, %v9778_v55  ;;  %v4270_v57 = vand.u32 2147483647, %v9778_v55  ;;  %v3724_v45 = vpop.xlane.xlu1 %3723 }
 0x5cb   :  { %v4244_v25 = vsel %vm9765_vm1, %v4243_v38, %v4239_v13  ;;  %v4224_v40 = vsel %vm4223_vm10, %v5062_v18, %v4220_v26  ;;  %v4279_v61 = vmul.f32 %v5068_v12, %v4278_v52  ;;  %v4562_v53 = vmul.f32 -1.442695, %v3754_v8 }
 0x5cc   :  { %4390 = vst.msk [vmem:[%s9892_s7 + $0xb8] sm:$0xff] %vm4366_vm0, %v4244_v25  ;;  %v4229_v42 = vsel %vm9771_vm2, %v4228_v43, %v4224_v40  ;;  %v4205_v62 = vadd.f32 %v5066_v29, %v4204_v24  ;;  %v3753_v31 = vadd.f32 %v9372_v23, %v3712_v46  ;;  %v4263_v59 = vsub.f32 1.0, %v4262_v60  ;;  %v5072_v41 = vpop.eup %5071 }
 0x5cd   :  { %4389 = vst.msk [vmem:[%s9892_s7 + $0xb0] sm:$0xff] %vm4366_vm0, %v4229_v42  ;;  %v4280_v20 = vadd.f32 %v5068_v12, %v4279_v61  ;;  %v4272_v51 = vand.u32 2147483648, %v9778_v55  ;;  %v3757_v17 = vadd.f32 %v9372_v23, %v3724_v45  ;;  %vm4267_vm1 = vweird.f32 %v5070_v49 }
 0x5ce   :  { %v4209_v35 = vsel %vm4208_vm14, %v5066_v29, %v4205_v62  ;;  %5075 = vpow2.f32 %v4562_v53  ;;  %v4264_v3 = vmul.f32 %v5070_v49, %v4263_v59  ;;  %v3883_v16 = vadd.f32 1.0, %v5072_v41  ;;  %v5074_v18 = vpop.eup %5073 }
 0x5cf   :  { %v4214_v47 = vsel %vm9791_vm8, %v4213_v4, %v4209_v35  ;;  %v4284_v33 = vsel %vm4283_vm15, %v5068_v12, %v4280_v20  ;;  %v4561_v58 = vmul.f32 -1.442695, %v3753_v31  ;;  %v4565_v32 = vmul.f32 -1.442695, %v3757_v17  ;;  %v3721_v2 = vpop.xlane.xlu0 %3720 }
 0x5d0   :  { %4388 = vst.msk [vmem:[%s9892_s7 + $0xa8] sm:$0xff] %vm4366_vm0, %v4214_v47  ;;  %v4289_v44 = vsel %vm9818_vm13, %v4288_v1, %v4284_v33  ;;  %v4265_v38 = vadd.f32 %v5070_v49, %v4264_v3  ;;  %vm4266_vm2 = vweird.f32 %v9778_v55  ;;  %v4247_v10 = vmul.f32 %v5074_v18, %v9800_v11 }
 0x5d1   :  { %4393 = vst.msk [vmem:[%s9892_s7 + $0xd0] sm:$0xff] %vm4366_vm0, %v4289_v44  ;;  %5077 = vrcp.f32 %v3883_v16  ;;  %vm4268_vm3 = vmor %vm4266_vm2, %vm4267_vm1  ;;  %vm4271_vm4 = vcmp.eq.f32.partialorder %v4270_v57, 8.507059e+37  ;;  %v4273_v0 = vor.u32 1.1754944e-38, %v4272_v51  ;;  %v3756_v43 = vadd.f32 %v9372_v23, %v3721_v2 }
 0x5d2   :  { %5079 = vpow2.f32 %v4561_v58  ;;  %v4269_v36 = vsel %vm4268_vm3, %v5070_v49, %v4265_v38  ;;  %v4248_v28 = vsub.f32 1.0, %v4247_v10  ;;  %v4255_v34 = vand.u32 2147483647, %v9800_v11 }
 0x5d3   :  { %5081 = vpow2.f32 %v4565_v32  ;;  %v4274_v63 = vsel %vm4271_vm4, %v4273_v0, %v4269_v36  ;;  %v4257_v5 = vand.u32 2147483648, %v9800_v11  ;;  %vm4252_vm5 = vweird.f32 %v5074_v18 }
 0x5d4   :  { %v5076_v14 = vpop.eup %5075  ;;  %4392 = vst.msk [vmem:[%s9892_s7 + $0xc8] sm:$0xff] %vm4366_vm0, %v4274_v63  ;;  %v4249_v55 = vmul.f32 %v5074_v18, %v4248_v28  ;;  %v4564_v37 = vmul.f32 -1.442695, %v3756_v43  ;;  %vm4251_vm6 = vweird.f32 %v9800_v11  ;;  %vm4256_vm8 = vcmp.eq.f32.partialorder %v4255_v34, 8.507059e+37 }
 0x5d5   :  { %v3882_v50 = vadd.f32 1.0, %v5076_v14  ;;  %vm4253_vm7 = vmor %vm4251_vm6, %vm4252_vm5  ;;  %v4258_v6 = vor.u32 1.1754944e-38, %v4257_v5  ;;  %v4332_v30 = vand.u32 2147483648, %v3883_v16  ;;  %v4330_v7 = vand.u32 2147483647, %v3883_v16 }
 0x5d6   :  { %v4250_v29 = vadd.f32 %v5074_v18, %v4249_v55  ;;  %vm4326_vm10 = vweird.f32 %v3883_v16 }
 0x5d7   :  { %v5078_v21 = vpop.eup %5077  ;;  %5083 = vrcp.f32 %v3882_v50  ;;  %v4333_v13 = vor.u32 1.1754944e-38, %v4332_v30  ;;  %vm4331_vm12 = vcmp.eq.f32.partialorder %v4330_v7, 8.507059e+37  ;;  %v4315_v25 = vand.u32 2147483647, %v3882_v50 }
 0x5d8   :  { %v5080_v23 = vpop.eup %5079  ;;  %v4322_v54 = vmul.f32 %v5078_v21, %v3883_v16  ;;  %5085 = vpow2.f32 %v4564_v37  ;;  %v4254_v12 = vsel %vm4253_vm7, %v5074_v18, %v4250_v29  ;;  %vm4327_vm9 = vweird.f32 %v5078_v21 }
 0x5d9   :  { %v5082_v19 = vpop.eup %5081  ;;  %v3881_v15 = vadd.f32 1.0, %v5080_v23  ;;  %v4259_v9 = vsel %vm4256_vm8, %v4258_v6, %v4254_v12  ;;  %vm4328_vm11 = vmor %vm4326_vm10, %vm4327_vm9  ;;  %v4317_v49 = vand.u32 2147483648, %v3882_v50  ;;  %vm4311_vm14 = vweird.f32 %v3882_v50 }
 0x5da   :  { %v4323_v27 = vsub.f32 1.0, %v4322_v54  ;;  %v9854_v39 = vadd.f32 1.0, %v5082_v19  ;;  %4391 = vst.msk [vmem:[%s9892_s7 + $0xc0] sm:$0xff] %vm4366_vm0, %v4259_v9  ;;  %vm4316_vm15 = vcmp.eq.f32.partialorder %v4315_v25, 8.507059e+37 }
 0x5db   :  { %5087 = vrcp.f32 %v3881_v15  ;;  %v4318_v20 = vor.u32 1.1754944e-38, %v4317_v49  ;;  %v4300_v57 = vand.u32 2147483647, %v3881_v15  ;;  %v4302_v53 = vand.u32 2147483648, %v3881_v15 }
 0x5dc   :  { %v4324_v4 = vmul.f32 %v5078_v21, %v4323_v27  ;;  %5089 = vrcp.f32 %v9854_v39  ;;  %v4362_v59 = vand.u32 2147483648, %v9854_v39  ;;  %v4360_v47 = vand.u32 2147483647, %v9854_v39 }
 0x5dd   :  { %v5084_v26 = vpop.eup %5083  ;;  %vm4296_vm4 = vweird.f32 %v3881_v15  ;;  %v4303_v3 = vor.u32 1.1754944e-38, %v4302_v53  ;;  %vm4356_vm6 = vweird.f32 %v9854_v39  ;;  %vm4301_vm7 = vcmp.eq.f32.partialorder %v4300_v57, 8.507059e+37 }
 0x5de   :  { %v5086_v56 = vpop.eup %5085  ;;  %v4325_v22 = vadd.f32 %v5078_v21, %v4324_v4  ;;  %v4307_v11 = vmul.f32 %v5084_v26, %v3882_v50  ;;  %vm4312_vm13 = vweird.f32 %v5084_v26  ;;  %v4363_v18 = vor.u32 1.1754944e-38, %v4362_v59 }
 0x5df   :  { %v3884_v52 = vadd.f32 1.0, %v5086_v56  ;;  %vm4313_vm1 = vmor %vm4311_vm14, %vm4312_vm13  ;;  %vm4361_vm9 = vcmp.eq.f32.partialorder %v4360_v47, 8.507059e+37 }
 0x5e0   :  { %v4329_v8 = vsel %vm4328_vm11, %v5078_v21, %v4325_v22  ;;  %v4308_v46 = vsub.f32 1.0, %v4307_v11 }
 0x5e1   :  { %v5088_v40 = vpop.eup %5087  ;;  %v4334_v24 = vsel %vm4331_vm12, %v4333_v13, %v4329_v8  ;;  %5091 = vrcp.f32 %v3884_v52  ;;  %v4347_v10 = vand.u32 2147483648, %v3884_v52  ;;  %v4345_v28 = vand.u32 2147483647, %v3884_v52 }
 0x5e2   :  { %v5090_v42 = vpop.eup %5089  ;;  %4396 = vst.msk [vmem:[%s9892_s7 + $0xe8] sm:$0xff] %vm4366_vm0, %v4334_v24  ;;  %v4309_v61 = vmul.f32 %v5084_v26, %v4308_v46  ;;  %v4292_v62 = vmul.f32 %v5088_v40, %v3881_v15  ;;  %vm4297_vm2 = vweird.f32 %v5088_v40  ;;  %vm4341_vm11 = vweird.f32 %v3884_v52 }
 0x5e3   :  { %v4352_v48 = vmul.f32 %v5090_v42, %v9854_v39  ;;  %vm4357_vm3 = vweird.f32 %v5090_v42  ;;  %vm4298_vm5 = vmor %vm4296_vm4, %vm4297_vm2  ;;  %v4348_v14 = vor.u32 1.1754944e-38, %v4347_v10  ;;  %vm4346_vm13 = vcmp.eq.f32.partialorder %v4345_v28, 8.507059e+37 }
 0x5e4   :  { %v4310_v1 = vadd.f32 %v5084_v26, %v4309_v61  ;;  %v4293_v60 = vsub.f32 1.0, %v4292_v62  ;;  %vm4358_vm8 = vmor %vm4356_vm6, %vm4357_vm3 }
 0x5e5   :  { %v4353_v31 = vsub.f32 1.0, %v4352_v48 }
 0x5e6   :  { %v4314_v45 = vsel %vm4313_vm1, %v5084_v26, %v4310_v1  ;;  %v4294_v35 = vmul.f32 %v5088_v40, %v4293_v60 }
 0x5e7   :  { %v5092_v51 = vpop.eup %5091  ;;  %v4319_v17 = vsel %vm4316_vm15, %v4318_v20, %v4314_v45  ;;  %v4354_v41 = vmul.f32 %v5090_v42, %v4353_v31 }
 0x5e8   :  { %4395 = vst.msk [vmem:[%s9892_s7 + $0xe0] sm:$0xff] %vm4366_vm0, %v4319_v17  ;;  %v4295_v33 = vadd.f32 %v5088_v40, %v4294_v35  ;;  %v4337_v44 = vmul.f32 %v5092_v51, %v3884_v52  ;;  %vm4342_vm10 = vweird.f32 %v5092_v51 }
 0x5e9   :  { %v4355_v16 = vadd.f32 %v5090_v42, %v4354_v41  ;;  %vm4343_vm12 = vmor %vm4341_vm11, %vm4342_vm10 }
 0x5ea   :  { %v4299_v58 = vsel %vm4298_vm5, %v5088_v40, %v4295_v33  ;;  %v4338_v32 = vsub.f32 1.0, %v4337_v44 }
 0x5eb   :  { %v4304_v2 = vsel %vm4301_vm7, %v4303_v3, %v4299_v58  ;;  %v4359_v38 = vsel %vm4358_vm8, %v5090_v42, %v4355_v16 }
 0x5ec   :  { %4394 = vst.msk [vmem:[%s9892_s7 + $0xd8] sm:$0xff] %vm4366_vm0, %v4304_v2  ;;  %v4364_v0 = vsel %vm4361_vm9, %v4363_v18, %v4359_v38  ;;  %v4339_v36 = vmul.f32 %v5092_v51, %v4338_v32 }
 0x5ed   :  { %4398 = vst.msk [vmem:[%s9892_s7 + $0xf8] sm:$0xff] %vm4366_vm0, %v4364_v0 }
 0x5ee   :  { %v4340_v43 = vadd.f32 %v5092_v51, %v4339_v36 }
 0x5f0   :  { %v4344_v63 = vsel %vm4343_vm12, %v5092_v51, %v4340_v43 }
 0x5f1   :  { %v4349_v34 = vsel %vm4346_vm13, %v4348_v14, %v4344_v63 }
 0x5f2   :  { %4397 = vst.msk [vmem:[%s9892_s7 + $0xf0] sm:$0xff] %vm4366_vm0, %v4349_v34 }
 0x5f3   :  { %4403 = vsyncpa [#allocation3], 1 }

</bundles_post_ra>
